<compile_context>
chip_gen: v7x
topology: tpu7x:2x2x1
jax: 0.10.0
libtpu: 0.0.40
codegen_flags: <defaults>
</compile_context>

<pallas_src>
import functools

import jax
import jax.numpy as jnp
from jax.experimental import pallas as pl
from jax.experimental.pallas import tpu as pltpu

# Logical (PyTorch) dims.
D_IN = 784          # fc1 in
H_LOG = 400         # fc1 out / fc3 out / fc4 in
Z_LOG = 20          # fc21 out / fc3 in
D_OUT_LOG = 784 * 3 # fc4 out

# Lane-padded dims (multiples of 128).
H = 512
Z = 128
D_OUT = 2432


def vae_forward_kernel(x_ref, w1_ref, b1_ref, w21_ref, b21_ref,
                       w3_ref, b3_ref, w4_ref, b4_ref,
                       recon_ref, mu_ref):
    x = x_ref[...]                                                    # [TB, 784] bf16

    # encode: h1 = relu(x @ W1 + b1); mu = h1 @ W21 + b21
    h1 = jnp.dot(x, w1_ref[...], preferred_element_type=jnp.float32) + b1_ref[...]
    h1 = jnp.maximum(h1, 0.0)                                         # [TB, 512] f32
    mu = jnp.dot(h1.astype(jnp.bfloat16), w21_ref[...],
                 preferred_element_type=jnp.float32) + b21_ref[...]   # [TB, 128] f32
    mu_ref[...] = mu

    # decode: h3 = relu(mu @ W3 + b3); recon = sigmoid(h3 @ W4 + b4)
    h3 = jnp.dot(mu.astype(jnp.bfloat16), w3_ref[...],
                 preferred_element_type=jnp.float32) + b3_ref[...]
    h3 = jnp.maximum(h3, 0.0)                                         # [TB, 512] f32
    logits = jnp.dot(h3.astype(jnp.bfloat16), w4_ref[...],
                     preferred_element_type=jnp.float32) + b4_ref[...]  # [TB, 2432]
    # sigmoid(x) = 1 / (1 + exp(-x)); exp + approximate reciprocal both live on
    # the otherwise-idle EUP slot.
    recon_ref[...] = pl.reciprocal(1.0 + jnp.exp(-logits), approx=True)


def _pad_to(a, shape):
    pads = [(0, t - s) for s, t in zip(a.shape, shape)]
    return jnp.pad(a, pads)


def prepare_params(params):
    """Pad logical params to lane-dense shapes; weights -> bf16, biases -> f32."""
    (w1, b1, w21, b21, w3, b3, w4, b4) = params
    return (
        _pad_to(w1, (D_IN, H)).astype(jnp.bfloat16),
        _pad_to(b1, (1, H)).astype(jnp.float32),
        _pad_to(w21, (H, Z)).astype(jnp.bfloat16),
        _pad_to(b21, (1, Z)).astype(jnp.float32),
        _pad_to(w3, (Z, H)).astype(jnp.bfloat16),
        _pad_to(b3, (1, H)).astype(jnp.float32),
        _pad_to(w4, (H, D_OUT)).astype(jnp.bfloat16),
        _pad_to(b4, (1, D_OUT)).astype(jnp.float32),
    )


@functools.partial(jax.jit, static_argnames=("tb",))
def vae_forward(x, params, tb=128):
    """x: any shape with trailing size 784*k (PyTorch: x.view(-1, 784))."""
    x2d = jnp.reshape(x, (-1, D_IN))
    B = x2d.shape[0]
    Bp = pl.cdiv(B, tb) * tb
    x_pad = jnp.pad(x2d.astype(jnp.bfloat16), ((0, Bp - B), (0, 0)))

    (w1, b1, w21, b21, w3, b3, w4, b4) = prepare_params(params)

    n_tiles = Bp // tb
    pinned = lambda i: (0, 0)          # weights/biases: same block every step
    batched = lambda i: (i, 0)         # activations: tile i of the batch

    flops = 2 * Bp * (D_IN * H + H * Z + Z * H + H * D_OUT)
    bytes_accessed = (
        x_pad.size * 2
        + sum(int(a.size) * a.dtype.itemsize
              for a in (w1, b1, w21, b21, w3, b3, w4, b4))
        + Bp * D_OUT * 4 + Bp * Z * 4
    )
    cost = pl.CostEstimate(flops=flops,
                           transcendentals=2 * Bp * D_OUT,
                           bytes_accessed=bytes_accessed)

    recon_pad, mu_pad = pl.pallas_call(
        vae_forward_kernel,
        out_shape=(
            jax.ShapeDtypeStruct((Bp, D_OUT), jnp.float32),
            jax.ShapeDtypeStruct((Bp, Z), jnp.float32),
        ),
        grid=(n_tiles,),
        in_specs=[
            pl.BlockSpec((tb, D_IN), batched),    # x
            pl.BlockSpec((D_IN, H), pinned),      # w1
            pl.BlockSpec((1, H), pinned),         # b1
            pl.BlockSpec((H, Z), pinned),         # w21
            pl.BlockSpec((1, Z), pinned),         # b21
            pl.BlockSpec((Z, H), pinned),         # w3
            pl.BlockSpec((1, H), pinned),         # b3
            pl.BlockSpec((H, D_OUT), pinned),     # w4
            pl.BlockSpec((1, D_OUT), pinned),     # b4
        ],
        out_specs=(
            pl.BlockSpec((tb, D_OUT), batched),   # recon
            pl.BlockSpec((tb, Z), batched),       # mu
        ),
        compiler_params=pltpu.CompilerParams(
            dimension_semantics=("parallel",),
            vmem_limit_bytes=48 << 20,            # < 64 MiB physical on v7x
        ),
        cost_estimate=cost,
    )(x_pad, w1, b1, w21, b21, w3, b3, w4, b4)

    return recon_pad[:B, :D_OUT_LOG], mu_pad[:B, :Z_LOG]


def init_params(key):
    """nn.Linear default init (uniform ±1/sqrt(fan_in)), in logical f32 shapes.

    Weights are [in, out] (transposed from PyTorch's [out, in]) so the kernel
    computes y = x @ W + b; biases are [1, out] to broadcast over the batch axis.
    """
    def linear(key, fan_in, fan_out):
        kw, kb = jax.random.split(key)
        bound = 1.0 / jnp.sqrt(jnp.float32(fan_in))
        w = jax.random.uniform(kw, (fan_in, fan_out), jnp.float32, -bound, bound)
        b = jax.random.uniform(kb, (1, fan_out), jnp.float32, -bound, bound)
        return w, b

    k1, k21, k3, k4 = jax.random.split(key, 4)
    w1, b1 = linear(k1, D_IN, H_LOG)         # fc1
    w21, b21 = linear(k21, H_LOG, Z_LOG)     # fc21 (fc22 exists in __init__ but is unused in forward)
    w3, b3 = linear(k3, Z_LOG, H_LOG)        # fc3
    w4, b4 = linear(k4, H_LOG, D_OUT_LOG)    # fc4
    return (w1, b1, w21, b21, w3, b3, w4, b4)


def vae_forward_ref(x, params):
    """Pure-JAX f32 reference (unpadded)."""
    x2d = jnp.reshape(x, (-1, D_IN)).astype(jnp.float32)
    (w1, b1, w21, b21, w3, b3, w4, b4) = params
    h1 = jnp.maximum(x2d @ w1 + b1, 0.0)
    mu = h1 @ w21 + b21
    h3 = jnp.maximum(mu @ w3 + b3, 0.0)
    recon = jax.nn.sigmoid(h3 @ w4 + b4)
    return recon, mu


if __name__ == "__main__":
    key = jax.random.PRNGKey(0)
    kx, kp = jax.random.split(key)

    # Small MNIST-like batch: NCHW [4, 1, 28, 28]; forward views it as [-1, 784].
    x = jax.random.normal(kx, (4, 1, 28, 28), dtype=jnp.float32)
    params = init_params(kp)

    recon, mu = vae_forward(x, params)
    jax.block_until_ready((recon, mu))

    recon_ref, mu_ref = vae_forward_ref(x, params)
    assert recon.shape == (4, D_OUT_LOG) and mu.shape == (4, Z_LOG)
    # bf16 matmul inputs with f32 accumulation -> loosened tolerance vs f32 ref.
    assert jnp.allclose(recon, recon_ref, atol=3e-2, rtol=3e-2)
    assert jnp.allclose(mu, mu_ref, atol=3e-2, rtol=3e-2)

    print("KERNEL_OK")
</pallas_src>

<mosaic_0001>
module attributes {stable_mosaic.version = 11 : i64} {
  func.func @vae_forward_kernel(%arg0: i32, %arg1: memref<128x784xbf16, #tpu.memory_space<vmem>>, %arg2: memref<784x512xbf16, #tpu.memory_space<vmem>>, %arg3: memref<1x512xf32, #tpu.memory_space<vmem>>, %arg4: memref<512x128xbf16, #tpu.memory_space<vmem>>, %arg5: memref<1x128xf32, #tpu.memory_space<vmem>>, %arg6: memref<128x512xbf16, #tpu.memory_space<vmem>>, %arg7: memref<1x512xf32, #tpu.memory_space<vmem>>, %arg8: memref<512x2432xbf16, #tpu.memory_space<vmem>>, %arg9: memref<1x2432xf32, #tpu.memory_space<vmem>>, %arg10: memref<128x2432xf32, #tpu.memory_space<vmem>>, %arg11: memref<128x128xf32, #tpu.memory_space<vmem>>) attributes {dimension_semantics = [#tpu.dimension_semantics<parallel>], iteration_bounds = array<i64: 1>, scalar_prefetch = 0 : i64, scratch_operands = 0 : i64, tpu.core_type = #tpu.core_type<tc>, window_params = [{transform_indices = @transform_0, window_bounds = array<i64: 128, 784>}, {pipeline_mode = #tpu.pipeline_mode<synchronous>, transform_indices = @transform_1, window_bounds = array<i64: 784, 512>}, {pipeline_mode = #tpu.pipeline_mode<synchronous>, transform_indices = @transform_2, window_bounds = array<i64: 1, 512>}, {pipeline_mode = #tpu.pipeline_mode<synchronous>, transform_indices = @transform_3, window_bounds = array<i64: 512, 128>}, {pipeline_mode = #tpu.pipeline_mode<synchronous>, transform_indices = @transform_4, window_bounds = array<i64: 1, 128>}, {pipeline_mode = #tpu.pipeline_mode<synchronous>, transform_indices = @transform_5, window_bounds = array<i64: 128, 512>}, {pipeline_mode = #tpu.pipeline_mode<synchronous>, transform_indices = @transform_6, window_bounds = array<i64: 1, 512>}, {pipeline_mode = #tpu.pipeline_mode<synchronous>, transform_indices = @transform_7, window_bounds = array<i64: 512, 2432>}, {pipeline_mode = #tpu.pipeline_mode<synchronous>, transform_indices = @transform_8, window_bounds = array<i64: 1, 2432>}, {transform_indices = @transform_9, window_bounds = array<i64: 128, 2432>}, {transform_indices = @transform_10, window_bounds = array<i64: 128, 128>}]} {
    %c0 = arith.constant 0 : index
    %c0_0 = arith.constant 0 : index
    %0 = vector.load %arg1[%c0, %c0_0] : memref<128x784xbf16, #tpu.memory_space<vmem>>, vector<128x784xbf16>
    %c0_1 = arith.constant 0 : index
    %c0_2 = arith.constant 0 : index
    %1 = vector.load %arg2[%c0_1, %c0_2] : memref<784x512xbf16, #tpu.memory_space<vmem>>, vector<784x512xbf16>
    %cst = arith.constant dense<0.000000e+00> : vector<128x512xf32>
    %2 = tpu.matmul %0, %1, %cst {dimension_numbers = #tpu.dot_dimension_numbers<[1], [0], [0], [1], [0, 0, 1, 1], [], []>} : vector<128x784xbf16>, vector<784x512xbf16>, vector<128x512xf32> -> vector<128x512xf32>
    %c0_3 = arith.constant 0 : index
    %c0_4 = arith.constant 0 : index
    %3 = vector.load %arg3[%c0_3, %c0_4] : memref<1x512xf32, #tpu.memory_space<vmem>>, vector<1x512xf32>
    %4 = vector.broadcast %3 : vector<1x512xf32> to vector<128x512xf32>
    %5 = arith.addf %2, %4 : vector<128x512xf32>
    %cst_5 = arith.constant 0.000000e+00 : f32
    %6 = vector.broadcast %cst_5 : f32 to vector<128x512xf32>
    %7 = arith.maximumf %5, %6 : vector<128x512xf32>
    %8 = arith.truncf %7 : vector<128x512xf32> to vector<128x512xbf16>
    %c0_6 = arith.constant 0 : index
    %c0_7 = arith.constant 0 : index
    %9 = vector.load %arg4[%c0_6, %c0_7] : memref<512x128xbf16, #tpu.memory_space<vmem>>, vector<512x128xbf16>
    %cst_8 = arith.constant dense<0.000000e+00> : vector<128x128xf32>
    %10 = tpu.matmul %8, %9, %cst_8 {dimension_numbers = #tpu.dot_dimension_numbers<[1], [0], [0], [1], [0, 0, 1, 1], [], []>} : vector<128x512xbf16>, vector<512x128xbf16>, vector<128x128xf32> -> vector<128x128xf32>
    %c0_9 = arith.constant 0 : index
    %c0_10 = arith.constant 0 : index
    %11 = vector.load %arg5[%c0_9, %c0_10] : memref<1x128xf32, #tpu.memory_space<vmem>>, vector<1x128xf32>
    %12 = vector.broadcast %11 : vector<1x128xf32> to vector<128x128xf32>
    %13 = arith.addf %10, %12 : vector<128x128xf32>
    %c0_11 = arith.constant 0 : index
    %c0_12 = arith.constant 0 : index
    %14 = vector.load %arg11[%c0_11, %c0_12] : memref<128x128xf32, #tpu.memory_space<vmem>>, vector<128x128xf32>
    tpu.vector_store %arg11[%c0_11, %c0_12], %13 {strides = array<i32>} : memref<128x128xf32, #tpu.memory_space<vmem>>, vector<128x128xf32>,
    %15 = arith.truncf %13 : vector<128x128xf32> to vector<128x128xbf16>
    %c0_13 = arith.constant 0 : index
    %c0_14 = arith.constant 0 : index
    %16 = vector.load %arg6[%c0_13, %c0_14] : memref<128x512xbf16, #tpu.memory_space<vmem>>, vector<128x512xbf16>
    %cst_15 = arith.constant dense<0.000000e+00> : vector<128x512xf32>
    %17 = tpu.matmul %15, %16, %cst_15 {dimension_numbers = #tpu.dot_dimension_numbers<[1], [0], [0], [1], [0, 0, 1, 1], [], []>} : vector<128x128xbf16>, vector<128x512xbf16>, vector<128x512xf32> -> vector<128x512xf32>
    %c0_16 = arith.constant 0 : index
    %c0_17 = arith.constant 0 : index
    %18 = vector.load %arg7[%c0_16, %c0_17] : memref<1x512xf32, #tpu.memory_space<vmem>>, vector<1x512xf32>
    %19 = vector.broadcast %18 : vector<1x512xf32> to vector<128x512xf32>
    %20 = arith.addf %17, %19 : vector<128x512xf32>
    %cst_18 = arith.constant 0.000000e+00 : f32
    %21 = vector.broadcast %cst_18 : f32 to vector<128x512xf32>
    %22 = arith.maximumf %20, %21 : vector<128x512xf32>
    %23 = arith.truncf %22 : vector<128x512xf32> to vector<128x512xbf16>
    %c0_19 = arith.constant 0 : index
    %c0_20 = arith.constant 0 : index
    %24 = vector.load %arg8[%c0_19, %c0_20] : memref<512x2432xbf16, #tpu.memory_space<vmem>>, vector<512x2432xbf16>
    %cst_21 = arith.constant dense<0.000000e+00> : vector<128x2432xf32>
    %25 = tpu.matmul %23, %24, %cst_21 {dimension_numbers = #tpu.dot_dimension_numbers<[1], [0], [0], [1], [0, 0, 1, 1], [], []>} : vector<128x512xbf16>, vector<512x2432xbf16>, vector<128x2432xf32> -> vector<128x2432xf32>
    %c0_22 = arith.constant 0 : index
    %c0_23 = arith.constant 0 : index
    %26 = vector.load %arg9[%c0_22, %c0_23] : memref<1x2432xf32, #tpu.memory_space<vmem>>, vector<1x2432xf32>
    %27 = vector.broadcast %26 : vector<1x2432xf32> to vector<128x2432xf32>
    %28 = arith.addf %25, %27 : vector<128x2432xf32>
    %cst_24 = arith.constant 0.000000e+00 : f32
    %29 = vector.broadcast %cst_24 : f32 to vector<128x2432xf32>
    %30 = arith.subf %29, %28 : vector<128x2432xf32>
    %31 = math.exp %30 : vector<128x2432xf32>
    %cst_25 = arith.constant 1.000000e+00 : f32
    %32 = vector.broadcast %cst_25 : f32 to vector<128x2432xf32>
    %33 = arith.addf %32, %31 : vector<128x2432xf32>
    %34 = tpu.reciprocal %33 {approx = true} : vector<128x2432xf32> -> vector<128x2432xf32>
    %c0_26 = arith.constant 0 : index
    %c0_27 = arith.constant 0 : index
    %35 = vector.load %arg10[%c0_26, %c0_27] : memref<128x2432xf32, #tpu.memory_space<vmem>>, vector<128x2432xf32>
    tpu.vector_store %arg10[%c0_26, %c0_27], %34 {strides = array<i32>} : memref<128x2432xf32, #tpu.memory_space<vmem>>, vector<128x2432xf32>,
    return
  }
  func.func @transform_0(%arg0: i32) -> (i32, i32) {
    %c0_i32 = arith.constant 0 : i32
    %c0_i32_0 = arith.constant 0 : i32
    return %arg0, %c0_i32 : i32, i32
  }
  func.func @transform_1(%arg0: i32) -> (i32, i32) {
    %c0_i32 = arith.constant 0 : i32
    %c0_i32_0 = arith.constant 0 : i32
    %c0_i32_1 = arith.constant 0 : i32
    return %c0_i32, %c0_i32_0 : i32, i32
  }
  func.func @transform_2(%arg0: i32) -> (i32, i32) {
    %c0_i32 = arith.constant 0 : i32
    %c0_i32_0 = arith.constant 0 : i32
    %c0_i32_1 = arith.constant 0 : i32
    return %c0_i32, %c0_i32_0 : i32, i32
  }
  func.func @transform_3(%arg0: i32) -> (i32, i32) {
    %c0_i32 = arith.constant 0 : i32
    %c0_i32_0 = arith.constant 0 : i32
    %c0_i32_1 = arith.constant 0 : i32
    return %c0_i32, %c0_i32_0 : i32, i32
  }
  func.func @transform_4(%arg0: i32) -> (i32, i32) {
    %c0_i32 = arith.constant 0 : i32
    %c0_i32_0 = arith.constant 0 : i32
    %c0_i32_1 = arith.constant 0 : i32
    return %c0_i32, %c0_i32_0 : i32, i32
  }
  func.func @transform_5(%arg0: i32) -> (i32, i32) {
    %c0_i32 = arith.constant 0 : i32
    %c0_i32_0 = arith.constant 0 : i32
    %c0_i32_1 = arith.constant 0 : i32
    return %c0_i32, %c0_i32_0 : i32, i32
  }
  func.func @transform_6(%arg0: i32) -> (i32, i32) {
    %c0_i32 = arith.constant 0 : i32
    %c0_i32_0 = arith.constant 0 : i32
    %c0_i32_1 = arith.constant 0 : i32
    return %c0_i32, %c0_i32_0 : i32, i32
  }
  func.func @transform_7(%arg0: i32) -> (i32, i32) {
    %c0_i32 = arith.constant 0 : i32
    %c0_i32_0 = arith.constant 0 : i32
    %c0_i32_1 = arith.constant 0 : i32
    return %c0_i32, %c0_i32_0 : i32, i32
  }
  func.func @transform_8(%arg0: i32) -> (i32, i32) {
    %c0_i32 = arith.constant 0 : i32
    %c0_i32_0 = arith.constant 0 : i32
    %c0_i32_1 = arith.constant 0 : i32
    return %c0_i32, %c0_i32_0 : i32, i32
  }
  func.func @transform_9(%arg0: i32) -> (i32, i32) {
    %c0_i32 = arith.constant 0 : i32
    %c0_i32_0 = arith.constant 0 : i32
    return %arg0, %c0_i32 : i32, i32
  }
  func.func @transform_10(%arg0: i32) -> (i32, i32) {
    %c0_i32 = arith.constant 0 : i32
    %c0_i32_0 = arith.constant 0 : i32
    return %arg0, %c0_i32 : i32, i32
  }
}

</mosaic_0001>

<bundles_post_ra>
// kernel: vae_forward.1
= control target key start
LH: loop header
LB: loop body
LE: loop exit
PB: predicated region body
PF: predicated region fallthrough
CT: control target
= control target key end

     0   :  { %vm1577_vm0 = vcmask 130048   ;;  %s21682_s1 = inlined_call_operand.vmem [shape: bf16[784,512], index: 1, kind: input, shape index: {}]   ;;  %s21683_s0 = inlined_call_operand.vmem [shape: bf16[128,784], index: 0, kind: input, shape index: {}]   ;;  %s21684_s3 = inlined_call_operand.vmem [shape: bf16[512,128], index: 3, kind: input, shape index: {}]   ;;  %s21685_s5 = inlined_call_operand.vmem [shape: bf16[128,512], index: 5, kind: input, shape index: {}]   ;;  %s21686_s2 = inlined_call_operand.vmem [shape: f32[1,512], index: 2, kind: input, shape index: {}]   ;;  %s21687_s7 = inlined_call_operand.vmem [shape: bf16[512,2432], index: 7, kind: input, shape index: {}]   ;;  %s21688_s4 = inlined_call_operand.vmem [shape: f32[1,128], index: 4, kind: input, shape index: {}]   ;;  %s21689_s10 = inlined_call_operand.vmem [shape: f32[128,128], index: 10, kind: output, shape index: {1}]   ;;  %s21690_s6 = inlined_call_operand.vmem [shape: f32[1,512], index: 6, kind: input, shape index: {}]   ;;  %s21691_s8 = inlined_call_operand.vmem [shape: f32[1,2432], index: 8, kind: input, shape index: {}]   ;;  %s21692_s9 = inlined_call_operand.vmem [shape: f32[128,2432], index: 9, kind: output, shape index: {0}]  }
   0x1   :  { %v13522_v0 = vld [vmem:[%s21682_s1 + $0x4] ss:$16 sps:$4 sm:$0xff]   ;;  %v13524_v1 = vld [vmem:[%s21682_s1 + $0xc] ss:$16 sps:$4 sm:$0xff]   ;;  %v13526_v2 = vld [vmem:[%s21682_s1] ss:$16 sps:$4 sm:$0xff]  }
   0x2   :  { %1602 = vmatprep.subr.bf16.mxu0 %v13522_v0  ;;  %v13527_v3 = vld [vmem:[%s21682_s1 + $0x8] ss:$16 sps:$4 sm:$0xff]   ;;  %2054 = vmatprep.subr.bf16.mxu1 %v13524_v1  ;;  %v13528_v4 = vld [vmem:[%s21682_s1 + $0x24] ss:$16 sps:$4 sm:$0xff]   ;;  %v13530_v5 = vld [vmem:[%s21682_s1 + $0x2c] ss:$16 sps:$4 sm:$0xff]  }
   0x3   :  { %1603 = vmatpush1.bf16.msra.mxu0 %v13526_v2  ;;  %2055 = vmatpush1.bf16.msra.mxu1 %v13527_v3  ;;  %v13532_v6 = vld [vmem:[%s21682_s1 + $0x20] ss:$16 sps:$4 sm:$0xff]   ;;  %v13533_v7 = vld [vmem:[%s21682_s1 + $0x28] ss:$16 sps:$4 sm:$0xff]   ;;  %v13534_v8 = vld [vmem:[%s21682_s1 + $0x44] ss:$16 sps:$4 sm:$0xff]  }
   0x4   :  { %1604 = vmatprep.subr.bf16.mxu0 %v13528_v4  ;;  %2056 = vmatprep.subr.bf16.mxu1 %v13530_v5  ;;  %v13536_v9 = vld [vmem:[%s21682_s1 + $0x4c] ss:$16 sps:$4 sm:$0xff]   ;;  %v13538_v10 = vld [vmem:[%s21682_s1 + $0x40] ss:$16 sps:$4 sm:$0xff]   ;;  %v13539_v11 = vld [vmem:[%s21682_s1 + $0x48] ss:$16 sps:$4 sm:$0xff]  }
   0x5   :  { %v13540_v12 = vld [vmem:[%s21682_s1 + $0x64] ss:$16 sps:$4 sm:$0xff]   ;;  %v13542_v13 = vld [vmem:[%s21682_s1 + $0x6c] ss:$16 sps:$4 sm:$0xff]   ;;  %v13544_v14 = vld [vmem:[%s21682_s1 + $0x60] ss:$16 sps:$4 sm:$0xff]  }
   0x6   :  { %v13545_v15 = vld [vmem:[%s21682_s1 + $0x68] ss:$16 sps:$4 sm:$0xff]   ;;  %v13546_v16 = vld [vmem:[%s21682_s1 + $0x84] ss:$16 sps:$4 sm:$0xff]   ;;  %v13548_v17 = vld [vmem:[%s21682_s1 + $0x8c] ss:$16 sps:$4 sm:$0xff]  }
   0x7   :  { %1605 = vmatpush1.bf16.msra.mxu0 %v13532_v6  ;;  %2057 = vmatpush1.bf16.msra.mxu1 %v13533_v7  ;;  %v13550_v18 = vld [vmem:[%s21682_s1 + $0x80] ss:$16 sps:$4 sm:$0xff]   ;;  %v13551_v19 = vld [vmem:[%s21682_s1 + $0x88] ss:$16 sps:$4 sm:$0xff]   ;;  %v13552_v20 = vld [vmem:[%s21682_s1 + $0xa4] ss:$16 sps:$4 sm:$0xff]  }
   0x8   :  { %1606 = vmatprep.subr.bf16.mxu0 %v13534_v8  ;;  %2058 = vmatprep.subr.bf16.mxu1 %v13536_v9  ;;  %v13554_v21 = vld [vmem:[%s21682_s1 + $0xac] ss:$16 sps:$4 sm:$0xff]   ;;  %v13556_v22 = vld [vmem:[%s21682_s1 + $0xa0] ss:$16 sps:$4 sm:$0xff]   ;;  %v13557_v23 = vld [vmem:[%s21682_s1 + $0xa8] ss:$16 sps:$4 sm:$0xff]  }
   0x9   :  { %v13558_v24 = vld [vmem:[%s21682_s1 + $0xc4] ss:$16 sps:$4 sm:$0xff]   ;;  %v13560_v25 = vld [vmem:[%s21682_s1 + $0xcc] ss:$16 sps:$4 sm:$0xff]   ;;  %v13562_v26 = vld [vmem:[%s21682_s1 + $0xc0] ss:$16 sps:$4 sm:$0xff]  }
   0xa   :  { %v13563_v27 = vld [vmem:[%s21682_s1 + $0xc8] ss:$16 sps:$4 sm:$0xff]   ;;  %v13564_v28 = vld [vmem:[%s21682_s1 + $0xe4] ss:$16 sps:$4 sm:$0xff]   ;;  %v13566_v29 = vld [vmem:[%s21682_s1 + $0xec] ss:$16 sps:$4 sm:$0xff]  }
   0xb   :  { %1607 = vmatpush1.bf16.msra.mxu0 %v13538_v10  ;;  %2059 = vmatpush1.bf16.msra.mxu1 %v13539_v11  ;;  %v13568_v30 = vld [vmem:[%s21682_s1 + $0xe0] ss:$16 sps:$4 sm:$0xff]   ;;  %v13569_v31 = vld [vmem:[%s21682_s1 + $0xe8] ss:$16 sps:$4 sm:$0xff]   ;;  %v13570_v32 = vld [vmem:[%s21682_s1 + $0x104] ss:$16 sps:$4 sm:$0xff]  }
   0xc   :  { %1608 = vmatprep.subr.bf16.mxu0 %v13540_v12  ;;  %2060 = vmatprep.subr.bf16.mxu1 %v13542_v13  ;;  %v13572_v33 = vld [vmem:[%s21682_s1 + $0x10c] ss:$16 sps:$4 sm:$0xff]   ;;  %v13574_v34 = vld [vmem:[%s21682_s1 + $0x100] ss:$16 sps:$4 sm:$0xff]   ;;  %v13575_v35 = vld [vmem:[%s21682_s1 + $0x108] ss:$16 sps:$4 sm:$0xff]  }
   0xd   :  { %v13576_v36 = vld [vmem:[%s21682_s1 + $0x124] ss:$16 sps:$4 sm:$0xff]   ;;  %v13578_v37 = vld [vmem:[%s21682_s1 + $0x12c] ss:$16 sps:$4 sm:$0xff]   ;;  %v13580_v38 = vld [vmem:[%s21682_s1 + $0x120] ss:$16 sps:$4 sm:$0xff]  }
   0xe   :  { %v13581_v39 = vld [vmem:[%s21682_s1 + $0x128] ss:$16 sps:$4 sm:$0xff]   ;;  %v13582_v40 = vld [vmem:[%s21682_s1 + $0x144] ss:$16 sps:$4 sm:$0xff]   ;;  %v13584_v41 = vld [vmem:[%s21682_s1 + $0x14c] ss:$16 sps:$4 sm:$0xff]  }
   0xf   :  { %1609 = vmatpush1.bf16.msra.mxu0 %v13544_v14  ;;  %2061 = vmatpush1.bf16.msra.mxu1 %v13545_v15  ;;  %v13586_v42 = vld [vmem:[%s21682_s1 + $0x140] ss:$16 sps:$4 sm:$0xff]   ;;  %v13587_v43 = vld [vmem:[%s21682_s1 + $0x148] ss:$16 sps:$4 sm:$0xff]   ;;  %v13588_v44 = vld [vmem:[%s21682_s1 + $0x164] ss:$16 sps:$4 sm:$0xff]  }
  0x10   :  { %1610 = vmatprep.subr.bf16.mxu0 %v13546_v16  ;;  %2062 = vmatprep.subr.bf16.mxu1 %v13548_v17  ;;  %v13590_v45 = vld [vmem:[%s21682_s1 + $0x16c] ss:$16 sps:$4 sm:$0xff]   ;;  %v13592_v46 = vld [vmem:[%s21682_s1 + $0x160] ss:$16 sps:$4 sm:$0xff]   ;;  %v13593_v47 = vld [vmem:[%s21682_s1 + $0x168] ss:$16 sps:$4 sm:$0xff]  }
  0x11   :  { %v13620_v48 = vld [vmem:[%s21683_s0 + $0x4] ss:$28 sps:$4 sm:$0xff]   ;;  %v13596_v50 = vld [vmem:[%s21682_s1 + $0x18c] ss:$16 sps:$4 sm:$0xff]   ;;  %v13599_v52 = vld [vmem:[%s21682_s1 + $0x188] ss:$16 sps:$4 sm:$0xff]  }
  0x12   :  { %v13594_v49 = vld [vmem:[%s21682_s1 + $0x184] ss:$16 sps:$4 sm:$0xff]   ;;  %1634 = vmatprep.mubr.bf16.mxu0 %v13620_v48  ;;  %2086 = vmatprep.mubr.bf16.mxu1 %v13620_v48  ;;  %v13598_v51 = vld [vmem:[%s21682_s1 + $0x180] ss:$16 sps:$4 sm:$0xff]   ;;  %v13602_v54 = vld [vmem:[%s21682_s1 + $0x1ac] ss:$16 sps:$4 sm:$0xff]  }
  0x13   :  { %1611 = vmatpush1.bf16.msra.mxu0 %v13550_v18  ;;  %2063 = vmatpush1.bf16.msra.mxu1 %v13551_v19  ;;  %v13600_v53 = vld [vmem:[%s21682_s1 + $0x1a4] ss:$16 sps:$4 sm:$0xff]   ;;  %v13604_v55 = vld [vmem:[%s21682_s1 + $0x1a0] ss:$16 sps:$4 sm:$0xff]   ;;  %v13605_v56 = vld [vmem:[%s21682_s1 + $0x1a8] ss:$16 sps:$4 sm:$0xff]  }
  0x14   :  { %1612 = vmatprep.subr.bf16.mxu0 %v13552_v20  ;;  %2064 = vmatprep.subr.bf16.mxu1 %v13554_v21  ;;  %v13606_v57 = vld [vmem:[%s21682_s1 + $0x1c4] ss:$16 sps:$4 sm:$0xff]   ;;  %v13608_v58 = vld [vmem:[%s21682_s1 + $0x1cc] ss:$16 sps:$4 sm:$0xff]   ;;  %v13610_v59 = vld [vmem:[%s21682_s1 + $0x1c0] ss:$16 sps:$4 sm:$0xff]  }
  0x15   :  { %v13611_v60 = vld [vmem:[%s21682_s1 + $0x1c8] ss:$16 sps:$4 sm:$0xff]   ;;  %v13612_v61 = vld [vmem:[%s21682_s1 + $0x1e4] ss:$16 sps:$4 sm:$0xff]   ;;  %v13614_v62 = vld [vmem:[%s21682_s1 + $0x1ec] ss:$16 sps:$4 sm:$0xff]  }
  0x16   :  { %v13616_v63 = vld [vmem:[%s21682_s1 + $0x1e0] ss:$16 sps:$4 sm:$0xff]   ;;  %v13617_v0 = vld [vmem:[%s21682_s1 + $0x1e8] ss:$16 sps:$4 sm:$0xff]   ;;  %v13623_v1 = vld [vmem:[%s21682_s1 + $0x204] ss:$16 sps:$4 sm:$0xff]  }
  0x17   :  { %1613 = vmatpush1.bf16.msra.mxu0 %v13556_v22  ;;  %2065 = vmatpush1.bf16.msra.mxu1 %v13557_v23  ;;  %v13626_v2 = vld [vmem:[%s21682_s1 + $0x20c] ss:$16 sps:$4 sm:$0xff]   ;;  %v13621_v4 = vld [vmem:[%s21682_s1 + $0x200] ss:$16 sps:$4 sm:$0xff]   ;;  %v13624_v5 = vld [vmem:[%s21682_s1 + $0x208] ss:$16 sps:$4 sm:$0xff]  }
  0x18   :  { %1614 = vmatprep.subr.bf16.mxu0 %v13558_v24  ;;  %2066 = vmatprep.subr.bf16.mxu1 %v13560_v25  ;;  %v13618_v3 = vld [vmem:[%s21683_s0] ss:$28 sps:$4 sm:$0xff]   ;;  %v13629_v6 = vld [vmem:[%s21682_s1 + $0x224] ss:$16 sps:$4 sm:$0xff]   ;;  %v13630_v10 = vld [vmem:[%s21682_s1 + $0x228] ss:$16 sps:$4 sm:$0xff]  }
  0x19   :  { %v13632_v7 = vld [vmem:[%s21682_s1 + $0x22c] ss:$16 sps:$4 sm:$0xff]   ;;  %v13627_v9 = vld [vmem:[%s21682_s1 + $0x220] ss:$16 sps:$4 sm:$0xff]   ;;  %v13638_v11 = vld [vmem:[%s21682_s1 + $0x244] ss:$16 sps:$4 sm:$0xff]  }
  0x1a   :  { %v13633_v8 = vld [vmem:[%s21683_s0 + $0x3c] ss:$28 sps:$4 sm:$0xff]   ;;  %v13636_v14 = vld [vmem:[%s21682_s1 + $0x240] ss:$16 sps:$4 sm:$0xff]   ;;  %v13644_v16 = vld [vmem:[%s21682_s1 + $0x264] ss:$16 sps:$4 sm:$0xff]  }
  0x1b   :  { %1615 = vmatpush1.bf16.msra.mxu0 %v13562_v26  ;;  %2067 = vmatpush1.bf16.msra.mxu1 %v13563_v27  ;;  %v13641_v12 = vld [vmem:[%s21682_s1 + $0x24c] ss:$16 sps:$4 sm:$0xff]   ;;  %v13635_v13 = vld [vmem:[%s21683_s0 + $0x38] ss:$28 sps:$4 sm:$0xff]   ;;  %v13642_v19 = vld [vmem:[%s21682_s1 + $0x260] ss:$16 sps:$4 sm:$0xff]  }
  0x1c   :  { %1616 = vmatprep.subr.bf16.mxu0 %v13564_v28  ;;  %2068 = vmatprep.subr.bf16.mxu1 %v13566_v29  ;;  %v13639_v15 = vld [vmem:[%s21682_s1 + $0x248] ss:$16 sps:$4 sm:$0xff]   ;;  %v13647_v17 = vld [vmem:[%s21682_s1 + $0x26c] ss:$16 sps:$4 sm:$0xff]   ;;  %v13648_v18 = vld [vmem:[%s21683_s0 + $0x74] ss:$28 sps:$4 sm:$0xff]  }
  0x1d   :  { %v13645_v20 = vld [vmem:[%s21682_s1 + $0x268] ss:$16 sps:$4 sm:$0xff]   ;;  %v13653_v21 = vld [vmem:[%s21682_s1 + $0x284] ss:$16 sps:$4 sm:$0xff]   ;;  %v13656_v22 = vld [vmem:[%s21682_s1 + $0x28c] ss:$16 sps:$4 sm:$0xff]  }
  0x1e   :  { %v13650_v23 = vld [vmem:[%s21683_s0 + $0x70] ss:$28 sps:$4 sm:$0xff]   ;;  %v13654_v25 = vld [vmem:[%s21682_s1 + $0x288] ss:$16 sps:$4 sm:$0xff]   ;;  %v13659_v26 = vld [vmem:[%s21682_s1 + $0x2a4] ss:$16 sps:$4 sm:$0xff]  }
  0x1f   :  { %1617 = vmatpush1.bf16.msra.mxu0 %v13568_v30  ;;  %2069 = vmatpush1.bf16.msra.mxu1 %v13569_v31  ;;  %v13651_v24 = vld [vmem:[%s21682_s1 + $0x280] ss:$16 sps:$4 sm:$0xff]   ;;  %v13662_v27 = vld [vmem:[%s21682_s1 + $0x2ac] ss:$16 sps:$4 sm:$0xff]   ;;  %v13660_v30 = vld [vmem:[%s21682_s1 + $0x2a8] ss:$16 sps:$4 sm:$0xff]  }
  0x20   :  { %1618 = vmatprep.subr.bf16.mxu0 %v13570_v32  ;;  %2070 = vmatprep.subr.bf16.mxu1 %v13572_v33  ;;  %v13663_v28 = vld [vmem:[%s21683_s0 + $0xac] ss:$28 sps:$4 sm:$0xff]   ;;  %v13657_v29 = vld [vmem:[%s21682_s1 + $0x2a0] ss:$16 sps:$4 sm:$0xff]   ;;  %v13668_v31 = vld [vmem:[%s21682_s1 + $0x2c4] ss:$16 sps:$4 sm:$0xff]  }
  0x21   :  { %v13671_v32 = vld [vmem:[%s21682_s1 + $0x2cc] ss:$16 sps:$4 sm:$0xff]   ;;  %v13665_v33 = vld [vmem:[%s21683_s0 + $0xa8] ss:$28 sps:$4 sm:$0xff]  }
  0x22   :  { %v13693_v48 = vld [vmem:[%s21683_s0 + $0x11c] ss:$28 sps:$4 sm:$0xff]  }
  0x23   :  { %1619 = vmatpush1.bf16.msra.mxu0 %v13574_v34  ;;  %2071 = vmatpush1.bf16.msra.mxu1 %v13575_v35  ;;  %v13666_v34 = vld [vmem:[%s21682_s1 + $0x2c0] ss:$16 sps:$4 sm:$0xff]   ;;  %v13669_v35 = vld [vmem:[%s21682_s1 + $0x2c8] ss:$16 sps:$4 sm:$0xff]  }
  0x24   :  { %1620 = vmatprep.subr.bf16.mxu0 %v13576_v36  ;;  %2072 = vmatprep.subr.bf16.mxu1 %v13578_v37  ;;  %v13674_v36 = vld [vmem:[%s21682_s1 + $0x2e4] ss:$16 sps:$4 sm:$0xff]   ;;  %v13677_v37 = vld [vmem:[%s21682_s1 + $0x2ec] ss:$16 sps:$4 sm:$0xff]  }
  0x27   :  { %1621 = vmatpush1.bf16.msra.mxu0 %v13580_v38  ;;  %2073 = vmatpush1.bf16.msra.mxu1 %v13581_v39  ;;  %v13678_v38 = vld [vmem:[%s21683_s0 + $0xe4] ss:$28 sps:$4 sm:$0xff]  }
  0x28   :  { %1622 = vmatprep.subr.bf16.mxu0 %v13582_v40  ;;  %2074 = vmatprep.subr.bf16.mxu1 %v13584_v41  ;;  %v13672_v39 = vld [vmem:[%s21682_s1 + $0x2e0] ss:$16 sps:$4 sm:$0xff]   ;;  %v13675_v40 = vld [vmem:[%s21682_s1 + $0x2e8] ss:$16 sps:$4 sm:$0xff]   ;;  %v13683_v41 = vld [vmem:[%s21682_s1 + $0x304] ss:$16 sps:$4 sm:$0xff]  }
  0x2b   :  { %1623 = vmatpush1.bf16.msra.mxu0 %v13586_v42  ;;  %2075 = vmatpush1.bf16.msra.mxu1 %v13587_v43  ;;  %v13686_v42 = vld [vmem:[%s21682_s1 + $0x30c] ss:$16 sps:$4 sm:$0xff]  }
  0x2c   :  { %1624 = vmatprep.subr.bf16.mxu0 %v13588_v44  ;;  %2076 = vmatprep.subr.bf16.mxu1 %v13590_v45  ;;  %v13680_v43 = vld [vmem:[%s21683_s0 + $0xe0] ss:$28 sps:$4 sm:$0xff]   ;;  %v13684_v45 = vld [vmem:[%s21682_s1 + $0x308] ss:$16 sps:$4 sm:$0xff]  }
  0x2d   :  { %v13681_v44 = vld [vmem:[%s21682_s1 + $0x300] ss:$16 sps:$4 sm:$0xff]  }
  0x2f   :  { %1625 = vmatpush1.bf16.msra.mxu0 %v13592_v46  ;;  %2077 = vmatpush1.bf16.msra.mxu1 %v13593_v47  ;;  %v13689_v46 = vld [vmem:[%s21682_s1 + $0x324] ss:$16 sps:$4 sm:$0xff]   ;;  %v13692_v47 = vld [vmem:[%s21682_s1 + $0x32c] ss:$16 sps:$4 sm:$0xff]  }
  0x30   :  { %1626 = vmatprep.subr.bf16.mxu0 %v13594_v49  ;;  %2078 = vmatprep.subr.bf16.mxu1 %v13596_v50  ;;  %v13687_v49 = vld [vmem:[%s21682_s1 + $0x320] ss:$16 sps:$4 sm:$0xff]   ;;  %v13690_v50 = vld [vmem:[%s21682_s1 + $0x328] ss:$16 sps:$4 sm:$0xff]  }
  0x33   :  { %1627 = vmatpush1.bf16.msra.mxu0 %v13598_v51  ;;  %2079 = vmatpush1.bf16.msra.mxu1 %v13599_v52  ;;  %v13698_v51 = vld [vmem:[%s21682_s1 + $0x344] ss:$16 sps:$4 sm:$0xff]   ;;  %v13701_v52 = vld [vmem:[%s21682_s1 + $0x34c] ss:$16 sps:$4 sm:$0xff]  }
  0x34   :  { %1628 = vmatprep.subr.bf16.mxu0 %v13600_v53  ;;  %2080 = vmatprep.subr.bf16.mxu1 %v13602_v54  ;;  %v13695_v53 = vld [vmem:[%s21683_s0 + $0x118] ss:$28 sps:$4 sm:$0xff]   ;;  %v13696_v54 = vld [vmem:[%s21682_s1 + $0x340] ss:$16 sps:$4 sm:$0xff]  }
  0x37   :  { %1629 = vmatpush1.bf16.msra.mxu0 %v13604_v55  ;;  %2081 = vmatpush1.bf16.msra.mxu1 %v13605_v56  ;;  %v13699_v55 = vld [vmem:[%s21682_s1 + $0x348] ss:$16 sps:$4 sm:$0xff]   ;;  %v13704_v56 = vld [vmem:[%s21682_s1 + $0x364] ss:$16 sps:$4 sm:$0xff]  }
  0x38   :  { %1630 = vmatprep.subr.bf16.mxu0 %v13606_v57  ;;  %2082 = vmatprep.subr.bf16.mxu1 %v13608_v58  ;;  %v13707_v57 = vld [vmem:[%s21682_s1 + $0x36c] ss:$16 sps:$4 sm:$0xff]   ;;  %v13708_v58 = vld [vmem:[%s21683_s0 + $0x154] ss:$28 sps:$4 sm:$0xff]  }
  0x3b   :  { %1631 = vmatpush1.bf16.msra.mxu0 %v13610_v59  ;;  %2083 = vmatpush1.bf16.msra.mxu1 %v13611_v60  ;;  %v13702_v59 = vld [vmem:[%s21682_s1 + $0x360] ss:$16 sps:$4 sm:$0xff]   ;;  %v13705_v60 = vld [vmem:[%s21682_s1 + $0x368] ss:$16 sps:$4 sm:$0xff]  }
  0x3c   :  { %1632 = vmatprep.subr.bf16.mxu0 %v13612_v61  ;;  %2084 = vmatprep.subr.bf16.mxu1 %v13614_v62  ;;  %v13713_v61 = vld [vmem:[%s21682_s1 + $0x384] ss:$16 sps:$4 sm:$0xff]   ;;  %v13716_v62 = vld [vmem:[%s21682_s1 + $0x38c] ss:$16 sps:$4 sm:$0xff]  }
  0x3f   :  { %1633 = vmatpush1.bf16.msra.mxu0 %v13616_v63  ;;  %2085 = vmatpush1.bf16.msra.mxu1 %v13617_v0  ;;  %v13710_v63 = vld [vmem:[%s21683_s0 + $0x150] ss:$28 sps:$4 sm:$0xff]  }
  0x40   :  { %1715 = vmatprep.subr.bf16.mxu0 %v13623_v1  ;;  %2167 = vmatprep.subr.bf16.mxu1 %v13626_v2  ;;  %v13711_v0 = vld [vmem:[%s21682_s1 + $0x380] ss:$16 sps:$4 sm:$0xff]   ;;  %v13714_v1 = vld [vmem:[%s21682_s1 + $0x388] ss:$16 sps:$4 sm:$0xff]   ;;  %v13719_v2 = vld [vmem:[%s21682_s1 + $0x3a4] ss:$16 sps:$4 sm:$0xff]  }
  0x42   :  { %1635 = vmatmul.mubr.bf16.vlgmr.msra.gmra.mrb[0].mxu0 %v13618_v3  ;;  %2087 = vmatmul.mubr.bf16.vlgmr.msra.gmra.mrb[0].mxu1 %v13618_v3  ;;  %v13722_v3 = vld [vmem:[%s21682_s1 + $0x3ac] ss:$16 sps:$4 sm:$0xff]  }
  0x43   :  { %1716 = vmatpush1.bf16.msra.mxu0 %v13621_v4  ;;  %2168 = vmatpush1.bf16.msra.mxu1 %v13624_v5  ;;  %v13723_v4 = vld [vmem:[%s21683_s0 + $0x18c] ss:$28 sps:$4 sm:$0xff]   ;;  %v13717_v5 = vld [vmem:[%s21682_s1 + $0x3a0] ss:$16 sps:$4 sm:$0xff]  }
  0x44   :  { %1717 = vmatprep.subr.bf16.mxu0 %v13629_v6  ;;  %2169 = vmatprep.subr.bf16.mxu1 %v13632_v7  ;;  %v13720_v6 = vld [vmem:[%s21682_s1 + $0x3a8] ss:$16 sps:$4 sm:$0xff]   ;;  %v13728_v7 = vld [vmem:[%s21682_s1 + $0x3c4] ss:$16 sps:$4 sm:$0xff]  }
  0x45   :  { %1644 = vmatprep.mubr.bf16.mxu0 %v13633_v8  ;;  %2096 = vmatprep.mubr.bf16.mxu1 %v13633_v8  ;;  %v13731_v8 = vld [vmem:[%s21682_s1 + $0x3cc] ss:$16 sps:$4 sm:$0xff]  }
  0x47   :  { %1718 = vmatpush1.bf16.msra.mxu0 %v13627_v9  ;;  %2170 = vmatpush1.bf16.msra.mxu1 %v13630_v10  ;;  %v13725_v9 = vld [vmem:[%s21683_s0 + $0x188] ss:$28 sps:$4 sm:$0xff]   ;;  %v13726_v10 = vld [vmem:[%s21682_s1 + $0x3c0] ss:$16 sps:$4 sm:$0xff]  }
  0x48   :  { %1719 = vmatprep.subr.bf16.mxu0 %v13638_v11  ;;  %2171 = vmatprep.subr.bf16.mxu1 %v13641_v12  ;;  %v13729_v11 = vld [vmem:[%s21682_s1 + $0x3c8] ss:$16 sps:$4 sm:$0xff]   ;;  %v13734_v12 = vld [vmem:[%s21682_s1 + $0x3e4] ss:$16 sps:$4 sm:$0xff]  }
  0x4a   :  { %1645 = vmatmul.mubr.bf16.gmra.mrb[4].mxu0 %v13635_v13  ;;  %2097 = vmatmul.mubr.bf16.gmra.mrb[4].mxu1 %v13635_v13  ;;  %v13737_v13 = vld [vmem:[%s21682_s1 + $0x3ec] ss:$16 sps:$4 sm:$0xff]  }
  0x4b   :  { %1720 = vmatpush1.bf16.msra.mxu0 %v13636_v14  ;;  %2172 = vmatpush1.bf16.msra.mxu1 %v13639_v15  ;;  %v13740_v14 = vld [vmem:[%s21683_s0 + $0xc] ss:$28 sps:$4 sm:$0xff]   ;;  %v13732_v15 = vld [vmem:[%s21682_s1 + $0x3e0] ss:$16 sps:$4 sm:$0xff]  }
  0x4c   :  { %1721 = vmatprep.subr.bf16.mxu0 %v13644_v16  ;;  %2173 = vmatprep.subr.bf16.mxu1 %v13647_v17  ;;  %v13735_v16 = vld [vmem:[%s21682_s1 + $0x3e8] ss:$16 sps:$4 sm:$0xff]   ;;  %v13743_v17 = vld [vmem:[%s21682_s1 + $0x404] ss:$16 sps:$4 sm:$0xff]  }
  0x4d   :  { %1654 = vmatprep.mubr.bf16.mxu0 %v13648_v18  ;;  %2106 = vmatprep.mubr.bf16.mxu1 %v13648_v18  ;;  %v13746_v18 = vld [vmem:[%s21682_s1 + $0x40c] ss:$16 sps:$4 sm:$0xff]  }
  0x4f   :  { %1722 = vmatpush1.bf16.msra.mxu0 %v13642_v19  ;;  %2174 = vmatpush1.bf16.msra.mxu1 %v13645_v20  ;;  %v13738_v19 = vld [vmem:[%s21683_s0 + $0x8] ss:$28 sps:$4 sm:$0xff]   ;;  %v13741_v20 = vld [vmem:[%s21682_s1 + $0x400] ss:$16 sps:$4 sm:$0xff]  }
  0x50   :  { %1723 = vmatprep.subr.bf16.mxu0 %v13653_v21  ;;  %2175 = vmatprep.subr.bf16.mxu1 %v13656_v22  ;;  %v13744_v21 = vld [vmem:[%s21682_s1 + $0x408] ss:$16 sps:$4 sm:$0xff]   ;;  %v13749_v22 = vld [vmem:[%s21682_s1 + $0x424] ss:$16 sps:$4 sm:$0xff]  }
  0x52   :  { %1655 = vmatmul.mubr.bf16.gmra.mrb[8].mxu0 %v13650_v23  ;;  %2107 = vmatmul.mubr.bf16.gmra.mrb[8].mxu1 %v13650_v23  ;;  %v13752_v23 = vld [vmem:[%s21682_s1 + $0x42c] ss:$16 sps:$4 sm:$0xff]  }
  0x53   :  { %1724 = vmatpush1.bf16.msra.mxu0 %v13651_v24  ;;  %2176 = vmatpush1.bf16.msra.mxu1 %v13654_v25  ;;  %v13753_v24 = vld [vmem:[%s21683_s0 + $0x44] ss:$28 sps:$4 sm:$0xff]  }
  0x54   :  { %1725 = vmatprep.subr.bf16.mxu0 %v13659_v26  ;;  %2177 = vmatprep.subr.bf16.mxu1 %v13662_v27  ;;  %v13747_v25 = vld [vmem:[%s21682_s1 + $0x420] ss:$16 sps:$4 sm:$0xff]   ;;  %v13750_v26 = vld [vmem:[%s21682_s1 + $0x428] ss:$16 sps:$4 sm:$0xff]   ;;  %v13758_v27 = vld [vmem:[%s21682_s1 + $0x444] ss:$16 sps:$4 sm:$0xff]  }
  0x55   :  { %1664 = vmatprep.mubr.bf16.mxu0 %v13663_v28  ;;  %2116 = vmatprep.mubr.bf16.mxu1 %v13663_v28  ;;  %v13761_v28 = vld [vmem:[%s21682_s1 + $0x44c] ss:$16 sps:$4 sm:$0xff]  }
  0x57   :  { %1726 = vmatpush1.bf16.msra.mxu0 %v13657_v29  ;;  %2178 = vmatpush1.bf16.msra.mxu1 %v13660_v30  ;;  %v13755_v29 = vld [vmem:[%s21683_s0 + $0x40] ss:$28 sps:$4 sm:$0xff]  }
  0x58   :  { %1727 = vmatprep.subr.bf16.mxu0 %v13668_v31  ;;  %2179 = vmatprep.subr.bf16.mxu1 %v13671_v32  ;;  %v13756_v30 = vld [vmem:[%s21682_s1 + $0x440] ss:$16 sps:$4 sm:$0xff]   ;;  %v13759_v31 = vld [vmem:[%s21682_s1 + $0x448] ss:$16 sps:$4 sm:$0xff]   ;;  %v13764_v32 = vld [vmem:[%s21682_s1 + $0x464] ss:$16 sps:$4 sm:$0xff]  }
  0x5a   :  { %1665 = vmatmul.mubr.bf16.gmra.mrb[12].mxu0 %v13665_v33  ;;  %2117 = vmatmul.mubr.bf16.gmra.mrb[12].mxu1 %v13665_v33  ;;  %v13767_v33 = vld [vmem:[%s21682_s1 + $0x46c] ss:$16 sps:$4 sm:$0xff]  }
  0x5b   :  { %1728 = vmatpush1.bf16.msra.mxu0 %v13666_v34  ;;  %2180 = vmatpush1.bf16.msra.mxu1 %v13669_v35  ;;  %v13768_v34 = vld [vmem:[%s21683_s0 + $0x7c] ss:$28 sps:$4 sm:$0xff]   ;;  %v13762_v35 = vld [vmem:[%s21682_s1 + $0x460] ss:$16 sps:$4 sm:$0xff]  }
  0x5c   :  { %1729 = vmatprep.subr.bf16.mxu0 %v13674_v36  ;;  %2181 = vmatprep.subr.bf16.mxu1 %v13677_v37  ;;  %v13765_v36 = vld [vmem:[%s21682_s1 + $0x468] ss:$16 sps:$4 sm:$0xff]   ;;  %v13773_v37 = vld [vmem:[%s21682_s1 + $0x484] ss:$16 sps:$4 sm:$0xff]  }
  0x5d   :  { %1674 = vmatprep.mubr.bf16.mxu0 %v13678_v38  ;;  %2126 = vmatprep.mubr.bf16.mxu1 %v13678_v38  ;;  %v13776_v38 = vld [vmem:[%s21682_s1 + $0x48c] ss:$16 sps:$4 sm:$0xff]  }
  0x5f   :  { %1730 = vmatpush1.bf16.msra.mxu0 %v13672_v39  ;;  %2182 = vmatpush1.bf16.msra.mxu1 %v13675_v40  ;;  %v13770_v39 = vld [vmem:[%s21683_s0 + $0x78] ss:$28 sps:$4 sm:$0xff]   ;;  %v13771_v40 = vld [vmem:[%s21682_s1 + $0x480] ss:$16 sps:$4 sm:$0xff]  }
  0x60   :  { %1731 = vmatprep.subr.bf16.mxu0 %v13683_v41  ;;  %2183 = vmatprep.subr.bf16.mxu1 %v13686_v42  ;;  %v13774_v41 = vld [vmem:[%s21682_s1 + $0x488] ss:$16 sps:$4 sm:$0xff]   ;;  %v13779_v42 = vld [vmem:[%s21682_s1 + $0x4a4] ss:$16 sps:$4 sm:$0xff]  }
  0x62   :  { %1675 = vmatmul.mubr.bf16.gmra.mrb[16].mxu0 %v13680_v43  ;;  %2127 = vmatmul.mubr.bf16.gmra.mrb[16].mxu1 %v13680_v43  ;;  %v13782_v43 = vld [vmem:[%s21682_s1 + $0x4ac] ss:$16 sps:$4 sm:$0xff]  }
  0x63   :  { %1732 = vmatpush1.bf16.msra.mxu0 %v13681_v44  ;;  %2184 = vmatpush1.bf16.msra.mxu1 %v13684_v45  ;;  %v13783_v44 = vld [vmem:[%s21683_s0 + $0xb4] ss:$28 sps:$4 sm:$0xff]  }
  0x64   :  { %1733 = vmatprep.subr.bf16.mxu0 %v13689_v46  ;;  %2185 = vmatprep.subr.bf16.mxu1 %v13692_v47  ;;  %v13777_v45 = vld [vmem:[%s21682_s1 + $0x4a0] ss:$16 sps:$4 sm:$0xff]   ;;  %v13780_v46 = vld [vmem:[%s21682_s1 + $0x4a8] ss:$16 sps:$4 sm:$0xff]   ;;  %v13788_v47 = vld [vmem:[%s21682_s1 + $0x4c4] ss:$16 sps:$4 sm:$0xff]  }
  0x65   :  { %1684 = vmatprep.mubr.bf16.mxu0 %v13693_v48  ;;  %2136 = vmatprep.mubr.bf16.mxu1 %v13693_v48  ;;  %v13791_v48 = vld [vmem:[%s21682_s1 + $0x4cc] ss:$16 sps:$4 sm:$0xff]  }
  0x67   :  { %1734 = vmatpush1.bf16.msra.mxu0 %v13687_v49  ;;  %2186 = vmatpush1.bf16.msra.mxu1 %v13690_v50  ;;  %v13785_v49 = vld [vmem:[%s21683_s0 + $0xb0] ss:$28 sps:$4 sm:$0xff]  }
  0x68   :  { %1735 = vmatprep.subr.bf16.mxu0 %v13698_v51  ;;  %2187 = vmatprep.subr.bf16.mxu1 %v13701_v52  ;;  %v13786_v50 = vld [vmem:[%s21682_s1 + $0x4c0] ss:$16 sps:$4 sm:$0xff]   ;;  %v13789_v51 = vld [vmem:[%s21682_s1 + $0x4c8] ss:$16 sps:$4 sm:$0xff]   ;;  %v13794_v52 = vld [vmem:[%s21682_s1 + $0x4e4] ss:$16 sps:$4 sm:$0xff]  }
  0x6a   :  { %1685 = vmatmul.mubr.bf16.gmra.mrb[20].mxu0 %v13695_v53  ;;  %2137 = vmatmul.mubr.bf16.gmra.mrb[20].mxu1 %v13695_v53  ;;  %v13797_v53 = vld [vmem:[%s21682_s1 + $0x4ec] ss:$16 sps:$4 sm:$0xff]  }
  0x6b   :  { %1736 = vmatpush1.bf16.msra.mxu0 %v13696_v54  ;;  %2188 = vmatpush1.bf16.msra.mxu1 %v13699_v55  ;;  %v13798_v54 = vld [vmem:[%s21683_s0 + $0xec] ss:$28 sps:$4 sm:$0xff]   ;;  %v13792_v55 = vld [vmem:[%s21682_s1 + $0x4e0] ss:$16 sps:$4 sm:$0xff]  }
  0x6c   :  { %1737 = vmatprep.subr.bf16.mxu0 %v13704_v56  ;;  %2189 = vmatprep.subr.bf16.mxu1 %v13707_v57  ;;  %v13795_v56 = vld [vmem:[%s21682_s1 + $0x4e8] ss:$16 sps:$4 sm:$0xff]   ;;  %v13803_v57 = vld [vmem:[%s21682_s1 + $0x504] ss:$16 sps:$4 sm:$0xff]  }
  0x6d   :  { %1694 = vmatprep.mubr.bf16.mxu0 %v13708_v58  ;;  %2146 = vmatprep.mubr.bf16.mxu1 %v13708_v58  ;;  %v13806_v58 = vld [vmem:[%s21682_s1 + $0x50c] ss:$16 sps:$4 sm:$0xff]  }
  0x6f   :  { %1738 = vmatpush1.bf16.msra.mxu0 %v13702_v59  ;;  %2190 = vmatpush1.bf16.msra.mxu1 %v13705_v60  ;;  %v13800_v59 = vld [vmem:[%s21683_s0 + $0xe8] ss:$28 sps:$4 sm:$0xff]   ;;  %v13801_v60 = vld [vmem:[%s21682_s1 + $0x500] ss:$16 sps:$4 sm:$0xff]  }
  0x70   :  { %1739 = vmatprep.subr.bf16.mxu0 %v13713_v61  ;;  %2191 = vmatprep.subr.bf16.mxu1 %v13716_v62  ;;  %v13804_v61 = vld [vmem:[%s21682_s1 + $0x508] ss:$16 sps:$4 sm:$0xff]   ;;  %v13809_v62 = vld [vmem:[%s21682_s1 + $0x524] ss:$16 sps:$4 sm:$0xff]  }
  0x72   :  { %1695 = vmatmul.mubr.bf16.gmra.mrb[24].mxu0 %v13710_v63  ;;  %2147 = vmatmul.mubr.bf16.gmra.mrb[24].mxu1 %v13710_v63  ;;  %v13812_v63 = vld [vmem:[%s21682_s1 + $0x52c] ss:$16 sps:$4 sm:$0xff]  }
  0x73   :  { %1740 = vmatpush1.bf16.msra.mxu0 %v13711_v0  ;;  %2192 = vmatpush1.bf16.msra.mxu1 %v13714_v1  ;;  %v13807_v0 = vld [vmem:[%s21682_s1 + $0x520] ss:$16 sps:$4 sm:$0xff]  }
  0x74   :  { %1741 = vmatprep.subr.bf16.mxu0 %v13719_v2  ;;  %2193 = vmatprep.subr.bf16.mxu1 %v13722_v3  ;;  %v13813_v1 = vld [vmem:[%s21683_s0 + $0x124] ss:$28 sps:$4 sm:$0xff]   ;;  %v13810_v2 = vld [vmem:[%s21682_s1 + $0x528] ss:$16 sps:$4 sm:$0xff]  }
  0x75   :  { %1704 = vmatprep.mubr.bf16.mxu0 %v13723_v4  ;;  %2156 = vmatprep.mubr.bf16.mxu1 %v13723_v4  ;;  %v13818_v3 = vld [vmem:[%s21682_s1 + $0x544] ss:$16 sps:$4 sm:$0xff]   ;;  %v13815_v4 = vld [vmem:[%s21683_s0 + $0x120] ss:$28 sps:$4 sm:$0xff]  }
  0x77   :  { %1742 = vmatpush1.bf16.msra.mxu0 %v13717_v5  ;;  %2194 = vmatpush1.bf16.msra.mxu1 %v13720_v6  ;;  %v13821_v5 = vld [vmem:[%s21682_s1 + $0x54c] ss:$16 sps:$4 sm:$0xff]   ;;  %v13816_v6 = vld [vmem:[%s21682_s1 + $0x540] ss:$16 sps:$4 sm:$0xff]  }
  0x78   :  { %1743 = vmatprep.subr.bf16.mxu0 %v13728_v7  ;;  %2195 = vmatprep.subr.bf16.mxu1 %v13731_v8  ;;  %v13819_v7 = vld [vmem:[%s21682_s1 + $0x548] ss:$16 sps:$4 sm:$0xff]   ;;  %v13824_v8 = vld [vmem:[%s21682_s1 + $0x564] ss:$16 sps:$4 sm:$0xff]  }
  0x7a   :  { %1705 = vmatmul.mubr.bf16.gmra.mrb[28].mxu0 %v13725_v9  ;;  %2157 = vmatmul.mubr.bf16.gmra.mrb[28].mxu1 %v13725_v9  ;;  %v13827_v9 = vld [vmem:[%s21682_s1 + $0x56c] ss:$16 sps:$4 sm:$0xff]  }
  0x7b   :  { %1744 = vmatpush1.bf16.msra.mxu0 %v13726_v10  ;;  %2196 = vmatpush1.bf16.msra.mxu1 %v13729_v11  ;;  %v13828_v10 = vld [vmem:[%s21683_s0 + $0x15c] ss:$28 sps:$4 sm:$0xff]   ;;  %v13822_v11 = vld [vmem:[%s21682_s1 + $0x560] ss:$16 sps:$4 sm:$0xff]  }
  0x7c   :  { %1745 = vmatprep.subr.bf16.mxu0 %v13734_v12  ;;  %2197 = vmatprep.subr.bf16.mxu1 %v13737_v13  ;;  %v13825_v12 = vld [vmem:[%s21682_s1 + $0x568] ss:$16 sps:$4 sm:$0xff]   ;;  %v13833_v13 = vld [vmem:[%s21682_s1 + $0x584] ss:$16 sps:$4 sm:$0xff]  }
  0x7d   :  { %1747 = vmatprep.mubr.bf16.mxu0 %v13740_v14  ;;  %2199 = vmatprep.mubr.bf16.mxu1 %v13740_v14  ;;  %v13836_v14 = vld [vmem:[%s21682_s1 + $0x58c] ss:$16 sps:$4 sm:$0xff]  }
  0x7f   :  { %1746 = vmatpush1.bf16.msra.mxu0 %v13732_v15  ;;  %2198 = vmatpush1.bf16.msra.mxu1 %v13735_v16  ;;  %v13830_v15 = vld [vmem:[%s21683_s0 + $0x158] ss:$28 sps:$4 sm:$0xff]   ;;  %v13831_v16 = vld [vmem:[%s21682_s1 + $0x580] ss:$16 sps:$4 sm:$0xff]  }
  0x80   :  { %1828 = vmatprep.subr.bf16.mxu0 %v13743_v17  ;;  %2280 = vmatprep.subr.bf16.mxu1 %v13746_v18  ;;  %v13834_v17 = vld [vmem:[%s21682_s1 + $0x588] ss:$16 sps:$4 sm:$0xff]   ;;  %v13839_v18 = vld [vmem:[%s21682_s1 + $0x5a4] ss:$16 sps:$4 sm:$0xff]  }
  0x82   :  { %1748 = vmatmul.mubr.bf16.vlgmr.msra.gmra.mrb[0].mxu0 %v13738_v19  ;;  %2200 = vmatmul.mubr.bf16.vlgmr.msra.gmra.mrb[0].mxu1 %v13738_v19  ;;  %v13842_v19 = vld [vmem:[%s21682_s1 + $0x5ac] ss:$16 sps:$4 sm:$0xff]  }
  0x83   :  { %1829 = vmatpush1.bf16.msra.mxu0 %v13741_v20  ;;  %2281 = vmatpush1.bf16.msra.mxu1 %v13744_v21  ;;  %v13843_v20 = vld [vmem:[%s21683_s0 + $0x194] ss:$28 sps:$4 sm:$0xff]  }
  0x84   :  { %1830 = vmatprep.subr.bf16.mxu0 %v13749_v22  ;;  %2282 = vmatprep.subr.bf16.mxu1 %v13752_v23  ;;  %v13837_v21 = vld [vmem:[%s21682_s1 + $0x5a0] ss:$16 sps:$4 sm:$0xff]   ;;  %v13840_v22 = vld [vmem:[%s21682_s1 + $0x5a8] ss:$16 sps:$4 sm:$0xff]   ;;  %v13848_v23 = vld [vmem:[%s21682_s1 + $0x5c4] ss:$16 sps:$4 sm:$0xff]  }
  0x85   :  { %1757 = vmatprep.mubr.bf16.mxu0 %v13753_v24  ;;  %2209 = vmatprep.mubr.bf16.mxu1 %v13753_v24  ;;  %v13851_v24 = vld [vmem:[%s21682_s1 + $0x5cc] ss:$16 sps:$4 sm:$0xff]  }
  0x87   :  { %1831 = vmatpush1.bf16.msra.mxu0 %v13747_v25  ;;  %2283 = vmatpush1.bf16.msra.mxu1 %v13750_v26  ;;  %v13845_v25 = vld [vmem:[%s21683_s0 + $0x190] ss:$28 sps:$4 sm:$0xff]  }
  0x88   :  { %1832 = vmatprep.subr.bf16.mxu0 %v13758_v27  ;;  %2284 = vmatprep.subr.bf16.mxu1 %v13761_v28  ;;  %v13846_v26 = vld [vmem:[%s21682_s1 + $0x5c0] ss:$16 sps:$4 sm:$0xff]   ;;  %v13849_v27 = vld [vmem:[%s21682_s1 + $0x5c8] ss:$16 sps:$4 sm:$0xff]   ;;  %v13854_v28 = vld [vmem:[%s21682_s1 + $0x5e4] ss:$16 sps:$4 sm:$0xff]  }
  0x8a   :  { %1758 = vmatmul.mubr.bf16.gmra.mrb[4].mxu0 %v13755_v29  ;;  %2210 = vmatmul.mubr.bf16.gmra.mrb[4].mxu1 %v13755_v29  ;;  %v13857_v29 = vld [vmem:[%s21682_s1 + $0x5ec] ss:$16 sps:$4 sm:$0xff]  }
  0x8b   :  { %1833 = vmatpush1.bf16.msra.mxu0 %v13756_v30  ;;  %2285 = vmatpush1.bf16.msra.mxu1 %v13759_v31  ;;  %v13860_v30 = vld [vmem:[%s21683_s0 + $0x14] ss:$28 sps:$4 sm:$0xff]  }
  0x8c   :  { %1834 = vmatprep.subr.bf16.mxu0 %v13764_v32  ;;  %2286 = vmatprep.subr.bf16.mxu1 %v13767_v33  ;;  %v13852_v31 = vld [vmem:[%s21682_s1 + $0x5e0] ss:$16 sps:$4 sm:$0xff]   ;;  %v13855_v32 = vld [vmem:[%s21682_s1 + $0x5e8] ss:$16 sps:$4 sm:$0xff]   ;;  %v13863_v33 = vld [vmem:[%s21682_s1 + $0x604] ss:$16 sps:$4 sm:$0xff]  }
  0x8d   :  { %1767 = vmatprep.mubr.bf16.mxu0 %v13768_v34  ;;  %2219 = vmatprep.mubr.bf16.mxu1 %v13768_v34  ;;  %v13858_v34 = vld [vmem:[%s21683_s0 + $0x10] ss:$28 sps:$4 sm:$0xff]  }
  0x8f   :  { %1835 = vmatpush1.bf16.msra.mxu0 %v13762_v35  ;;  %2287 = vmatpush1.bf16.msra.mxu1 %v13765_v36  ;;  %v13866_v35 = vld [vmem:[%s21682_s1 + $0x60c] ss:$16 sps:$4 sm:$0xff]   ;;  %v13861_v36 = vld [vmem:[%s21682_s1 + $0x600] ss:$16 sps:$4 sm:$0xff]  }
  0x90   :  { %1836 = vmatprep.subr.bf16.mxu0 %v13773_v37  ;;  %2288 = vmatprep.subr.bf16.mxu1 %v13776_v38  ;;  %v13864_v37 = vld [vmem:[%s21682_s1 + $0x608] ss:$16 sps:$4 sm:$0xff]  }
  0x91   :  { %v13867_v38 = vld [vmem:[%s21683_s0 + $0x4c] ss:$28 sps:$4 sm:$0xff]  }
  0x92   :  { %1768 = vmatmul.mubr.bf16.gmra.mrb[8].mxu0 %v13770_v39  ;;  %2220 = vmatmul.mubr.bf16.gmra.mrb[8].mxu1 %v13770_v39  ;;  %v13896_v39 = vld [vmem:[%s21684_s3 + $0x40] sm:$0xff]  }
  0x93   :  { %1837 = vmatpush1.bf16.msra.mxu0 %v13771_v40  ;;  %2289 = vmatpush1.bf16.msra.mxu1 %v13774_v41  ;;  %v13898_v40 = vld [vmem:[%s21684_s3 + $0xc0] sm:$0xff]  }
  0x94   :  { %1838 = vmatprep.subr.bf16.mxu0 %v13779_v42  ;;  %2290 = vmatprep.subr.bf16.mxu1 %v13782_v43  ;;  %v13869_v41 = vld [vmem:[%s21683_s0 + $0x48] ss:$28 sps:$4 sm:$0xff]   ;;  %v13872_v43 = vld [vmem:[%s21683_s0 + $0x80] ss:$28 sps:$4 sm:$0xff]  }
  0x95   :  { %1777 = vmatprep.mubr.bf16.mxu0 %v13783_v44  ;;  %2229 = vmatprep.mubr.bf16.mxu1 %v13783_v44  ;;  %v13870_v42 = vld [vmem:[%s21683_s0 + $0x84] ss:$28 sps:$4 sm:$0xff]   ;;  %v13873_v44 = vld [vmem:[%s21683_s0 + $0xbc] ss:$28 sps:$4 sm:$0xff]  }
  0x97   :  { %1839 = vmatpush1.bf16.msra.mxu0 %v13777_v45  ;;  %2291 = vmatpush1.bf16.msra.mxu1 %v13780_v46  ;;  %v13875_v45 = vld [vmem:[%s21683_s0 + $0xb8] ss:$28 sps:$4 sm:$0xff]  }
  0x98   :  { %1840 = vmatprep.subr.bf16.mxu0 %v13788_v47  ;;  %2292 = vmatprep.subr.bf16.mxu1 %v13791_v48  ;;  %v13876_v46 = vld [vmem:[%s21683_s0 + $0xf4] ss:$28 sps:$4 sm:$0xff]   ;;  %v13879_v48 = vld [vmem:[%s21683_s0 + $0x12c] ss:$28 sps:$4 sm:$0xff]  }
  0x99   :  { %v13878_v47 = vld [vmem:[%s21683_s0 + $0xf0] ss:$28 sps:$4 sm:$0xff]  }
  0x9a   :  { %1778 = vmatmul.mubr.bf16.gmra.mrb[12].mxu0 %v13785_v49  ;;  %2230 = vmatmul.mubr.bf16.gmra.mrb[12].mxu1 %v13785_v49  ;;  %v13881_v49 = vld [vmem:[%s21683_s0 + $0x128] ss:$28 sps:$4 sm:$0xff]  }
  0x9b   :  { %1841 = vmatpush1.bf16.msra.mxu0 %v13786_v50  ;;  %2293 = vmatpush1.bf16.msra.mxu1 %v13789_v51  ;;  %v13882_v50 = vld [vmem:[%s21683_s0 + $0x164] ss:$28 sps:$4 sm:$0xff]  }
  0x9c   :  { %1842 = vmatprep.subr.bf16.mxu0 %v13794_v52  ;;  %2294 = vmatprep.subr.bf16.mxu1 %v13797_v53  ;;  %v13884_v51 = vld [vmem:[%s21683_s0 + $0x160] ss:$28 sps:$4 sm:$0xff]   ;;  %v13887_v53 = vld [vmem:[%s21683_s0 + $0x198] ss:$28 sps:$4 sm:$0xff]  }
  0x9d   :  { %1787 = vmatprep.mubr.bf16.mxu0 %v13798_v54  ;;  %2239 = vmatprep.mubr.bf16.mxu1 %v13798_v54  ;;  %v13885_v52 = vld [vmem:[%s21683_s0 + $0x19c] ss:$28 sps:$4 sm:$0xff]   ;;  %v16090_v54 = vmov 0  }
  0x9f   :  { %1843 = vmatpush1.bf16.msra.mxu0 %v13792_v55  ;;  %2295 = vmatpush1.bf16.msra.mxu1 %v13795_v56  ;;  %v13888_v55 = vld [vmem:[%s21683_s0 + $0x18] ss:$28 sps:$4 sm:$0xff]   ;;  %v13897_v56 = vld [vmem:[%s21684_s3] sm:$0xff]  }
  0xa0   :  { %1844 = vmatprep.subr.bf16.mxu0 %v13803_v57  ;;  %2296 = vmatprep.subr.bf16.mxu1 %v13806_v58  ;;  %v13899_v57 = vld [vmem:[%s21684_s3 + $0x80] sm:$0xff]   ;;  %v13900_v58 = vld [vmem:[%s21684_s3 + $0x48] sm:$0xff]  }
  0xa2   :  { %1788 = vmatmul.mubr.bf16.gmra.mrb[16].mxu0 %v13800_v59  ;;  %2240 = vmatmul.mubr.bf16.gmra.mrb[16].mxu1 %v13800_v59  ;;  %v13902_v59 = vld [vmem:[%s21684_s3 + $0xc8] sm:$0xff]  }
  0xa3   :  { %1845 = vmatpush1.bf16.msra.mxu0 %v13801_v60  ;;  %2297 = vmatpush1.bf16.msra.mxu1 %v13804_v61  ;;  %v13901_v60 = vld [vmem:[%s21684_s3 + $0x8] sm:$0xff]  }
  0xa4   :  { %1846 = vmatprep.subr.bf16.mxu0 %v13809_v62  ;;  %2298 = vmatprep.subr.bf16.mxu1 %v13812_v63  ;;  %v13903_v61 = vld [vmem:[%s21684_s3 + $0x88] sm:$0xff]   ;;  %v13904_v62 = vld [vmem:[%s21684_s3 + $0x50] sm:$0xff]  }
  0xa5   :  { %1797 = vmatprep.mubr.bf16.mxu0 %v13813_v1  ;;  %2249 = vmatprep.mubr.bf16.mxu1 %v13813_v1  ;;  %v13906_v63 = vld [vmem:[%s21684_s3 + $0xd0] sm:$0xff]  }
  0xa6   :  { %v13905_v1 = vld [vmem:[%s21684_s3 + $0x10] sm:$0xff]  }
  0xa7   :  { %1847 = vmatpush1.bf16.msra.mxu0 %v13807_v0  ;;  %2299 = vmatpush1.bf16.msra.mxu1 %v13810_v2  ;;  %v13889_v0 = vld [vmem:[%s21683_s0 + $0x50] ss:$28 sps:$4 sm:$0xff]  }
  0xa8   :  { %1848 = vmatprep.subr.bf16.mxu0 %v13818_v3  ;;  %2300 = vmatprep.subr.bf16.mxu1 %v13821_v5  ;;  %v13907_v2 = vld [vmem:[%s21684_s3 + $0x90] sm:$0xff]   ;;  %v13908_v3 = vld [vmem:[%s21684_s3 + $0x58] sm:$0xff]  }
  0xa9   :  { %v13909_v5 = vld [vmem:[%s21684_s3 + $0x18] sm:$0xff]  }
  0xaa   :  { %1798 = vmatmul.mubr.bf16.gmra.mrb[20].mxu0 %v13815_v4  ;;  %2250 = vmatmul.mubr.bf16.gmra.mrb[20].mxu1 %v13815_v4  ;;  %v13910_v4 = vld [vmem:[%s21684_s3 + $0xd8] sm:$0xff]  }
  0xab   :  { %1849 = vmatpush1.bf16.msra.mxu0 %v13816_v6  ;;  %2301 = vmatpush1.bf16.msra.mxu1 %v13819_v7  ;;  %v13911_v6 = vld [vmem:[%s21684_s3 + $0x98] sm:$0xff]   ;;  %v13912_v7 = vld [vmem:[%s21684_s3 + $0x60] sm:$0xff]  }
  0xac   :  { %1850 = vmatprep.subr.bf16.mxu0 %v13824_v8  ;;  %2302 = vmatprep.subr.bf16.mxu1 %v13827_v9  ;;  %v13914_v8 = vld [vmem:[%s21684_s3 + $0xe0] sm:$0xff]  }
  0xad   :  { %1807 = vmatprep.mubr.bf16.mxu0 %v13828_v10  ;;  %2259 = vmatprep.mubr.bf16.mxu1 %v13828_v10  ;;  %v13890_v9 = vld [vmem:[%s21683_s0 + $0x88] ss:$28 sps:$4 sm:$0xff]  }
  0xae   :  { %v13913_v10 = vld [vmem:[%s21684_s3 + $0x20] sm:$0xff]  }
  0xaf   :  { %1851 = vmatpush1.bf16.msra.mxu0 %v13822_v11  ;;  %2303 = vmatpush1.bf16.msra.mxu1 %v13825_v12  ;;  %v13915_v11 = vld [vmem:[%s21684_s3 + $0xa0] sm:$0xff]   ;;  %v13916_v12 = vld [vmem:[%s21684_s3 + $0x68] sm:$0xff]  }
  0xb0   :  { %1852 = vmatprep.subr.bf16.mxu0 %v13833_v13  ;;  %2304 = vmatprep.subr.bf16.mxu1 %v13836_v14  ;;  %v13918_v13 = vld [vmem:[%s21684_s3 + $0xe8] sm:$0xff]  }
  0xb1   :  { %v13917_v14 = vld [vmem:[%s21684_s3 + $0x28] sm:$0xff]  }
  0xb2   :  { %1808 = vmatmul.mubr.bf16.gmra.mrb[24].mxu0 %v13830_v15  ;;  %2260 = vmatmul.mubr.bf16.gmra.mrb[24].mxu1 %v13830_v15  ;;  %v13919_v15 = vld [vmem:[%s21684_s3 + $0xa8] sm:$0xff]  }
  0xb3   :  { %1853 = vmatpush1.bf16.msra.mxu0 %v13831_v16  ;;  %2305 = vmatpush1.bf16.msra.mxu1 %v13834_v17  ;;  %v13920_v16 = vld [vmem:[%s21684_s3 + $0x70] sm:$0xff]  }
  0xb4   :  { %1854 = vmatprep.subr.bf16.mxu0 %v13839_v18  ;;  %2306 = vmatprep.subr.bf16.mxu1 %v13842_v19  ;;  %v13922_v17 = vld [vmem:[%s21684_s3 + $0xf0] sm:$0xff]   ;;  %v13891_v18 = vld [vmem:[%s21683_s0 + $0xc0] ss:$28 sps:$4 sm:$0xff]  }
  0xb5   :  { %1817 = vmatprep.mubr.bf16.mxu0 %v13843_v20  ;;  %2269 = vmatprep.mubr.bf16.mxu1 %v13843_v20  ;;  %v13921_v19 = vld [vmem:[%s21684_s3 + $0x30] sm:$0xff]  }
  0xb6   :  { %v13923_v20 = vld [vmem:[%s21684_s3 + $0xb0] sm:$0xff]  }
  0xb7   :  { %1855 = vmatpush1.bf16.msra.mxu0 %v13837_v21  ;;  %2307 = vmatpush1.bf16.msra.mxu1 %v13840_v22  ;;  %v13892_v21 = vld [vmem:[%s21683_s0 + $0xf8] ss:$28 sps:$4 sm:$0xff]   ;;  %v13893_v22 = vld [vmem:[%s21683_s0 + $0x130] ss:$28 sps:$4 sm:$0xff]  }
  0xb8   :  { %1856 = vmatprep.subr.bf16.mxu0 %v13848_v23  ;;  %2308 = vmatprep.subr.bf16.mxu1 %v13851_v24  ;;  %v13894_v23 = vld [vmem:[%s21683_s0 + $0x168] ss:$28 sps:$4 sm:$0xff]   ;;  %v13895_v24 = vld [vmem:[%s21683_s0 + $0x1a0] ss:$28 sps:$4 sm:$0xff]  }
  0xba   :  { %1818 = vmatmul.mubr.bf16.gmra.mrb[28].mxu0 %v13845_v25  ;;  %2270 = vmatmul.mubr.bf16.gmra.mrb[28].mxu1 %v13845_v25  ;;  %v13924_v25 = vld [vmem:[%s21684_s3 + $0x78] sm:$0xff]  }
  0xbb   :  { %1857 = vmatpush1.bf16.msra.mxu0 %v13846_v26  ;;  %2309 = vmatpush1.bf16.msra.mxu1 %v13849_v27  ;;  %v13926_v26 = vld [vmem:[%s21684_s3 + $0xf8] sm:$0xff]  }
  0xbc   :  { %1858 = vmatprep.subr.bf16.mxu0 %v13854_v28  ;;  %2310 = vmatprep.subr.bf16.mxu1 %v13857_v29  ;;  %v13925_v27 = vld [vmem:[%s21684_s3 + $0x38] sm:$0xff]   ;;  %v13930_v29 = vld [vmem:[%s21685_s5 + $0x4] ss:$16 sps:$4 sm:$0xff]  }
  0xbd   :  { %1860 = vmatprep.mubr.bf16.mxu0 %v13860_v30  ;;  %2312 = vmatprep.mubr.bf16.mxu1 %v13860_v30  ;;  %v13927_v28 = vld [vmem:[%s21684_s3 + $0xb8] sm:$0xff]  }
  0xbe   :  { %v13945_v30 = vld [vmem:[%s21685_s5 + $0xc] ss:$16 sps:$4 sm:$0xff]  }
  0xbf   :  { %1859 = vmatpush1.bf16.msra.mxu0 %v13852_v31  ;;  %2311 = vmatpush1.bf16.msra.mxu1 %v13855_v32  ;;  %v297_v31 = vlaneseq }
  0xc0   :  { %1941 = vmatprep.subr.bf16.mxu0 %v13863_v33  ;;  %2393 = vmatprep.subr.bf16.mxu1 %v13866_v35  ;;  %v295_v35 = vld [vmem:[%s21686_s2] sm:$0xf] }
  0xc1   :  { %v17036_v32 = vshrl.u32 %v297_v31, 7 }
  0xc2   :  { %1861 = vmatmul.mubr.bf16.vlgmr.msra.gmra.mrb[0].mxu0 %v13858_v34  ;;  %2313 = vmatmul.mubr.bf16.vlgmr.msra.gmra.mrb[0].mxu1 %v13858_v34 }
  0xc3   :  { %1942 = vmatpush1.bf16.msra.mxu0 %v13861_v36  ;;  %2394 = vmatpush1.bf16.msra.mxu1 %v13864_v37  ;;  %21767 = vst [vmem:[#allocation2_spill] sm:$0xff] %v17036_v32  ;;  %v17039_v33 = vsub.s32 0, %v17036_v32  ;;  %v17042_v34 = vsub.s32 2, %v17036_v32  ;;  %v17048_v36 = vsub.s32 1, %v17036_v32  ;;  %v17051_v37 = vsub.s32 3, %v17036_v32 }
  0xc4   :  { %1870 = vmatprep.mubr.bf16.mxu0 %v13867_v38  ;;  %2322 = vmatprep.mubr.bf16.mxu1 %v13867_v38 }
  0xc5   :  { %12433 = vmatprep.subr.bf16.mxu0 %v13896_v39  ;;  %12497 = vmatprep.subr.bf16.mxu1 %v13898_v40  ;;  %21768 = vst [vmem:[#allocation3_spill] sm:$0xff] %v17039_v33  ;;  %21769 = vst [vmem:[#allocation4_spill] sm:$0xff] %v17042_v34  ;;  %v17054_v38 = vrot.slane %v295_v35, %v17039_v33  ;;  %v17057_v39 = vrot.slane %v295_v35, %v17042_v34 }
  0xc6   :  { %21770 = vst [vmem:[#allocation5_spill] sm:$0xff] %v17048_v36  ;;  %21771 = vst [vmem:[#allocation6_spill] sm:$0xff] %v17051_v37  ;;  %v17060_v40 = vrot.slane %v295_v35, %v17048_v36 }
  0xca   :  { %1871 = vmatmul.mubr.bf16.gmra.mrb[4].mxu0 %v13869_v41  ;;  %2323 = vmatmul.mubr.bf16.gmra.mrb[4].mxu1 %v13869_v41  ;;  %v17063_v41 = vrot.slane %v295_v35, %v17051_v37 }
  0xcb   :  { %1880 = vmatprep.mubr.bf16.mxu0 %v13870_v42  ;;  %2332 = vmatprep.mubr.bf16.mxu1 %v13870_v42 }
  0xd2   :  { %1881 = vmatmul.mubr.bf16.gmra.mrb[8].mxu0 %v13872_v43  ;;  %2333 = vmatmul.mubr.bf16.gmra.mrb[8].mxu1 %v13872_v43 }
  0xd3   :  { %1890 = vmatprep.mubr.bf16.mxu0 %v13873_v44  ;;  %2342 = vmatprep.mubr.bf16.mxu1 %v13873_v44 }
  0xda   :  { %1891 = vmatmul.mubr.bf16.gmra.mrb[12].mxu0 %v13875_v45  ;;  %2343 = vmatmul.mubr.bf16.gmra.mrb[12].mxu1 %v13875_v45 }
  0xdb   :  { %1900 = vmatprep.mubr.bf16.mxu0 %v13876_v46  ;;  %2352 = vmatprep.mubr.bf16.mxu1 %v13876_v46 }
  0xe2   :  { %1901 = vmatmul.mubr.bf16.gmra.mrb[16].mxu0 %v13878_v47  ;;  %2353 = vmatmul.mubr.bf16.gmra.mrb[16].mxu1 %v13878_v47 }
  0xe3   :  { %1910 = vmatprep.mubr.bf16.mxu0 %v13879_v48  ;;  %2362 = vmatprep.mubr.bf16.mxu1 %v13879_v48 }
  0xea   :  { %1911 = vmatmul.mubr.bf16.gmra.mrb[20].mxu0 %v13881_v49  ;;  %2363 = vmatmul.mubr.bf16.gmra.mrb[20].mxu1 %v13881_v49 }
  0xeb   :  { %1920 = vmatprep.mubr.bf16.mxu0 %v13882_v50  ;;  %2372 = vmatprep.mubr.bf16.mxu1 %v13882_v50 }
  0xf2   :  { %1921 = vmatmul.mubr.bf16.gmra.mrb[24].mxu0 %v13884_v51  ;;  %2373 = vmatmul.mubr.bf16.gmra.mrb[24].mxu1 %v13884_v51 }
  0xf3   :  { %1930 = vmatprep.mubr.bf16.mxu0 %v13885_v52  ;;  %2382 = vmatprep.mubr.bf16.mxu1 %v13885_v52 }
  0xfa   :  { %1931 = vmatmul.mubr.bf16.gmra.mrb[28].mxu0 %v13887_v53  ;;  %2383 = vmatmul.mubr.bf16.gmra.mrb[28].mxu1 %v13887_v53 }
  0xfb   :  { %1973 = vmatprep.mubr.bf16.mxu0 %v16090_v54  ;;  %2425 = vmatprep.mubr.bf16.mxu1 %v16090_v54 }
 0x102   :  { %11744 = vmatmul.mubr.msk.bf16.vlgmr.msra.gmra.mrb[0].mxu0 %vm1577_vm0, %v13888_v55  ;;  %11752 = vmatmul.mubr.msk.bf16.vlgmr.msra.gmra.mrb[0].mxu1 %vm1577_vm0, %v13888_v55 }
 0x103   :  { %1983 = vmatprep.mubr.bf16.mxu0 %v16090_v54  ;;  %2435 = vmatprep.mubr.bf16.mxu1 %v16090_v54 }
 0x104   :  { %12434 = vmatpush3.bf16.msra.mxu0 %v13897_v56  ;;  %12498 = vmatpush3.bf16.msra.mxu1 %v13899_v57 }
 0x105   :  { %12435 = vmatprep.subr.bf16.mxu0 %v13900_v58  ;;  %12499 = vmatprep.subr.bf16.mxu1 %v13902_v59 }
 0x108   :  { %12436 = vmatpush3.bf16.msra.mxu0 %v13901_v60  ;;  %12500 = vmatpush3.bf16.msra.mxu1 %v13903_v61 }
 0x109   :  { %12437 = vmatprep.subr.bf16.mxu0 %v13904_v62  ;;  %12501 = vmatprep.subr.bf16.mxu1 %v13906_v63 }
 0x10a   :  { %11745 = vmatmul.mubr.msk.bf16.gmra.mrb[4].mxu0 %vm1577_vm0, %v13889_v0  ;;  %11753 = vmatmul.mubr.msk.bf16.gmra.mrb[4].mxu1 %vm1577_vm0, %v13889_v0 }
 0x10b   :  { %1993 = vmatprep.mubr.bf16.mxu0 %v16090_v54  ;;  %2445 = vmatprep.mubr.bf16.mxu1 %v16090_v54 }
 0x10c   :  { %12438 = vmatpush3.bf16.msra.mxu0 %v13905_v1  ;;  %12502 = vmatpush3.bf16.msra.mxu1 %v13907_v2 }
 0x10d   :  { %12439 = vmatprep.subr.bf16.mxu0 %v13908_v3  ;;  %12503 = vmatprep.subr.bf16.mxu1 %v13910_v4 }
 0x110   :  { %12440 = vmatpush3.bf16.msra.mxu0 %v13909_v5  ;;  %12504 = vmatpush3.bf16.msra.mxu1 %v13911_v6 }
 0x111   :  { %12441 = vmatprep.subr.bf16.mxu0 %v13912_v7  ;;  %12505 = vmatprep.subr.bf16.mxu1 %v13914_v8 }
 0x112   :  { %11746 = vmatmul.mubr.msk.bf16.gmra.mrb[8].mxu0 %vm1577_vm0, %v13890_v9  ;;  %11754 = vmatmul.mubr.msk.bf16.gmra.mrb[8].mxu1 %vm1577_vm0, %v13890_v9  ;;  %v13928_v9 = vld [vmem:[%s21685_s5] ss:$16 sps:$4 sm:$0xff]  }
 0x113   :  { %2003 = vmatprep.mubr.bf16.mxu0 %v16090_v54  ;;  %2455 = vmatprep.mubr.bf16.mxu1 %v16090_v54 }
 0x114   :  { %12442 = vmatpush3.bf16.msra.mxu0 %v13913_v10  ;;  %12506 = vmatpush3.bf16.msra.mxu1 %v13915_v11  ;;  %v13943_v10 = vld [vmem:[%s21685_s5 + $0x8] ss:$16 sps:$4 sm:$0xff]  }
 0x115   :  { %12443 = vmatprep.subr.bf16.mxu0 %v13916_v12  ;;  %12507 = vmatprep.subr.bf16.mxu1 %v13918_v13 }
 0x118   :  { %12444 = vmatpush3.bf16.msra.mxu0 %v13917_v14  ;;  %12508 = vmatpush3.bf16.msra.mxu1 %v13919_v15  ;;  %v13933_v15 = vld [vmem:[%s21685_s5 + $0x24] ss:$16 sps:$4 sm:$0xff]  }
 0x119   :  { %12445 = vmatprep.subr.bf16.mxu0 %v13920_v16  ;;  %12509 = vmatprep.subr.bf16.mxu1 %v13922_v17  ;;  %v13948_v16 = vld [vmem:[%s21685_s5 + $0x2c] ss:$16 sps:$4 sm:$0xff]  }
 0x11a   :  { %11747 = vmatmul.mubr.msk.bf16.gmra.mrb[12].mxu0 %vm1577_vm0, %v13891_v18  ;;  %11755 = vmatmul.mubr.msk.bf16.gmra.mrb[12].mxu1 %vm1577_vm0, %v13891_v18 }
 0x11b   :  { %2013 = vmatprep.mubr.bf16.mxu0 %v16090_v54  ;;  %2465 = vmatprep.mubr.bf16.mxu1 %v16090_v54 }
 0x11c   :  { %12446 = vmatpush3.bf16.msra.mxu0 %v13921_v19  ;;  %12510 = vmatpush3.bf16.msra.mxu1 %v13923_v20 }
 0x11d   :  { %12447 = vmatprep.subr.bf16.mxu0 %v13924_v25  ;;  %12511 = vmatprep.subr.bf16.mxu1 %v13926_v26 }
 0x120   :  { %12448 = vmatpush3.bf16.msra.mxu0 %v13925_v27  ;;  %12512 = vmatpush3.bf16.msra.mxu1 %v13927_v28  ;;  %v13931_v27 = vld [vmem:[%s21685_s5 + $0x20] ss:$16 sps:$4 sm:$0xff]   ;;  %v13936_v28 = vld [vmem:[%s21685_s5 + $0x44] ss:$16 sps:$4 sm:$0xff]  }
 0x121   :  { %3297 = vmatprep.subr.bf16.mxu0 %v13930_v29  ;;  %3410 = vmatprep.subr.bf16.mxu1 %v13945_v30  ;;  %v13946_v29 = vld [vmem:[%s21685_s5 + $0x28] ss:$16 sps:$4 sm:$0xff]  }
 0x122   :  { %11748 = vmatmul.mubr.msk.bf16.gmra.mrb[16].mxu0 %vm1577_vm0, %v13892_v21  ;;  %11756 = vmatmul.mubr.msk.bf16.gmra.mrb[16].mxu1 %vm1577_vm0, %v13892_v21 }
 0x123   :  { %2023 = vmatprep.mubr.bf16.mxu0 %v16090_v54  ;;  %2475 = vmatprep.mubr.bf16.mxu1 %v16090_v54 }
 0x12a   :  { %11749 = vmatmul.mubr.msk.bf16.gmra.mrb[20].mxu0 %vm1577_vm0, %v13893_v22  ;;  %11757 = vmatmul.mubr.msk.bf16.gmra.mrb[20].mxu1 %vm1577_vm0, %v13893_v22 }
 0x12b   :  { %2033 = vmatprep.mubr.bf16.mxu0 %v16090_v54  ;;  %2485 = vmatprep.mubr.bf16.mxu1 %v16090_v54 }
 0x132   :  { %11750 = vmatmul.mubr.msk.bf16.gmra.mrb[24].mxu0 %vm1577_vm0, %v13894_v23  ;;  %11758 = vmatmul.mubr.msk.bf16.gmra.mrb[24].mxu1 %vm1577_vm0, %v13894_v23 }
 0x133   :  { %2043 = vmatprep.mubr.bf16.mxu0 %v16090_v54  ;;  %2495 = vmatprep.mubr.bf16.mxu1 %v16090_v54 }
 0x13a   :  { %11751 = vmatmul.mubr.msk.bf16.gmra.mrb[28].mxu0 %vm1577_vm0, %v13895_v24  ;;  %11759 = vmatmul.mubr.msk.bf16.gmra.mrb[28].mxu1 %vm1577_vm0, %v13895_v24 }
 0x1d5   :  { %v1975_v42 = vpop.f32.mrb[0].mxu0  ;;  %v2427_v43 = vpop.f32.mrb[0].mxu1 }
 0x1d6   :  { %v12689_v44 = vadd.f32 %v1975_v42, %v17054_v38  ;;  %v12721_v45 = vadd.f32 %v2427_v43, %v17057_v39  ;;  %v1977_v46 = vpop.f32.mrb[1].mxu0  ;;  %v2429_v47 = vpop.f32.mrb[1].mxu1  ;;  %v13954_v43 = vld [vmem:[%s21685_s5 + $0x4c] ss:$16 sps:$4 sm:$0xff]  }
 0x1d7   :  { %v12690_v48 = vadd.f32 %v1977_v46, %v17060_v40  ;;  %v12722_v49 = vadd.f32 %v2429_v47, %v17063_v41  ;;  %v1979_v50 = vpop.f32.mrb[2].mxu0  ;;  %v2431_v51 = vpop.f32.mrb[2].mxu1 }
 0x1d8   :  { %v12691_v52 = vadd.f32 %v1979_v50, %v17054_v38  ;;  %v12723_v53 = vadd.f32 %v2431_v51, %v17057_v39  ;;  %v1981_v55 = vpop.f32.mrb[3].mxu0  ;;  %v2433_v56 = vpop.f32.mrb[3].mxu1  ;;  %v2506_v59 = vmax.f32 %v12689_v44, 0.0  ;;  %v2508_v60 = vmax.f32 %v12721_v45, 0.0 }
 0x1d9   :  { %v12692_v57 = vadd.f32 %v1981_v55, %v17060_v40  ;;  %v12724_v58 = vadd.f32 %v2433_v56, %v17063_v41  ;;  %v2507_v63 = vmax.f32 %v12690_v48, 0.0  ;;  %v2509_v0 = vmax.f32 %v12722_v49, 0.0  ;;  %v13934_v55 = vld [vmem:[%s21685_s5 + $0x40] ss:$16 sps:$4 sm:$0xff]   ;;  %v13952_v56 = vld [vmem:[%s21685_s5 + $0x48] ss:$16 sps:$4 sm:$0xff]  }
 0x1da   :  { %v2510_v61 = vmax.f32 %v12691_v52, 0.0  ;;  %v2512_v62 = vmax.f32 %v12723_v53, 0.0 }
 0x1db   :  { %v2511_v1 = vmax.f32 %v12692_v57, 0.0  ;;  %v2513_v2 = vmax.f32 %v12724_v58, 0.0 }
 0x1dc   :  { %v2570_v3 = vpack.c.bf16 %v2510_v61, %v2506_v59  ;;  %v2572_v4 = vpack.c.bf16 %v2512_v62, %v2508_v60  ;;  %v13939_v61 = vld [vmem:[%s21685_s5 + $0x64] ss:$16 sps:$4 sm:$0xff]   ;;  %v13957_v62 = vld [vmem:[%s21685_s5 + $0x6c] ss:$16 sps:$4 sm:$0xff]  }
 0x1dd   :  { %v2571_v5 = vpack.c.bf16 %v2511_v1, %v2507_v63  ;;  %v1985_v6 = vpop.f32.mrb[4].mxu0  ;;  %v2437_v7 = vpop.f32.mrb[4].mxu1  ;;  %v2573_v8 = vpack.c.bf16 %v2513_v2, %v2509_v0 }
 0x1de   :  { %v12693_v11 = vadd.f32 %v1985_v6, %v17054_v38  ;;  %v12725_v12 = vadd.f32 %v2437_v7, %v17057_v39  ;;  %v1987_v13 = vpop.f32.mrb[5].mxu0  ;;  %v2439_v14 = vpop.f32.mrb[5].mxu1 }
 0x1df   :  { %v12694_v17 = vadd.f32 %v1987_v13, %v17060_v40  ;;  %v12726_v18 = vadd.f32 %v2439_v14, %v17063_v41  ;;  %v1989_v19 = vpop.f32.mrb[6].mxu0  ;;  %v2441_v20 = vpop.f32.mrb[6].mxu1  ;;  %2897 = vmatprep.mubr.bf16.mxu0 %v2571_v5  ;;  %2994 = vmatprep.mubr.bf16.mxu1 %v2573_v8 }
 0x1e0   :  { %v12695_v21 = vadd.f32 %v1989_v19, %v17054_v38  ;;  %v12727_v22 = vadd.f32 %v2441_v20, %v17057_v39  ;;  %v1991_v23 = vpop.f32.mrb[7].mxu0  ;;  %v2443_v24 = vpop.f32.mrb[7].mxu1  ;;  %2898 = vmatmul.mubr.bf16.vlgmr.msra.gmra.mrb[32].mxu0 %v2570_v3  ;;  %2995 = vmatmul.mubr.bf16.vlgmr.msra.gmra.mrb[32].mxu1 %v2572_v4  ;;  %v2514_v30 = vmax.f32 %v12693_v11, 0.0  ;;  %v2516_v31 = vmax.f32 %v12725_v12, 0.0  ;;  %v13955_v11 = vld [vmem:[%s21685_s5 + $0x68] ss:$16 sps:$4 sm:$0xff]  }
 0x1e1   :  { %v12696_v25 = vadd.f32 %v1991_v23, %v17060_v40  ;;  %v12728_v26 = vadd.f32 %v2443_v24, %v17063_v41  ;;  %3298 = vmatpush1.bf16.msra.mxu0 %v13928_v9  ;;  %3411 = vmatpush1.bf16.msra.mxu1 %v13943_v10  ;;  %v2515_v44 = vmax.f32 %v12694_v17, 0.0  ;;  %v2517_v45 = vmax.f32 %v12726_v18, 0.0  ;;  %v13937_v9 = vld [vmem:[%s21685_s5 + $0x60] ss:$16 sps:$4 sm:$0xff]   ;;  %v13942_v10 = vld [vmem:[%s21685_s5 + $0x84] ss:$16 sps:$4 sm:$0xff]  }
 0x1e2   :  { %v2518_v35 = vmax.f32 %v12695_v21, 0.0  ;;  %v2520_v42 = vmax.f32 %v12727_v22, 0.0  ;;  %3299 = vmatprep.subr.bf16.mxu0 %v13933_v15  ;;  %3412 = vmatprep.subr.bf16.mxu1 %v13948_v16  ;;  %v13963_v16 = vld [vmem:[%s21685_s5 + $0x8c] ss:$16 sps:$4 sm:$0xff]  }
 0x1e3   :  { %v2519_v46 = vmax.f32 %v12696_v25, 0.0  ;;  %v2521_v47 = vmax.f32 %v12728_v26, 0.0 }
 0x1e4   :  { %v2574_v48 = vpack.c.bf16 %v2518_v35, %v2514_v30  ;;  %v2576_v49 = vpack.c.bf16 %v2520_v42, %v2516_v31  ;;  %v13951_v42 = vld [vmem:[%s21685_s5 + $0xa4] ss:$16 sps:$4 sm:$0xff]  }
 0x1e5   :  { %v2575_v50 = vpack.c.bf16 %v2519_v46, %v2515_v44  ;;  %v1995_v51 = vpop.f32.mrb[8].mxu0  ;;  %v2447_v52 = vpop.f32.mrb[8].mxu1  ;;  %v2577_v53 = vpack.c.bf16 %v2521_v47, %v2517_v45  ;;  %3300 = vmatpush1.bf16.msra.mxu0 %v13931_v27  ;;  %3413 = vmatpush1.bf16.msra.mxu1 %v13946_v29  ;;  %v13940_v27 = vld [vmem:[%s21685_s5 + $0x80] ss:$16 sps:$4 sm:$0xff]  }
 0x1e6   :  { %v12697_v57 = vadd.f32 %v1995_v51, %v17054_v38  ;;  %v12729_v58 = vadd.f32 %v2447_v52, %v17057_v39  ;;  %v1997_v59 = vpop.f32.mrb[9].mxu0  ;;  %v2449_v60 = vpop.f32.mrb[9].mxu1  ;;  %3301 = vmatprep.subr.bf16.mxu0 %v13936_v28  ;;  %3414 = vmatprep.subr.bf16.mxu1 %v13954_v43  ;;  %v13961_v28 = vld [vmem:[%s21685_s5 + $0x88] ss:$16 sps:$4 sm:$0xff]  }
 0x1e7   :  { %v12698_v63 = vadd.f32 %v1997_v59, %v17060_v40  ;;  %v12730_v0 = vadd.f32 %v2449_v60, %v17063_v41  ;;  %v1999_v1 = vpop.f32.mrb[10].mxu0  ;;  %v2451_v2 = vpop.f32.mrb[10].mxu1  ;;  %2905 = vmatprep.mubr.bf16.mxu0 %v2575_v50  ;;  %3002 = vmatprep.mubr.bf16.mxu1 %v2577_v53  ;;  %v13949_v53 = vld [vmem:[%s21685_s5 + $0xa0] ss:$16 sps:$4 sm:$0xff]   ;;  %v13960_v59 = vld [vmem:[%s21685_s5 + $0xc4] ss:$16 sps:$4 sm:$0xff]  }
 0x1e8   :  { %v12699_v3 = vadd.f32 %v1999_v1, %v17054_v38  ;;  %v12731_v4 = vadd.f32 %v2451_v2, %v17057_v39  ;;  %v2001_v5 = vpop.f32.mrb[11].mxu0  ;;  %v2453_v6 = vpop.f32.mrb[11].mxu1  ;;  %2906 = vmatmul.mubr.bf16.gmra.mrb[36].mxu0 %v2574_v48  ;;  %3003 = vmatmul.mubr.bf16.gmra.mrb[36].mxu1 %v2576_v49  ;;  %v2522_v12 = vmax.f32 %v12697_v57, 0.0  ;;  %v2524_v13 = vmax.f32 %v12729_v58, 0.0 }
 0x1e9   :  { %v12700_v7 = vadd.f32 %v2001_v5, %v17060_v40  ;;  %v12732_v8 = vadd.f32 %v2453_v6, %v17063_v41  ;;  %3302 = vmatpush1.bf16.msra.mxu0 %v13934_v55  ;;  %3415 = vmatpush1.bf16.msra.mxu1 %v13952_v56  ;;  %v2523_v17 = vmax.f32 %v12698_v63, 0.0  ;;  %v2525_v18 = vmax.f32 %v12730_v0, 0.0  ;;  %v13958_v6 = vld [vmem:[%s21685_s5 + $0xc0] ss:$16 sps:$4 sm:$0xff]  }
 0x1ea   :  { %v2526_v14 = vmax.f32 %v12699_v3, 0.0  ;;  %v2528_v15 = vmax.f32 %v12731_v4, 0.0  ;;  %3303 = vmatprep.subr.bf16.mxu0 %v13939_v61  ;;  %3416 = vmatprep.subr.bf16.mxu1 %v13957_v62 }
 0x1eb   :  { %v2527_v19 = vmax.f32 %v12700_v7, 0.0  ;;  %v2529_v20 = vmax.f32 %v12732_v8, 0.0 }
 0x1ec   :  { %v2578_v21 = vpack.c.bf16 %v2526_v14, %v2522_v12  ;;  %v2580_v22 = vpack.c.bf16 %v2528_v15, %v2524_v13 }
 0x1ed   :  { %v2579_v23 = vpack.c.bf16 %v2527_v19, %v2523_v17  ;;  %v2005_v24 = vpop.f32.mrb[12].mxu0  ;;  %v2457_v25 = vpop.f32.mrb[12].mxu1  ;;  %v2581_v26 = vpack.c.bf16 %v2529_v20, %v2525_v18  ;;  %3304 = vmatpush1.bf16.msra.mxu0 %v13937_v9  ;;  %3417 = vmatpush1.bf16.msra.mxu1 %v13955_v11 }
 0x1ee   :  { %v12701_v29 = vadd.f32 %v2005_v24, %v17054_v38  ;;  %v12733_v30 = vadd.f32 %v2457_v25, %v17057_v39  ;;  %v2007_v31 = vpop.f32.mrb[13].mxu0  ;;  %v2459_v35 = vpop.f32.mrb[13].mxu1  ;;  %3305 = vmatprep.subr.bf16.mxu0 %v13942_v10  ;;  %3418 = vmatprep.subr.bf16.mxu1 %v13963_v16 }
 0x1ef   :  { %v12702_v43 = vadd.f32 %v2007_v31, %v17060_v40  ;;  %v12734_v44 = vadd.f32 %v2459_v35, %v17063_v41  ;;  %v2009_v45 = vpop.f32.mrb[14].mxu0  ;;  %v2461_v46 = vpop.f32.mrb[14].mxu1  ;;  %2913 = vmatprep.mubr.bf16.mxu0 %v2579_v23  ;;  %3010 = vmatprep.mubr.bf16.mxu1 %v2581_v26 }
 0x1f0   :  { %v12703_v47 = vadd.f32 %v2009_v45, %v17054_v38  ;;  %v12735_v48 = vadd.f32 %v2461_v46, %v17057_v39  ;;  %v2011_v49 = vpop.f32.mrb[15].mxu0  ;;  %v2463_v50 = vpop.f32.mrb[15].mxu1  ;;  %2914 = vmatmul.mubr.bf16.gmra.mrb[40].mxu0 %v2578_v21  ;;  %3011 = vmatmul.mubr.bf16.gmra.mrb[40].mxu1 %v2580_v22  ;;  %v2530_v55 = vmax.f32 %v12701_v29, 0.0  ;;  %v2532_v56 = vmax.f32 %v12733_v30, 0.0 }
 0x1f1   :  { %v12704_v51 = vadd.f32 %v2011_v49, %v17060_v40  ;;  %v12736_v52 = vadd.f32 %v2463_v50, %v17063_v41  ;;  %3306 = vmatpush1.bf16.msra.mxu0 %v13940_v27  ;;  %3419 = vmatpush1.bf16.msra.mxu1 %v13961_v28  ;;  %v2531_v60 = vmax.f32 %v12702_v43, 0.0  ;;  %v2533_v61 = vmax.f32 %v12734_v44, 0.0 }
 0x1f2   :  { %v2534_v57 = vmax.f32 %v12703_v47, 0.0  ;;  %v2536_v58 = vmax.f32 %v12735_v48, 0.0  ;;  %3307 = vmatprep.subr.bf16.mxu0 %v13951_v42 }
 0x1f3   :  { %v2535_v62 = vmax.f32 %v12704_v51, 0.0  ;;  %v2537_v63 = vmax.f32 %v12736_v52, 0.0 }
 0x1f4   :  { %v2582_v0 = vpack.c.bf16 %v2534_v57, %v2530_v55  ;;  %v2584_v1 = vpack.c.bf16 %v2536_v58, %v2532_v56 }
 0x1f5   :  { %v2583_v2 = vpack.c.bf16 %v2535_v62, %v2531_v60  ;;  %v2015_v3 = vpop.f32.mrb[16].mxu0  ;;  %v2467_v4 = vpop.f32.mrb[16].mxu1  ;;  %v2585_v5 = vpack.c.bf16 %v2537_v63, %v2533_v61  ;;  %3308 = vmatpush1.bf16.msra.mxu0 %v13949_v53 }
 0x1f6   :  { %v12705_v7 = vadd.f32 %v2015_v3, %v17054_v38  ;;  %v12737_v8 = vadd.f32 %v2467_v4, %v17057_v39  ;;  %v2017_v9 = vpop.f32.mrb[17].mxu0  ;;  %v2469_v10 = vpop.f32.mrb[17].mxu1  ;;  %3309 = vmatprep.subr.bf16.mxu0 %v13960_v59 }
 0x1f7   :  { %v12706_v11 = vadd.f32 %v2017_v9, %v17060_v40  ;;  %v12738_v12 = vadd.f32 %v2469_v10, %v17063_v41  ;;  %v2019_v13 = vpop.f32.mrb[18].mxu0  ;;  %v2471_v14 = vpop.f32.mrb[18].mxu1  ;;  %2921 = vmatprep.mubr.bf16.mxu0 %v2583_v2  ;;  %3018 = vmatprep.mubr.bf16.mxu1 %v2585_v5 }
 0x1f8   :  { %v12707_v15 = vadd.f32 %v2019_v13, %v17054_v38  ;;  %v12739_v16 = vadd.f32 %v2471_v14, %v17057_v39  ;;  %v2021_v17 = vpop.f32.mrb[19].mxu0  ;;  %v2473_v18 = vpop.f32.mrb[19].mxu1  ;;  %2922 = vmatmul.mubr.bf16.gmra.mrb[44].mxu0 %v2582_v0  ;;  %3019 = vmatmul.mubr.bf16.gmra.mrb[44].mxu1 %v2584_v1  ;;  %v2538_v21 = vmax.f32 %v12705_v7, 0.0  ;;  %v2540_v22 = vmax.f32 %v12737_v8, 0.0 }
 0x1f9   :  { %v12708_v19 = vadd.f32 %v2021_v17, %v17060_v40  ;;  %v12740_v20 = vadd.f32 %v2473_v18, %v17063_v41  ;;  %3310 = vmatpush1.bf16.msra.mxu0 %v13958_v6  ;;  %v2539_v25 = vmax.f32 %v12706_v11, 0.0  ;;  %v2541_v26 = vmax.f32 %v12738_v12, 0.0 }
 0x1fa   :  { %v2542_v23 = vmax.f32 %v12707_v15, 0.0  ;;  %v2544_v24 = vmax.f32 %v12739_v16, 0.0 }
 0x1fb   :  { %v2543_v27 = vmax.f32 %v12708_v19, 0.0  ;;  %v2545_v28 = vmax.f32 %v12740_v20, 0.0 }
 0x1fc   :  { %v2586_v29 = vpack.c.bf16 %v2542_v23, %v2538_v21  ;;  %v2588_v30 = vpack.c.bf16 %v2544_v24, %v2540_v22 }
 0x1fd   :  { %v2587_v31 = vpack.c.bf16 %v2543_v27, %v2539_v25  ;;  %v2025_v35 = vpop.f32.mrb[20].mxu0  ;;  %v2477_v42 = vpop.f32.mrb[20].mxu1  ;;  %v2589_v43 = vpack.c.bf16 %v2545_v28, %v2541_v26 }
 0x1fe   :  { %v12709_v44 = vadd.f32 %v2025_v35, %v17054_v38  ;;  %v12741_v45 = vadd.f32 %v2477_v42, %v17057_v39  ;;  %v2027_v46 = vpop.f32.mrb[21].mxu0  ;;  %v2479_v47 = vpop.f32.mrb[21].mxu1 }
 0x1ff   :  { %v12710_v48 = vadd.f32 %v2027_v46, %v17060_v40  ;;  %v12742_v49 = vadd.f32 %v2479_v47, %v17063_v41  ;;  %v2029_v50 = vpop.f32.mrb[22].mxu0  ;;  %v2481_v51 = vpop.f32.mrb[22].mxu1  ;;  %2929 = vmatprep.mubr.bf16.mxu0 %v2587_v31  ;;  %3026 = vmatprep.mubr.bf16.mxu1 %v2589_v43 }
 0x200   :  { %v12711_v52 = vadd.f32 %v2029_v50, %v17054_v38  ;;  %v12743_v53 = vadd.f32 %v2481_v51, %v17057_v39  ;;  %v2031_v55 = vpop.f32.mrb[23].mxu0  ;;  %v2483_v56 = vpop.f32.mrb[23].mxu1  ;;  %2930 = vmatmul.mubr.bf16.gmra.mrb[48].mxu0 %v2586_v29  ;;  %3027 = vmatmul.mubr.bf16.gmra.mrb[48].mxu1 %v2588_v30  ;;  %v2546_v59 = vmax.f32 %v12709_v44, 0.0  ;;  %v2548_v60 = vmax.f32 %v12741_v45, 0.0 }
 0x201   :  { %v12712_v57 = vadd.f32 %v2031_v55, %v17060_v40  ;;  %v12744_v58 = vadd.f32 %v2483_v56, %v17063_v41  ;;  %v2547_v63 = vmax.f32 %v12710_v48, 0.0  ;;  %v2549_v0 = vmax.f32 %v12742_v49, 0.0 }
 0x202   :  { %v2550_v61 = vmax.f32 %v12711_v52, 0.0  ;;  %v2552_v62 = vmax.f32 %v12743_v53, 0.0 }
 0x203   :  { %v2551_v1 = vmax.f32 %v12712_v57, 0.0  ;;  %v2553_v2 = vmax.f32 %v12744_v58, 0.0 }
 0x204   :  { %v2590_v3 = vpack.c.bf16 %v2550_v61, %v2546_v59  ;;  %v2592_v4 = vpack.c.bf16 %v2552_v62, %v2548_v60 }
 0x205   :  { %v2591_v5 = vpack.c.bf16 %v2551_v1, %v2547_v63  ;;  %v2035_v6 = vpop.f32.mrb[24].mxu0  ;;  %v2487_v7 = vpop.f32.mrb[24].mxu1  ;;  %v2593_v8 = vpack.c.bf16 %v2553_v2, %v2549_v0 }
 0x206   :  { %v12713_v9 = vadd.f32 %v2035_v6, %v17054_v38  ;;  %v12745_v10 = vadd.f32 %v2487_v7, %v17057_v39  ;;  %v2037_v11 = vpop.f32.mrb[25].mxu0  ;;  %v2489_v12 = vpop.f32.mrb[25].mxu1  ;;  %v13972_v7 = vld [vmem:[%s21685_s5 + $0xcc] ss:$16 sps:$4 sm:$0xff]  }
 0x207   :  { %v12714_v13 = vadd.f32 %v2037_v11, %v17060_v40  ;;  %v12746_v14 = vadd.f32 %v2489_v12, %v17063_v41  ;;  %v2039_v15 = vpop.f32.mrb[26].mxu0  ;;  %v2491_v16 = vpop.f32.mrb[26].mxu1  ;;  %2937 = vmatprep.mubr.bf16.mxu0 %v2591_v5  ;;  %3034 = vmatprep.mubr.bf16.mxu1 %v2593_v8  ;;  %v13970_v8 = vld [vmem:[%s21685_s5 + $0xc8] ss:$16 sps:$4 sm:$0xff]   ;;  %v13967_v11 = vld [vmem:[%s21685_s5 + $0xe0] ss:$16 sps:$4 sm:$0xff]  }
 0x208   :  { %v12715_v17 = vadd.f32 %v2039_v15, %v17054_v38  ;;  %v12747_v18 = vadd.f32 %v2491_v16, %v17057_v39  ;;  %v2041_v19 = vpop.f32.mrb[27].mxu0  ;;  %v2493_v20 = vpop.f32.mrb[27].mxu1  ;;  %2938 = vmatmul.mubr.bf16.gmra.mrb[52].mxu0 %v2590_v3  ;;  %3035 = vmatmul.mubr.bf16.gmra.mrb[52].mxu1 %v2592_v4  ;;  %v2554_v23 = vmax.f32 %v12713_v9, 0.0  ;;  %v2556_v24 = vmax.f32 %v12745_v10, 0.0  ;;  %v13969_v9 = vld [vmem:[%s21685_s5 + $0xe4] ss:$16 sps:$4 sm:$0xff]  }
 0x209   :  { %v12716_v21 = vadd.f32 %v2041_v19, %v17060_v40  ;;  %v12748_v22 = vadd.f32 %v2493_v20, %v17063_v41  ;;  %v2555_v27 = vmax.f32 %v12714_v13, 0.0  ;;  %v2557_v28 = vmax.f32 %v12746_v14, 0.0  ;;  %v13975_v10 = vld [vmem:[%s21685_s5 + $0xec] ss:$16 sps:$4 sm:$0xff]   ;;  %v13973_v12 = vld [vmem:[%s21685_s5 + $0xe8] ss:$16 sps:$4 sm:$0xff]   ;;  %3311 = vmatprep.subr.bf16.mxu0 %v13969_v9 }
 0x20a   :  { %v2558_v25 = vmax.f32 %v12715_v17, 0.0  ;;  %v2560_v26 = vmax.f32 %v12747_v18, 0.0  ;;  %3312 = vmatpush1.bf16.msra.mxu0 %v13967_v11  ;;  %v13978_v13 = vld [vmem:[%s21687_s7 + $0x4] ss:$76 sps:$4 sm:$0xff]   ;;  %v13981_v14 = vld [vmem:[%s21687_s7 + $0xc] ss:$76 sps:$4 sm:$0xff]  }
 0x20b   :  { %v2559_v29 = vmax.f32 %v12716_v21, 0.0  ;;  %v2561_v30 = vmax.f32 %v12748_v22, 0.0  ;;  %7432 = vmatprep.subr.bf16.mxu0 %v13978_v13  ;;  %v17230_v15 = vld [vmem:[%s21688_s4] ss:$0 sm:$0xff] }
 0x20c   :  { %v2594_v31 = vpack.c.bf16 %v2558_v25, %v2554_v23  ;;  %v2596_v35 = vpack.c.bf16 %v2560_v26, %v2556_v24 }
 0x20d   :  { %v2595_v42 = vpack.c.bf16 %v2559_v29, %v2555_v27  ;;  %v2045_v43 = vpop.f32.mrb[28].mxu0  ;;  %v2497_v44 = vpop.f32.mrb[28].mxu1  ;;  %v2597_v45 = vpack.c.bf16 %v2561_v30, %v2557_v28 }
 0x20e   :  { %v12717_v46 = vadd.f32 %v2045_v43, %v17054_v38  ;;  %v12749_v47 = vadd.f32 %v2497_v44, %v17057_v39  ;;  %v2047_v48 = vpop.f32.mrb[29].mxu0  ;;  %v2499_v49 = vpop.f32.mrb[29].mxu1  ;;  %v13976_v43 = vld [vmem:[%s21687_s7] ss:$76 sps:$4 sm:$0xff]   ;;  %v13979_v44 = vld [vmem:[%s21687_s7 + $0x8] ss:$76 sps:$4 sm:$0xff]  }
 0x20f   :  { %v12718_v50 = vadd.f32 %v2047_v48, %v17060_v40  ;;  %v12750_v51 = vadd.f32 %v2499_v49, %v17063_v41  ;;  %v2049_v52 = vpop.f32.mrb[30].mxu0  ;;  %v2501_v53 = vpop.f32.mrb[30].mxu1  ;;  %2945 = vmatprep.mubr.bf16.mxu0 %v2595_v42  ;;  %3042 = vmatprep.mubr.bf16.mxu1 %v2597_v45  ;;  %v13987_v48 = vld [vmem:[%s21687_s7 + $0xa4] ss:$76 sps:$4 sm:$0xff]  }
 0x210   :  { %v12719_v55 = vadd.f32 %v2049_v52, %v17054_v38  ;;  %v12751_v56 = vadd.f32 %v2501_v53, %v17057_v39  ;;  %v2051_v57 = vpop.f32.mrb[31].mxu0  ;;  %v2503_v58 = vpop.f32.mrb[31].mxu1  ;;  %2946 = vmatmul.mubr.bf16.gmra.mrb[56].mxu0 %v2594_v31  ;;  %3043 = vmatmul.mubr.bf16.gmra.mrb[56].mxu1 %v2596_v35  ;;  %v2562_v61 = vmax.f32 %v12717_v46, 0.0  ;;  %v2564_v62 = vmax.f32 %v12749_v47, 0.0  ;;  %v13984_v47 = vld [vmem:[%s21687_s7 + $0x9c] ss:$76 sps:$4 sm:$0xff]  }
 0x211   :  { %v12720_v59 = vadd.f32 %v2051_v57, %v17060_v40  ;;  %v12752_v60 = vadd.f32 %v2503_v58, %v17063_v41  ;;  %v2563_v1 = vmax.f32 %v12718_v50, 0.0  ;;  %v2565_v2 = vmax.f32 %v12750_v51, 0.0  ;;  %v13966_v40 = vld [vmem:[%s21685_s5 + $0xac] ss:$16 sps:$4 sm:$0xff]   ;;  %v13964_v41 = vld [vmem:[%s21685_s5 + $0xa8] ss:$16 sps:$4 sm:$0xff]  }
 0x212   :  { %v2566_v63 = vmax.f32 %v12719_v55, 0.0  ;;  %v2568_v0 = vmax.f32 %v12751_v56, 0.0  ;;  %3420 = vmatprep.subr.bf16.mxu1 %v13966_v40  ;;  %v13996_v40 = vld [vmem:[%s21687_s7 + $0x1cc] ss:$76 sps:$4 sm:$0xff]  }
 0x213   :  { %v2567_v3 = vmax.f32 %v12720_v59, 0.0  ;;  %v2569_v4 = vmax.f32 %v12752_v60, 0.0  ;;  %3421 = vmatpush1.bf16.msra.mxu1 %v13964_v41  ;;  %v13982_v60 = vld [vmem:[%s21687_s7 + $0x98] ss:$76 sps:$4 sm:$0xff]   ;;  %v13999_v41 = vld [vmem:[%s21687_s7 + $0x1d4] ss:$76 sps:$4 sm:$0xff]  }
 0x214   :  { %v2598_v5 = vpack.c.bf16 %v2566_v63, %v2562_v61  ;;  %v2600_v38 = vpack.c.bf16 %v2568_v0, %v2564_v62  ;;  %3422 = vmatprep.subr.bf16.mxu1 %v13972_v7  ;;  %v13985_v61 = vld [vmem:[%s21687_s7 + $0xa0] ss:$76 sps:$4 sm:$0xff]   ;;  %v13993_v63 = vld [vmem:[%s21687_s7 + $0x13c] ss:$76 sps:$4 sm:$0xff]  }
 0x215   :  { %v2599_v6 = vpack.c.bf16 %v2567_v3, %v2563_v1  ;;  %v2601_v39 = vpack.c.bf16 %v2569_v4, %v2565_v2  ;;  %v13990_v62 = vld [vmem:[%s21687_s7 + $0x134] ss:$76 sps:$4 sm:$0xff]  }
 0x217   :  { %2953 = vmatprep.mubr.bf16.mxu0 %v2599_v6  ;;  %3050 = vmatprep.mubr.bf16.mxu1 %v2601_v39 }
 0x218   :  { %2954 = vmatmul.mubr.bf16.gmra.mrb[60].mxu0 %v2598_v5  ;;  %3051 = vmatmul.mubr.bf16.gmra.mrb[60].mxu1 %v2600_v38  ;;  %v13988_v5 = vld [vmem:[%s21687_s7 + $0x130] ss:$76 sps:$4 sm:$0xff]   ;;  %v13991_v38 = vld [vmem:[%s21687_s7 + $0x138] ss:$76 sps:$4 sm:$0xff]  }
 0x219   :  { %3329 = vmatprep.mubr.bf16.mxu0 %v16090_v54  ;;  %3442 = vmatprep.mubr.bf16.mxu1 %v16090_v54 }
 0x21a   :  { %3423 = vmatpush1.bf16.msra.mxu1 %v13970_v8 }
 0x21b   :  { %3424 = vmatprep.subr.bf16.mxu1 %v13975_v10 }
 0x21e   :  { %3425 = vmatpush1.bf16.msra.mxu1 %v13973_v12 }
 0x21f   :  { %7658 = vmatprep.subr.bf16.mxu1 %v13981_v14 }
 0x2b3   :  { %v12449_v16 = vpop.f32.mrb[32].mxu0  ;;  %v12513_v17 = vpop.f32.mrb[32].mxu1 }
 0x2b4   :  { %v12450_v18 = vpop.f32.mrb[33].mxu0  ;;  %v12514_v19 = vpop.f32.mrb[33].mxu1 }
 0x2b5   :  { %v12451_v20 = vadd.f32 %v12450_v18, %v12449_v16  ;;  %v12515_v21 = vadd.f32 %v12514_v19, %v12513_v17  ;;  %v12452_v22 = vpop.f32.mrb[34].mxu0  ;;  %v12516_v23 = vpop.f32.mrb[34].mxu1  ;;  %v13994_v18 = vld [vmem:[%s21687_s7 + $0x1c8] ss:$76 sps:$4 sm:$0xff]   ;;  %v13997_v19 = vld [vmem:[%s21687_s7 + $0x1d0] ss:$76 sps:$4 sm:$0xff]  }
 0x2b6   :  { %v12453_v24 = vpop.f32.mrb[35].mxu0  ;;  %v12517_v25 = vpop.f32.mrb[35].mxu1 }
 0x2b7   :  { %v2900_v26 = vadd.f32 %v12451_v20, %v17230_v15  ;;  %v12454_v27 = vadd.f32 %v12453_v24, %v12452_v22  ;;  %v12518_v28 = vadd.f32 %v12517_v25, %v12516_v23  ;;  %v14002_v20 = vld [vmem:[%s21687_s7 + $0x264] ss:$76 sps:$4 sm:$0xff]  }
 0x2b9   :  { %v2997_v29 = vadd.f32 %v12515_v21, %v2900_v26  ;;  %v2903_v30 = vadd.f32 %v12454_v27, %v17230_v15  ;;  %v14005_v21 = vld [vmem:[%s21687_s7 + $0x26c] ss:$76 sps:$4 sm:$0xff]  }
 0x2ba   :  { %v14000_v27 = vld [vmem:[%s21687_s7 + $0x260] ss:$76 sps:$4 sm:$0xff]  }
 0x2bb   :  { %3059 = vst [vmem:[%s21689_s10] sm:$0xff] %v2997_v29  ;;  %v3000_v31 = vadd.f32 %v12518_v28, %v2903_v30  ;;  %v12455_v35 = vpop.f32.mrb[36].mxu0  ;;  %v12519_v42 = vpop.f32.mrb[36].mxu1  ;;  %v14003_v28 = vld [vmem:[%s21687_s7 + $0x268] ss:$76 sps:$4 sm:$0xff]  }
 0x2bc   :  { %v12456_v45 = vpop.f32.mrb[37].mxu0  ;;  %v12520_v46 = vpop.f32.mrb[37].mxu1 }
 0x2bd   :  { %3060 = vst [vmem:[%s21689_s10 + $0x8] sm:$0xff] %v3000_v31  ;;  %v3075_v49 = vpack.c.bf16 %v3000_v31, %v2997_v29  ;;  %v12457_v50 = vadd.f32 %v12456_v45, %v12455_v35  ;;  %v12521_v51 = vadd.f32 %v12520_v46, %v12519_v42  ;;  %v12458_v52 = vpop.f32.mrb[38].mxu0  ;;  %v12522_v53 = vpop.f32.mrb[38].mxu1  ;;  %v14008_v31 = vld [vmem:[%s21687_s7 + $0x2fc] ss:$76 sps:$4 sm:$0xff]  }
 0x2be   :  { %v12459_v55 = vpop.f32.mrb[39].mxu0  ;;  %v12523_v56 = vpop.f32.mrb[39].mxu1  ;;  %v14011_v35 = vld [vmem:[%s21687_s7 + $0x304] ss:$76 sps:$4 sm:$0xff]  }
 0x2bf   :  { %v2908_v57 = vadd.f32 %v12457_v50, %v17230_v15  ;;  %v12460_v58 = vadd.f32 %v12459_v55, %v12458_v52  ;;  %v12524_v59 = vadd.f32 %v12523_v56, %v12522_v53  ;;  %3330 = vmatmul.mubr.bf16.vlgmr.msra.gmra.mrb[64].mxu0 %v3075_v49  ;;  %3443 = vmatmul.mubr.bf16.vlgmr.msra.gmra.mrb[64].mxu1 %v3075_v49  ;;  %v14006_v52 = vld [vmem:[%s21687_s7 + $0x2f8] ss:$76 sps:$4 sm:$0xff]   ;;  %v14009_v53 = vld [vmem:[%s21687_s7 + $0x300] ss:$76 sps:$4 sm:$0xff]   ;;  %v14017_v56 = vld [vmem:[%s21687_s7 + $0x39c] ss:$76 sps:$4 sm:$0xff]  }
 0x2c0   :  { %3339 = vmatprep.mubr.bf16.mxu0 %v16090_v54  ;;  %3452 = vmatprep.mubr.bf16.mxu1 %v16090_v54  ;;  %v14014_v55 = vld [vmem:[%s21687_s7 + $0x394] ss:$76 sps:$4 sm:$0xff]  }
 0x2c1   :  { %v3005_v0 = vadd.f32 %v12521_v51, %v2908_v57  ;;  %v2911_v1 = vadd.f32 %v12460_v58, %v17230_v15  ;;  %7433 = vmatpush1.bf16.msra.mxu0 %v13976_v43  ;;  %7659 = vmatpush1.bf16.msra.mxu1 %v13979_v44 }
 0x2c2   :  { %7434 = vmatprep.subr.bf16.mxu0 %v13984_v47  ;;  %7660 = vmatprep.subr.bf16.mxu1 %v13987_v48 }
 0x2c3   :  { %3061 = vst [vmem:[%s21689_s10 + $0x10] sm:$0xff] %v3005_v0  ;;  %v3008_v2 = vadd.f32 %v12524_v59, %v2911_v1  ;;  %v12461_v3 = vpop.f32.mrb[40].mxu0  ;;  %v12525_v4 = vpop.f32.mrb[40].mxu1 }
 0x2c4   :  { %v12462_v6 = vpop.f32.mrb[41].mxu0  ;;  %v12526_v39 = vpop.f32.mrb[41].mxu1 }
 0x2c5   :  { %3062 = vst [vmem:[%s21689_s10 + $0x18] sm:$0xff] %v3008_v2  ;;  %v12463_v7 = vadd.f32 %v12462_v6, %v12461_v3  ;;  %v12527_v8 = vadd.f32 %v12526_v39, %v12525_v4  ;;  %v12464_v9 = vpop.f32.mrb[42].mxu0  ;;  %v12528_v10 = vpop.f32.mrb[42].mxu1  ;;  %v3076_v11 = vpack.c.bf16 %v3008_v2, %v3005_v0  ;;  %7435 = vmatpush1.bf16.msra.mxu0 %v13982_v60  ;;  %v14020_v2 = vld [vmem:[%s21687_s7 + $0x42c] ss:$76 sps:$4 sm:$0xff]  }
 0x2c6   :  { %7661 = vmatpush1.bf16.msra.mxu1 %v13985_v61  ;;  %v12465_v12 = vpop.f32.mrb[43].mxu0  ;;  %v12529_v13 = vpop.f32.mrb[43].mxu1  ;;  %7436 = vmatprep.subr.bf16.mxu0 %v13990_v62  ;;  %v14012_v62 = vld [vmem:[%s21687_s7 + $0x390] ss:$76 sps:$4 sm:$0xff]   ;;  %v14023_v3 = vld [vmem:[%s21687_s7 + $0x434] ss:$76 sps:$4 sm:$0xff]  }
 0x2c7   :  { %7662 = vmatprep.subr.bf16.mxu1 %v13993_v63  ;;  %v2916_v14 = vadd.f32 %v12463_v7, %v17230_v15  ;;  %v12466_v16 = vadd.f32 %v12465_v12, %v12464_v9  ;;  %v12530_v17 = vadd.f32 %v12529_v13, %v12528_v10  ;;  %3340 = vmatmul.mubr.bf16.gmra.mrb[68].mxu0 %v3076_v11  ;;  %v14015_v63 = vld [vmem:[%s21687_s7 + $0x398] ss:$76 sps:$4 sm:$0xff]   ;;  %v14018_v10 = vld [vmem:[%s21687_s7 + $0x428] ss:$76 sps:$4 sm:$0xff]  }
 0x2c8   :  { %3453 = vmatmul.mubr.bf16.gmra.mrb[68].mxu1 %v3076_v11  ;;  %3349 = vmatprep.mubr.bf16.mxu0 %v16090_v54  ;;  %v14021_v11 = vld [vmem:[%s21687_s7 + $0x430] ss:$76 sps:$4 sm:$0xff]   ;;  %v14029_v13 = vld [vmem:[%s21687_s7 + $0x4cc] ss:$76 sps:$4 sm:$0xff]  }
 0x2c9   :  { %3462 = vmatprep.mubr.bf16.mxu1 %v16090_v54  ;;  %v3013_v22 = vadd.f32 %v12527_v8, %v2916_v14  ;;  %v2919_v23 = vadd.f32 %v12466_v16, %v17230_v15  ;;  %7437 = vmatpush1.bf16.msra.mxu0 %v13988_v5  ;;  %v14026_v12 = vld [vmem:[%s21687_s7 + $0x4c4] ss:$76 sps:$4 sm:$0xff]  }
 0x2ca   :  { %7663 = vmatpush1.bf16.msra.mxu1 %v13991_v38  ;;  %7438 = vmatprep.subr.bf16.mxu0 %v13996_v40 }
 0x2cb   :  { %7664 = vmatprep.subr.bf16.mxu1 %v13999_v41  ;;  %3063 = vst [vmem:[%s21689_s10 + $0x20] sm:$0xff] %v3013_v22  ;;  %v3016_v24 = vadd.f32 %v12530_v17, %v2919_v23  ;;  %v12467_v25 = vpop.f32.mrb[44].mxu0  ;;  %v12531_v26 = vpop.f32.mrb[44].mxu1 }
 0x2cc   :  { %v12468_v29 = vpop.f32.mrb[45].mxu0  ;;  %v12532_v30 = vpop.f32.mrb[45].mxu1 }
 0x2cd   :  { %3064 = vst [vmem:[%s21689_s10 + $0x28] sm:$0xff] %v3016_v24  ;;  %v12469_v42 = vadd.f32 %v12468_v29, %v12467_v25  ;;  %v12533_v43 = vadd.f32 %v12532_v30, %v12531_v26  ;;  %v12470_v44 = vpop.f32.mrb[46].mxu0  ;;  %v12534_v45 = vpop.f32.mrb[46].mxu1  ;;  %v3077_v46 = vpack.c.bf16 %v3016_v24, %v3013_v22  ;;  %7439 = vmatpush1.bf16.msra.mxu0 %v13994_v18  ;;  %v14032_v24 = vld [vmem:[%s21687_s7 + $0x55c] ss:$76 sps:$4 sm:$0xff]  }
 0x2ce   :  { %7665 = vmatpush1.bf16.msra.mxu1 %v13997_v19  ;;  %v12471_v47 = vpop.f32.mrb[47].mxu0  ;;  %v12535_v48 = vpop.f32.mrb[47].mxu1  ;;  %7440 = vmatprep.subr.bf16.mxu0 %v14002_v20  ;;  %v14024_v20 = vld [vmem:[%s21687_s7 + $0x4c0] ss:$76 sps:$4 sm:$0xff]   ;;  %v14035_v25 = vld [vmem:[%s21687_s7 + $0x564] ss:$76 sps:$4 sm:$0xff]  }
 0x2cf   :  { %7666 = vmatprep.subr.bf16.mxu1 %v14005_v21  ;;  %v2924_v49 = vadd.f32 %v12469_v42, %v17230_v15  ;;  %v12472_v50 = vadd.f32 %v12471_v47, %v12470_v44  ;;  %v12536_v51 = vadd.f32 %v12535_v48, %v12534_v45  ;;  %3350 = vmatmul.mubr.bf16.gmra.mrb[72].mxu0 %v3077_v46  ;;  %v14027_v21 = vld [vmem:[%s21687_s7 + $0x4c8] ss:$76 sps:$4 sm:$0xff]   ;;  %v14030_v45 = vld [vmem:[%s21687_s7 + $0x558] ss:$76 sps:$4 sm:$0xff]  }
 0x2d0   :  { %3463 = vmatmul.mubr.bf16.gmra.mrb[72].mxu1 %v3077_v46  ;;  %3359 = vmatprep.mubr.bf16.mxu0 %v16090_v54  ;;  %v14033_v46 = vld [vmem:[%s21687_s7 + $0x560] ss:$76 sps:$4 sm:$0xff]   ;;  %v14041_v48 = vld [vmem:[%s21687_s7 + $0x5fc] ss:$76 sps:$4 sm:$0xff]  }
 0x2d1   :  { %3472 = vmatprep.mubr.bf16.mxu1 %v16090_v54  ;;  %v3021_v57 = vadd.f32 %v12533_v43, %v2924_v49  ;;  %v2927_v58 = vadd.f32 %v12472_v50, %v17230_v15  ;;  %7441 = vmatpush1.bf16.msra.mxu0 %v14000_v27  ;;  %v14038_v47 = vld [vmem:[%s21687_s7 + $0x5f4] ss:$76 sps:$4 sm:$0xff]  }
 0x2d2   :  { %7667 = vmatpush1.bf16.msra.mxu1 %v14003_v28  ;;  %7442 = vmatprep.subr.bf16.mxu0 %v14008_v31 }
 0x2d3   :  { %7668 = vmatprep.subr.bf16.mxu1 %v14011_v35  ;;  %3065 = vst [vmem:[%s21689_s10 + $0x30] sm:$0xff] %v3021_v57  ;;  %v3024_v59 = vadd.f32 %v12536_v51, %v2927_v58  ;;  %v12473_v60 = vpop.f32.mrb[48].mxu0  ;;  %v12537_v61 = vpop.f32.mrb[48].mxu1 }
 0x2d4   :  { %v12474_v0 = vpop.f32.mrb[49].mxu0  ;;  %v12538_v1 = vpop.f32.mrb[49].mxu1 }
 0x2d5   :  { %3066 = vst [vmem:[%s21689_s10 + $0x38] sm:$0xff] %v3024_v59  ;;  %v12475_v4 = vadd.f32 %v12474_v0, %v12473_v60  ;;  %v12539_v5 = vadd.f32 %v12538_v1, %v12537_v61  ;;  %v12476_v38 = vpop.f32.mrb[50].mxu0  ;;  %v12540_v6 = vpop.f32.mrb[50].mxu1  ;;  %v3078_v39 = vpack.c.bf16 %v3024_v59, %v3021_v57  ;;  %7443 = vmatpush1.bf16.msra.mxu0 %v14006_v52  ;;  %v14044_v59 = vld [vmem:[%s21687_s7 + $0x68c] ss:$76 sps:$4 sm:$0xff]  }
 0x2d6   :  { %7669 = vmatpush1.bf16.msra.mxu1 %v14009_v53  ;;  %v12477_v40 = vpop.f32.mrb[51].mxu0  ;;  %v12541_v41 = vpop.f32.mrb[51].mxu1  ;;  %7444 = vmatprep.subr.bf16.mxu0 %v14014_v55  ;;  %v14036_v55 = vld [vmem:[%s21687_s7 + $0x5f0] ss:$76 sps:$4 sm:$0xff]   ;;  %v14047_v60 = vld [vmem:[%s21687_s7 + $0x694] ss:$76 sps:$4 sm:$0xff]  }
 0x2d7   :  { %7670 = vmatprep.subr.bf16.mxu1 %v14017_v56  ;;  %v2932_v7 = vadd.f32 %v12475_v4, %v17230_v15  ;;  %v12478_v8 = vadd.f32 %v12477_v40, %v12476_v38  ;;  %v12542_v9 = vadd.f32 %v12541_v41, %v12540_v6  ;;  %3360 = vmatmul.mubr.bf16.gmra.mrb[76].mxu0 %v3078_v39  ;;  %v14039_v56 = vld [vmem:[%s21687_s7 + $0x5f8] ss:$76 sps:$4 sm:$0xff]   ;;  %v14042_v6 = vld [vmem:[%s21687_s7 + $0x688] ss:$76 sps:$4 sm:$0xff]  }
 0x2d8   :  { %3473 = vmatmul.mubr.bf16.gmra.mrb[76].mxu1 %v3078_v39  ;;  %3369 = vmatprep.mubr.bf16.mxu0 %v16090_v54  ;;  %v14045_v39 = vld [vmem:[%s21687_s7 + $0x690] ss:$76 sps:$4 sm:$0xff]   ;;  %v14053_v41 = vld [vmem:[%s21687_s7 + $0x72c] ss:$76 sps:$4 sm:$0xff]  }
 0x2d9   :  { %3482 = vmatprep.mubr.bf16.mxu1 %v16090_v54  ;;  %v3029_v14 = vadd.f32 %v12539_v5, %v2932_v7  ;;  %v2935_v16 = vadd.f32 %v12478_v8, %v17230_v15  ;;  %7445 = vmatpush1.bf16.msra.mxu0 %v14012_v62  ;;  %v14050_v40 = vld [vmem:[%s21687_s7 + $0x724] ss:$76 sps:$4 sm:$0xff]  }
 0x2da   :  { %7671 = vmatpush1.bf16.msra.mxu1 %v14015_v63  ;;  %7446 = vmatprep.subr.bf16.mxu0 %v14020_v2 }
 0x2db   :  { %7672 = vmatprep.subr.bf16.mxu1 %v14023_v3  ;;  %3067 = vst [vmem:[%s21689_s10 + $0x40] sm:$0xff] %v3029_v14  ;;  %v3032_v17 = vadd.f32 %v12542_v9, %v2935_v16  ;;  %v12479_v18 = vpop.f32.mrb[52].mxu0  ;;  %v12543_v19 = vpop.f32.mrb[52].mxu1 }
 0x2dc   :  { %v12480_v22 = vpop.f32.mrb[53].mxu0  ;;  %v12544_v23 = vpop.f32.mrb[53].mxu1 }
 0x2dd   :  { %3068 = vst [vmem:[%s21689_s10 + $0x48] sm:$0xff] %v3032_v17  ;;  %v12481_v26 = vadd.f32 %v12480_v22, %v12479_v18  ;;  %v12545_v27 = vadd.f32 %v12544_v23, %v12543_v19  ;;  %v12482_v28 = vpop.f32.mrb[54].mxu0  ;;  %v12546_v29 = vpop.f32.mrb[54].mxu1  ;;  %v3079_v30 = vpack.c.bf16 %v3032_v17, %v3029_v14  ;;  %7447 = vmatpush1.bf16.msra.mxu0 %v14018_v10  ;;  %v14056_v17 = vld [vmem:[%s21687_s7 + $0x7bc] ss:$76 sps:$4 sm:$0xff]  }
 0x2de   :  { %7673 = vmatpush1.bf16.msra.mxu1 %v14021_v11  ;;  %v12483_v31 = vpop.f32.mrb[55].mxu0  ;;  %v12547_v35 = vpop.f32.mrb[55].mxu1  ;;  %7448 = vmatprep.subr.bf16.mxu0 %v14026_v12  ;;  %v14048_v12 = vld [vmem:[%s21687_s7 + $0x720] ss:$76 sps:$4 sm:$0xff]   ;;  %v14059_v18 = vld [vmem:[%s21687_s7 + $0x7c4] ss:$76 sps:$4 sm:$0xff]  }
 0x2df   :  { %7674 = vmatprep.subr.bf16.mxu1 %v14029_v13  ;;  %v2940_v42 = vadd.f32 %v12481_v26, %v17230_v15  ;;  %v12484_v43 = vadd.f32 %v12483_v31, %v12482_v28  ;;  %v12548_v44 = vadd.f32 %v12547_v35, %v12546_v29  ;;  %3370 = vmatmul.mubr.bf16.gmra.mrb[80].mxu0 %v3079_v30  ;;  %v14051_v13 = vld [vmem:[%s21687_s7 + $0x728] ss:$76 sps:$4 sm:$0xff]   ;;  %v14054_v29 = vld [vmem:[%s21687_s7 + $0x7b8] ss:$76 sps:$4 sm:$0xff]  }
 0x2e0   :  { %3483 = vmatmul.mubr.bf16.gmra.mrb[80].mxu1 %v3079_v30  ;;  %3379 = vmatprep.mubr.bf16.mxu0 %v16090_v54  ;;  %v14057_v30 = vld [vmem:[%s21687_s7 + $0x7c0] ss:$76 sps:$4 sm:$0xff]  }
 0x2e1   :  { %3492 = vmatprep.mubr.bf16.mxu1 %v16090_v54  ;;  %v3037_v49 = vadd.f32 %v12545_v27, %v2940_v42  ;;  %v2943_v50 = vadd.f32 %v12484_v43, %v17230_v15  ;;  %7449 = vmatpush1.bf16.msra.mxu0 %v14024_v20 }
 0x2e2   :  { %7675 = vmatpush1.bf16.msra.mxu1 %v14027_v21  ;;  %7450 = vmatprep.subr.bf16.mxu0 %v14032_v24 }
 0x2e3   :  { %7676 = vmatprep.subr.bf16.mxu1 %v14035_v25  ;;  %3069 = vst [vmem:[%s21689_s10 + $0x50] sm:$0xff] %v3037_v49  ;;  %v3040_v51 = vadd.f32 %v12548_v44, %v2943_v50  ;;  %v12485_v52 = vpop.f32.mrb[56].mxu0  ;;  %v12549_v53 = vpop.f32.mrb[56].mxu1  ;;  %v14060_v44 = vld [vmem:[%s21687_s7 + $0x850] ss:$76 sps:$4 sm:$0xff]  }
 0x2e4   :  { %v12486_v57 = vpop.f32.mrb[57].mxu0  ;;  %v12550_v58 = vpop.f32.mrb[57].mxu1  ;;  %v14074_v50 = vld [vmem:[%s21687_s7 + $0x984] ss:$76 sps:$4 sm:$0xff]  }
 0x2e5   :  { %3070 = vst [vmem:[%s21689_s10 + $0x58] sm:$0xff] %v3040_v51  ;;  %v12487_v61 = vadd.f32 %v12486_v57, %v12485_v52  ;;  %v12551_v62 = vadd.f32 %v12550_v58, %v12549_v53  ;;  %v12488_v63 = vpop.f32.mrb[58].mxu0  ;;  %v12552_v0 = vpop.f32.mrb[58].mxu1  ;;  %v3080_v1 = vpack.c.bf16 %v3040_v51, %v3037_v49  ;;  %7451 = vmatpush1.bf16.msra.mxu0 %v14030_v45  ;;  %v14063_v45 = vld [vmem:[%s21687_s7 + $0x858] ss:$76 sps:$4 sm:$0xff]  }
 0x2e6   :  { %7677 = vmatpush1.bf16.msra.mxu1 %v14033_v46  ;;  %v12489_v2 = vpop.f32.mrb[59].mxu0  ;;  %v12553_v3 = vpop.f32.mrb[59].mxu1  ;;  %7452 = vmatprep.subr.bf16.mxu0 %v14038_v47  ;;  %v14068_v46 = vld [vmem:[%s21687_s7 + $0x8ec] ss:$76 sps:$4 sm:$0xff]   ;;  %v14071_v47 = vld [vmem:[%s21687_s7 + $0x8f4] ss:$76 sps:$4 sm:$0xff]  }
 0x2e7   :  { %7678 = vmatprep.subr.bf16.mxu1 %v14041_v48  ;;  %v2948_v4 = vadd.f32 %v12487_v61, %v17230_v15  ;;  %v12490_v5 = vadd.f32 %v12489_v2, %v12488_v63  ;;  %v12554_v38 = vadd.f32 %v12553_v3, %v12552_v0  ;;  %3380 = vmatmul.mubr.bf16.gmra.mrb[84].mxu0 %v3080_v1  ;;  %v14066_v48 = vld [vmem:[%s21687_s7 + $0x8e8] ss:$76 sps:$4 sm:$0xff]   ;;  %v14069_v49 = vld [vmem:[%s21687_s7 + $0x8f0] ss:$76 sps:$4 sm:$0xff]   ;;  %v14077_v51 = vld [vmem:[%s21687_s7 + $0x98c] ss:$76 sps:$4 sm:$0xff]  }
 0x2e8   :  { %3493 = vmatmul.mubr.bf16.gmra.mrb[84].mxu1 %v3080_v1  ;;  %3389 = vmatprep.mubr.bf16.mxu0 %v16090_v54  ;;  %v3115_v52 = vld [vmem:[%s21690_s6] sm:$0xf] }
 0x2e9   :  { %3502 = vmatprep.mubr.bf16.mxu1 %v16090_v54  ;;  %v3045_v7 = vadd.f32 %v12551_v62, %v2948_v4  ;;  %v2951_v8 = vadd.f32 %v12490_v5, %v17230_v15  ;;  %7453 = vmatpush1.bf16.msra.mxu0 %v14036_v55  ;;  %v17506_v53 = vrot.slane %v3115_v52, %v17039_v33 }
 0x2ea   :  { %7679 = vmatpush1.bf16.msra.mxu1 %v14039_v56  ;;  %7454 = vmatprep.subr.bf16.mxu0 %v14044_v59  ;;  %v17509_v55 = vrot.slane %v3115_v52, %v17042_v34  ;;  %v17512_v56 = vrot.slane %v3115_v52, %v17048_v36  ;;  %v17515_v57 = vrot.slane %v3115_v52, %v17051_v37 }
 0x2eb   :  { %7680 = vmatprep.subr.bf16.mxu1 %v14047_v60  ;;  %3071 = vst [vmem:[%s21689_s10 + $0x60] sm:$0xff] %v3045_v7  ;;  %v3048_v9 = vadd.f32 %v12554_v38, %v2951_v8  ;;  %v12491_v10 = vpop.f32.mrb[60].mxu0  ;;  %v12555_v11 = vpop.f32.mrb[60].mxu1 }
 0x2ec   :  { %v12492_v14 = vpop.f32.mrb[61].mxu0  ;;  %v12556_v16 = vpop.f32.mrb[61].mxu1 }
 0x2ed   :  { %3072 = vst [vmem:[%s21689_s10 + $0x68] sm:$0xff] %v3048_v9  ;;  %v12493_v19 = vadd.f32 %v12492_v14, %v12491_v10  ;;  %v12557_v20 = vadd.f32 %v12556_v16, %v12555_v11  ;;  %v12494_v21 = vpop.f32.mrb[62].mxu0  ;;  %v12558_v22 = vpop.f32.mrb[62].mxu1  ;;  %v3081_v23 = vpack.c.bf16 %v3048_v9, %v3045_v7  ;;  %7455 = vmatpush1.bf16.msra.mxu0 %v14042_v6 }
 0x2ee   :  { %7681 = vmatpush1.bf16.msra.mxu1 %v14045_v39  ;;  %v12495_v24 = vpop.f32.mrb[63].mxu0  ;;  %v12559_v25 = vpop.f32.mrb[63].mxu1  ;;  %7456 = vmatprep.subr.bf16.mxu0 %v14050_v40 }
 0x2ef   :  { %7682 = vmatprep.subr.bf16.mxu1 %v14053_v41  ;;  %v2956_v26 = vadd.f32 %v12493_v19, %v17230_v15  ;;  %v12496_v27 = vadd.f32 %v12495_v24, %v12494_v21  ;;  %v12560_v28 = vadd.f32 %v12559_v25, %v12558_v22  ;;  %3390 = vmatmul.mubr.bf16.gmra.mrb[88].mxu0 %v3081_v23  ;;  %v14072_v21 = vld [vmem:[%s21687_s7 + $0x980] ss:$76 sps:$4 sm:$0xff]   ;;  %v14075_v22 = vld [vmem:[%s21687_s7 + $0x988] ss:$76 sps:$4 sm:$0xff]  }
 0x2f0   :  { %3503 = vmatmul.mubr.bf16.gmra.mrb[88].mxu1 %v3081_v23  ;;  %3399 = vmatprep.mubr.bf16.mxu0 %v16090_v54 }
 0x2f1   :  { %3512 = vmatprep.mubr.bf16.mxu1 %v16090_v54  ;;  %v3053_v31 = vadd.f32 %v12557_v20, %v2956_v26  ;;  %v2959_v35 = vadd.f32 %v12496_v27, %v17230_v15  ;;  %7457 = vmatpush1.bf16.msra.mxu0 %v14048_v12  ;;  %v14062_v54 = vld [vmem:[%s21687_s7 + $0x854] ss:$76 sps:$4 sm:$0xff]   ;;  %v14065_v15 = vld [vmem:[%s21687_s7 + $0x85c] ss:$76 sps:$4 sm:$0xff]  }
 0x2f2   :  { %7683 = vmatpush1.bf16.msra.mxu1 %v14051_v13  ;;  %7458 = vmatprep.subr.bf16.mxu0 %v14056_v17  ;;  %v14080_v27 = vld [vmem:[%s21687_s7 + $0xa1c] ss:$76 sps:$4 sm:$0xff]  }
 0x2f3   :  { %7684 = vmatprep.subr.bf16.mxu1 %v14059_v18  ;;  %3073 = vst [vmem:[%s21689_s10 + $0x70] sm:$0xff] %v3053_v31  ;;  %v3056_v42 = vadd.f32 %v12560_v28, %v2959_v35  ;;  %v14083_v28 = vld [vmem:[%s21687_s7 + $0xa24] ss:$76 sps:$4 sm:$0xff]  }
 0x2f5   :  { %3074 = vst [vmem:[%s21689_s10 + $0x78] sm:$0xff] %v3056_v42  ;;  %v3082_v43 = vpack.c.bf16 %v3056_v42, %v3053_v31  ;;  %7459 = vmatpush1.bf16.msra.mxu0 %v14054_v29 }
 0x2f6   :  { %7685 = vmatpush1.bf16.msra.mxu1 %v14057_v30  ;;  %7460 = vmatprep.subr.bf16.mxu0 %v14062_v54 }
 0x2f7   :  { %3400 = vmatmul.mubr.bf16.gmra.mrb[92].mxu0 %v3082_v43  ;;  %7686 = vmatprep.subr.bf16.mxu1 %v14065_v15 }
 0x2f8   :  { %3513 = vmatmul.mubr.bf16.gmra.mrb[92].mxu1 %v3082_v43 }
 0x2f9   :  { %7461 = vmatpush1.bf16.msra.mxu0 %v14060_v44 }
 0x2fa   :  { %7687 = vmatpush1.bf16.msra.mxu1 %v14063_v45  ;;  %7462 = vmatprep.subr.bf16.mxu0 %v14068_v46  ;;  %v14078_v46 = vld [vmem:[%s21687_s7 + $0xa18] ss:$76 sps:$4 sm:$0xff]  }
 0x2fb   :  { %7688 = vmatprep.subr.bf16.mxu1 %v14071_v47  ;;  %v14081_v47 = vld [vmem:[%s21687_s7 + $0xa20] ss:$76 sps:$4 sm:$0xff]  }
 0x2fd   :  { %7463 = vmatpush1.bf16.msra.mxu0 %v14066_v48  ;;  %v14086_v48 = vld [vmem:[%s21687_s7 + $0xab4] ss:$76 sps:$4 sm:$0xff]  }
 0x2fe   :  { %7689 = vmatpush1.bf16.msra.mxu1 %v14069_v49  ;;  %7545 = vmatprep.subr.bf16.mxu0 %v14074_v50 }
 0x2ff   :  { %7771 = vmatprep.subr.bf16.mxu1 %v14077_v51 }
 0x392   :  { %v3331_v58 = vpop.f32.mrb[64].mxu0  ;;  %v3444_v59 = vpop.f32.mrb[64].mxu1 }
 0x393   :  { %v3332_v60 = vadd.f32 %v3331_v58, %v17506_v53  ;;  %v3445_v61 = vadd.f32 %v3444_v59, %v17509_v55  ;;  %v3333_v62 = vpop.f32.mrb[65].mxu0  ;;  %v3446_v63 = vpop.f32.mrb[65].mxu1  ;;  %v14089_v58 = vld [vmem:[%s21687_s7 + $0xabc] ss:$76 sps:$4 sm:$0xff]  }
 0x394   :  { %v3334_v0 = vadd.f32 %v3333_v62, %v17512_v56  ;;  %v3447_v1 = vadd.f32 %v3446_v63, %v17515_v57  ;;  %v3335_v2 = vpop.f32.mrb[66].mxu0  ;;  %v3448_v3 = vpop.f32.mrb[66].mxu1 }
 0x395   :  { %v3336_v4 = vadd.f32 %v3335_v2, %v17506_v53  ;;  %v3449_v5 = vadd.f32 %v3448_v3, %v17509_v55  ;;  %v3337_v38 = vpop.f32.mrb[67].mxu0  ;;  %v3450_v6 = vpop.f32.mrb[67].mxu1  ;;  %v3523_v41 = vmax.f32 %v3332_v60, 0.0  ;;  %v3525_v7 = vmax.f32 %v3445_v61, 0.0 }
 0x396   :  { %v3338_v39 = vadd.f32 %v3337_v38, %v17512_v56  ;;  %v3451_v40 = vadd.f32 %v3450_v6, %v17515_v57  ;;  %v3524_v10 = vmax.f32 %v3334_v0, 0.0  ;;  %v3526_v11 = vmax.f32 %v3447_v1, 0.0  ;;  %v14087_v38 = vld [vmem:[%s21687_s7 + $0xab8] ss:$76 sps:$4 sm:$0xff]  }
 0x397   :  { %v3527_v8 = vmax.f32 %v3336_v4, 0.0  ;;  %v3529_v9 = vmax.f32 %v3449_v5, 0.0  ;;  %v14084_v5 = vld [vmem:[%s21687_s7 + $0xab0] ss:$76 sps:$4 sm:$0xff]  }
 0x398   :  { %v3528_v12 = vmax.f32 %v3338_v39, 0.0  ;;  %v3530_v13 = vmax.f32 %v3451_v40, 0.0 }
 0x399   :  { %v17525_v14 = vpack.c.bf16 %v3527_v8, %v3523_v41  ;;  %v17527_v16 = vpack.c.bf16 %v3529_v9, %v3525_v7  ;;  %v14092_v7 = vld [vmem:[%s21687_s7 + $0xb4c] ss:$76 sps:$4 sm:$0xff]   ;;  %v14095_v8 = vld [vmem:[%s21687_s7 + $0xb54] ss:$76 sps:$4 sm:$0xff]  }
 0x39a   :  { %v17529_v17 = vpack.c.bf16 %v3528_v12, %v3524_v10  ;;  %v17531_v18 = vpack.c.bf16 %v3530_v13, %v3526_v11  ;;  %v3341_v19 = vpop.f32.mrb[68].mxu0 }
 0x39b   :  { %21772 = vst [vmem:[#allocation7_spill] sm:$0xff] %v17525_v14  ;;  %21773 = vst [vmem:[#allocation8_spill] sm:$0xff] %v17527_v16  ;;  %v3454_v20 = vpop.f32.mrb[68].mxu1  ;;  %v3342_v23 = vadd.f32 %v3341_v19, %v17506_v53  ;;  %v3343_v25 = vpop.f32.mrb[69].mxu0 }
 0x39c   :  { %21774 = vst [vmem:[#allocation9_spill] sm:$0xff] %v17529_v17  ;;  %21775 = vst [vmem:[#allocation10_spill] sm:$0xff] %v17531_v18  ;;  %v3455_v24 = vadd.f32 %v3454_v20, %v17509_v55  ;;  %v3456_v26 = vpop.f32.mrb[69].mxu1  ;;  %v3344_v29 = vadd.f32 %v3343_v25, %v17512_v56  ;;  %v3345_v31 = vpop.f32.mrb[70].mxu0  ;;  %7464 = vmatprep.mubr.bf16.mxu0 %v17529_v17  ;;  %7690 = vmatprep.mubr.bf16.mxu1 %v17529_v17  ;;  %v14093_v25 = vld [vmem:[%s21687_s7 + $0xb50] ss:$76 sps:$4 sm:$0xff]  }
 0x39d   :  { %v3457_v30 = vadd.f32 %v3456_v26, %v17515_v57  ;;  %v3458_v35 = vpop.f32.mrb[70].mxu1  ;;  %v3346_v42 = vadd.f32 %v3345_v31, %v17506_v53  ;;  %v3347_v54 = vpop.f32.mrb[71].mxu0  ;;  %7465 = vmatmul.mubr.bf16.vlgmr.msra.gmra.mrb[96].mxu0 %v17525_v14  ;;  %7691 = vmatmul.mubr.bf16.vlgmr.msra.gmra.mrb[96].mxu1 %v17525_v14  ;;  %v3531_v49 = vmax.f32 %v3342_v23, 0.0  ;;  %v14098_v26 = vld [vmem:[%s21687_s7 + $0xbe4] ss:$76 sps:$4 sm:$0xff]  }
 0x39e   :  { %v3459_v43 = vadd.f32 %v3458_v35, %v17509_v55  ;;  %v3460_v15 = vpop.f32.mrb[71].mxu1  ;;  %v3348_v44 = vadd.f32 %v3347_v54, %v17512_v56  ;;  %7546 = vmatpush1.bf16.msra.mxu0 %v14072_v21  ;;  %7772 = vmatpush1.bf16.msra.mxu1 %v14075_v22  ;;  %v3533_v50 = vmax.f32 %v3455_v24, 0.0  ;;  %v3532_v59 = vmax.f32 %v3344_v29, 0.0  ;;  %v14090_v24 = vld [vmem:[%s21687_s7 + $0xb48] ss:$76 sps:$4 sm:$0xff]  }
 0x39f   :  { %v3461_v45 = vadd.f32 %v3460_v15, %v17515_v57  ;;  %v3535_v51 = vmax.f32 %v3346_v42, 0.0  ;;  %7547 = vmatprep.subr.bf16.mxu0 %v14080_v27  ;;  %7773 = vmatprep.subr.bf16.mxu1 %v14083_v28  ;;  %v3534_v60 = vmax.f32 %v3457_v30, 0.0  ;;  %v14101_v31 = vld [vmem:[%s21687_s7 + $0xbec] ss:$76 sps:$4 sm:$0xff]  }
 0x3a0   :  { %v3537_v52 = vmax.f32 %v3459_v43, 0.0  ;;  %v3536_v61 = vmax.f32 %v3348_v44, 0.0 }
 0x3a1   :  { %v3538_v62 = vmax.f32 %v3461_v45, 0.0  ;;  %v17569_v63 = vpack.c.bf16 %v3535_v51, %v3531_v49  ;;  %v14096_v49 = vld [vmem:[%s21687_s7 + $0xbe0] ss:$76 sps:$4 sm:$0xff]  }
 0x3a2   :  { %v17571_v0 = vpack.c.bf16 %v3537_v52, %v3533_v50  ;;  %v17573_v1 = vpack.c.bf16 %v3536_v61, %v3532_v59  ;;  %v3351_v3 = vpop.f32.mrb[72].mxu0  ;;  %7548 = vmatpush1.bf16.msra.mxu0 %v14078_v46  ;;  %7774 = vmatpush1.bf16.msra.mxu1 %v14081_v47  ;;  %v14099_v50 = vld [vmem:[%s21687_s7 + $0xbe8] ss:$76 sps:$4 sm:$0xff]   ;;  %v14107_v61 = vld [vmem:[%s21687_s7 + $0xc84] ss:$76 sps:$4 sm:$0xff]  }
 0x3a3   :  { %21776 = vst [vmem:[#allocation11_spill] sm:$0xff] %v17569_v63  ;;  %v17575_v2 = vpack.c.bf16 %v3538_v62, %v3534_v60  ;;  %v3464_v4 = vpop.f32.mrb[72].mxu1  ;;  %v3352_v6 = vadd.f32 %v3351_v3, %v17506_v53  ;;  %v3353_v40 = vpop.f32.mrb[73].mxu0  ;;  %7549 = vmatprep.subr.bf16.mxu0 %v14086_v48  ;;  %7775 = vmatprep.subr.bf16.mxu1 %v14089_v58  ;;  %v14104_v60 = vld [vmem:[%s21687_s7 + $0xc7c] ss:$76 sps:$4 sm:$0xff]  }
 0x3a4   :  { %21777 = vst [vmem:[#allocation12_spill] sm:$0xff] %v17571_v0  ;;  %21778 = vst [vmem:[#allocation13_spill] sm:$0xff] %v17573_v1  ;;  %v3465_v39 = vadd.f32 %v3464_v4, %v17509_v55  ;;  %v3466_v41 = vpop.f32.mrb[73].mxu1  ;;  %v3354_v9 = vadd.f32 %v3353_v40, %v17512_v56  ;;  %v3355_v11 = vpop.f32.mrb[74].mxu0  ;;  %7474 = vmatprep.mubr.bf16.mxu0 %v17573_v1  ;;  %7700 = vmatprep.mubr.bf16.mxu1 %v17573_v1 }
 0x3a5   :  { %21779 = vst [vmem:[#allocation14_spill] sm:$0xff] %v17575_v2  ;;  %v3467_v10 = vadd.f32 %v3466_v41, %v17515_v57  ;;  %v3468_v12 = vpop.f32.mrb[74].mxu1  ;;  %v3356_v13 = vadd.f32 %v3355_v11, %v17506_v53  ;;  %v3357_v20 = vpop.f32.mrb[75].mxu0  ;;  %7475 = vmatmul.mubr.bf16.gmra.mrb[100].mxu0 %v17569_v63  ;;  %7701 = vmatmul.mubr.bf16.gmra.mrb[100].mxu1 %v17569_v63  ;;  %v3539_v27 = vmax.f32 %v3352_v6, 0.0 }
 0x3a6   :  { %v3469_v19 = vadd.f32 %v3468_v12, %v17509_v55  ;;  %v3470_v21 = vpop.f32.mrb[75].mxu1  ;;  %v3358_v22 = vadd.f32 %v3357_v20, %v17512_v56  ;;  %7550 = vmatpush1.bf16.msra.mxu0 %v14084_v5  ;;  %7776 = vmatpush1.bf16.msra.mxu1 %v14087_v38  ;;  %v3541_v28 = vmax.f32 %v3465_v39, 0.0  ;;  %v3540_v35 = vmax.f32 %v3354_v9, 0.0  ;;  %v14105_v9 = vld [vmem:[%s21687_s7 + $0xc80] ss:$76 sps:$4 sm:$0xff]  }
 0x3a7   :  { %v3471_v23 = vadd.f32 %v3470_v21, %v17515_v57  ;;  %v3543_v29 = vmax.f32 %v3356_v13, 0.0  ;;  %7551 = vmatprep.subr.bf16.mxu0 %v14092_v7  ;;  %7777 = vmatprep.subr.bf16.mxu1 %v14095_v8  ;;  %v3542_v42 = vmax.f32 %v3467_v10, 0.0  ;;  %v14102_v8 = vld [vmem:[%s21687_s7 + $0xc78] ss:$76 sps:$4 sm:$0xff]   ;;  %v14110_v10 = vld [vmem:[%s21687_s7 + $0xd14] ss:$76 sps:$4 sm:$0xff]  }
 0x3a8   :  { %v3545_v30 = vmax.f32 %v3469_v19, 0.0  ;;  %v3544_v43 = vmax.f32 %v3358_v22, 0.0  ;;  %v14113_v20 = vld [vmem:[%s21687_s7 + $0xd1c] ss:$76 sps:$4 sm:$0xff]  }
 0x3a9   :  { %v3546_v54 = vmax.f32 %v3471_v23, 0.0  ;;  %v17613_v15 = vpack.c.bf16 %v3543_v29, %v3539_v27 }
 0x3aa   :  { %v17615_v44 = vpack.c.bf16 %v3545_v30, %v3541_v28  ;;  %v17617_v45 = vpack.c.bf16 %v3544_v43, %v3540_v35  ;;  %v3361_v47 = vpop.f32.mrb[76].mxu0  ;;  %7552 = vmatpush1.bf16.msra.mxu0 %v14090_v24  ;;  %7778 = vmatpush1.bf16.msra.mxu1 %v14093_v25  ;;  %v14111_v35 = vld [vmem:[%s21687_s7 + $0xd18] ss:$76 sps:$4 sm:$0xff]  }
 0x3ab   :  { %21780 = vst [vmem:[#allocation15_spill] sm:$0xff] %v17613_v15  ;;  %v17619_v46 = vpack.c.bf16 %v3546_v54, %v3542_v42  ;;  %v3474_v48 = vpop.f32.mrb[76].mxu1  ;;  %v3362_v51 = vadd.f32 %v3361_v47, %v17506_v53  ;;  %v3363_v58 = vpop.f32.mrb[77].mxu0  ;;  %7553 = vmatprep.subr.bf16.mxu0 %v14098_v26  ;;  %7779 = vmatprep.subr.bf16.mxu1 %v14101_v31  ;;  %v14108_v31 = vld [vmem:[%s21687_s7 + $0xd10] ss:$76 sps:$4 sm:$0xff]  }
 0x3ac   :  { %21781 = vst [vmem:[#allocation16_spill] sm:$0xff] %v17617_v45  ;;  %v3475_v52 = vadd.f32 %v3474_v48, %v17509_v55  ;;  %v3476_v59 = vpop.f32.mrb[77].mxu1  ;;  %v3364_v62 = vadd.f32 %v3363_v58, %v17512_v56  ;;  %v3365_v4 = vpop.f32.mrb[78].mxu0  ;;  %7484 = vmatprep.mubr.bf16.mxu0 %v17617_v45  ;;  %7710 = vmatprep.mubr.bf16.mxu1 %v17617_v45  ;;  %v14116_v48 = vld [vmem:[%s21687_s7 + $0xdac] ss:$76 sps:$4 sm:$0xff]  }
 0x3ad   :  { %v3477_v3 = vadd.f32 %v3476_v59, %v17515_v57  ;;  %v3478_v5 = vpop.f32.mrb[78].mxu1  ;;  %v3366_v38 = vadd.f32 %v3365_v4, %v17506_v53  ;;  %v3367_v39 = vpop.f32.mrb[79].mxu0  ;;  %7485 = vmatmul.mubr.bf16.gmra.mrb[104].mxu0 %v17613_v15  ;;  %7711 = vmatmul.mubr.bf16.gmra.mrb[104].mxu1 %v17613_v15  ;;  %v3547_v11 = vmax.f32 %v3362_v51, 0.0 }
 0x3ae   :  { %v3479_v6 = vadd.f32 %v3478_v5, %v17509_v55  ;;  %v3480_v40 = vpop.f32.mrb[79].mxu1  ;;  %v3368_v41 = vadd.f32 %v3367_v39, %v17512_v56  ;;  %7554 = vmatpush1.bf16.msra.mxu0 %v14096_v49  ;;  %7780 = vmatpush1.bf16.msra.mxu1 %v14099_v50  ;;  %v3549_v12 = vmax.f32 %v3475_v52, 0.0  ;;  %v3548_v21 = vmax.f32 %v3364_v62, 0.0  ;;  %v14119_v49 = vld [vmem:[%s21687_s7 + $0xdb4] ss:$76 sps:$4 sm:$0xff]  }
 0x3af   :  { %v3481_v7 = vadd.f32 %v3480_v40, %v17515_v57  ;;  %v3551_v13 = vmax.f32 %v3366_v38, 0.0  ;;  %7555 = vmatprep.subr.bf16.mxu0 %v14104_v60  ;;  %7781 = vmatprep.subr.bf16.mxu1 %v14107_v61  ;;  %v3550_v22 = vmax.f32 %v3477_v3, 0.0  ;;  %v14114_v5 = vld [vmem:[%s21687_s7 + $0xda8] ss:$76 sps:$4 sm:$0xff]   ;;  %v14117_v38 = vld [vmem:[%s21687_s7 + $0xdb0] ss:$76 sps:$4 sm:$0xff]  }
 0x3b0   :  { %v3553_v19 = vmax.f32 %v3479_v6, 0.0  ;;  %v3552_v23 = vmax.f32 %v3368_v41, 0.0  ;;  %v14122_v6 = vld [vmem:[%s21687_s7 + $0xe44] ss:$76 sps:$4 sm:$0xff]  }
 0x3b1   :  { %v3554_v24 = vmax.f32 %v3481_v7, 0.0  ;;  %v17657_v25 = vpack.c.bf16 %v3551_v13, %v3547_v11 }
 0x3b2   :  { %v17659_v26 = vpack.c.bf16 %v3553_v19, %v3549_v12  ;;  %v17661_v27 = vpack.c.bf16 %v3552_v23, %v3548_v21  ;;  %v3371_v29 = vpop.f32.mrb[80].mxu0  ;;  %7556 = vmatpush1.bf16.msra.mxu0 %v14102_v8  ;;  %7782 = vmatpush1.bf16.msra.mxu1 %v14105_v9  ;;  %v14125_v8 = vld [vmem:[%s21687_s7 + $0xe4c] ss:$76 sps:$4 sm:$0xff]  }
 0x3b3   :  { %21782 = vst [vmem:[#allocation17_spill] sm:$0xff] %v17657_v25  ;;  %v17663_v28 = vpack.c.bf16 %v3554_v24, %v3550_v22  ;;  %v3484_v30 = vpop.f32.mrb[80].mxu1  ;;  %v3372_v42 = vadd.f32 %v3371_v29, %v17506_v53  ;;  %v3373_v54 = vpop.f32.mrb[81].mxu0  ;;  %7557 = vmatprep.subr.bf16.mxu0 %v14110_v10  ;;  %7783 = vmatprep.subr.bf16.mxu1 %v14113_v20  ;;  %v14120_v24 = vld [vmem:[%s21687_s7 + $0xe40] ss:$76 sps:$4 sm:$0xff]  }
 0x3b4   :  { %21783 = vst [vmem:[#allocation18_spill] sm:$0xff] %v17661_v27  ;;  %v3485_v43 = vadd.f32 %v3484_v30, %v17509_v55  ;;  %v3486_v47 = vpop.f32.mrb[81].mxu1  ;;  %v3374_v50 = vadd.f32 %v3373_v54, %v17512_v56  ;;  %v3375_v52 = vpop.f32.mrb[82].mxu0  ;;  %7494 = vmatprep.mubr.bf16.mxu0 %v17661_v27  ;;  %7720 = vmatprep.mubr.bf16.mxu1 %v17661_v27  ;;  %v14123_v29 = vld [vmem:[%s21687_s7 + $0xe48] ss:$76 sps:$4 sm:$0xff]  }
 0x3b5   :  { %v3487_v51 = vadd.f32 %v3486_v47, %v17515_v57  ;;  %v3488_v58 = vpop.f32.mrb[82].mxu1  ;;  %v3376_v59 = vadd.f32 %v3375_v52, %v17506_v53  ;;  %v3377_v61 = vpop.f32.mrb[83].mxu0  ;;  %7495 = vmatmul.mubr.bf16.gmra.mrb[108].mxu0 %v17657_v25  ;;  %7721 = vmatmul.mubr.bf16.gmra.mrb[108].mxu1 %v17657_v25  ;;  %v3555_v39 = vmax.f32 %v3372_v42, 0.0  ;;  %v14131_v54 = vld [vmem:[%s21687_s7 + $0xee4] ss:$76 sps:$4 sm:$0xff]  }
 0x3b6   :  { %v3489_v60 = vadd.f32 %v3488_v58, %v17509_v55  ;;  %v3490_v62 = vpop.f32.mrb[83].mxu1  ;;  %v3378_v3 = vadd.f32 %v3377_v61, %v17512_v56  ;;  %7558 = vmatpush1.bf16.msra.mxu0 %v14108_v31  ;;  %7784 = vmatpush1.bf16.msra.mxu1 %v14111_v35  ;;  %v3557_v40 = vmax.f32 %v3485_v43, 0.0  ;;  %v3556_v9 = vmax.f32 %v3374_v50, 0.0  ;;  %v14128_v43 = vld [vmem:[%s21687_s7 + $0xedc] ss:$76 sps:$4 sm:$0xff]  }
 0x3b7   :  { %v3491_v4 = vadd.f32 %v3490_v62, %v17515_v57  ;;  %v3559_v41 = vmax.f32 %v3376_v59, 0.0  ;;  %7559 = vmatprep.subr.bf16.mxu0 %v14116_v48  ;;  %7785 = vmatprep.subr.bf16.mxu1 %v14119_v49  ;;  %v3558_v10 = vmax.f32 %v3487_v51, 0.0  ;;  %v14126_v62 = vld [vmem:[%s21687_s7 + $0xed8] ss:$76 sps:$4 sm:$0xff]  }
 0x3b8   :  { %v3561_v7 = vmax.f32 %v3489_v60, 0.0  ;;  %v3560_v11 = vmax.f32 %v3378_v3, 0.0  ;;  %v14129_v3 = vld [vmem:[%s21687_s7 + $0xee0] ss:$76 sps:$4 sm:$0xff]  }
 0x3b9   :  { %v3562_v12 = vmax.f32 %v3491_v4, 0.0  ;;  %v17701_v13 = vpack.c.bf16 %v3559_v41, %v3555_v39  ;;  %v14134_v4 = vld [vmem:[%s21687_s7 + $0xf74] ss:$76 sps:$4 sm:$0xff]  }
 0x3ba   :  { %v17703_v19 = vpack.c.bf16 %v3561_v7, %v3557_v40  ;;  %v17705_v20 = vpack.c.bf16 %v3560_v11, %v3556_v9  ;;  %v3381_v22 = vpop.f32.mrb[84].mxu0  ;;  %7560 = vmatpush1.bf16.msra.mxu0 %v14114_v5  ;;  %7786 = vmatpush1.bf16.msra.mxu1 %v14117_v38  ;;  %v14137_v40 = vld [vmem:[%s21687_s7 + $0xf7c] ss:$76 sps:$4 sm:$0xff]  }
 0x3bb   :  { %21784 = vst [vmem:[#allocation19_spill] sm:$0xff] %v17701_v13  ;;  %v17707_v21 = vpack.c.bf16 %v3562_v12, %v3558_v10  ;;  %v3494_v23 = vpop.f32.mrb[84].mxu1  ;;  %v3382_v30 = vadd.f32 %v3381_v22, %v17506_v53  ;;  %v3383_v35 = vpop.f32.mrb[85].mxu0  ;;  %7561 = vmatprep.subr.bf16.mxu0 %v14122_v6  ;;  %7787 = vmatprep.subr.bf16.mxu1 %v14125_v8 }
 0x3bc   :  { %21785 = vst [vmem:[#allocation20_spill] sm:$0xff] %v17705_v20  ;;  %v3495_v31 = vadd.f32 %v3494_v23, %v17509_v55  ;;  %v3496_v42 = vpop.f32.mrb[85].mxu1  ;;  %v3384_v47 = vadd.f32 %v3383_v35, %v17512_v56  ;;  %v3385_v49 = vpop.f32.mrb[86].mxu0  ;;  %7504 = vmatprep.mubr.bf16.mxu0 %v17705_v20  ;;  %7730 = vmatprep.mubr.bf16.mxu1 %v17705_v20 }
 0x3bd   :  { %v3497_v48 = vadd.f32 %v3496_v42, %v17515_v57  ;;  %v3498_v50 = vpop.f32.mrb[86].mxu1  ;;  %v3386_v51 = vadd.f32 %v3385_v49, %v17506_v53  ;;  %v3387_v58 = vpop.f32.mrb[87].mxu0  ;;  %7505 = vmatmul.mubr.bf16.gmra.mrb[112].mxu0 %v17701_v13  ;;  %7731 = vmatmul.mubr.bf16.gmra.mrb[112].mxu1 %v17701_v13  ;;  %v3563_v5 = vmax.f32 %v3382_v30, 0.0  ;;  %v14135_v30 = vld [vmem:[%s21687_s7 + $0xf78] ss:$76 sps:$4 sm:$0xff]  }
 0x3be   :  { %v3499_v52 = vadd.f32 %v3498_v50, %v17509_v55  ;;  %v3500_v59 = vpop.f32.mrb[87].mxu1  ;;  %v3388_v60 = vadd.f32 %v3387_v58, %v17512_v56  ;;  %7562 = vmatpush1.bf16.msra.mxu0 %v14120_v24  ;;  %7788 = vmatpush1.bf16.msra.mxu1 %v14123_v29  ;;  %v3565_v38 = vmax.f32 %v3495_v31, 0.0  ;;  %v3564_v41 = vmax.f32 %v3384_v47, 0.0  ;;  %v14132_v29 = vld [vmem:[%s21687_s7 + $0xf70] ss:$76 sps:$4 sm:$0xff]  }
 0x3bf   :  { %v3501_v61 = vadd.f32 %v3500_v59, %v17515_v57  ;;  %v3567_v6 = vmax.f32 %v3386_v51, 0.0  ;;  %7563 = vmatprep.subr.bf16.mxu0 %v14128_v43  ;;  %7789 = vmatprep.subr.bf16.mxu1 %v14131_v54  ;;  %v3566_v7 = vmax.f32 %v3497_v48, 0.0  ;;  %v14140_v54 = vld [vmem:[%s21687_s7 + $0x100c] ss:$76 sps:$4 sm:$0xff]   ;;  %v14143_v47 = vld [vmem:[%s21687_s7 + $0x1014] ss:$76 sps:$4 sm:$0xff]  }
 0x3c0   :  { %v3569_v39 = vmax.f32 %v3499_v52, 0.0  ;;  %v3568_v8 = vmax.f32 %v3388_v60, 0.0 }
 0x3c1   :  { %v3570_v9 = vmax.f32 %v3501_v61, 0.0  ;;  %v17745_v10 = vpack.c.bf16 %v3567_v6, %v3563_v5  ;;  %v14146_v5 = vld [vmem:[%s21687_s7 + $0x10a4] ss:$76 sps:$4 sm:$0xff]  }
 0x3c2   :  { %v17747_v11 = vpack.c.bf16 %v3569_v39, %v3565_v38  ;;  %v17749_v12 = vpack.c.bf16 %v3568_v8, %v3564_v41  ;;  %v3391_v23 = vpop.f32.mrb[88].mxu0  ;;  %7564 = vmatpush1.bf16.msra.mxu0 %v14126_v62  ;;  %7790 = vmatpush1.bf16.msra.mxu1 %v14129_v3  ;;  %v14138_v3 = vld [vmem:[%s21687_s7 + $0x1008] ss:$76 sps:$4 sm:$0xff]   ;;  %v14149_v41 = vld [vmem:[%s21687_s7 + $0x10ac] ss:$76 sps:$4 sm:$0xff]  }
 0x3c3   :  { %21786 = vst [vmem:[#allocation21_spill] sm:$0xff] %v17745_v10  ;;  %v17751_v22 = vpack.c.bf16 %v3570_v9, %v3566_v7  ;;  %v3504_v24 = vpop.f32.mrb[88].mxu1  ;;  %v3392_v31 = vadd.f32 %v3391_v23, %v17506_v53  ;;  %v3393_v42 = vpop.f32.mrb[89].mxu0  ;;  %7565 = vmatprep.subr.bf16.mxu0 %v14134_v4  ;;  %7791 = vmatprep.subr.bf16.mxu1 %v14137_v40  ;;  %v14141_v4 = vld [vmem:[%s21687_s7 + $0x1010] ss:$76 sps:$4 sm:$0xff]  }
 0x3c4   :  { %21787 = vst [vmem:[#allocation22_spill] sm:$0xff] %v17749_v12  ;;  %v3505_v35 = vadd.f32 %v3504_v24, %v17509_v55  ;;  %v3506_v43 = vpop.f32.mrb[89].mxu1  ;;  %v3394_v48 = vadd.f32 %v3393_v42, %v17512_v56  ;;  %v3395_v50 = vpop.f32.mrb[90].mxu0  ;;  %7514 = vmatprep.mubr.bf16.mxu0 %v17749_v12  ;;  %7740 = vmatprep.mubr.bf16.mxu1 %v17749_v12 }
 0x3c5   :  { %v3507_v49 = vadd.f32 %v3506_v43, %v17515_v57  ;;  %v3508_v51 = vpop.f32.mrb[90].mxu1  ;;  %v3396_v52 = vadd.f32 %v3395_v50, %v17506_v53  ;;  %v3397_v59 = vpop.f32.mrb[91].mxu0  ;;  %7515 = vmatmul.mubr.bf16.gmra.mrb[116].mxu0 %v17745_v10  ;;  %7741 = vmatmul.mubr.bf16.gmra.mrb[116].mxu1 %v17745_v10  ;;  %v3571_v38 = vmax.f32 %v3392_v31, 0.0  ;;  %v14144_v43 = vld [vmem:[%s21687_s7 + $0x10a0] ss:$76 sps:$4 sm:$0xff]  }
 0x3c6   :  { %v3509_v58 = vadd.f32 %v3508_v51, %v17509_v55  ;;  %v3510_v60 = vpop.f32.mrb[91].mxu1  ;;  %v3398_v61 = vadd.f32 %v3397_v59, %v17512_v56  ;;  %7566 = vmatpush1.bf16.msra.mxu0 %v14132_v29  ;;  %7792 = vmatpush1.bf16.msra.mxu1 %v14135_v30  ;;  %v3573_v6 = vmax.f32 %v3505_v35, 0.0  ;;  %v3572_v7 = vmax.f32 %v3394_v48, 0.0  ;;  %v14152_v51 = vld [vmem:[%s21687_s7 + $0x113c] ss:$76 sps:$4 sm:$0xff]  }
 0x3c7   :  { %v3511_v62 = vadd.f32 %v3510_v60, %v17515_v57  ;;  %v3575_v39 = vmax.f32 %v3396_v52, 0.0  ;;  %7567 = vmatprep.subr.bf16.mxu0 %v14140_v54  ;;  %7793 = vmatprep.subr.bf16.mxu1 %v14143_v47  ;;  %v3574_v8 = vmax.f32 %v3507_v49, 0.0  ;;  %v14147_v54 = vld [vmem:[%s21687_s7 + $0x10a8] ss:$76 sps:$4 sm:$0xff]   ;;  %v14155_v52 = vld [vmem:[%s21687_s7 + $0x1144] ss:$76 sps:$4 sm:$0xff]  }
 0x3c8   :  { %v3577_v40 = vmax.f32 %v3509_v58, 0.0  ;;  %v3576_v9 = vmax.f32 %v3398_v61, 0.0 }
 0x3c9   :  { %v3578_v23 = vmax.f32 %v3511_v62, 0.0  ;;  %v17789_v24 = vpack.c.bf16 %v3575_v39, %v3571_v38  ;;  %v14150_v39 = vld [vmem:[%s21687_s7 + $0x1138] ss:$76 sps:$4 sm:$0xff]  }
 0x3ca   :  { %v17791_v29 = vpack.c.bf16 %v3577_v40, %v3573_v6  ;;  %v17793_v30 = vpack.c.bf16 %v3576_v9, %v3572_v7  ;;  %v3401_v35 = vpop.f32.mrb[92].mxu0  ;;  %7568 = vmatpush1.bf16.msra.mxu0 %v14138_v3  ;;  %7794 = vmatpush1.bf16.msra.mxu1 %v14141_v4 }
 0x3cb   :  { %21788 = vst [vmem:[#allocation23_spill] sm:$0xff] %v17789_v24  ;;  %v17795_v31 = vpack.c.bf16 %v3578_v23, %v3574_v8  ;;  %v3514_v42 = vpop.f32.mrb[92].mxu1  ;;  %v3402_v47 = vadd.f32 %v3401_v35, %v17506_v53  ;;  %v3403_v49 = vpop.f32.mrb[93].mxu0  ;;  %7569 = vmatprep.subr.bf16.mxu0 %v14146_v5  ;;  %7795 = vmatprep.subr.bf16.mxu1 %v14149_v41 }
 0x3cc   :  { %21789 = vst [vmem:[#allocation24_spill] sm:$0xff] %v17793_v30  ;;  %v3515_v48 = vadd.f32 %v3514_v42, %v17509_v55  ;;  %v3516_v50 = vpop.f32.mrb[93].mxu1  ;;  %v3404_v58 = vadd.f32 %v3403_v49, %v17512_v56  ;;  %v3405_v60 = vpop.f32.mrb[94].mxu0  ;;  %7524 = vmatprep.mubr.bf16.mxu0 %v17793_v30  ;;  %7750 = vmatprep.mubr.bf16.mxu1 %v17793_v30  ;;  %v14159_v49 = vld [vmem:[%s21687_s7 + $0x11d8] ss:$76 sps:$4 sm:$0xff]  }
 0x3cd   :  { %v3517_v59 = vadd.f32 %v3516_v50, %v17515_v57  ;;  %v3518_v61 = vpop.f32.mrb[94].mxu1  ;;  %v3406_v62 = vadd.f32 %v3405_v60, %v17506_v53  ;;  %v3407_v4 = vpop.f32.mrb[95].mxu0  ;;  %7525 = vmatmul.mubr.bf16.gmra.mrb[120].mxu0 %v17789_v24  ;;  %7751 = vmatmul.mubr.bf16.gmra.mrb[120].mxu1 %v17789_v24  ;;  %v14153_v53 = vld [vmem:[%s21687_s7 + $0x1140] ss:$76 sps:$4 sm:$0xff]   ;;  %v3579_v40 = vmax.f32 %v3402_v47, 0.0 }
 0x3ce   :  { %v3519_v3 = vadd.f32 %v3518_v61, %v17509_v55  ;;  %v3520_v5 = vpop.f32.mrb[95].mxu1  ;;  %v3408_v38 = vadd.f32 %v3407_v4, %v17512_v56  ;;  %7570 = vmatpush1.bf16.msra.mxu0 %v14144_v43  ;;  %7796 = vmatpush1.bf16.msra.mxu1 %v14147_v54  ;;  %v14158_v55 = vld [vmem:[%s21687_s7 + $0x11d4] ss:$76 sps:$4 sm:$0xff]   ;;  %v3581_v41 = vmax.f32 %v3515_v48, 0.0  ;;  %v3580_v8 = vmax.f32 %v3404_v58, 0.0 }
 0x3cf   :  { %v3521_v6 = vadd.f32 %v3520_v5, %v17515_v57  ;;  %v3583_v7 = vmax.f32 %v3406_v62, 0.0  ;;  %7571 = vmatprep.subr.bf16.mxu0 %v14152_v51  ;;  %7797 = vmatprep.subr.bf16.mxu1 %v14155_v52  ;;  %v14161_v57 = vld [vmem:[%s21687_s7 + $0x11dc] ss:$76 sps:$4 sm:$0xff]   ;;  %v3582_v9 = vmax.f32 %v3517_v59, 0.0  ;;  %v14164_v50 = vld [vmem:[%s21687_s7 + $0x126c] ss:$76 sps:$4 sm:$0xff]  }
 0x3d0   :  { %v3585_v56 = vmax.f32 %v3519_v3, 0.0  ;;  %v3584_v23 = vmax.f32 %v3408_v38, 0.0  ;;  %v14156_v48 = vld [vmem:[%s21687_s7 + $0x11d0] ss:$76 sps:$4 sm:$0xff]   ;;  %v14167_v51 = vld [vmem:[%s21687_s7 + $0x1274] ss:$76 sps:$4 sm:$0xff]  }
 0x3d1   :  { %v3586_v35 = vmax.f32 %v3521_v6, 0.0  ;;  %v17833_v42 = vpack.c.bf16 %v3583_v7, %v3579_v40  ;;  %v14162_v52 = vld [vmem:[%s21687_s7 + $0x1268] ss:$76 sps:$4 sm:$0xff]   ;;  %v14165_v58 = vld [vmem:[%s21687_s7 + $0x1270] ss:$76 sps:$4 sm:$0xff]  }
 0x3d2   :  { %v17835_v43 = vpack.c.bf16 %v3585_v56, %v3581_v41  ;;  %v17837_v54 = vpack.c.bf16 %v3584_v23, %v3580_v8  ;;  %7572 = vmatpush1.bf16.msra.mxu0 %v14150_v39  ;;  %7798 = vmatpush1.bf16.msra.mxu1 %v14153_v53  ;;  %v14170_v59 = vld [vmem:[%s21687_s7 + $0x14] ss:$76 sps:$4 sm:$0xff]   ;;  %v14173_v60 = vld [vmem:[%s21687_s7 + $0x1c] ss:$76 sps:$4 sm:$0xff]   ;;  %v14171_v62 = vld [vmem:[%s21687_s7 + $0x18] ss:$76 sps:$4 sm:$0xff]  }
 0x3d3   :  { %21790 = vst [vmem:[#allocation25_spill] sm:$0xff] %v17833_v42  ;;  %v17839_v47 = vpack.c.bf16 %v3586_v35, %v3582_v9  ;;  %7573 = vmatprep.subr.bf16.mxu0 %v14158_v55  ;;  %7799 = vmatprep.subr.bf16.mxu1 %v14161_v57  ;;  %v14168_v61 = vld [vmem:[%s21687_s7 + $0x10] ss:$76 sps:$4 sm:$0xff]   ;;  %v14176_v3 = vld [vmem:[%s21687_s7 + $0xac] ss:$76 sps:$4 sm:$0xff]  }
 0x3d4   :  { %21791 = vst [vmem:[#allocation26_spill] sm:$0xff] %v17837_v54  ;;  %7534 = vmatprep.mubr.bf16.mxu0 %v17837_v54  ;;  %7760 = vmatprep.mubr.bf16.mxu1 %v17837_v54  ;;  %v14179_v4 = vld [vmem:[%s21687_s7 + $0xb4] ss:$76 sps:$4 sm:$0xff]   ;;  %v14177_v38 = vld [vmem:[%s21687_s7 + $0xb0] ss:$76 sps:$4 sm:$0xff]  }
 0x3d5   :  { %7535 = vmatmul.mubr.bf16.gmra.mrb[124].mxu0 %v17833_v42  ;;  %7761 = vmatmul.mubr.bf16.gmra.mrb[124].mxu1 %v17833_v42  ;;  %v14174_v5 = vld [vmem:[%s21687_s7 + $0xa8] ss:$76 sps:$4 sm:$0xff]   ;;  %v14182_v6 = vld [vmem:[%s21687_s7 + $0x144] ss:$76 sps:$4 sm:$0xff]   ;;  %v14185_v39 = vld [vmem:[%s21687_s7 + $0x14c] ss:$76 sps:$4 sm:$0xff]  }
 0x3d6   :  { %7574 = vmatpush1.bf16.msra.mxu0 %v14156_v48  ;;  %7577 = vmatprep.mubr.bf16.mxu0 %v17531_v18  ;;  %v14180_v53 = vld [vmem:[%s21687_s7 + $0x140] ss:$76 sps:$4 sm:$0xff]   ;;  %v14183_v55 = vld [vmem:[%s21687_s7 + $0x148] ss:$76 sps:$4 sm:$0xff]   ;;  %v14191_v41 = vld [vmem:[%s21687_s7 + $0x1e4] ss:$76 sps:$4 sm:$0xff]  }
 0x3d7   :  { %7800 = vmatpush1.bf16.msra.mxu1 %v14159_v49  ;;  %7803 = vmatprep.mubr.bf16.mxu1 %v17531_v18  ;;  %v14188_v40 = vld [vmem:[%s21687_s7 + $0x1dc] ss:$76 sps:$4 sm:$0xff]   ;;  %v14186_v7 = vld [vmem:[%s21687_s7 + $0x1d8] ss:$76 sps:$4 sm:$0xff]   ;;  %v14189_v56 = vld [vmem:[%s21687_s7 + $0x1e0] ss:$76 sps:$4 sm:$0xff]  }
 0x3d8   :  { %7575 = vmatprep.subr.bf16.mxu0 %v14164_v50  ;;  %7801 = vmatprep.subr.bf16.mxu1 %v14167_v51  ;;  %v14194_v57 = vld [vmem:[%s21687_s7 + $0x274] ss:$76 sps:$4 sm:$0xff]   ;;  %v14197_v8 = vld [vmem:[%s21687_s7 + $0x27c] ss:$76 sps:$4 sm:$0xff]   ;;  %v14195_v23 = vld [vmem:[%s21687_s7 + $0x278] ss:$76 sps:$4 sm:$0xff]  }
 0x3d9   :  { %v14192_v9 = vld [vmem:[%s21687_s7 + $0x270] ss:$76 sps:$4 sm:$0xff]   ;;  %v14200_v35 = vld [vmem:[%s21687_s7 + $0x30c] ss:$76 sps:$4 sm:$0xff]   ;;  %v14203_v48 = vld [vmem:[%s21687_s7 + $0x314] ss:$76 sps:$4 sm:$0xff]  }
 0x3da   :  { %7576 = vmatpush1.bf16.msra.mxu0 %v14162_v52  ;;  %v14198_v49 = vld [vmem:[%s21687_s7 + $0x308] ss:$76 sps:$4 sm:$0xff]   ;;  %v14201_v50 = vld [vmem:[%s21687_s7 + $0x310] ss:$76 sps:$4 sm:$0xff]   ;;  %v14209_v52 = vld [vmem:[%s21687_s7 + $0x3ac] ss:$76 sps:$4 sm:$0xff]  }
 0x3db   :  { %7802 = vmatpush1.bf16.msra.mxu1 %v14165_v58  ;;  %7884 = vmatprep.subr.bf16.mxu0 %v14170_v59  ;;  %v14206_v51 = vld [vmem:[%s21687_s7 + $0x3a4] ss:$76 sps:$4 sm:$0xff]   ;;  %v14204_v58 = vld [vmem:[%s21687_s7 + $0x3a0] ss:$76 sps:$4 sm:$0xff]   ;;  %v14207_v59 = vld [vmem:[%s21687_s7 + $0x3a8] ss:$76 sps:$4 sm:$0xff]  }
 0x3dc   :  { %8110 = vmatprep.subr.bf16.mxu1 %v14173_v60  ;;  %v14212_v60 = vld [vmem:[%s21687_s7 + $0x43c] ss:$76 sps:$4 sm:$0xff]  }
 0x3dd   :  { %7578 = vmatmul.mubr.bf16.vlgmr.msra.gmra.mrb[96].mxu0 %v17527_v16 }
 0x3de   :  { %7804 = vmatmul.mubr.bf16.vlgmr.msra.gmra.mrb[96].mxu1 %v17527_v16  ;;  %7587 = vmatprep.mubr.bf16.mxu0 %v17575_v2 }
 0x3df   :  { %7813 = vmatprep.mubr.bf16.mxu1 %v17575_v2  ;;  %7885 = vmatpush1.bf16.msra.mxu0 %v14168_v61  ;;  %v14215_v61 = vld [vmem:[%s21687_s7 + $0x444] ss:$76 sps:$4 sm:$0xff]  }
 0x3e0   :  { %8111 = vmatpush1.bf16.msra.mxu1 %v14171_v62  ;;  %7886 = vmatprep.subr.bf16.mxu0 %v14176_v3  ;;  %v14210_v62 = vld [vmem:[%s21687_s7 + $0x438] ss:$76 sps:$4 sm:$0xff]   ;;  %v14213_v3 = vld [vmem:[%s21687_s7 + $0x440] ss:$76 sps:$4 sm:$0xff]  }
 0x3e1   :  { %8112 = vmatprep.subr.bf16.mxu1 %v14179_v4  ;;  %v14218_v4 = vld [vmem:[%s21687_s7 + $0x4d4] ss:$76 sps:$4 sm:$0xff]  }
 0x3e3   :  { %7887 = vmatpush1.bf16.msra.mxu0 %v14174_v5  ;;  %v14221_v5 = vld [vmem:[%s21687_s7 + $0x4dc] ss:$76 sps:$4 sm:$0xff]  }
 0x3e4   :  { %8113 = vmatpush1.bf16.msra.mxu1 %v14177_v38  ;;  %7888 = vmatprep.subr.bf16.mxu0 %v14182_v6  ;;  %v14216_v38 = vld [vmem:[%s21687_s7 + $0x4d0] ss:$76 sps:$4 sm:$0xff]   ;;  %v14219_v6 = vld [vmem:[%s21687_s7 + $0x4d8] ss:$76 sps:$4 sm:$0xff]  }
 0x3e5   :  { %7588 = vmatmul.mubr.bf16.gmra.mrb[100].mxu0 %v17571_v0  ;;  %8114 = vmatprep.subr.bf16.mxu1 %v14185_v39  ;;  %v14224_v39 = vld [vmem:[%s21687_s7 + $0x56c] ss:$76 sps:$4 sm:$0xff]  }
 0x3e6   :  { %7814 = vmatmul.mubr.bf16.gmra.mrb[100].mxu1 %v17571_v0  ;;  %7597 = vmatprep.mubr.bf16.mxu0 %v17619_v46 }
 0x3e7   :  { %7823 = vmatprep.mubr.bf16.mxu1 %v17619_v46  ;;  %7889 = vmatpush1.bf16.msra.mxu0 %v14180_v53  ;;  %v14227_v53 = vld [vmem:[%s21687_s7 + $0x574] ss:$76 sps:$4 sm:$0xff]  }
 0x3e8   :  { %8115 = vmatpush1.bf16.msra.mxu1 %v14183_v55  ;;  %7890 = vmatprep.subr.bf16.mxu0 %v14188_v40  ;;  %v14222_v55 = vld [vmem:[%s21687_s7 + $0x568] ss:$76 sps:$4 sm:$0xff]   ;;  %v14225_v40 = vld [vmem:[%s21687_s7 + $0x570] ss:$76 sps:$4 sm:$0xff]  }
 0x3e9   :  { %8116 = vmatprep.subr.bf16.mxu1 %v14191_v41  ;;  %v14230_v41 = vld [vmem:[%s21687_s7 + $0x604] ss:$76 sps:$4 sm:$0xff]  }
 0x3eb   :  { %7891 = vmatpush1.bf16.msra.mxu0 %v14186_v7  ;;  %v14233_v7 = vld [vmem:[%s21687_s7 + $0x60c] ss:$76 sps:$4 sm:$0xff]  }
 0x3ec   :  { %8117 = vmatpush1.bf16.msra.mxu1 %v14189_v56  ;;  %7892 = vmatprep.subr.bf16.mxu0 %v14194_v57  ;;  %v14228_v56 = vld [vmem:[%s21687_s7 + $0x600] ss:$76 sps:$4 sm:$0xff]   ;;  %v14231_v57 = vld [vmem:[%s21687_s7 + $0x608] ss:$76 sps:$4 sm:$0xff]  }
 0x3ed   :  { %7598 = vmatmul.mubr.bf16.gmra.mrb[104].mxu0 %v17615_v44  ;;  %8118 = vmatprep.subr.bf16.mxu1 %v14197_v8  ;;  %v14236_v8 = vld [vmem:[%s21687_s7 + $0x69c] ss:$76 sps:$4 sm:$0xff]  }
 0x3ee   :  { %7824 = vmatmul.mubr.bf16.gmra.mrb[104].mxu1 %v17615_v44  ;;  %7607 = vmatprep.mubr.bf16.mxu0 %v17663_v28 }
 0x3ef   :  { %7833 = vmatprep.mubr.bf16.mxu1 %v17663_v28  ;;  %7893 = vmatpush1.bf16.msra.mxu0 %v14192_v9  ;;  %v14239_v9 = vld [vmem:[%s21687_s7 + $0x6a4] ss:$76 sps:$4 sm:$0xff]  }
 0x3f0   :  { %8119 = vmatpush1.bf16.msra.mxu1 %v14195_v23  ;;  %7894 = vmatprep.subr.bf16.mxu0 %v14200_v35  ;;  %v14234_v23 = vld [vmem:[%s21687_s7 + $0x698] ss:$76 sps:$4 sm:$0xff]   ;;  %v14237_v35 = vld [vmem:[%s21687_s7 + $0x6a0] ss:$76 sps:$4 sm:$0xff]  }
 0x3f1   :  { %8120 = vmatprep.subr.bf16.mxu1 %v14203_v48  ;;  %v14242_v48 = vld [vmem:[%s21687_s7 + $0x734] ss:$76 sps:$4 sm:$0xff]  }
 0x3f3   :  { %7895 = vmatpush1.bf16.msra.mxu0 %v14198_v49  ;;  %v14245_v49 = vld [vmem:[%s21687_s7 + $0x73c] ss:$76 sps:$4 sm:$0xff]  }
 0x3f4   :  { %8121 = vmatpush1.bf16.msra.mxu1 %v14201_v50  ;;  %7896 = vmatprep.subr.bf16.mxu0 %v14206_v51  ;;  %v14240_v50 = vld [vmem:[%s21687_s7 + $0x730] ss:$76 sps:$4 sm:$0xff]   ;;  %v14243_v51 = vld [vmem:[%s21687_s7 + $0x738] ss:$76 sps:$4 sm:$0xff]  }
 0x3f5   :  { %7608 = vmatmul.mubr.bf16.gmra.mrb[108].mxu0 %v17659_v26  ;;  %8122 = vmatprep.subr.bf16.mxu1 %v14209_v52  ;;  %v14248_v52 = vld [vmem:[%s21687_s7 + $0x7cc] ss:$76 sps:$4 sm:$0xff]  }
 0x3f6   :  { %7834 = vmatmul.mubr.bf16.gmra.mrb[108].mxu1 %v17659_v26  ;;  %7617 = vmatprep.mubr.bf16.mxu0 %v17707_v21 }
 0x3f7   :  { %7843 = vmatprep.mubr.bf16.mxu1 %v17707_v21  ;;  %7897 = vmatpush1.bf16.msra.mxu0 %v14204_v58  ;;  %v14251_v58 = vld [vmem:[%s21687_s7 + $0x7d4] ss:$76 sps:$4 sm:$0xff]  }
 0x3f8   :  { %8123 = vmatpush1.bf16.msra.mxu1 %v14207_v59  ;;  %7898 = vmatprep.subr.bf16.mxu0 %v14212_v60  ;;  %v14246_v59 = vld [vmem:[%s21687_s7 + $0x7c8] ss:$76 sps:$4 sm:$0xff]   ;;  %v14249_v60 = vld [vmem:[%s21687_s7 + $0x7d0] ss:$76 sps:$4 sm:$0xff]  }
 0x3f9   :  { %8124 = vmatprep.subr.bf16.mxu1 %v14215_v61  ;;  %v14254_v61 = vld [vmem:[%s21687_s7 + $0x864] ss:$76 sps:$4 sm:$0xff]  }
 0x3fb   :  { %7899 = vmatpush1.bf16.msra.mxu0 %v14210_v62  ;;  %v14257_v62 = vld [vmem:[%s21687_s7 + $0x86c] ss:$76 sps:$4 sm:$0xff]  }
 0x3fc   :  { %8125 = vmatpush1.bf16.msra.mxu1 %v14213_v3  ;;  %7900 = vmatprep.subr.bf16.mxu0 %v14218_v4  ;;  %v14252_v3 = vld [vmem:[%s21687_s7 + $0x860] ss:$76 sps:$4 sm:$0xff]   ;;  %v14255_v4 = vld [vmem:[%s21687_s7 + $0x868] ss:$76 sps:$4 sm:$0xff]  }
 0x3fd   :  { %7618 = vmatmul.mubr.bf16.gmra.mrb[112].mxu0 %v17703_v19  ;;  %8126 = vmatprep.subr.bf16.mxu1 %v14221_v5  ;;  %v14260_v5 = vld [vmem:[%s21687_s7 + $0x8fc] ss:$76 sps:$4 sm:$0xff]  }
 0x3fe   :  { %7844 = vmatmul.mubr.bf16.gmra.mrb[112].mxu1 %v17703_v19  ;;  %7627 = vmatprep.mubr.bf16.mxu0 %v17751_v22 }
 0x3ff   :  { %7853 = vmatprep.mubr.bf16.mxu1 %v17751_v22  ;;  %7901 = vmatpush1.bf16.msra.mxu0 %v14216_v38  ;;  %v14263_v38 = vld [vmem:[%s21687_s7 + $0x904] ss:$76 sps:$4 sm:$0xff]  }
 0x400   :  { %8127 = vmatpush1.bf16.msra.mxu1 %v14219_v6  ;;  %7902 = vmatprep.subr.bf16.mxu0 %v14224_v39  ;;  %v14258_v6 = vld [vmem:[%s21687_s7 + $0x8f8] ss:$76 sps:$4 sm:$0xff]   ;;  %v14261_v39 = vld [vmem:[%s21687_s7 + $0x900] ss:$76 sps:$4 sm:$0xff]  }
 0x401   :  { %8128 = vmatprep.subr.bf16.mxu1 %v14227_v53  ;;  %v14266_v53 = vld [vmem:[%s21687_s7 + $0x994] ss:$76 sps:$4 sm:$0xff]  }
 0x403   :  { %7903 = vmatpush1.bf16.msra.mxu0 %v14222_v55  ;;  %v14269_v55 = vld [vmem:[%s21687_s7 + $0x99c] ss:$76 sps:$4 sm:$0xff]  }
 0x404   :  { %8129 = vmatpush1.bf16.msra.mxu1 %v14225_v40  ;;  %7904 = vmatprep.subr.bf16.mxu0 %v14230_v41  ;;  %v14264_v40 = vld [vmem:[%s21687_s7 + $0x990] ss:$76 sps:$4 sm:$0xff]   ;;  %v14267_v41 = vld [vmem:[%s21687_s7 + $0x998] ss:$76 sps:$4 sm:$0xff]  }
 0x405   :  { %7628 = vmatmul.mubr.bf16.gmra.mrb[116].mxu0 %v17747_v11  ;;  %8130 = vmatprep.subr.bf16.mxu1 %v14233_v7  ;;  %v14272_v7 = vld [vmem:[%s21687_s7 + $0xa2c] ss:$76 sps:$4 sm:$0xff]  }
 0x406   :  { %7854 = vmatmul.mubr.bf16.gmra.mrb[116].mxu1 %v17747_v11  ;;  %7637 = vmatprep.mubr.bf16.mxu0 %v17795_v31 }
 0x407   :  { %7863 = vmatprep.mubr.bf16.mxu1 %v17795_v31  ;;  %7905 = vmatpush1.bf16.msra.mxu0 %v14228_v56  ;;  %v14275_v56 = vld [vmem:[%s21687_s7 + $0xa34] ss:$76 sps:$4 sm:$0xff]  }
 0x408   :  { %8131 = vmatpush1.bf16.msra.mxu1 %v14231_v57  ;;  %7906 = vmatprep.subr.bf16.mxu0 %v14236_v8  ;;  %v14270_v57 = vld [vmem:[%s21687_s7 + $0xa28] ss:$76 sps:$4 sm:$0xff]   ;;  %v14273_v8 = vld [vmem:[%s21687_s7 + $0xa30] ss:$76 sps:$4 sm:$0xff]  }
 0x409   :  { %8132 = vmatprep.subr.bf16.mxu1 %v14239_v9  ;;  %v14278_v9 = vld [vmem:[%s21687_s7 + $0xac4] ss:$76 sps:$4 sm:$0xff]  }
 0x40b   :  { %7907 = vmatpush1.bf16.msra.mxu0 %v14234_v23  ;;  %v14281_v23 = vld [vmem:[%s21687_s7 + $0xacc] ss:$76 sps:$4 sm:$0xff]  }
 0x40c   :  { %8133 = vmatpush1.bf16.msra.mxu1 %v14237_v35  ;;  %7908 = vmatprep.subr.bf16.mxu0 %v14242_v48  ;;  %v14276_v35 = vld [vmem:[%s21687_s7 + $0xac0] ss:$76 sps:$4 sm:$0xff]   ;;  %v14279_v48 = vld [vmem:[%s21687_s7 + $0xac8] ss:$76 sps:$4 sm:$0xff]  }
 0x40d   :  { %7638 = vmatmul.mubr.bf16.gmra.mrb[120].mxu0 %v17791_v29  ;;  %8134 = vmatprep.subr.bf16.mxu1 %v14245_v49  ;;  %v14284_v49 = vld [vmem:[%s21687_s7 + $0xb5c] ss:$76 sps:$4 sm:$0xff]  }
 0x40e   :  { %7864 = vmatmul.mubr.bf16.gmra.mrb[120].mxu1 %v17791_v29  ;;  %7647 = vmatprep.mubr.bf16.mxu0 %v17839_v47 }
 0x40f   :  { %7873 = vmatprep.mubr.bf16.mxu1 %v17839_v47  ;;  %7909 = vmatpush1.bf16.msra.mxu0 %v14240_v50  ;;  %v14287_v50 = vld [vmem:[%s21687_s7 + $0xb64] ss:$76 sps:$4 sm:$0xff]  }
 0x410   :  { %8135 = vmatpush1.bf16.msra.mxu1 %v14243_v51  ;;  %7910 = vmatprep.subr.bf16.mxu0 %v14248_v52  ;;  %v14282_v51 = vld [vmem:[%s21687_s7 + $0xb58] ss:$76 sps:$4 sm:$0xff]   ;;  %v14285_v52 = vld [vmem:[%s21687_s7 + $0xb60] ss:$76 sps:$4 sm:$0xff]  }
 0x411   :  { %8136 = vmatprep.subr.bf16.mxu1 %v14251_v58  ;;  %v14290_v58 = vld [vmem:[%s21687_s7 + $0xbf4] ss:$76 sps:$4 sm:$0xff]  }
 0x413   :  { %7911 = vmatpush1.bf16.msra.mxu0 %v14246_v59  ;;  %v14293_v59 = vld [vmem:[%s21687_s7 + $0xbfc] ss:$76 sps:$4 sm:$0xff]  }
 0x414   :  { %8137 = vmatpush1.bf16.msra.mxu1 %v14249_v60  ;;  %7912 = vmatprep.subr.bf16.mxu0 %v14254_v61  ;;  %v14288_v60 = vld [vmem:[%s21687_s7 + $0xbf0] ss:$76 sps:$4 sm:$0xff]   ;;  %v14291_v61 = vld [vmem:[%s21687_s7 + $0xbf8] ss:$76 sps:$4 sm:$0xff]  }
 0x415   :  { %7648 = vmatmul.mubr.bf16.gmra.mrb[124].mxu0 %v17835_v43  ;;  %8138 = vmatprep.subr.bf16.mxu1 %v14257_v62  ;;  %v14296_v62 = vld [vmem:[%s21687_s7 + $0xc8c] ss:$76 sps:$4 sm:$0xff]  }
 0x416   :  { %7874 = vmatmul.mubr.bf16.gmra.mrb[124].mxu1 %v17835_v43  ;;  %7916 = vmatprep.mubr.bf16.mxu0 %v17529_v17 }
 0x417   :  { %7913 = vmatpush1.bf16.msra.mxu0 %v14252_v3  ;;  %8142 = vmatprep.mubr.bf16.mxu1 %v17529_v17  ;;  %v14299_v3 = vld [vmem:[%s21687_s7 + $0xc94] ss:$76 sps:$4 sm:$0xff]  }
 0x418   :  { %8139 = vmatpush1.bf16.msra.mxu1 %v14255_v4  ;;  %7914 = vmatprep.subr.bf16.mxu0 %v14260_v5  ;;  %v14294_v4 = vld [vmem:[%s21687_s7 + $0xc88] ss:$76 sps:$4 sm:$0xff]   ;;  %v14297_v5 = vld [vmem:[%s21687_s7 + $0xc90] ss:$76 sps:$4 sm:$0xff]  }
 0x419   :  { %8140 = vmatprep.subr.bf16.mxu1 %v14263_v38  ;;  %v14302_v38 = vld [vmem:[%s21687_s7 + $0xd24] ss:$76 sps:$4 sm:$0xff]  }
 0x41b   :  { %7915 = vmatpush1.bf16.msra.mxu0 %v14258_v6  ;;  %v14305_v6 = vld [vmem:[%s21687_s7 + $0xd2c] ss:$76 sps:$4 sm:$0xff]  }
 0x41c   :  { %8141 = vmatpush1.bf16.msra.mxu1 %v14261_v39  ;;  %7997 = vmatprep.subr.bf16.mxu0 %v14266_v53  ;;  %v14300_v39 = vld [vmem:[%s21687_s7 + $0xd20] ss:$76 sps:$4 sm:$0xff]   ;;  %v14303_v53 = vld [vmem:[%s21687_s7 + $0xd28] ss:$76 sps:$4 sm:$0xff]  }
 0x41d   :  { %8223 = vmatprep.subr.bf16.mxu1 %v14269_v55  ;;  %v14308_v55 = vld [vmem:[%s21687_s7 + $0xdbc] ss:$76 sps:$4 sm:$0xff]  }
 0x41e   :  { %7917 = vmatmul.mubr.bf16.vlgmr.msra.gmra.mrb[128].mxu0 %v17525_v14 }
 0x41f   :  { %8143 = vmatmul.mubr.bf16.vlgmr.msra.gmra.mrb[128].mxu1 %v17525_v14  ;;  %7926 = vmatprep.mubr.bf16.mxu0 %v17573_v1 }
 0x420   :  { %7998 = vmatpush1.bf16.msra.mxu0 %v14264_v40  ;;  %8152 = vmatprep.mubr.bf16.mxu1 %v17573_v1  ;;  %v14311_v40 = vld [vmem:[%s21687_s7 + $0xdc4] ss:$76 sps:$4 sm:$0xff]  }
 0x421   :  { %8224 = vmatpush1.bf16.msra.mxu1 %v14267_v41  ;;  %7999 = vmatprep.subr.bf16.mxu0 %v14272_v7  ;;  %v14306_v41 = vld [vmem:[%s21687_s7 + $0xdb8] ss:$76 sps:$4 sm:$0xff]   ;;  %v14309_v7 = vld [vmem:[%s21687_s7 + $0xdc0] ss:$76 sps:$4 sm:$0xff]  }
 0x422   :  { %8225 = vmatprep.subr.bf16.mxu1 %v14275_v56  ;;  %v14314_v56 = vld [vmem:[%s21687_s7 + $0xe54] ss:$76 sps:$4 sm:$0xff]  }
 0x424   :  { %8000 = vmatpush1.bf16.msra.mxu0 %v14270_v57  ;;  %v14317_v57 = vld [vmem:[%s21687_s7 + $0xe5c] ss:$76 sps:$4 sm:$0xff]  }
 0x425   :  { %8226 = vmatpush1.bf16.msra.mxu1 %v14273_v8  ;;  %8001 = vmatprep.subr.bf16.mxu0 %v14278_v9  ;;  %v14312_v8 = vld [vmem:[%s21687_s7 + $0xe50] ss:$76 sps:$4 sm:$0xff]   ;;  %v14315_v9 = vld [vmem:[%s21687_s7 + $0xe58] ss:$76 sps:$4 sm:$0xff]  }
 0x426   :  { %7927 = vmatmul.mubr.bf16.gmra.mrb[132].mxu0 %v17569_v63  ;;  %8227 = vmatprep.subr.bf16.mxu1 %v14281_v23  ;;  %v14320_v23 = vld [vmem:[%s21687_s7 + $0xeec] ss:$76 sps:$4 sm:$0xff]  }
 0x427   :  { %8153 = vmatmul.mubr.bf16.gmra.mrb[132].mxu1 %v17569_v63  ;;  %7936 = vmatprep.mubr.bf16.mxu0 %v17617_v45 }
 0x428   :  { %8002 = vmatpush1.bf16.msra.mxu0 %v14276_v35  ;;  %8162 = vmatprep.mubr.bf16.mxu1 %v17617_v45  ;;  %v14323_v35 = vld [vmem:[%s21687_s7 + $0xef4] ss:$76 sps:$4 sm:$0xff]  }
 0x429   :  { %8228 = vmatpush1.bf16.msra.mxu1 %v14279_v48  ;;  %8003 = vmatprep.subr.bf16.mxu0 %v14284_v49  ;;  %v14318_v48 = vld [vmem:[%s21687_s7 + $0xee8] ss:$76 sps:$4 sm:$0xff]   ;;  %v14321_v49 = vld [vmem:[%s21687_s7 + $0xef0] ss:$76 sps:$4 sm:$0xff]  }
 0x42a   :  { %8229 = vmatprep.subr.bf16.mxu1 %v14287_v50  ;;  %v14326_v50 = vld [vmem:[%s21687_s7 + $0xf84] ss:$76 sps:$4 sm:$0xff]  }
 0x42c   :  { %8004 = vmatpush1.bf16.msra.mxu0 %v14282_v51  ;;  %v14329_v51 = vld [vmem:[%s21687_s7 + $0xf8c] ss:$76 sps:$4 sm:$0xff]  }
 0x42d   :  { %8230 = vmatpush1.bf16.msra.mxu1 %v14285_v52  ;;  %8005 = vmatprep.subr.bf16.mxu0 %v14290_v58  ;;  %v14324_v52 = vld [vmem:[%s21687_s7 + $0xf80] ss:$76 sps:$4 sm:$0xff]   ;;  %v14327_v58 = vld [vmem:[%s21687_s7 + $0xf88] ss:$76 sps:$4 sm:$0xff]  }
 0x42e   :  { %7937 = vmatmul.mubr.bf16.gmra.mrb[136].mxu0 %v17613_v15  ;;  %8231 = vmatprep.subr.bf16.mxu1 %v14293_v59  ;;  %v14332_v59 = vld [vmem:[%s21687_s7 + $0x101c] ss:$76 sps:$4 sm:$0xff]  }
 0x42f   :  { %8163 = vmatmul.mubr.bf16.gmra.mrb[136].mxu1 %v17613_v15  ;;  %7946 = vmatprep.mubr.bf16.mxu0 %v17661_v27 }
 0x430   :  { %8006 = vmatpush1.bf16.msra.mxu0 %v14288_v60  ;;  %8172 = vmatprep.mubr.bf16.mxu1 %v17661_v27  ;;  %v14335_v60 = vld [vmem:[%s21687_s7 + $0x1024] ss:$76 sps:$4 sm:$0xff]  }
 0x431   :  { %8232 = vmatpush1.bf16.msra.mxu1 %v14291_v61  ;;  %8007 = vmatprep.subr.bf16.mxu0 %v14296_v62  ;;  %v14330_v61 = vld [vmem:[%s21687_s7 + $0x1018] ss:$76 sps:$4 sm:$0xff]   ;;  %v14333_v62 = vld [vmem:[%s21687_s7 + $0x1020] ss:$76 sps:$4 sm:$0xff]  }
 0x432   :  { %8233 = vmatprep.subr.bf16.mxu1 %v14299_v3  ;;  %v14338_v3 = vld [vmem:[%s21687_s7 + $0x10b4] ss:$76 sps:$4 sm:$0xff]  }
 0x434   :  { %8008 = vmatpush1.bf16.msra.mxu0 %v14294_v4  ;;  %v14341_v4 = vld [vmem:[%s21687_s7 + $0x10bc] ss:$76 sps:$4 sm:$0xff]  }
 0x435   :  { %8234 = vmatpush1.bf16.msra.mxu1 %v14297_v5  ;;  %8009 = vmatprep.subr.bf16.mxu0 %v14302_v38  ;;  %v14336_v5 = vld [vmem:[%s21687_s7 + $0x10b0] ss:$76 sps:$4 sm:$0xff]   ;;  %v14339_v38 = vld [vmem:[%s21687_s7 + $0x10b8] ss:$76 sps:$4 sm:$0xff]  }
 0x436   :  { %7947 = vmatmul.mubr.bf16.gmra.mrb[140].mxu0 %v17657_v25  ;;  %8235 = vmatprep.subr.bf16.mxu1 %v14305_v6  ;;  %v14344_v6 = vld [vmem:[%s21687_s7 + $0x114c] ss:$76 sps:$4 sm:$0xff]  }
 0x437   :  { %8173 = vmatmul.mubr.bf16.gmra.mrb[140].mxu1 %v17657_v25  ;;  %7956 = vmatprep.mubr.bf16.mxu0 %v17705_v20 }
 0x438   :  { %8010 = vmatpush1.bf16.msra.mxu0 %v14300_v39  ;;  %8182 = vmatprep.mubr.bf16.mxu1 %v17705_v20  ;;  %v14347_v39 = vld [vmem:[%s21687_s7 + $0x1154] ss:$76 sps:$4 sm:$0xff]  }
 0x439   :  { %8236 = vmatpush1.bf16.msra.mxu1 %v14303_v53  ;;  %8011 = vmatprep.subr.bf16.mxu0 %v14308_v55  ;;  %v14342_v53 = vld [vmem:[%s21687_s7 + $0x1148] ss:$76 sps:$4 sm:$0xff]   ;;  %v14345_v55 = vld [vmem:[%s21687_s7 + $0x1150] ss:$76 sps:$4 sm:$0xff]  }
 0x43a   :  { %8237 = vmatprep.subr.bf16.mxu1 %v14311_v40  ;;  %v14350_v40 = vld [vmem:[%s21687_s7 + $0x11e4] ss:$76 sps:$4 sm:$0xff]  }
 0x43c   :  { %8012 = vmatpush1.bf16.msra.mxu0 %v14306_v41  ;;  %v14353_v41 = vld [vmem:[%s21687_s7 + $0x11ec] ss:$76 sps:$4 sm:$0xff]  }
 0x43d   :  { %8238 = vmatpush1.bf16.msra.mxu1 %v14309_v7  ;;  %8013 = vmatprep.subr.bf16.mxu0 %v14314_v56  ;;  %v14348_v7 = vld [vmem:[%s21687_s7 + $0x11e0] ss:$76 sps:$4 sm:$0xff]   ;;  %v14351_v56 = vld [vmem:[%s21687_s7 + $0x11e8] ss:$76 sps:$4 sm:$0xff]  }
 0x43e   :  { %7957 = vmatmul.mubr.bf16.gmra.mrb[144].mxu0 %v17701_v13  ;;  %8239 = vmatprep.subr.bf16.mxu1 %v14317_v57  ;;  %v14356_v57 = vld [vmem:[%s21687_s7 + $0x127c] ss:$76 sps:$4 sm:$0xff]  }
 0x43f   :  { %8183 = vmatmul.mubr.bf16.gmra.mrb[144].mxu1 %v17701_v13  ;;  %7966 = vmatprep.mubr.bf16.mxu0 %v17749_v12 }
 0x440   :  { %8014 = vmatpush1.bf16.msra.mxu0 %v14312_v8  ;;  %8192 = vmatprep.mubr.bf16.mxu1 %v17749_v12  ;;  %v14359_v8 = vld [vmem:[%s21687_s7 + $0x1284] ss:$76 sps:$4 sm:$0xff]  }
 0x441   :  { %8240 = vmatpush1.bf16.msra.mxu1 %v14315_v9  ;;  %8015 = vmatprep.subr.bf16.mxu0 %v14320_v23  ;;  %v14354_v9 = vld [vmem:[%s21687_s7 + $0x1278] ss:$76 sps:$4 sm:$0xff]   ;;  %v14357_v23 = vld [vmem:[%s21687_s7 + $0x1280] ss:$76 sps:$4 sm:$0xff]  }
 0x442   :  { %8241 = vmatprep.subr.bf16.mxu1 %v14323_v35  ;;  %v14362_v35 = vld [vmem:[%s21687_s7 + $0x24] ss:$76 sps:$4 sm:$0xff]  }
 0x444   :  { %8016 = vmatpush1.bf16.msra.mxu0 %v14318_v48  ;;  %v14365_v48 = vld [vmem:[%s21687_s7 + $0x2c] ss:$76 sps:$4 sm:$0xff]  }
 0x445   :  { %8242 = vmatpush1.bf16.msra.mxu1 %v14321_v49  ;;  %8017 = vmatprep.subr.bf16.mxu0 %v14326_v50  ;;  %v14360_v49 = vld [vmem:[%s21687_s7 + $0x20] ss:$76 sps:$4 sm:$0xff]   ;;  %v14363_v50 = vld [vmem:[%s21687_s7 + $0x28] ss:$76 sps:$4 sm:$0xff]  }
 0x446   :  { %7967 = vmatmul.mubr.bf16.gmra.mrb[148].mxu0 %v17745_v10  ;;  %8243 = vmatprep.subr.bf16.mxu1 %v14329_v51  ;;  %v14368_v51 = vld [vmem:[%s21687_s7 + $0xbc] ss:$76 sps:$4 sm:$0xff]  }
 0x447   :  { %8193 = vmatmul.mubr.bf16.gmra.mrb[148].mxu1 %v17745_v10  ;;  %7976 = vmatprep.mubr.bf16.mxu0 %v17793_v30 }
 0x448   :  { %8018 = vmatpush1.bf16.msra.mxu0 %v14324_v52  ;;  %8202 = vmatprep.mubr.bf16.mxu1 %v17793_v30  ;;  %v14371_v52 = vld [vmem:[%s21687_s7 + $0xc4] ss:$76 sps:$4 sm:$0xff]  }
 0x449   :  { %8244 = vmatpush1.bf16.msra.mxu1 %v14327_v58  ;;  %8019 = vmatprep.subr.bf16.mxu0 %v14332_v59  ;;  %v14366_v58 = vld [vmem:[%s21687_s7 + $0xb8] ss:$76 sps:$4 sm:$0xff]   ;;  %v14369_v59 = vld [vmem:[%s21687_s7 + $0xc0] ss:$76 sps:$4 sm:$0xff]  }
 0x44a   :  { %8245 = vmatprep.subr.bf16.mxu1 %v14335_v60  ;;  %v14374_v60 = vld [vmem:[%s21687_s7 + $0x154] ss:$76 sps:$4 sm:$0xff]  }
 0x44c   :  { %8020 = vmatpush1.bf16.msra.mxu0 %v14330_v61  ;;  %v14377_v61 = vld [vmem:[%s21687_s7 + $0x15c] ss:$76 sps:$4 sm:$0xff]  }
 0x44d   :  { %8246 = vmatpush1.bf16.msra.mxu1 %v14333_v62  ;;  %8021 = vmatprep.subr.bf16.mxu0 %v14338_v3  ;;  %v14372_v62 = vld [vmem:[%s21687_s7 + $0x150] ss:$76 sps:$4 sm:$0xff]   ;;  %v14375_v3 = vld [vmem:[%s21687_s7 + $0x158] ss:$76 sps:$4 sm:$0xff]  }
 0x44e   :  { %7977 = vmatmul.mubr.bf16.gmra.mrb[152].mxu0 %v17789_v24  ;;  %8247 = vmatprep.subr.bf16.mxu1 %v14341_v4  ;;  %v14380_v4 = vld [vmem:[%s21687_s7 + $0x1ec] ss:$76 sps:$4 sm:$0xff]  }
 0x44f   :  { %8203 = vmatmul.mubr.bf16.gmra.mrb[152].mxu1 %v17789_v24  ;;  %7986 = vmatprep.mubr.bf16.mxu0 %v17837_v54 }
 0x450   :  { %8022 = vmatpush1.bf16.msra.mxu0 %v14336_v5  ;;  %8212 = vmatprep.mubr.bf16.mxu1 %v17837_v54  ;;  %v14383_v5 = vld [vmem:[%s21687_s7 + $0x1f4] ss:$76 sps:$4 sm:$0xff]  }
 0x451   :  { %8248 = vmatpush1.bf16.msra.mxu1 %v14339_v38  ;;  %8023 = vmatprep.subr.bf16.mxu0 %v14344_v6  ;;  %v14378_v38 = vld [vmem:[%s21687_s7 + $0x1e8] ss:$76 sps:$4 sm:$0xff]   ;;  %v14381_v6 = vld [vmem:[%s21687_s7 + $0x1f0] ss:$76 sps:$4 sm:$0xff]  }
 0x452   :  { %8249 = vmatprep.subr.bf16.mxu1 %v14347_v39  ;;  %v14386_v39 = vld [vmem:[%s21687_s7 + $0x284] ss:$76 sps:$4 sm:$0xff]  }
 0x454   :  { %8024 = vmatpush1.bf16.msra.mxu0 %v14342_v53  ;;  %v14389_v53 = vld [vmem:[%s21687_s7 + $0x28c] ss:$76 sps:$4 sm:$0xff]  }
 0x455   :  { %8250 = vmatpush1.bf16.msra.mxu1 %v14345_v55  ;;  %8025 = vmatprep.subr.bf16.mxu0 %v14350_v40  ;;  %v14384_v55 = vld [vmem:[%s21687_s7 + $0x280] ss:$76 sps:$4 sm:$0xff]   ;;  %v14387_v40 = vld [vmem:[%s21687_s7 + $0x288] ss:$76 sps:$4 sm:$0xff]  }
 0x456   :  { %7987 = vmatmul.mubr.bf16.gmra.mrb[156].mxu0 %v17833_v42  ;;  %8251 = vmatprep.subr.bf16.mxu1 %v14353_v41  ;;  %v14392_v41 = vld [vmem:[%s21687_s7 + $0x31c] ss:$76 sps:$4 sm:$0xff]  }
 0x457   :  { %8213 = vmatmul.mubr.bf16.gmra.mrb[156].mxu1 %v17833_v42  ;;  %8029 = vmatprep.mubr.bf16.mxu0 %v17531_v18 }
 0x458   :  { %8026 = vmatpush1.bf16.msra.mxu0 %v14348_v7  ;;  %8255 = vmatprep.mubr.bf16.mxu1 %v17531_v18  ;;  %v14395_v7 = vld [vmem:[%s21687_s7 + $0x324] ss:$76 sps:$4 sm:$0xff]  }
 0x459   :  { %8252 = vmatpush1.bf16.msra.mxu1 %v14351_v56  ;;  %8027 = vmatprep.subr.bf16.mxu0 %v14356_v57  ;;  %v14390_v56 = vld [vmem:[%s21687_s7 + $0x318] ss:$76 sps:$4 sm:$0xff]   ;;  %v14393_v57 = vld [vmem:[%s21687_s7 + $0x320] ss:$76 sps:$4 sm:$0xff]  }
 0x45a   :  { %8253 = vmatprep.subr.bf16.mxu1 %v14359_v8  ;;  %v14398_v8 = vld [vmem:[%s21687_s7 + $0x3b4] ss:$76 sps:$4 sm:$0xff]  }
 0x45c   :  { %8028 = vmatpush1.bf16.msra.mxu0 %v14354_v9  ;;  %v14401_v9 = vld [vmem:[%s21687_s7 + $0x3bc] ss:$76 sps:$4 sm:$0xff]  }
 0x45d   :  { %8254 = vmatpush1.bf16.msra.mxu1 %v14357_v23  ;;  %8336 = vmatprep.subr.bf16.mxu0 %v14362_v35  ;;  %v14396_v23 = vld [vmem:[%s21687_s7 + $0x3b0] ss:$76 sps:$4 sm:$0xff]   ;;  %v14399_v35 = vld [vmem:[%s21687_s7 + $0x3b8] ss:$76 sps:$4 sm:$0xff]  }
 0x45e   :  { %8562 = vmatprep.subr.bf16.mxu1 %v14365_v48  ;;  %v14404_v48 = vld [vmem:[%s21687_s7 + $0x44c] ss:$76 sps:$4 sm:$0xff]  }
 0x45f   :  { %8030 = vmatmul.mubr.bf16.vlgmr.msra.gmra.mrb[128].mxu0 %v17527_v16 }
 0x460   :  { %8256 = vmatmul.mubr.bf16.vlgmr.msra.gmra.mrb[128].mxu1 %v17527_v16  ;;  %8039 = vmatprep.mubr.bf16.mxu0 %v17575_v2 }
 0x461   :  { %8265 = vmatprep.mubr.bf16.mxu1 %v17575_v2  ;;  %8337 = vmatpush1.bf16.msra.mxu0 %v14360_v49  ;;  %v14407_v49 = vld [vmem:[%s21687_s7 + $0x454] ss:$76 sps:$4 sm:$0xff]  }
 0x462   :  { %8563 = vmatpush1.bf16.msra.mxu1 %v14363_v50  ;;  %8338 = vmatprep.subr.bf16.mxu0 %v14368_v51  ;;  %v14402_v50 = vld [vmem:[%s21687_s7 + $0x448] ss:$76 sps:$4 sm:$0xff]   ;;  %v14405_v51 = vld [vmem:[%s21687_s7 + $0x450] ss:$76 sps:$4 sm:$0xff]  }
 0x463   :  { %8564 = vmatprep.subr.bf16.mxu1 %v14371_v52  ;;  %v14410_v52 = vld [vmem:[%s21687_s7 + $0x4e4] ss:$76 sps:$4 sm:$0xff]  }
 0x465   :  { %8339 = vmatpush1.bf16.msra.mxu0 %v14366_v58  ;;  %v14413_v58 = vld [vmem:[%s21687_s7 + $0x4ec] ss:$76 sps:$4 sm:$0xff]  }
 0x466   :  { %8565 = vmatpush1.bf16.msra.mxu1 %v14369_v59  ;;  %8340 = vmatprep.subr.bf16.mxu0 %v14374_v60  ;;  %v14408_v59 = vld [vmem:[%s21687_s7 + $0x4e0] ss:$76 sps:$4 sm:$0xff]   ;;  %v14411_v60 = vld [vmem:[%s21687_s7 + $0x4e8] ss:$76 sps:$4 sm:$0xff]  }
 0x467   :  { %8040 = vmatmul.mubr.bf16.gmra.mrb[132].mxu0 %v17571_v0  ;;  %8566 = vmatprep.subr.bf16.mxu1 %v14377_v61  ;;  %v14416_v61 = vld [vmem:[%s21687_s7 + $0x57c] ss:$76 sps:$4 sm:$0xff]  }
 0x468   :  { %8266 = vmatmul.mubr.bf16.gmra.mrb[132].mxu1 %v17571_v0  ;;  %8049 = vmatprep.mubr.bf16.mxu0 %v17619_v46 }
 0x469   :  { %8275 = vmatprep.mubr.bf16.mxu1 %v17619_v46  ;;  %8341 = vmatpush1.bf16.msra.mxu0 %v14372_v62  ;;  %v14419_v62 = vld [vmem:[%s21687_s7 + $0x584] ss:$76 sps:$4 sm:$0xff]  }
 0x46a   :  { %8567 = vmatpush1.bf16.msra.mxu1 %v14375_v3  ;;  %8342 = vmatprep.subr.bf16.mxu0 %v14380_v4  ;;  %v14414_v3 = vld [vmem:[%s21687_s7 + $0x578] ss:$76 sps:$4 sm:$0xff]   ;;  %v14417_v4 = vld [vmem:[%s21687_s7 + $0x580] ss:$76 sps:$4 sm:$0xff]  }
 0x46b   :  { %8568 = vmatprep.subr.bf16.mxu1 %v14383_v5  ;;  %v14422_v5 = vld [vmem:[%s21687_s7 + $0x614] ss:$76 sps:$4 sm:$0xff]  }
 0x46d   :  { %8343 = vmatpush1.bf16.msra.mxu0 %v14378_v38  ;;  %v14425_v38 = vld [vmem:[%s21687_s7 + $0x61c] ss:$76 sps:$4 sm:$0xff]  }
 0x46e   :  { %8569 = vmatpush1.bf16.msra.mxu1 %v14381_v6  ;;  %8344 = vmatprep.subr.bf16.mxu0 %v14386_v39  ;;  %v14420_v6 = vld [vmem:[%s21687_s7 + $0x610] ss:$76 sps:$4 sm:$0xff]   ;;  %v14423_v39 = vld [vmem:[%s21687_s7 + $0x618] ss:$76 sps:$4 sm:$0xff]  }
 0x46f   :  { %8050 = vmatmul.mubr.bf16.gmra.mrb[136].mxu0 %v17615_v44  ;;  %8570 = vmatprep.subr.bf16.mxu1 %v14389_v53  ;;  %v14428_v53 = vld [vmem:[%s21687_s7 + $0x6ac] ss:$76 sps:$4 sm:$0xff]  }
 0x470   :  { %8276 = vmatmul.mubr.bf16.gmra.mrb[136].mxu1 %v17615_v44  ;;  %8059 = vmatprep.mubr.bf16.mxu0 %v17663_v28 }
 0x471   :  { %8285 = vmatprep.mubr.bf16.mxu1 %v17663_v28  ;;  %8345 = vmatpush1.bf16.msra.mxu0 %v14384_v55  ;;  %v14431_v55 = vld [vmem:[%s21687_s7 + $0x6b4] ss:$76 sps:$4 sm:$0xff]  }
 0x472   :  { %8571 = vmatpush1.bf16.msra.mxu1 %v14387_v40  ;;  %8346 = vmatprep.subr.bf16.mxu0 %v14392_v41  ;;  %v14426_v40 = vld [vmem:[%s21687_s7 + $0x6a8] ss:$76 sps:$4 sm:$0xff]   ;;  %v14429_v41 = vld [vmem:[%s21687_s7 + $0x6b0] ss:$76 sps:$4 sm:$0xff]  }
 0x473   :  { %8572 = vmatprep.subr.bf16.mxu1 %v14395_v7  ;;  %v14434_v7 = vld [vmem:[%s21687_s7 + $0x744] ss:$76 sps:$4 sm:$0xff]  }
 0x475   :  { %8347 = vmatpush1.bf16.msra.mxu0 %v14390_v56  ;;  %v14437_v56 = vld [vmem:[%s21687_s7 + $0x74c] ss:$76 sps:$4 sm:$0xff]  }
 0x476   :  { %8573 = vmatpush1.bf16.msra.mxu1 %v14393_v57  ;;  %8348 = vmatprep.subr.bf16.mxu0 %v14398_v8  ;;  %v14432_v57 = vld [vmem:[%s21687_s7 + $0x740] ss:$76 sps:$4 sm:$0xff]   ;;  %v14435_v8 = vld [vmem:[%s21687_s7 + $0x748] ss:$76 sps:$4 sm:$0xff]  }
 0x477   :  { %8060 = vmatmul.mubr.bf16.gmra.mrb[140].mxu0 %v17659_v26  ;;  %8574 = vmatprep.subr.bf16.mxu1 %v14401_v9  ;;  %v14440_v9 = vld [vmem:[%s21687_s7 + $0x7dc] ss:$76 sps:$4 sm:$0xff]  }
 0x478   :  { %8286 = vmatmul.mubr.bf16.gmra.mrb[140].mxu1 %v17659_v26  ;;  %8069 = vmatprep.mubr.bf16.mxu0 %v17707_v21 }
 0x479   :  { %8295 = vmatprep.mubr.bf16.mxu1 %v17707_v21  ;;  %8349 = vmatpush1.bf16.msra.mxu0 %v14396_v23  ;;  %v14443_v23 = vld [vmem:[%s21687_s7 + $0x7e4] ss:$76 sps:$4 sm:$0xff]  }
 0x47a   :  { %8575 = vmatpush1.bf16.msra.mxu1 %v14399_v35  ;;  %8350 = vmatprep.subr.bf16.mxu0 %v14404_v48  ;;  %v14438_v35 = vld [vmem:[%s21687_s7 + $0x7d8] ss:$76 sps:$4 sm:$0xff]   ;;  %v14441_v48 = vld [vmem:[%s21687_s7 + $0x7e0] ss:$76 sps:$4 sm:$0xff]  }
 0x47b   :  { %8576 = vmatprep.subr.bf16.mxu1 %v14407_v49  ;;  %v14446_v49 = vld [vmem:[%s21687_s7 + $0x874] ss:$76 sps:$4 sm:$0xff]  }
 0x47d   :  { %8351 = vmatpush1.bf16.msra.mxu0 %v14402_v50  ;;  %v14449_v50 = vld [vmem:[%s21687_s7 + $0x87c] ss:$76 sps:$4 sm:$0xff]  }
 0x47e   :  { %8577 = vmatpush1.bf16.msra.mxu1 %v14405_v51  ;;  %8352 = vmatprep.subr.bf16.mxu0 %v14410_v52  ;;  %v14444_v51 = vld [vmem:[%s21687_s7 + $0x870] ss:$76 sps:$4 sm:$0xff]   ;;  %v14447_v52 = vld [vmem:[%s21687_s7 + $0x878] ss:$76 sps:$4 sm:$0xff]  }
 0x47f   :  { %8070 = vmatmul.mubr.bf16.gmra.mrb[144].mxu0 %v17703_v19  ;;  %8578 = vmatprep.subr.bf16.mxu1 %v14413_v58  ;;  %v14452_v58 = vld [vmem:[%s21687_s7 + $0x90c] ss:$76 sps:$4 sm:$0xff]  }
 0x480   :  { %8296 = vmatmul.mubr.bf16.gmra.mrb[144].mxu1 %v17703_v19  ;;  %8079 = vmatprep.mubr.bf16.mxu0 %v17751_v22 }
 0x481   :  { %8305 = vmatprep.mubr.bf16.mxu1 %v17751_v22  ;;  %8353 = vmatpush1.bf16.msra.mxu0 %v14408_v59  ;;  %v14455_v59 = vld [vmem:[%s21687_s7 + $0x914] ss:$76 sps:$4 sm:$0xff]  }
 0x482   :  { %8579 = vmatpush1.bf16.msra.mxu1 %v14411_v60  ;;  %8354 = vmatprep.subr.bf16.mxu0 %v14416_v61  ;;  %v14450_v60 = vld [vmem:[%s21687_s7 + $0x908] ss:$76 sps:$4 sm:$0xff]   ;;  %v14453_v61 = vld [vmem:[%s21687_s7 + $0x910] ss:$76 sps:$4 sm:$0xff]  }
 0x483   :  { %8580 = vmatprep.subr.bf16.mxu1 %v14419_v62  ;;  %v14458_v62 = vld [vmem:[%s21687_s7 + $0x9a4] ss:$76 sps:$4 sm:$0xff]  }
 0x485   :  { %8355 = vmatpush1.bf16.msra.mxu0 %v14414_v3  ;;  %v14461_v3 = vld [vmem:[%s21687_s7 + $0x9ac] ss:$76 sps:$4 sm:$0xff]  }
 0x486   :  { %8581 = vmatpush1.bf16.msra.mxu1 %v14417_v4  ;;  %8356 = vmatprep.subr.bf16.mxu0 %v14422_v5  ;;  %v14456_v4 = vld [vmem:[%s21687_s7 + $0x9a0] ss:$76 sps:$4 sm:$0xff]   ;;  %v14459_v5 = vld [vmem:[%s21687_s7 + $0x9a8] ss:$76 sps:$4 sm:$0xff]  }
 0x487   :  { %8080 = vmatmul.mubr.bf16.gmra.mrb[148].mxu0 %v17747_v11  ;;  %8582 = vmatprep.subr.bf16.mxu1 %v14425_v38  ;;  %v14464_v38 = vld [vmem:[%s21687_s7 + $0xa3c] ss:$76 sps:$4 sm:$0xff]  }
 0x488   :  { %8306 = vmatmul.mubr.bf16.gmra.mrb[148].mxu1 %v17747_v11  ;;  %8089 = vmatprep.mubr.bf16.mxu0 %v17795_v31 }
 0x489   :  { %8315 = vmatprep.mubr.bf16.mxu1 %v17795_v31  ;;  %8357 = vmatpush1.bf16.msra.mxu0 %v14420_v6  ;;  %v14467_v6 = vld [vmem:[%s21687_s7 + $0xa44] ss:$76 sps:$4 sm:$0xff]  }
 0x48a   :  { %8583 = vmatpush1.bf16.msra.mxu1 %v14423_v39  ;;  %8358 = vmatprep.subr.bf16.mxu0 %v14428_v53  ;;  %v14462_v39 = vld [vmem:[%s21687_s7 + $0xa38] ss:$76 sps:$4 sm:$0xff]   ;;  %v14465_v53 = vld [vmem:[%s21687_s7 + $0xa40] ss:$76 sps:$4 sm:$0xff]  }
 0x48b   :  { %8584 = vmatprep.subr.bf16.mxu1 %v14431_v55  ;;  %v14470_v55 = vld [vmem:[%s21687_s7 + $0xad4] ss:$76 sps:$4 sm:$0xff]  }
 0x48d   :  { %8359 = vmatpush1.bf16.msra.mxu0 %v14426_v40  ;;  %v14473_v40 = vld [vmem:[%s21687_s7 + $0xadc] ss:$76 sps:$4 sm:$0xff]  }
 0x48e   :  { %8585 = vmatpush1.bf16.msra.mxu1 %v14429_v41  ;;  %8360 = vmatprep.subr.bf16.mxu0 %v14434_v7  ;;  %v14468_v41 = vld [vmem:[%s21687_s7 + $0xad0] ss:$76 sps:$4 sm:$0xff]   ;;  %v14471_v7 = vld [vmem:[%s21687_s7 + $0xad8] ss:$76 sps:$4 sm:$0xff]  }
 0x48f   :  { %8090 = vmatmul.mubr.bf16.gmra.mrb[152].mxu0 %v17791_v29  ;;  %8586 = vmatprep.subr.bf16.mxu1 %v14437_v56  ;;  %v14476_v56 = vld [vmem:[%s21687_s7 + $0xb6c] ss:$76 sps:$4 sm:$0xff]  }
 0x490   :  { %8316 = vmatmul.mubr.bf16.gmra.mrb[152].mxu1 %v17791_v29  ;;  %8099 = vmatprep.mubr.bf16.mxu0 %v17839_v47 }
 0x491   :  { %8325 = vmatprep.mubr.bf16.mxu1 %v17839_v47  ;;  %8361 = vmatpush1.bf16.msra.mxu0 %v14432_v57  ;;  %v14479_v57 = vld [vmem:[%s21687_s7 + $0xb74] ss:$76 sps:$4 sm:$0xff]  }
 0x492   :  { %8587 = vmatpush1.bf16.msra.mxu1 %v14435_v8  ;;  %8362 = vmatprep.subr.bf16.mxu0 %v14440_v9  ;;  %v14474_v8 = vld [vmem:[%s21687_s7 + $0xb68] ss:$76 sps:$4 sm:$0xff]   ;;  %v4259_v9 = vld [vmem:[%s21691_s8] sm:$0xff] }
 0x493   :  { %8588 = vmatprep.subr.bf16.mxu1 %v14443_v23  ;;  %v14477_v23 = vld [vmem:[%s21687_s7 + $0xb70] ss:$76 sps:$4 sm:$0xff]  }
 0x495   :  { %8363 = vmatpush1.bf16.msra.mxu0 %v14438_v35  ;;  %v14482_v35 = vld [vmem:[%s21687_s7 + $0xc04] ss:$76 sps:$4 sm:$0xff]  }
 0x496   :  { %8589 = vmatpush1.bf16.msra.mxu1 %v14441_v48  ;;  %8364 = vmatprep.subr.bf16.mxu0 %v14446_v49  ;;  %v14485_v48 = vld [vmem:[%s21687_s7 + $0xc0c] ss:$76 sps:$4 sm:$0xff]   ;;  %v18603_v49 = vrot.slane %v4259_v9, %v17039_v33 }
 0x497   :  { %8100 = vmatmul.mubr.bf16.gmra.mrb[156].mxu0 %v17835_v43  ;;  %8590 = vmatprep.subr.bf16.mxu1 %v14449_v50  ;;  %v14480_v50 = vld [vmem:[%s21687_s7 + $0xc00] ss:$76 sps:$4 sm:$0xff]  }
 0x498   :  { %8326 = vmatmul.mubr.bf16.gmra.mrb[156].mxu1 %v17835_v43  ;;  %8368 = vmatprep.mubr.bf16.mxu0 %v17529_v17 }
 0x499   :  { %8365 = vmatpush1.bf16.msra.mxu0 %v14444_v51  ;;  %8594 = vmatprep.mubr.bf16.mxu1 %v17529_v17  ;;  %v18609_v51 = vrot.slane %v4259_v9, %v17042_v34 }
 0x49a   :  { %8591 = vmatpush1.bf16.msra.mxu1 %v14447_v52  ;;  %8366 = vmatprep.subr.bf16.mxu0 %v14452_v58  ;;  %v18612_v52 = vrot.slane %v4259_v9, %v17048_v36  ;;  %v14483_v58 = vld [vmem:[%s21687_s7 + $0xc08] ss:$76 sps:$4 sm:$0xff]  }
 0x49b   :  { %8592 = vmatprep.subr.bf16.mxu1 %v14455_v59  ;;  %v18618_v59 = vrot.slane %v4259_v9, %v17051_v37 }
 0x49d   :  { %8367 = vmatpush1.bf16.msra.mxu0 %v14450_v60  ;;  %v14488_v60 = vld [vmem:[%s21687_s7 + $0xc9c] ss:$76 sps:$4 sm:$0xff]  }
 0x49e   :  { %8593 = vmatpush1.bf16.msra.mxu1 %v14453_v61  ;;  %8449 = vmatprep.subr.bf16.mxu0 %v14458_v62  ;;  %v14491_v62 = vld [vmem:[%s21687_s7 + $0xca4] ss:$76 sps:$4 sm:$0xff]  }
 0x49f   :  { %8675 = vmatprep.subr.bf16.mxu1 %v14461_v3 }
 0x4a0   :  { %8369 = vmatmul.mubr.bf16.vlgmr.msra.gmra.mrb[160].mxu0 %v17525_v14 }
 0x4a1   :  { %8595 = vmatmul.mubr.bf16.vlgmr.msra.gmra.mrb[160].mxu1 %v17525_v14  ;;  %8378 = vmatprep.mubr.bf16.mxu0 %v17573_v1 }
 0x4a2   :  { %8450 = vmatpush1.bf16.msra.mxu0 %v14456_v4  ;;  %8604 = vmatprep.mubr.bf16.mxu1 %v17573_v1 }
 0x4a3   :  { %8676 = vmatpush1.bf16.msra.mxu1 %v14459_v5  ;;  %8451 = vmatprep.subr.bf16.mxu0 %v14464_v38  ;;  %v14486_v38 = vld [vmem:[%s21687_s7 + $0xc98] ss:$76 sps:$4 sm:$0xff]  }
 0x4a4   :  { %8677 = vmatprep.subr.bf16.mxu1 %v14467_v6 }
 0x4a6   :  { %8452 = vmatpush1.bf16.msra.mxu0 %v14462_v39 }
 0x4a7   :  { %8678 = vmatpush1.bf16.msra.mxu1 %v14465_v53  ;;  %8453 = vmatprep.subr.bf16.mxu0 %v14470_v55  ;;  %v14489_v55 = vld [vmem:[%s21687_s7 + $0xca0] ss:$76 sps:$4 sm:$0xff]  }
 0x4a8   :  { %8379 = vmatmul.mubr.bf16.gmra.mrb[164].mxu0 %v17569_v63  ;;  %8679 = vmatprep.subr.bf16.mxu1 %v14473_v40 }
 0x4a9   :  { %8605 = vmatmul.mubr.bf16.gmra.mrb[164].mxu1 %v17569_v63  ;;  %8388 = vmatprep.mubr.bf16.mxu0 %v17617_v45 }
 0x4aa   :  { %8454 = vmatpush1.bf16.msra.mxu0 %v14468_v41  ;;  %8614 = vmatprep.mubr.bf16.mxu1 %v17617_v45  ;;  %v14494_v41 = vld [vmem:[%s21687_s7 + $0xd34] ss:$76 sps:$4 sm:$0xff]  }
 0x4ab   :  { %8680 = vmatpush1.bf16.msra.mxu1 %v14471_v7  ;;  %8455 = vmatprep.subr.bf16.mxu0 %v14476_v56 }
 0x4ac   :  { %8681 = vmatprep.subr.bf16.mxu1 %v14479_v57 }
 0x4ae   :  { %8456 = vmatpush1.bf16.msra.mxu0 %v14474_v8 }
 0x4af   :  { %8682 = vmatpush1.bf16.msra.mxu1 %v14477_v23  ;;  %8457 = vmatprep.subr.bf16.mxu0 %v14482_v35  ;;  %v14497_v23 = vld [vmem:[%s21687_s7 + $0xd3c] ss:$76 sps:$4 sm:$0xff]  }
 0x4b0   :  { %8389 = vmatmul.mubr.bf16.gmra.mrb[168].mxu0 %v17613_v15  ;;  %8683 = vmatprep.subr.bf16.mxu1 %v14485_v48  ;;  %v7579_v61 = vpop.f32.mrb[96].mxu0 }
 0x4b1   :  { %8615 = vmatmul.mubr.bf16.gmra.mrb[168].mxu1 %v17613_v15  ;;  %8398 = vmatprep.mubr.bf16.mxu0 %v17661_v27  ;;  %v12753_v3 = vadd.f32 %v7579_v61, %v18603_v49  ;;  %v7805_v4 = vpop.f32.mrb[96].mxu1  ;;  %v7581_v5 = vpop.f32.mrb[97].mxu0 }
 0x4b2   :  { %8458 = vmatpush1.bf16.msra.mxu0 %v14480_v50  ;;  %8624 = vmatprep.mubr.bf16.mxu1 %v17661_v27  ;;  %v12785_v6 = vadd.f32 %v7805_v4, %v18609_v51  ;;  %v12754_v39 = vadd.f32 %v7581_v5, %v18612_v52  ;;  %v7807_v53 = vpop.f32.mrb[97].mxu1  ;;  %v7583_v40 = vpop.f32.mrb[98].mxu0 }
 0x4b3   :  { %8684 = vmatpush1.bf16.msra.mxu1 %v14483_v58  ;;  %v9660_v7 = vsub.f32 0.0, %v12753_v3  ;;  %v12786_v56 = vadd.f32 %v7807_v53, %v18618_v59  ;;  %8459 = vmatprep.subr.bf16.mxu0 %v14488_v60  ;;  %v12755_v57 = vadd.f32 %v7583_v40, %v18603_v49  ;;  %v7809_v8 = vpop.f32.mrb[98].mxu1  ;;  %v7585_v9 = vpop.f32.mrb[99].mxu0  ;;  %v14492_v60 = vld [vmem:[%s21687_s7 + $0xd30] ss:$76 sps:$4 sm:$0xff]  }
 0x4b4   :  { %v9662_v35 = vsub.f32 0.0, %v12785_v6  ;;  %v9661_v48 = vsub.f32 0.0, %v12754_v39  ;;  %8685 = vmatprep.subr.bf16.mxu1 %v14491_v62  ;;  %v12787_v50 = vadd.f32 %v7809_v8, %v18609_v51  ;;  %v12756_v61 = vadd.f32 %v7585_v9, %v18612_v52  ;;  %v7811_v58 = vpop.f32.mrb[99].mxu1  ;;  %v14495_v6 = vld [vmem:[%s21687_s7 + $0xd38] ss:$76 sps:$4 sm:$0xff]  }
 0x4b5   :  { %v9964_v3 = vmul.f32 1.442695, %v9660_v7  ;;  %v9663_v4 = vsub.f32 0.0, %v12786_v56  ;;  %v9679_v5 = vsub.f32 0.0, %v12755_v57  ;;  %v12788_v53 = vadd.f32 %v7811_v58, %v18618_v59  ;;  %v14500_v62 = vld [vmem:[%s21687_s7 + $0xdcc] ss:$76 sps:$4 sm:$0xff]  }
 0x4b6   :  { %v9968_v39 = vmul.f32 1.442695, %v9662_v35  ;;  %v9966_v40 = vmul.f32 1.442695, %v9661_v48  ;;  %v9681_v8 = vsub.f32 0.0, %v12787_v50  ;;  %8460 = vmatpush1.bf16.msra.mxu0 %v14486_v38  ;;  %v9680_v9 = vsub.f32 0.0, %v12756_v61 }
 0x4b7   :  { %14872 = vpow2.f32 %v9964_v3  ;;  %v9970_v37 = vmul.f32 1.442695, %v9663_v4  ;;  %v10002_v7 = vmul.f32 1.442695, %v9679_v5  ;;  %8686 = vmatpush1.bf16.msra.mxu1 %v14489_v55  ;;  %v9682_v56 = vsub.f32 0.0, %v12788_v53  ;;  %8461 = vmatprep.subr.bf16.mxu0 %v14494_v41 }
 0x4b8   :  { %14874 = vpow2.f32 %v9968_v39  ;;  %v10006_v57 = vmul.f32 1.442695, %v9681_v8  ;;  %8399 = vmatmul.mubr.bf16.gmra.mrb[172].mxu0 %v17657_v25  ;;  %8687 = vmatprep.subr.bf16.mxu1 %v14497_v23  ;;  %v7589_v58 = vpop.f32.mrb[100].mxu0  ;;  %v14503_v35 = vld [vmem:[%s21687_s7 + $0xdd4] ss:$76 sps:$4 sm:$0xff]  }
 0x4b9   :  { %14876 = vpow2.f32 %v9966_v40  ;;  %v10004_v48 = vmul.f32 1.442695, %v9680_v9  ;;  %8625 = vmatmul.mubr.bf16.gmra.mrb[172].mxu1 %v17657_v25  ;;  %8408 = vmatprep.mubr.bf16.mxu0 %v17705_v20  ;;  %v12757_v38 = vadd.f32 %v7589_v58, %v18603_v49  ;;  %v7815_v55 = vpop.f32.mrb[100].mxu1  ;;  %v7591_v41 = vpop.f32.mrb[101].mxu0  ;;  %v14498_v50 = vld [vmem:[%s21687_s7 + $0xdc8] ss:$76 sps:$4 sm:$0xff]  }
 0x4ba   :  { %14878 = vpow2.f32 %v9970_v37  ;;  %v10008_v23 = vmul.f32 1.442695, %v9682_v56  ;;  %8462 = vmatpush1.bf16.msra.mxu0 %v14492_v60  ;;  %8634 = vmatprep.mubr.bf16.mxu1 %v17705_v20  ;;  %v12789_v61 = vadd.f32 %v7815_v55, %v18609_v51  ;;  %v12758_v3 = vadd.f32 %v7591_v41, %v18612_v52  ;;  %v7817_v4 = vpop.f32.mrb[101].mxu1  ;;  %v14501_v5 = vld [vmem:[%s21687_s7 + $0xdd0] ss:$76 sps:$4 sm:$0xff]   ;;  %v7593_v53 = vpop.f32.mrb[102].mxu0 }
 0x4bb   :  { %14880 = vpow2.f32 %v10002_v7  ;;  %8688 = vmatpush1.bf16.msra.mxu1 %v14495_v6  ;;  %v9698_v39 = vsub.f32 0.0, %v12757_v38  ;;  %v12790_v40 = vadd.f32 %v7817_v4, %v18618_v59  ;;  %8463 = vmatprep.subr.bf16.mxu0 %v14500_v62  ;;  %v12759_v37 = vadd.f32 %v7593_v53, %v18603_v49  ;;  %v7819_v60 = vpop.f32.mrb[102].mxu1  ;;  %v7595_v8 = vpop.f32.mrb[103].mxu0  ;;  %v14506_v9 = vld [vmem:[%s21687_s7 + $0xe64] ss:$76 sps:$4 sm:$0xff]  }
 0x4bc   :  { %14882 = vpow2.f32 %v10006_v57  ;;  %v9700_v56 = vsub.f32 0.0, %v12789_v61  ;;  %v9699_v58 = vsub.f32 0.0, %v12758_v3  ;;  %8689 = vmatprep.subr.bf16.mxu1 %v14503_v35  ;;  %v7821_v55 = vpop.f32.mrb[103].mxu1  ;;  %v14509_v6 = vld [vmem:[%s21687_s7 + $0xe6c] ss:$76 sps:$4 sm:$0xff]  }
 0x4bd   :  { %14884 = vpow2.f32 %v10004_v48  ;;  %v10040_v7 = vmul.f32 1.442695, %v9698_v39  ;;  %v9701_v62 = vsub.f32 0.0, %v12790_v40  ;;  %v9717_v38 = vsub.f32 0.0, %v12759_v37  ;;  %v14504_v41 = vld [vmem:[%s21687_s7 + $0xe60] ss:$76 sps:$4 sm:$0xff]  }
 0x4be   :  { %14886 = vpow2.f32 %v10008_v23  ;;  %v10044_v4 = vmul.f32 1.442695, %v9700_v56  ;;  %v10042_v53 = vmul.f32 1.442695, %v9699_v58  ;;  %8464 = vmatpush1.bf16.msra.mxu0 %v14498_v50  ;;  %v14507_v57 = vld [vmem:[%s21687_s7 + $0xe68] ss:$76 sps:$4 sm:$0xff]   ;;  %v12791_v39 = vadd.f32 %v7819_v60, %v18609_v51 }
 0x4bf   :  { %14888 = vpow2.f32 %v10040_v7  ;;  %v10046_v35 = vmul.f32 1.442695, %v9701_v62  ;;  %v10078_v61 = vmul.f32 1.442695, %v9717_v38  ;;  %8690 = vmatpush1.bf16.msra.mxu1 %v14501_v5  ;;  %8465 = vmatprep.subr.bf16.mxu0 %v14506_v9  ;;  %v14512_v48 = vld [vmem:[%s21687_s7 + $0xefc] ss:$76 sps:$4 sm:$0xff]   ;;  %v12760_v38 = vadd.f32 %v7595_v8, %v18612_v52 }
 0x4c0   :  { %14890 = vpow2.f32 %v10044_v4  ;;  %8409 = vmatmul.mubr.bf16.gmra.mrb[176].mxu0 %v17701_v13  ;;  %8691 = vmatprep.subr.bf16.mxu1 %v14509_v6  ;;  %v7599_v23 = vpop.f32.mrb[104].mxu0  ;;  %v14515_v50 = vld [vmem:[%s21687_s7 + $0xf04] ss:$76 sps:$4 sm:$0xff]   ;;  %v14513_v60 = vld [vmem:[%s21687_s7 + $0xf00] ss:$76 sps:$4 sm:$0xff]   ;;  %v18726_v33 = vadd.f32 %v7821_v55, %v18618_v59 }
 0x4c1   :  { %v14873_v3 = vpop.eup %14872  ;;  %14892 = vpow2.f32 %v10042_v53  ;;  %8635 = vmatmul.mubr.bf16.gmra.mrb[176].mxu1 %v17701_v13  ;;  %8418 = vmatprep.mubr.bf16.mxu0 %v17749_v12  ;;  %v7825_v5 = vpop.f32.mrb[104].mxu1  ;;  %v14510_v37 = vld [vmem:[%s21687_s7 + $0xef8] ss:$76 sps:$4 sm:$0xff]   ;;  %v14518_v53 = vld [vmem:[%s21687_s7 + $0xf94] ss:$76 sps:$4 sm:$0xff]  }
 0x4c2   :  { %v18699_v40 = vpop.f32.mrb[105].mxu0  ;;  %v14875_v9 = vpop.eup %14874  ;;  %v10572_v56 = vadd.f32 1.0, %v14873_v3  ;;  %14894 = vpow2.f32 %v10046_v35  ;;  %8466 = vmatpush1.bf16.msra.mxu0 %v14504_v41  ;;  %8644 = vmatprep.mubr.bf16.mxu1 %v17749_v12  ;;  %v14521_v8 = vld [vmem:[%s21687_s7 + $0xf9c] ss:$76 sps:$4 sm:$0xff]   ;;  %v9718_v12 = vsub.f32 0.0, %v12760_v38 }
 0x4c3   :  { %v18705_v58 = vpop.f32.mrb[105].mxu1  ;;  %v18710_v6 = vpop.f32.mrb[106].mxu0  ;;  %v10574_v62 = vadd.f32 1.0, %v14875_v9  ;;  %14896 = vpow2.f32 %v10078_v61  ;;  %8692 = vmatpush1.bf16.msra.mxu1 %v14507_v57  ;;  %8467 = vmatprep.subr.bf16.mxu0 %v14512_v48  ;;  %v9719_v48 = vsub.f32 0.0, %v12791_v39  ;;  %v14519_v39 = vld [vmem:[%s21687_s7 + $0xf98] ss:$76 sps:$4 sm:$0xff]  }
 0x4c4   :  { %v14877_v7 = vpop.eup %14876  ;;  %v18713_v4 = vpop.f32.mrb[106].mxu1  ;;  %14898 = vrcp.f32 %v10572_v56  ;;  %8693 = vmatprep.subr.bf16.mxu1 %v14515_v50  ;;  %v14516_v50 = vld [vmem:[%s21687_s7 + $0xf90] ss:$76 sps:$4 sm:$0xff]   ;;  %v14524_v55 = vld [vmem:[%s21687_s7 + $0x102c] ss:$76 sps:$4 sm:$0xff]  }
 0x4c5   :  { %v18715_v41 = vpop.f32.mrb[107].mxu0  ;;  %v14879_v35 = vpop.eup %14878  ;;  %v10573_v3 = vadd.f32 1.0, %v14877_v7  ;;  %14900 = vrcp.f32 %v10574_v62  ;;  %v14530_v13 = vld [vmem:[%s21687_s7 + $0x10c4] ss:$76 sps:$4 sm:$0xff]  }
 0x4c6   :  { %v18720_v36 = vpop.f32.mrb[107].mxu1  ;;  %v14881_v57 = vpop.eup %14880  ;;  %v10575_v61 = vadd.f32 1.0, %v14879_v35  ;;  %8468 = vmatpush1.bf16.msra.mxu0 %v14510_v37  ;;  %v18738_v35 = vadd.f32 %v7599_v23, %v18603_v49  ;;  %v18752_v23 = vadd.f32 %v7825_v5, %v18609_v51  ;;  %v18766_v5 = vadd.f32 %v18699_v40, %v18612_v52 }
 0x4c7   :  { %v14883_v9 = vpop.eup %14882  ;;  %14902 = vrcp.f32 %v10573_v3  ;;  %v10591_v34 = vadd.f32 1.0, %v14881_v57  ;;  %8694 = vmatpush1.bf16.msra.mxu1 %v14513_v60  ;;  %8469 = vmatprep.subr.bf16.mxu0 %v14518_v53  ;;  %v14522_v60 = vld [vmem:[%s21687_s7 + $0x1028] ss:$76 sps:$4 sm:$0xff]   ;;  %v18749_v57 = vmul.f32 1.442695, %v9719_v48  ;;  %v9720_v48 = vsub.f32 0.0, %v18726_v33 }
 0x4c8   :  { %v14885_v56 = vpop.eup %14884  ;;  %14904 = vrcp.f32 %v10575_v61  ;;  %v10593_v7 = vadd.f32 1.0, %v14883_v9  ;;  %8419 = vmatmul.mubr.bf16.gmra.mrb[180].mxu0 %v17745_v10  ;;  %8695 = vmatprep.subr.bf16.mxu1 %v14521_v8  ;;  %v18741_v38 = vpop.f32.mrb[108].mxu0  ;;  %v14527_v53 = vld [vmem:[%s21687_s7 + $0x1034] ss:$76 sps:$4 sm:$0xff]   ;;  %v14525_v9 = vld [vmem:[%s21687_s7 + $0x1030] ss:$76 sps:$4 sm:$0xff]   ;;  %v18778_v33 = vadd.f32 %v18705_v58, %v18618_v59  ;;  %v18805_v15 = vadd.f32 %v18715_v41, %v18612_v52 }
 0x4c9   :  { %v14887_v62 = vpop.eup %14886  ;;  %14906 = vrcp.f32 %v10591_v34  ;;  %v10592_v37 = vadd.f32 1.0, %v14885_v56  ;;  %8645 = vmatmul.mubr.bf16.gmra.mrb[180].mxu1 %v17745_v10  ;;  %8428 = vmatprep.mubr.bf16.mxu0 %v17793_v30  ;;  %v18756_v8 = vpop.f32.mrb[108].mxu1  ;;  %v9736_v27 = vsub.f32 0.0, %v18738_v35  ;;  %v14533_v58 = vld [vmem:[%s21687_s7 + $0x10cc] ss:$76 sps:$4 sm:$0xff]   ;;  %v18819_v41 = vadd.f32 %v18720_v36, %v18618_v59 }
 0x4ca   :  { %v14889_v3 = vpop.eup %14888  ;;  %14908 = vrcp.f32 %v10593_v7  ;;  %v10594_v34 = vadd.f32 1.0, %v14887_v62  ;;  %v18758_v61 = vpop.f32.mrb[109].mxu0  ;;  %8470 = vmatpush1.bf16.msra.mxu0 %v14516_v50  ;;  %8654 = vmatprep.mubr.bf16.mxu1 %v17793_v30 }
 0x4cb   :  { %v14891_v56 = vpop.eup %14890  ;;  %14910 = vrcp.f32 %v10592_v37  ;;  %v10610_v7 = vadd.f32 1.0, %v14889_v3  ;;  %v18769_v62 = vpop.f32.mrb[109].mxu1  ;;  %v10080_v3 = vmul.f32 1.442695, %v9718_v12  ;;  %8696 = vmatpush1.bf16.msra.mxu1 %v14519_v39  ;;  %8471 = vmatprep.subr.bf16.mxu0 %v14524_v55 }
 0x4cc   :  { %v18771_v10 = vpop.f32.mrb[110].mxu0  ;;  %v14893_v20 = vpop.eup %14892  ;;  %14912 = vrcp.f32 %v10594_v34  ;;  %v10612_v37 = vadd.f32 1.0, %v14891_v56  ;;  %v18787_v34 = vadd.f32 %v18710_v6, %v18603_v49  ;;  %8697 = vmatprep.subr.bf16.mxu1 %v14527_v53  ;;  %v9738_v56 = vsub.f32 0.0, %v18752_v23  ;;  %v14528_v6 = vld [vmem:[%s21687_s7 + $0x10c0] ss:$76 sps:$4 sm:$0xff]  }
 0x4cd   :  { %v18780_v40 = vpop.f32.mrb[110].mxu1  ;;  %v18782_v50 = vpop.f32.mrb[111].mxu0  ;;  %14914 = vrcp.f32 %v10610_v7  ;;  %v10611_v25 = vadd.f32 1.0, %v14893_v20  ;;  %v18797_v20 = vadd.f32 %v18713_v4, %v18609_v51  ;;  %v9737_v7 = vsub.f32 0.0, %v18766_v5  ;;  %v14536_v4 = vld [vmem:[%s21687_s7 + $0x115c] ss:$76 sps:$4 sm:$0xff]  }
 0x4ce   :  { %v14895_v30 = vpop.eup %14894  ;;  %v18789_v12 = vpop.f32.mrb[111].mxu1  ;;  %14916 = vrcp.f32 %v10612_v37  ;;  %8472 = vmatpush1.bf16.msra.mxu0 %v14522_v60  ;;  %v9739_v5 = vsub.f32 0.0, %v18778_v33  ;;  %v14539_v60 = vld [vmem:[%s21687_s7 + $0x1164] ss:$76 sps:$4 sm:$0xff]   ;;  %v18830_v33 = vadd.f32 %v18741_v38, %v18603_v49 }
 0x4cf   :  { %v14897_v39 = vpop.eup %14896  ;;  %v10613_v55 = vadd.f32 1.0, %v14895_v30  ;;  %14918 = vrcp.f32 %v10611_v25  ;;  %v14531_v30 = vld [vmem:[%s21687_s7 + $0x10c8] ss:$76 sps:$4 sm:$0xff]   ;;  %v10084_v25 = vmul.f32 1.442695, %v9720_v48  ;;  %8698 = vmatpush1.bf16.msra.mxu1 %v14525_v9  ;;  %8473 = vmatprep.subr.bf16.mxu0 %v14530_v13  ;;  %v9755_v48 = vsub.f32 0.0, %v18787_v34 }
 0x4d0   :  { %v14899_v35 = vpop.eup %14898  ;;  %v10629_v53 = vadd.f32 1.0, %v14897_v39  ;;  %v10116_v39 = vmul.f32 1.442695, %v9736_v27  ;;  %8429 = vmatmul.mubr.bf16.gmra.mrb[184].mxu0 %v17789_v24  ;;  %8699 = vmatprep.subr.bf16.mxu1 %v14533_v58  ;;  %v18833_v36 = vpop.f32.mrb[112].mxu0  ;;  %v14534_v13 = vld [vmem:[%s21687_s7 + $0x1158] ss:$76 sps:$4 sm:$0xff]   ;;  %v18845_v34 = vadd.f32 %v18756_v8, %v18609_v51 }
 0x4d1   :  { %v14901_v23 = vpop.eup %14900  ;;  %11180 = vst [vmem:[%s21692_s9] sm:$0xff] %v14899_v35  ;;  %14920 = vrcp.f32 %v10613_v55  ;;  %v10120_v27 = vmul.f32 1.442695, %v9738_v56  ;;  %v9757_v38 = vsub.f32 0.0, %v18797_v20  ;;  %8655 = vmatmul.mubr.bf16.gmra.mrb[184].mxu1 %v17789_v24  ;;  %8438 = vmatprep.mubr.bf16.mxu0 %v17837_v54  ;;  %v18849_v58 = vpop.f32.mrb[112].mxu1  ;;  %v14537_v35 = vld [vmem:[%s21687_s7 + $0x1160] ss:$76 sps:$4 sm:$0xff]  }
 0x4d2   :  { %v14903_v37 = vpop.eup %14902  ;;  %11182 = vst [vmem:[%s21692_s9 + $0x10] sm:$0xff] %v14901_v23  ;;  %14922 = vrcp.f32 %v10629_v53  ;;  %v18851_v55 = vpop.f32.mrb[113].mxu0  ;;  %v10118_v8 = vmul.f32 1.442695, %v9737_v7  ;;  %v9756_v20 = vsub.f32 0.0, %v18805_v15  ;;  %8474 = vmatpush1.bf16.msra.mxu0 %v14528_v6  ;;  %8664 = vmatprep.mubr.bf16.mxu1 %v17837_v54  ;;  %v9774_v54 = vsub.f32 0.0, %v18830_v33 }
 0x4d3   :  { %v14905_v9 = vpop.eup %14904  ;;  %11181 = vst [vmem:[%s21692_s9 + $0x8] sm:$0xff] %v14903_v37  ;;  %14924 = vpow2.f32 %v18749_v57  ;;  %v14542_v57 = vld [vmem:[%s21687_s7 + $0x11f4] ss:$76 sps:$4 sm:$0xff]   ;;  %v18864_v53 = vpop.f32.mrb[113].mxu1  ;;  %v10122_v24 = vmul.f32 1.442695, %v9739_v5  ;;  %8700 = vmatpush1.bf16.msra.mxu1 %v14531_v30  ;;  %8475 = vmatprep.subr.bf16.mxu0 %v14536_v4 }
 0x4d4   :  { %v14907_v56 = vpop.eup %14906  ;;  %11183 = vst [vmem:[%s21692_s9 + $0x18] sm:$0xff] %v14905_v9  ;;  %14926 = vpow2.f32 %v10080_v3  ;;  %v18866_v23 = vpop.f32.mrb[114].mxu0  ;;  %v9758_v9 = vsub.f32 0.0, %v18819_v41  ;;  %v10154_v7 = vmul.f32 1.442695, %v9755_v48  ;;  %8701 = vmatprep.subr.bf16.mxu1 %v14539_v60  ;;  %v9776_v41 = vsub.f32 0.0, %v18845_v34 }
 0x4d5   :  { %v14909_v37 = vpop.eup %14908  ;;  %11199 = vst [vmem:[%s21692_s9 + $0x98] sm:$0xff] %v14907_v56  ;;  %14928 = vpow2.f32 %v10084_v25  ;;  %v18872_v3 = vpop.f32.mrb[114].mxu1  ;;  %v14545_v30 = vld [vmem:[%s21687_s7 + $0x11fc] ss:$76 sps:$4 sm:$0xff]   ;;  %v10158_v5 = vmul.f32 1.442695, %v9757_v38 }
 0x4d6   :  { %v18874_v15 = vpop.f32.mrb[115].mxu0  ;;  %v14911_v6 = vpop.eup %14910  ;;  %11201 = vst [vmem:[%s21692_s9 + $0xa8] sm:$0xff] %v14909_v37  ;;  %14930 = vpow2.f32 %v10116_v39  ;;  %v10156_v60 = vmul.f32 1.442695, %v9756_v20  ;;  %8476 = vmatpush1.bf16.msra.mxu0 %v14534_v13  ;;  %v14540_v48 = vld [vmem:[%s21687_s7 + $0x11f0] ss:$76 sps:$4 sm:$0xff]  }
 0x4d7   :  { %v18880_v25 = vpop.f32.mrb[115].mxu1  ;;  %v14913_v4 = vpop.eup %14912  ;;  %11200 = vst [vmem:[%s21692_s9 + $0xa0] sm:$0xff] %v14911_v6  ;;  %14932 = vpow2.f32 %v10120_v27  ;;  %v10160_v27 = vmul.f32 1.442695, %v9758_v9  ;;  %8702 = vmatpush1.bf16.msra.mxu1 %v14537_v35  ;;  %8477 = vmatprep.subr.bf16.mxu0 %v14542_v57  ;;  %v14543_v38 = vld [vmem:[%s21687_s7 + $0x11f8] ss:$76 sps:$4 sm:$0xff]  }
 0x4d8   :  { %v14915_v39 = vpop.eup %14914  ;;  %11202 = vst [vmem:[%s21692_s9 + $0xb0] sm:$0xff] %v14913_v4  ;;  %14934 = vpow2.f32 %v10118_v8  ;;  %v14548_v13 = vld [vmem:[%s21687_s7 + $0x128c] ss:$76 sps:$4 sm:$0xff]   ;;  %v10192_v56 = vmul.f32 1.442695, %v9774_v54  ;;  %8439 = vmatmul.mubr.bf16.gmra.mrb[188].mxu0 %v17833_v42  ;;  %8703 = vmatprep.subr.bf16.mxu1 %v14545_v30  ;;  %v12766_v4 = vadd.f32 %v18758_v61, %v18612_v52 }
 0x4d9   :  { %v14917_v33 = vpop.eup %14916  ;;  %11218 = vst [vmem:[%s21692_s9 + $0x130] sm:$0xff] %v14915_v39  ;;  %14936 = vpow2.f32 %v10122_v24  ;;  %v18908_v24 = vpop.f32.mrb[116].mxu0  ;;  %v14551_v35 = vld [vmem:[%s21687_s7 + $0x1294] ss:$76 sps:$4 sm:$0xff]   ;;  %v10196_v8 = vmul.f32 1.442695, %v9776_v41  ;;  %8665 = vmatmul.mubr.bf16.gmra.mrb[188].mxu1 %v17833_v42  ;;  %8481 = vmatprep.mubr.bf16.mxu0 %v17531_v18  ;;  %v18983_v42 = vadd.f32 %v18780_v40, %v18609_v51  ;;  %v18998_v40 = vadd.f32 %v18782_v50, %v18612_v52 }
 0x4da   :  { %v14919_v34 = vpop.eup %14918  ;;  %11220 = vst [vmem:[%s21692_s9 + $0x140] sm:$0xff] %v14917_v33  ;;  %14938 = vpow2.f32 %v10154_v7  ;;  %v18918_v54 = vpop.f32.mrb[116].mxu1  ;;  %8478 = vmatpush1.bf16.msra.mxu0 %v14540_v48  ;;  %8707 = vmatprep.mubr.bf16.mxu1 %v17531_v18  ;;  %v14546_v6 = vld [vmem:[%s21687_s7 + $0x1288] ss:$76 sps:$4 sm:$0xff]  }
 0x4db   :  { %v14921_v57 = vpop.eup %14920  ;;  %11219 = vst [vmem:[%s21692_s9 + $0x138] sm:$0xff] %v14919_v34  ;;  %14940 = vpow2.f32 %v10158_v5  ;;  %v18920_v20 = vpop.f32.mrb[117].mxu0  ;;  %8704 = vmatpush1.bf16.msra.mxu1 %v14543_v38  ;;  %8479 = vmatprep.subr.bf16.mxu0 %v14548_v13  ;;  %v14549_v5 = vld [vmem:[%s21687_s7 + $0x1290] ss:$76 sps:$4 sm:$0xff]   ;;  %v12798_v34 = vadd.f32 %v18769_v62, %v18618_v59 }
 0x4dc   :  { %v14923_v37 = vpop.eup %14922  ;;  %11221 = vst [vmem:[%s21692_s9 + $0x148] sm:$0xff] %v14921_v57  ;;  %14942 = vpow2.f32 %v10156_v60  ;;  %v18926_v9 = vpop.f32.mrb[117].mxu1  ;;  %v14554_v60 = vld [vmem:[%s21687_s7 + $0x34] ss:$76 sps:$4 sm:$0xff]   ;;  %8705 = vmatprep.subr.bf16.mxu1 %v14551_v35  ;;  %v14557_v61 = vld [vmem:[%s21687_s7 + $0x3c] ss:$76 sps:$4 sm:$0xff]  }
 0x4dd   :  { %v18931_v7 = vpop.f32.mrb[118].mxu0  ;;  %v14925_v30 = vpop.eup %14924  ;;  %11237 = vst [vmem:[%s21692_s9 + $0x1c8] sm:$0xff] %v14923_v37  ;;  %14944 = vpow2.f32 %v10160_v27  ;;  %v9775_v35 = vsub.f32 0.0, %v12766_v4  ;;  %v14560_v4 = vld [vmem:[%s21687_s7 + $0xcc] ss:$76 sps:$4 sm:$0xff]  }
 0x4de   :  { %v18941_v41 = vpop.f32.mrb[118].mxu1  ;;  %v18943_v39 = vpop.f32.mrb[119].mxu0  ;;  %v10631_v33 = vadd.f32 1.0, %v14925_v30  ;;  %14946 = vpow2.f32 %v10192_v56  ;;  %8480 = vmatpush1.bf16.msra.mxu0 %v14546_v6  ;;  %v14552_v30 = vld [vmem:[%s21687_s7 + $0x30] ss:$76 sps:$4 sm:$0xff]   ;;  %v18963_v6 = vadd.f32 %v18771_v10, %v18603_v49 }
 0x4df   :  { %v14927_v48 = vpop.eup %14926  ;;  %v18948_v27 = vpop.f32.mrb[119].mxu1  ;;  %14948 = vpow2.f32 %v10196_v8  ;;  %8706 = vmatpush1.bf16.msra.mxu1 %v14549_v5  ;;  %8788 = vmatprep.subr.bf16.mxu0 %v14554_v60  ;;  %v14555_v8 = vld [vmem:[%s21687_s7 + $0x38] ss:$76 sps:$4 sm:$0xff]   ;;  %v14563_v5 = vld [vmem:[%s21687_s7 + $0xd4] ss:$76 sps:$4 sm:$0xff]  }
 0x4e0   :  { %v14929_v38 = vpop.eup %14928  ;;  %v10630_v13 = vadd.f32 1.0, %v14927_v48  ;;  %14950 = vrcp.f32 %v10631_v33  ;;  %9014 = vmatprep.subr.bf16.mxu1 %v14557_v61  ;;  %v18965_v33 = vpop.f32.mrb[120].mxu0  ;;  %v14558_v61 = vld [vmem:[%s21687_s7 + $0xc8] ss:$76 sps:$4 sm:$0xff]   ;;  %v9793_v14 = vsub.f32 0.0, %v18963_v6 }
 0x4e1   :  { %v14931_v57 = vpop.eup %14930  ;;  %v10632_v37 = vadd.f32 1.0, %v14929_v38  ;;  %8482 = vmatmul.mubr.bf16.vlgmr.msra.gmra.mrb[160].mxu0 %v17527_v16  ;;  %v18976_v10 = vpop.f32.mrb[121].mxu0 }
 0x4e2   :  { %v14933_v18 = vpop.eup %14932  ;;  %14952 = vrcp.f32 %v10630_v13  ;;  %v10648_v56 = vadd.f32 1.0, %v14931_v57  ;;  %v9777_v13 = vsub.f32 0.0, %v12798_v34  ;;  %8708 = vmatmul.mubr.bf16.vlgmr.msra.gmra.mrb[160].mxu1 %v17527_v16  ;;  %8491 = vmatprep.mubr.bf16.mxu0 %v17575_v2 }
 0x4e3   :  { %v14935_v48 = vpop.eup %14934  ;;  %14954 = vrcp.f32 %v10632_v37  ;;  %v10650_v62 = vadd.f32 1.0, %v14933_v18  ;;  %v18974_v18 = vpop.f32.mrb[120].mxu1  ;;  %8717 = vmatprep.mubr.bf16.mxu1 %v17575_v2  ;;  %8789 = vmatpush1.bf16.msra.mxu0 %v14552_v30  ;;  %v14566_v30 = vld [vmem:[%s21687_s7 + $0x164] ss:$76 sps:$4 sm:$0xff]  }
 0x4e4   :  { %v14937_v60 = vpop.eup %14936  ;;  %14956 = vrcp.f32 %v10648_v56  ;;  %v10649_v38 = vadd.f32 1.0, %v14935_v48  ;;  %v18987_v34 = vpop.f32.mrb[121].mxu1  ;;  %v14561_v56 = vld [vmem:[%s21687_s7 + $0xd0] ss:$76 sps:$4 sm:$0xff]   ;;  %9015 = vmatpush1.bf16.msra.mxu1 %v14555_v8  ;;  %8790 = vmatprep.subr.bf16.mxu0 %v14560_v4  ;;  %v10198_v2 = vmul.f32 1.442695, %v9777_v13 }
 0x4e5   :  { %v14939_v57 = vpop.eup %14938  ;;  %14958 = vrcp.f32 %v10650_v62  ;;  %v10651_v37 = vadd.f32 1.0, %v14937_v60  ;;  %v18992_v48 = vpop.f32.mrb[122].mxu0  ;;  %v18994_v60 = vmul.f32 1.442695, %v9775_v35  ;;  %v19008_v35 = vadd.f32 %v18789_v12, %v18618_v59  ;;  %9016 = vmatprep.subr.bf16.mxu1 %v14563_v5  ;;  %v14569_v12 = vld [vmem:[%s21687_s7 + $0x16c] ss:$76 sps:$4 sm:$0xff]  }
 0x4e6   :  { %v14941_v32 = vpop.eup %14940  ;;  %14960 = vrcp.f32 %v10649_v38  ;;  %v10667_v62 = vadd.f32 1.0, %v14939_v57  ;;  %v19001_v16 = vpop.f32.mrb[122].mxu1  ;;  %v9795_v4 = vsub.f32 0.0, %v18983_v42  ;;  %v9794_v13 = vsub.f32 0.0, %v18998_v40  ;;  %v14572_v42 = vld [vmem:[%s21687_s7 + $0x1fc] ss:$76 sps:$4 sm:$0xff]  }
 0x4e7   :  { %v19003_v45 = vpop.f32.mrb[123].mxu0  ;;  %v14943_v63 = vpop.eup %14942  ;;  %14962 = vrcp.f32 %v10651_v37  ;;  %v10669_v1 = vadd.f32 1.0, %v14941_v32  ;;  %v19017_v32 = vadd.f32 %v18833_v36, %v18603_v49  ;;  %v19025_v37 = vadd.f32 %v18849_v58, %v18609_v51  ;;  %8791 = vmatpush1.bf16.msra.mxu0 %v14558_v61  ;;  %v14575_v61 = vld [vmem:[%s21687_s7 + $0x204] ss:$76 sps:$4 sm:$0xff]  }
 0x4e8   :  { %v19010_v50 = vpop.f32.mrb[123].mxu1  ;;  %v14945_v38 = vpop.eup %14944  ;;  %14964 = vrcp.f32 %v10667_v62  ;;  %v10668_v57 = vadd.f32 1.0, %v14943_v63  ;;  %v14564_v63 = vld [vmem:[%s21687_s7 + $0x160] ss:$76 sps:$4 sm:$0xff]   ;;  %v19033_v62 = vadd.f32 %v18851_v55, %v18612_v52  ;;  %v19044_v40 = vadd.f32 %v18864_v53, %v18618_v59  ;;  %9017 = vmatpush1.bf16.msra.mxu1 %v14561_v56  ;;  %8792 = vmatprep.subr.bf16.mxu0 %v14566_v30 }
 0x4e9   :  { %v14947_v8 = vpop.eup %14946  ;;  %14966 = vrcp.f32 %v10669_v1  ;;  %v10670_v6 = vadd.f32 1.0, %v14945_v38  ;;  %v14567_v1 = vld [vmem:[%s21687_s7 + $0x168] ss:$76 sps:$4 sm:$0xff]   ;;  %v19046_v55 = vpop.f32.mrb[124].mxu0  ;;  %v19057_v53 = vadd.f32 %v18866_v23, %v18603_v49  ;;  %8492 = vmatmul.mubr.bf16.gmra.mrb[164].mxu0 %v17571_v0  ;;  %9018 = vmatprep.subr.bf16.mxu1 %v14569_v12  ;;  %v9814_v23 = vsub.f32 0.0, %v19025_v37 }
 0x4ea   :  { %v14949_v36 = vpop.eup %14948  ;;  %14968 = vrcp.f32 %v10668_v57  ;;  %v10686_v5 = vadd.f32 1.0, %v14947_v8  ;;  %v9796_v57 = vsub.f32 0.0, %v19008_v35  ;;  %v9812_v35 = vsub.f32 0.0, %v19017_v32  ;;  %v19060_v56 = vpop.f32.mrb[124].mxu1  ;;  %8718 = vmatmul.mubr.bf16.gmra.mrb[164].mxu1 %v17571_v0  ;;  %8501 = vmatprep.mubr.bf16.mxu0 %v17619_v46 }
 0x4eb   :  { %v14951_v58 = vpop.eup %14950  ;;  %14970 = vrcp.f32 %v10670_v6  ;;  %v10688_v38 = vadd.f32 1.0, %v14949_v36  ;;  %v10230_v6 = vmul.f32 1.442695, %v9793_v14  ;;  %v19062_v30 = vpop.f32.mrb[125].mxu0  ;;  %v14570_v36 = vld [vmem:[%s21687_s7 + $0x1f8] ss:$76 sps:$4 sm:$0xff]   ;;  %v12803_v32 = vadd.f32 %v18872_v3, %v18609_v51  ;;  %8727 = vmatprep.mubr.bf16.mxu1 %v17619_v46  ;;  %8793 = vmatpush1.bf16.msra.mxu0 %v14564_v63 }
 0x4ec   :  { %v14953_v8 = vpop.eup %14952  ;;  %11239 = vst [vmem:[%s21692_s9 + $0x1d8] sm:$0xff] %v14951_v58  ;;  %14972 = vrcp.f32 %v10686_v5  ;;  %v10234_v14 = vmul.f32 1.442695, %v9795_v4  ;;  %v19075_v12 = vpop.f32.mrb[125].mxu1  ;;  %v14573_v5 = vld [vmem:[%s21687_s7 + $0x200] ss:$76 sps:$4 sm:$0xff]   ;;  %v12772_v37 = vadd.f32 %v18874_v15, %v18612_v52  ;;  %9019 = vmatpush1.bf16.msra.mxu1 %v14567_v1  ;;  %8794 = vmatprep.subr.bf16.mxu0 %v14572_v42 }
 0x4ed   :  { %v14955_v58 = vpop.eup %14954  ;;  %11238 = vst [vmem:[%s21692_s9 + $0x1d0] sm:$0xff] %v14953_v8  ;;  %14974 = vrcp.f32 %v10688_v38  ;;  %v19080_v17 = vpop.f32.mrb[126].mxu0  ;;  %v10232_v3 = vmul.f32 1.442695, %v9794_v13  ;;  %v9813_v4 = vsub.f32 0.0, %v19033_v62  ;;  %v9815_v13 = vsub.f32 0.0, %v19044_v40  ;;  %9020 = vmatprep.subr.bf16.mxu1 %v14575_v61 }
 0x4ee   :  { %21792 = vst [vmem:[#allocation27_spill] sm:$0xff] %v19080_v17  ;;  %v14957_v8 = vpop.eup %14956  ;;  %11240 = vst [vmem:[%s21692_s9 + $0x1e0] sm:$0xff] %v14955_v58  ;;  %14976 = vpow2.f32 %v18994_v60  ;;  %v19090_v38 = vpop.f32.mrb[126].mxu1  ;;  %v10236_v60 = vmul.f32 1.442695, %v9796_v57  ;;  %v9833_v40 = vsub.f32 0.0, %v12803_v32 }
 0x4ef   :  { %v19092_v0 = vpop.f32.mrb[127].mxu0  ;;  %v14959_v17 = vpop.eup %14958  ;;  %11256 = vst [vmem:[%s21692_s9 + $0x260] sm:$0xff] %v14957_v8  ;;  %14978 = vpow2.f32 %v10198_v2  ;;  %v14578_v15 = vld [vmem:[%s21687_s7 + $0x294] ss:$76 sps:$4 sm:$0xff]   ;;  %v10268_v58 = vmul.f32 1.442695, %v9812_v35  ;;  %8795 = vmatpush1.bf16.msra.mxu0 %v14570_v36 }
 0x4f0   :  { %v19098_v62 = vpop.f32.mrb[127].mxu1  ;;  %v14961_v63 = vpop.eup %14960  ;;  %11258 = vst [vmem:[%s21692_s9 + $0x270] sm:$0xff] %v14959_v17  ;;  %14980 = vpow2.f32 %v10230_v6  ;;  %v9831_v2 = vsub.f32 0.0, %v19057_v53  ;;  %v14581_v1 = vld [vmem:[%s21687_s7 + $0x29c] ss:$76 sps:$4 sm:$0xff]   ;;  %v9832_v61 = vsub.f32 0.0, %v12772_v37  ;;  %9021 = vmatpush1.bf16.msra.mxu1 %v14573_v5  ;;  %8796 = vmatprep.subr.bf16.mxu0 %v14578_v15 }
 0x4f1   :  { %v14963_v42 = vpop.eup %14962  ;;  %11257 = vst [vmem:[%s21692_s9 + $0x268] sm:$0xff] %v14961_v63  ;;  %14982 = vpow2.f32 %v10234_v14  ;;  %v10272_v57 = vmul.f32 1.442695, %v9814_v23  ;;  %v10270_v17 = vmul.f32 1.442695, %v9813_v4  ;;  %8502 = vmatmul.mubr.bf16.gmra.mrb[168].mxu0 %v17615_v44  ;;  %9022 = vmatprep.subr.bf16.mxu1 %v14581_v1  ;;  %v12804_v1 = vadd.f32 %v18880_v25, %v18618_v59 }
 0x4f2   :  { %v14965_v8 = vpop.eup %14964  ;;  %11259 = vst [vmem:[%s21692_s9 + $0x278] sm:$0xff] %v14963_v42  ;;  %14984 = vpow2.f32 %v10232_v3  ;;  %v14576_v6 = vld [vmem:[%s21687_s7 + $0x290] ss:$76 sps:$4 sm:$0xff]   ;;  %v10274_v53 = vmul.f32 1.442695, %v9815_v13  ;;  %8728 = vmatmul.mubr.bf16.gmra.mrb[168].mxu1 %v17615_v44  ;;  %8511 = vmatprep.mubr.bf16.mxu0 %v17663_v28 }
 0x4f3   :  { %v14967_v35 = vpop.eup %14966  ;;  %11275 = vst [vmem:[%s21692_s9 + $0x2f8] sm:$0xff] %v14965_v8  ;;  %14986 = vpow2.f32 %v10236_v60  ;;  %v14579_v14 = vld [vmem:[%s21687_s7 + $0x298] ss:$76 sps:$4 sm:$0xff]   ;;  %v10306_v32 = vmul.f32 1.442695, %v9831_v2  ;;  %8737 = vmatprep.mubr.bf16.mxu1 %v17663_v28  ;;  %8797 = vmatpush1.bf16.msra.mxu0 %v14576_v6 }
 0x4f4   :  { %v14584_v36 = vld [vmem:[%s21687_s7 + $0x32c] ss:$76 sps:$4 sm:$0xff]   ;;  %v14969_v23 = vpop.eup %14968  ;;  %11277 = vst [vmem:[%s21692_s9 + $0x308] sm:$0xff] %v14967_v35  ;;  %14988 = vpow2.f32 %v10268_v58  ;;  %v14587_v5 = vld [vmem:[%s21687_s7 + $0x334] ss:$76 sps:$4 sm:$0xff]   ;;  %9023 = vmatpush1.bf16.msra.mxu1 %v14579_v14 }
 0x4f5   :  { %v14971_v3 = vpop.eup %14970  ;;  %11276 = vst [vmem:[%s21692_s9 + $0x300] sm:$0xff] %v14969_v23  ;;  %14990 = vpow2.f32 %v10272_v57  ;;  %v10310_v4 = vmul.f32 1.442695, %v9833_v40  ;;  %v10308_v60 = vmul.f32 1.442695, %v9832_v61  ;;  %8798 = vmatprep.subr.bf16.mxu0 %v14584_v36  ;;  %9024 = vmatprep.subr.bf16.mxu1 %v14587_v5  ;;  %v12773_v61 = vadd.f32 %v18908_v24, %v18603_v49 }
 0x4f6   :  { %v14973_v37 = vpop.eup %14972  ;;  %11278 = vst [vmem:[%s21692_s9 + $0x310] sm:$0xff] %v14971_v3  ;;  %14992 = vpow2.f32 %v10270_v17  ;;  %v14582_v13 = vld [vmem:[%s21687_s7 + $0x328] ss:$76 sps:$4 sm:$0xff]   ;;  %v14585_v63 = vld [vmem:[%s21687_s7 + $0x330] ss:$76 sps:$4 sm:$0xff]   ;;  %v9834_v23 = vsub.f32 0.0, %v12804_v1 }
 0x4f7   :  { %v14975_v15 = vpop.eup %14974  ;;  %11294 = vst [vmem:[%s21692_s9 + $0x390] sm:$0xff] %v14973_v37  ;;  %14994 = vpow2.f32 %v10274_v53  ;;  %v14590_v58 = vld [vmem:[%s21687_s7 + $0x3c4] ss:$76 sps:$4 sm:$0xff]   ;;  %v14593_v42 = vld [vmem:[%s21687_s7 + $0x3cc] ss:$76 sps:$4 sm:$0xff]   ;;  %8799 = vmatpush1.bf16.msra.mxu0 %v14582_v13  ;;  %v9850_v13 = vsub.f32 0.0, %v12773_v61 }
 0x4f8   :  { %v14977_v2 = vpop.eup %14976  ;;  %11296 = vst [vmem:[%s21692_s9 + $0x3a0] sm:$0xff] %v14975_v15  ;;  %14996 = vpow2.f32 %v10306_v32  ;;  %v14588_v6 = vld [vmem:[%s21687_s7 + $0x3c0] ss:$76 sps:$4 sm:$0xff]   ;;  %9025 = vmatpush1.bf16.msra.mxu1 %v14585_v63  ;;  %8800 = vmatprep.subr.bf16.mxu0 %v14590_v58  ;;  %v14591_v53 = vld [vmem:[%s21687_s7 + $0x3c8] ss:$76 sps:$4 sm:$0xff]  }
 0x4f9   :  { %v14979_v57 = vpop.eup %14978  ;;  %v10687_v40 = vadd.f32 1.0, %v14977_v2  ;;  %14998 = vpow2.f32 %v10310_v4  ;;  %v14596_v14 = vld [vmem:[%s21687_s7 + $0x45c] ss:$76 sps:$4 sm:$0xff]   ;;  %8512 = vmatmul.mubr.bf16.gmra.mrb[172].mxu0 %v17659_v26  ;;  %9026 = vmatprep.subr.bf16.mxu1 %v14593_v42  ;;  %v14599_v32 = vld [vmem:[%s21687_s7 + $0x464] ss:$76 sps:$4 sm:$0xff]   ;;  %v19181_v4 = vadd.f32 %v18918_v54, %v18609_v51  ;;  %v12774_v54 = vadd.f32 %v18920_v20, %v18612_v52 }
 0x4fa   :  { %v14981_v8 = vpop.eup %14980  ;;  %v10689_v17 = vadd.f32 1.0, %v14979_v57  ;;  %15000 = vpow2.f32 %v10308_v60  ;;  %8738 = vmatmul.mubr.bf16.gmra.mrb[172].mxu1 %v17659_v26  ;;  %8521 = vmatprep.mubr.bf16.mxu0 %v17707_v21  ;;  %v14594_v15 = vld [vmem:[%s21687_s7 + $0x458] ss:$76 sps:$4 sm:$0xff]   ;;  %v14597_v2 = vld [vmem:[%s21687_s7 + $0x460] ss:$76 sps:$4 sm:$0xff]  }
 0x4fb   :  { %v14983_v25 = vpop.eup %14982  ;;  %15002 = vrcp.f32 %v10687_v40  ;;  %v10705_v35 = vadd.f32 1.0, %v14981_v8  ;;  %8747 = vmatprep.mubr.bf16.mxu1 %v17707_v21  ;;  %8801 = vmatpush1.bf16.msra.mxu0 %v14588_v6  ;;  %v14602_v1 = vld [vmem:[%s21687_s7 + $0x4f4] ss:$76 sps:$4 sm:$0xff]   ;;  %v10312_v40 = vmul.f32 1.442695, %v9834_v23  ;;  %v12806_v8 = vadd.f32 %v18926_v9, %v18618_v59 }
 0x4fc   :  { %v14985_v36 = vpop.eup %14984  ;;  %15004 = vrcp.f32 %v10689_v17  ;;  %v10707_v24 = vadd.f32 1.0, %v14983_v25  ;;  %9027 = vmatpush1.bf16.msra.mxu1 %v14591_v53  ;;  %8802 = vmatprep.subr.bf16.mxu0 %v14596_v14  ;;  %v14605_v20 = vld [vmem:[%s21687_s7 + $0x4fc] ss:$76 sps:$4 sm:$0xff]   ;;  %v9852_v6 = vsub.f32 0.0, %v19181_v4  ;;  %v12775_v25 = vadd.f32 %v18931_v7, %v18603_v49 }
 0x4fd   :  { %v14987_v5 = vpop.eup %14986  ;;  %15006 = vrcp.f32 %v10705_v35  ;;  %v10706_v3 = vadd.f32 1.0, %v14985_v36  ;;  %9028 = vmatprep.subr.bf16.mxu1 %v14599_v32  ;;  %v10344_v14 = vmul.f32 1.442695, %v9850_v13  ;;  %v19207_v9 = vadd.f32 %v18941_v41, %v18609_v51  ;;  %v14600_v36 = vld [vmem:[%s21687_s7 + $0x4f0] ss:$76 sps:$4 sm:$0xff]  }
 0x4fe   :  { %v14989_v37 = vpop.eup %14988  ;;  %15008 = vrcp.f32 %v10707_v24  ;;  %v10708_v60 = vadd.f32 1.0, %v14987_v5  ;;  %v9851_v32 = vsub.f32 0.0, %v12774_v54  ;;  %v19214_v7 = vadd.f32 %v18943_v39, %v18612_v52  ;;  %v14603_v41 = vld [vmem:[%s21687_s7 + $0x4f8] ss:$76 sps:$4 sm:$0xff]   ;;  %v14611_v39 = vld [vmem:[%s21687_s7 + $0x594] ss:$76 sps:$4 sm:$0xff]  }
 0x4ff   :  { %v14991_v63 = vpop.eup %14990  ;;  %15010 = vrcp.f32 %v10706_v3  ;;  %v10724_v58 = vadd.f32 1.0, %v14989_v37  ;;  %8803 = vmatpush1.bf16.msra.mxu0 %v14594_v15  ;;  %v14608_v5 = vld [vmem:[%s21687_s7 + $0x58c] ss:$76 sps:$4 sm:$0xff]   ;;  %v9853_v37 = vsub.f32 0.0, %v12806_v8 }
 0x500   :  { %v14993_v42 = vpop.eup %14992  ;;  %15012 = vrcp.f32 %v10708_v60  ;;  %v10726_v57 = vadd.f32 1.0, %v14991_v63  ;;  %9029 = vmatpush1.bf16.msra.mxu1 %v14597_v2  ;;  %8804 = vmatprep.subr.bf16.mxu0 %v14602_v1  ;;  %v12808_v60 = vadd.f32 %v18948_v27, %v18618_v59  ;;  %v9869_v63 = vsub.f32 0.0, %v12775_v25  ;;  %v14606_v27 = vld [vmem:[%s21687_s7 + $0x588] ss:$76 sps:$4 sm:$0xff]  }
 0x501   :  { %v14995_v17 = vpop.eup %14994  ;;  %15014 = vrcp.f32 %v10724_v58  ;;  %v10725_v61 = vadd.f32 1.0, %v14993_v42  ;;  %8522 = vmatmul.mubr.bf16.gmra.mrb[176].mxu0 %v17703_v19  ;;  %9030 = vmatprep.subr.bf16.mxu1 %v14605_v20  ;;  %v12777_v58 = vadd.f32 %v18965_v33, %v18603_v49  ;;  %v10348_v2 = vmul.f32 1.442695, %v9852_v6  ;;  %v14609_v42 = vld [vmem:[%s21687_s7 + $0x590] ss:$76 sps:$4 sm:$0xff]  }
 0x502   :  { %v14997_v35 = vpop.eup %14996  ;;  %15016 = vrcp.f32 %v10726_v57  ;;  %v10727_v53 = vadd.f32 1.0, %v14995_v17  ;;  %8748 = vmatmul.mubr.bf16.gmra.mrb[176].mxu1 %v17703_v19  ;;  %8531 = vmatprep.mubr.bf16.mxu0 %v17751_v22  ;;  %v9871_v1 = vsub.f32 0.0, %v19207_v9  ;;  %v12809_v33 = vadd.f32 %v18974_v18, %v18609_v51  ;;  %v14614_v18 = vld [vmem:[%s21687_s7 + $0x624] ss:$76 sps:$4 sm:$0xff]  }
 0x503   :  { %v14999_v24 = vpop.eup %14998  ;;  %15018 = vrcp.f32 %v10725_v61  ;;  %v10743_v23 = vadd.f32 1.0, %v14997_v35  ;;  %8757 = vmatprep.mubr.bf16.mxu1 %v17751_v22  ;;  %8805 = vmatpush1.bf16.msra.mxu0 %v14600_v36  ;;  %v10346_v8 = vmul.f32 1.442695, %v9851_v32  ;;  %v9870_v20 = vsub.f32 0.0, %v19214_v7  ;;  %v14615_v32 = vld [vmem:[%s21687_s7 + $0x628] ss:$76 sps:$4 sm:$0xff]  }
 0x504   :  { %v15001_v3 = vpop.eup %15000  ;;  %15020 = vrcp.f32 %v10727_v53  ;;  %v10745_v4 = vadd.f32 1.0, %v14999_v24  ;;  %v12778_v17 = vadd.f32 %v18976_v10, %v18612_v52  ;;  %9031 = vmatpush1.bf16.msra.mxu1 %v14603_v41  ;;  %8806 = vmatprep.subr.bf16.mxu0 %v14608_v5  ;;  %v10350_v6 = vmul.f32 1.442695, %v9853_v37  ;;  %v14617_v10 = vld [vmem:[%s21687_s7 + $0x62c] ss:$76 sps:$4 sm:$0xff]  }
 0x505   :  { %v15003_v13 = vpop.eup %15002  ;;  %15022 = vrcp.f32 %v10743_v23  ;;  %v10744_v15 = vadd.f32 1.0, %v15001_v3  ;;  %v9872_v25 = vsub.f32 0.0, %v12808_v60  ;;  %v12810_v35 = vadd.f32 %v18987_v34, %v18618_v59  ;;  %9032 = vmatprep.subr.bf16.mxu1 %v14611_v39  ;;  %v14620_v5 = vld [vmem:[%s21687_s7 + $0x6bc] ss:$76 sps:$4 sm:$0xff]   ;;  %v14623_v60 = vld [vmem:[%s21687_s7 + $0x6c4] ss:$76 sps:$4 sm:$0xff]  }
 0x506   :  { %v15005_v54 = vpop.eup %15004  ;;  %11295 = vst [vmem:[%s21692_s9 + $0x398] sm:$0xff] %v15003_v13  ;;  %15024 = vrcp.f32 %v10745_v4  ;;  %v10382_v9 = vmul.f32 1.442695, %v9869_v63  ;;  %v9888_v36 = vsub.f32 0.0, %v12777_v58  ;;  %v10386_v34 = vmul.f32 1.442695, %v9871_v1 }
 0x507   :  { %v15007_v57 = vpop.eup %15006  ;;  %11297 = vst [vmem:[%s21692_s9 + $0x3a8] sm:$0xff] %v15005_v54  ;;  %15026 = vrcp.f32 %v10744_v15  ;;  %v9890_v23 = vsub.f32 0.0, %v12809_v33  ;;  %8807 = vmatpush1.bf16.msra.mxu0 %v14606_v27  ;;  %v10384_v7 = vmul.f32 1.442695, %v9870_v20  ;;  %v9889_v41 = vsub.f32 0.0, %v12778_v17 }
 0x508   :  { %v15009_v61 = vpop.eup %15008  ;;  %11313 = vst [vmem:[%s21692_s9 + $0x428] sm:$0xff] %v15007_v57  ;;  %15028 = vpow2.f32 %v10312_v40  ;;  %v14612_v40 = vld [vmem:[%s21687_s7 + $0x620] ss:$76 sps:$4 sm:$0xff]   ;;  %9033 = vmatpush1.bf16.msra.mxu1 %v14609_v42  ;;  %8808 = vmatprep.subr.bf16.mxu0 %v14614_v18  ;;  %v10388_v4 = vmul.f32 1.442695, %v9872_v25  ;;  %v9891_v37 = vsub.f32 0.0, %v12810_v35  ;;  %v12779_v17 = vadd.f32 %v18992_v48, %v18603_v49 }
 0x509   :  { %v15011_v53 = vpop.eup %15010  ;;  %11315 = vst [vmem:[%s21692_s9 + $0x438] sm:$0xff] %v15009_v61  ;;  %15030 = vpow2.f32 %v10344_v14  ;;  %8532 = vmatmul.mubr.bf16.gmra.mrb[180].mxu0 %v17747_v11  ;;  %9034 = vmatprep.subr.bf16.mxu1 %v14617_v10  ;;  %v10420_v13 = vmul.f32 1.442695, %v9888_v36  ;;  %v10424_v63 = vmul.f32 1.442695, %v9890_v23 }
 0x50a   :  { %v15013_v24 = vpop.eup %15012  ;;  %11314 = vst [vmem:[%s21692_s9 + $0x430] sm:$0xff] %v15011_v53  ;;  %15032 = vpow2.f32 %v10348_v2  ;;  %8758 = vmatmul.mubr.bf16.gmra.mrb[180].mxu1 %v17747_v11  ;;  %8541 = vmatprep.mubr.bf16.mxu0 %v17795_v31  ;;  %v14618_v58 = vld [vmem:[%s21687_s7 + $0x6b8] ss:$76 sps:$4 sm:$0xff]   ;;  %v10422_v54 = vmul.f32 1.442695, %v9889_v41  ;;  %v9907_v23 = vsub.f32 0.0, %v12779_v17  ;;  %v12782_v17 = vadd.f32 %v19062_v30, %v18612_v52 }
 0x50b   :  { %v15015_v14 = vpop.eup %15014  ;;  %11316 = vst [vmem:[%s21692_s9 + $0x440] sm:$0xff] %v15013_v24  ;;  %15034 = vpow2.f32 %v10346_v8  ;;  %8767 = vmatprep.mubr.bf16.mxu1 %v17795_v31  ;;  %8809 = vmatpush1.bf16.msra.mxu0 %v14612_v40  ;;  %v14621_v2 = vld [vmem:[%s21687_s7 + $0x6c0] ss:$76 sps:$4 sm:$0xff]   ;;  %v10426_v42 = vmul.f32 1.442695, %v9891_v37  ;;  %v12811_v40 = vadd.f32 %v19001_v16, %v18609_v51  ;;  %v19345_v16 = vadd.f32 %v19003_v45, %v18612_v52 }
 0x50c   :  { %v15017_v3 = vpop.eup %15016  ;;  %11332 = vst [vmem:[%s21692_s9 + $0x4c0] sm:$0xff] %v15015_v14  ;;  %15036 = vpow2.f32 %v10350_v6  ;;  %9035 = vmatpush1.bf16.msra.mxu1 %v14615_v32  ;;  %8810 = vmatprep.subr.bf16.mxu0 %v14620_v5  ;;  %v14626_v1 = vld [vmem:[%s21687_s7 + $0x754] ss:$76 sps:$4 sm:$0xff]   ;;  %v14629_v57 = vld [vmem:[%s21687_s7 + $0x75c] ss:$76 sps:$4 sm:$0xff]   ;;  %v19355_v37 = vadd.f32 %v19010_v50, %v18618_v59 }
 0x50d   :  { %v15019_v39 = vpop.eup %15018  ;;  %11334 = vst [vmem:[%s21692_s9 + $0x4d0] sm:$0xff] %v15017_v3  ;;  %15038 = vpow2.f32 %v10382_v9  ;;  %9036 = vmatprep.subr.bf16.mxu1 %v14623_v60  ;;  %v14624_v18 = vld [vmem:[%s21687_s7 + $0x750] ss:$76 sps:$4 sm:$0xff]   ;;  %v14627_v25 = vld [vmem:[%s21687_s7 + $0x758] ss:$76 sps:$4 sm:$0xff]  }
 0x50e   :  { %v15021_v15 = vpop.eup %15020  ;;  %11333 = vst [vmem:[%s21692_s9 + $0x4c8] sm:$0xff] %v15019_v39  ;;  %15040 = vpow2.f32 %v10386_v34  ;;  %v14632_v35 = vld [vmem:[%s21687_s7 + $0x7ec] ss:$76 sps:$4 sm:$0xff]   ;;  %v14635_v53 = vld [vmem:[%s21687_s7 + $0x7f4] ss:$76 sps:$4 sm:$0xff]  }
 0x50f   :  { %v15023_v27 = vpop.eup %15022  ;;  %11335 = vst [vmem:[%s21692_s9 + $0x4d8] sm:$0xff] %v15021_v15  ;;  %15042 = vpow2.f32 %v10384_v7  ;;  %8811 = vmatpush1.bf16.msra.mxu0 %v14618_v58  ;;  %v14630_v32 = vld [vmem:[%s21687_s7 + $0x7e8] ss:$76 sps:$4 sm:$0xff]   ;;  %v14633_v41 = vld [vmem:[%s21687_s7 + $0x7f0] ss:$76 sps:$4 sm:$0xff]  }
 0x510   :  { %v15025_v33 = vpop.eup %15024  ;;  %11351 = vst [vmem:[%s21692_s9 + $0x558] sm:$0xff] %v15023_v27  ;;  %15044 = vpow2.f32 %v10388_v4  ;;  %9037 = vmatpush1.bf16.msra.mxu1 %v14621_v2  ;;  %8812 = vmatprep.subr.bf16.mxu0 %v14626_v1  ;;  %v14638_v5 = vld [vmem:[%s21687_s7 + $0x884] ss:$76 sps:$4 sm:$0xff]   ;;  %v14641_v45 = vld [vmem:[%s21687_s7 + $0x88c] ss:$76 sps:$4 sm:$0xff]   ;;  %v12781_v27 = vadd.f32 %v19046_v55, %v18603_v49  ;;  %v9908_v1 = vsub.f32 0.0, %v19345_v16 }
 0x511   :  { %v15027_v8 = vpop.eup %15026  ;;  %11353 = vst [vmem:[%s21692_s9 + $0x568] sm:$0xff] %v15025_v33  ;;  %15046 = vpow2.f32 %v10420_v13  ;;  %8542 = vmatmul.mubr.bf16.gmra.mrb[184].mxu0 %v17791_v29  ;;  %9038 = vmatprep.subr.bf16.mxu1 %v14629_v57  ;;  %v9909_v13 = vsub.f32 0.0, %v12811_v40  ;;  %v10458_v58 = vmul.f32 1.442695, %v9907_v23  ;;  %v14636_v50 = vld [vmem:[%s21687_s7 + $0x880] ss:$76 sps:$4 sm:$0xff]   ;;  %v12813_v33 = vadd.f32 %v19060_v56, %v18609_v51 }
 0x512   :  { %v15029_v20 = vpop.eup %15028  ;;  %11352 = vst [vmem:[%s21692_s9 + $0x560] sm:$0xff] %v15027_v8  ;;  %15048 = vpow2.f32 %v10424_v63  ;;  %8768 = vmatmul.mubr.bf16.gmra.mrb[184].mxu1 %v17791_v29  ;;  %8551 = vmatprep.mubr.bf16.mxu0 %v17839_v47  ;;  %v14644_v55 = vld [vmem:[%s21687_s7 + $0x91c] ss:$76 sps:$4 sm:$0xff]   ;;  %v14647_v56 = vld [vmem:[%s21687_s7 + $0x924] ss:$76 sps:$4 sm:$0xff]  }
 0x513   :  { %v15031_v61 = vpop.eup %15030  ;;  %v10746_v6 = vadd.f32 1.0, %v15029_v20  ;;  %15050 = vpow2.f32 %v10422_v54  ;;  %8777 = vmatprep.mubr.bf16.mxu1 %v17839_v47  ;;  %8813 = vmatpush1.bf16.msra.mxu0 %v14624_v18  ;;  %v9910_v20 = vsub.f32 0.0, %v19355_v37  ;;  %v14650_v23 = vld [vmem:[%s21687_s7 + $0x9b4] ss:$76 sps:$4 sm:$0xff]   ;;  %v14648_v37 = vld [vmem:[%s21687_s7 + $0x9b0] ss:$76 sps:$4 sm:$0xff]  }
 0x514   :  { %v15033_v10 = vpop.eup %15032  ;;  %v10762_v48 = vadd.f32 1.0, %v15031_v61  ;;  %15052 = vpow2.f32 %v10426_v42  ;;  %9039 = vmatpush1.bf16.msra.mxu1 %v14627_v25  ;;  %8814 = vmatprep.subr.bf16.mxu0 %v14632_v35  ;;  %v14639_v42 = vld [vmem:[%s21687_s7 + $0x888] ss:$76 sps:$4 sm:$0xff]   ;;  %v12814_v25 = vadd.f32 %v19075_v12, %v18618_v59  ;;  %v21793_v35 = vld [vmem:[#allocation9_spill] sm:$0xff] }
 0x515   :  { %v15035_v9 = vpop.eup %15034  ;;  %15054 = vrcp.f32 %v10746_v6  ;;  %v10764_v36 = vadd.f32 1.0, %v15033_v10  ;;  %9040 = vmatprep.subr.bf16.mxu1 %v14635_v53  ;;  %v10462_v6 = vmul.f32 1.442695, %v9909_v13  ;;  %v21794_v53 = vld [vmem:[#allocation27_spill] sm:$0xff] }
 0x516   :  { %v15037_v24 = vpop.eup %15036  ;;  %15056 = vrcp.f32 %v10762_v48  ;;  %v10763_v34 = vadd.f32 1.0, %v15035_v9  ;;  %v9926_v48 = vsub.f32 0.0, %v12781_v27  ;;  %v12783_v9 = vadd.f32 %v21794_v53, %v18603_v49  ;;  %v14645_v49 = vld [vmem:[%s21687_s7 + $0x920] ss:$76 sps:$4 sm:$0xff]  }
 0x517   :  { %v15039_v14 = vpop.eup %15038  ;;  %15058 = vrcp.f32 %v10764_v36  ;;  %v10765_v7 = vadd.f32 1.0, %v15037_v24  ;;  %8815 = vmatpush1.bf16.msra.mxu0 %v14630_v32  ;;  %v14642_v36 = vld [vmem:[%s21687_s7 + $0x918] ss:$76 sps:$4 sm:$0xff]   ;;  %v9928_v24 = vsub.f32 0.0, %v12813_v33 }
 0x518   :  { %v15041_v3 = vpop.eup %15040  ;;  %15060 = vrcp.f32 %v10763_v34  ;;  %v10781_v4 = vadd.f32 1.0, %v15039_v14  ;;  %9041 = vmatpush1.bf16.msra.mxu1 %v14633_v41  ;;  %8816 = vmatprep.subr.bf16.mxu0 %v14638_v5  ;;  %v12815_v34 = vadd.f32 %v19090_v38, %v18609_v51  ;;  %v10460_v14 = vmul.f32 1.442695, %v9908_v1  ;;  %v14653_v38 = vld [vmem:[%s21687_s7 + $0x9bc] ss:$76 sps:$4 sm:$0xff]  }
 0x519   :  { %v15043_v60 = vpop.eup %15042  ;;  %15062 = vrcp.f32 %v10765_v7  ;;  %v10783_v39 = vadd.f32 1.0, %v15041_v3  ;;  %8552 = vmatmul.mubr.bf16.gmra.mrb[188].mxu0 %v17835_v43  ;;  %9042 = vmatprep.subr.bf16.mxu1 %v14641_v45  ;;  %v9927_v7 = vsub.f32 0.0, %v12782_v17  ;;  %v12784_v51 = vadd.f32 %v19092_v0, %v18612_v52 }
 0x51a   :  { %v15045_v15 = vpop.eup %15044  ;;  %15064 = vrcp.f32 %v10781_v4  ;;  %v10782_v63 = vadd.f32 1.0, %v15043_v60  ;;  %8778 = vmatmul.mubr.bf16.gmra.mrb[188].mxu1 %v17835_v43  ;;  %8820 = vmatprep.mubr.bf16.mxu0 %v21793_v35  ;;  %v10464_v41 = vmul.f32 1.442695, %v9910_v20  ;;  %v9929_v5 = vsub.f32 0.0, %v12814_v25  ;;  %v14651_v60 = vld [vmem:[%s21687_s7 + $0x9b8] ss:$76 sps:$4 sm:$0xff]  }
 0x51b   :  { %v15047_v54 = vpop.eup %15046  ;;  %15066 = vrcp.f32 %v10783_v39  ;;  %v10784_v2 = vadd.f32 1.0, %v15045_v15  ;;  %8817 = vmatpush1.bf16.msra.mxu0 %v14636_v50  ;;  %9046 = vmatprep.mubr.bf16.mxu1 %v21793_v35  ;;  %v12816_v3 = vadd.f32 %v19098_v62, %v18618_v59  ;;  %v10496_v0 = vmul.f32 1.442695, %v9926_v48  ;;  %v14665_v25 = vld [vmem:[%s21687_s7 + $0xaec] ss:$76 sps:$4 sm:$0xff]  }
 0x51c   :  { %v15049_v57 = vpop.eup %15048  ;;  %15068 = vrcp.f32 %v10782_v63  ;;  %v10800_v8 = vadd.f32 1.0, %v15047_v54  ;;  %9043 = vmatpush1.bf16.msra.mxu1 %v14639_v42  ;;  %8818 = vmatprep.subr.bf16.mxu0 %v14644_v55  ;;  %v9945_v52 = vsub.f32 0.0, %v12783_v9  ;;  %v10500_v59 = vmul.f32 1.442695, %v9928_v24  ;;  %v14656_v63 = vld [vmem:[%s21687_s7 + $0xa4c] ss:$76 sps:$4 sm:$0xff]  }
 0x51d   :  { %v15051_v18 = vpop.eup %15050  ;;  %15070 = vrcp.f32 %v10784_v2  ;;  %v10802_v61 = vadd.f32 1.0, %v15049_v57  ;;  %9044 = vmatprep.subr.bf16.mxu1 %v14647_v56  ;;  %v9947_v62 = vsub.f32 0.0, %v12815_v34  ;;  %v10498_v13 = vmul.f32 1.442695, %v9927_v7  ;;  %v21795_v54 = vld [vmem:[#allocation7_spill] sm:$0xff]  ;;  %v21796_v42 = vld [vmem:[#allocation13_spill] sm:$0xff] }
 0x51e   :  { %v15053_v10 = vpop.eup %15052  ;;  %15072 = vrcp.f32 %v10800_v8  ;;  %v10801_v30 = vadd.f32 1.0, %v15051_v18  ;;  %v9946_v15 = vsub.f32 0.0, %v12784_v51  ;;  %v10502_v27 = vmul.f32 1.442695, %v9929_v5  ;;  %v14659_v2 = vld [vmem:[%s21687_s7 + $0xa54] ss:$76 sps:$4 sm:$0xff]  }
 0x51f   :  { %v15055_v40 = vpop.eup %15054  ;;  %15074 = vrcp.f32 %v10802_v61  ;;  %v10803_v12 = vadd.f32 1.0, %v15053_v10  ;;  %8819 = vmatpush1.bf16.msra.mxu0 %v14642_v36  ;;  %v9948_v50 = vsub.f32 0.0, %v12816_v3  ;;  %v10534_v33 = vmul.f32 1.442695, %v9945_v52  ;;  %v14654_v8 = vld [vmem:[%s21687_s7 + $0xa48] ss:$76 sps:$4 sm:$0xff]  }
 0x520   :  { %v15057_v32 = vpop.eup %15056  ;;  %11354 = vst [vmem:[%s21692_s9 + $0x570] sm:$0xff] %v15055_v40  ;;  %15076 = vrcp.f32 %v10801_v30  ;;  %9045 = vmatpush1.bf16.msra.mxu1 %v14645_v49  ;;  %8901 = vmatprep.subr.bf16.mxu0 %v14650_v23  ;;  %v10538_v57 = vmul.f32 1.442695, %v9947_v62  ;;  %v10536_v17 = vmul.f32 1.442695, %v9946_v15  ;;  %v21797_v24 = vld [vmem:[#allocation11_spill] sm:$0xff] }
 0x521   :  { %v15059_v16 = vpop.eup %15058  ;;  %11370 = vst [vmem:[%s21692_s9 + $0x5f0] sm:$0xff] %v15057_v32  ;;  %15078 = vrcp.f32 %v10803_v12  ;;  %9127 = vmatprep.subr.bf16.mxu1 %v14653_v38  ;;  %v14657_v56 = vld [vmem:[%s21687_s7 + $0xa50] ss:$76 sps:$4 sm:$0xff]   ;;  %v14660_v48 = vld [vmem:[%s21687_s7 + $0xae0] ss:$76 sps:$4 sm:$0xff]  }
 0x522   :  { %v15061_v4 = vpop.eup %15060  ;;  %11372 = vst [vmem:[%s21692_s9 + $0x600] sm:$0xff] %v15059_v16  ;;  %15080 = vpow2.f32 %v10458_v58  ;;  %8821 = vmatmul.mubr.bf16.vlgmr.msra.gmra.mrb[192].mxu0 %v21795_v54  ;;  %v14662_v18 = vld [vmem:[%s21687_s7 + $0xae4] ss:$76 sps:$4 sm:$0xff]   ;;  %v14663_v9 = vld [vmem:[%s21687_s7 + $0xae8] ss:$76 sps:$4 sm:$0xff]  }
 0x523   :  { %v15063_v45 = vpop.eup %15062  ;;  %11371 = vst [vmem:[%s21692_s9 + $0x5f8] sm:$0xff] %v15061_v4  ;;  %15082 = vpow2.f32 %v10462_v6  ;;  %9047 = vmatmul.mubr.bf16.vlgmr.msra.gmra.mrb[192].mxu1 %v21795_v54  ;;  %8830 = vmatprep.mubr.bf16.mxu0 %v21796_v42  ;;  %v10540_v6 = vmul.f32 1.442695, %v9948_v50  ;;  %v14668_v36 = vld [vmem:[%s21687_s7 + $0xb7c] ss:$76 sps:$4 sm:$0xff]   ;;  %v21798_v32 = vld [vmem:[#allocation16_spill] sm:$0xff] }
 0x524   :  { %v15065_v39 = vpop.eup %15064  ;;  %11373 = vst [vmem:[%s21692_s9 + $0x608] sm:$0xff] %v15063_v45  ;;  %15084 = vpow2.f32 %v10460_v14  ;;  %8902 = vmatpush1.bf16.msra.mxu0 %v14648_v37  ;;  %9056 = vmatprep.mubr.bf16.mxu1 %v21796_v42  ;;  %v14671_v34 = vld [vmem:[%s21687_s7 + $0xb84] ss:$76 sps:$4 sm:$0xff]   ;;  %v14674_v52 = vld [vmem:[%s21687_s7 + $0xc14] ss:$76 sps:$4 sm:$0xff]  }
 0x525   :  { %v15067_v58 = vpop.eup %15066  ;;  %11389 = vst [vmem:[%s21692_s9 + $0x688] sm:$0xff] %v15065_v39  ;;  %15086 = vpow2.f32 %v10464_v41  ;;  %9128 = vmatpush1.bf16.msra.mxu1 %v14651_v60  ;;  %8903 = vmatprep.subr.bf16.mxu0 %v14656_v63  ;;  %v21799_v14 = vld [vmem:[#allocation2_spill] sm:$0xff]  ;;  %v14677_v62 = vld [vmem:[%s21687_s7 + $0xc1c] ss:$76 sps:$4 sm:$0xff]  }
 0x526   :  { %v15069_v1 = vpop.eup %15068  ;;  %11391 = vst [vmem:[%s21692_s9 + $0x698] sm:$0xff] %v15067_v58  ;;  %15088 = vpow2.f32 %v10496_v0  ;;  %9129 = vmatprep.subr.bf16.mxu1 %v14659_v2  ;;  %v21745_v7 = vsub.s32 4, %v21799_v14  ;;  %v14666_v16 = vld [vmem:[%s21687_s7 + $0xb78] ss:$76 sps:$4 sm:$0xff]   ;;  %v21744_v41 = vsub.s32 6, %v21799_v14  ;;  %v21743_v5 = vsub.s32 5, %v21799_v14 }
 0x527   :  { %v15071_v55 = vpop.eup %15070  ;;  %11390 = vst [vmem:[%s21692_s9 + $0x690] sm:$0xff] %v15069_v1  ;;  %15090 = vpow2.f32 %v10500_v59  ;;  %v14669_v0 = vld [vmem:[%s21687_s7 + $0xb80] ss:$76 sps:$4 sm:$0xff]   ;;  %v21742_v37 = vsub.s32 7, %v21799_v14  ;;  %v14757_v54 = vld [vmem:[%s21687_s7 + $0x208] ss:$76 sps:$4 sm:$0xff]  }
 0x528   :  { %v15073_v20 = vpop.eup %15072  ;;  %11392 = vst [vmem:[%s21692_s9 + $0x6a0] sm:$0xff] %v15071_v55  ;;  %15092 = vpow2.f32 %v10498_v13  ;;  %8904 = vmatpush1.bf16.msra.mxu0 %v14654_v8  ;;  %v16088_v13 = vld [vmem:[%s21691_s8] sm:$0xff]  ;;  %v14680_v8 = vld [vmem:[%s21687_s7 + $0xcac] ss:$76 sps:$4 sm:$0xff]  }
 0x529   :  { %v15075_v61 = vpop.eup %15074  ;;  %11408 = vst [vmem:[%s21692_s9 + $0x720] sm:$0xff] %v15073_v20  ;;  %15094 = vpow2.f32 %v10502_v27  ;;  %9130 = vmatpush1.bf16.msra.mxu1 %v14657_v56  ;;  %8905 = vmatprep.subr.bf16.mxu0 %v14662_v18  ;;  %v19510_v15 = vrot.slane %v16088_v13, %v21745_v7  ;;  %v14672_v27 = vld [vmem:[%s21687_s7 + $0xc10] ss:$76 sps:$4 sm:$0xff]   ;;  %v19517_v50 = vrot.slane %v16088_v13, %v21744_v41  ;;  %v14675_v55 = vld [vmem:[%s21687_s7 + $0xc18] ss:$76 sps:$4 sm:$0xff]   ;;  %v21800_v56 = vld [vmem:[#allocation15_spill] sm:$0xff] }
 0x52a   :  { %v15077_v10 = vpop.eup %15076  ;;  %11410 = vst [vmem:[%s21692_s9 + $0x730] sm:$0xff] %v15075_v61  ;;  %15096 = vpow2.f32 %v10534_v33  ;;  %8831 = vmatmul.mubr.bf16.gmra.mrb[196].mxu0 %v21797_v24  ;;  %9131 = vmatprep.subr.bf16.mxu1 %v14665_v25  ;;  %v19521_v2 = vrot.slane %v16088_v13, %v21743_v5  ;;  %v14683_v61 = vld [vmem:[%s21687_s7 + $0xcb4] ss:$76 sps:$4 sm:$0xff]  }
 0x52b   :  { %v15079_v30 = vpop.eup %15078  ;;  %11409 = vst [vmem:[%s21692_s9 + $0x728] sm:$0xff] %v15077_v10  ;;  %15098 = vpow2.f32 %v10538_v57  ;;  %9057 = vmatmul.mubr.bf16.gmra.mrb[196].mxu1 %v21797_v24  ;;  %8840 = vmatprep.mubr.bf16.mxu0 %v21798_v32  ;;  %v19528_v57 = vrot.slane %v16088_v13, %v21742_v37  ;;  %v21801_v10 = vld [vmem:[#allocation18_spill] sm:$0xff] }
 0x52c   :  { %v15081_v53 = vpop.eup %15080  ;;  %11411 = vst [vmem:[%s21692_s9 + $0x738] sm:$0xff] %v15079_v30  ;;  %15100 = vpow2.f32 %v10536_v17  ;;  %8906 = vmatpush1.bf16.msra.mxu0 %v14660_v48  ;;  %9066 = vmatprep.mubr.bf16.mxu1 %v21798_v32  ;;  %v14684_v13 = vld [vmem:[%s21687_s7 + $0xd40] ss:$76 sps:$4 sm:$0xff]  }
 0x52d   :  { %v15083_v40 = vpop.eup %15082  ;;  %v10819_v12 = vadd.f32 1.0, %v15081_v53  ;;  %15102 = vpow2.f32 %v10540_v6  ;;  %9132 = vmatpush1.bf16.msra.mxu1 %v14663_v9  ;;  %8907 = vmatprep.subr.bf16.mxu0 %v14668_v36  ;;  %v14678_v9 = vld [vmem:[%s21687_s7 + $0xca8] ss:$76 sps:$4 sm:$0xff]  }
 0x52e   :  { %v15085_v49 = vpop.eup %15084  ;;  %v10821_v23 = vadd.f32 1.0, %v15083_v40  ;;  %9133 = vmatprep.subr.bf16.mxu1 %v14671_v34 }
 0x52f   :  { %v15087_v51 = vpop.eup %15086  ;;  %15104 = vrcp.f32 %v10819_v12  ;;  %v10820_v38 = vadd.f32 1.0, %v15085_v49 }
 0x530   :  { %v15089_v3 = vpop.eup %15088  ;;  %15106 = vrcp.f32 %v10821_v23  ;;  %v10822_v4 = vadd.f32 1.0, %v15087_v51  ;;  %8908 = vmatpush1.bf16.msra.mxu0 %v14666_v16  ;;  %v14681_v23 = vld [vmem:[%s21687_s7 + $0xcb0] ss:$76 sps:$4 sm:$0xff]  }
 0x531   :  { %v15091_v45 = vpop.eup %15090  ;;  %15108 = vrcp.f32 %v10820_v38  ;;  %v10838_v59 = vadd.f32 1.0, %v15089_v3  ;;  %9134 = vmatpush1.bf16.msra.mxu1 %v14669_v0  ;;  %8909 = vmatprep.subr.bf16.mxu0 %v14674_v52  ;;  %v14686_v52 = vld [vmem:[%s21687_s7 + $0xd44] ss:$76 sps:$4 sm:$0xff]  }
 0x532   :  { %v15093_v60 = vpop.eup %15092  ;;  %15110 = vrcp.f32 %v10822_v4  ;;  %v10840_v39 = vadd.f32 1.0, %v15091_v45  ;;  %8841 = vmatmul.mubr.bf16.gmra.mrb[200].mxu0 %v21800_v56  ;;  %9135 = vmatprep.subr.bf16.mxu1 %v14677_v62  ;;  %v8031_v18 = vpop.f32.mrb[128].mxu0 }
 0x533   :  { %v15095_v63 = vpop.eup %15094  ;;  %15112 = vrcp.f32 %v10838_v59  ;;  %v10839_v58 = vadd.f32 1.0, %v15093_v60  ;;  %9067 = vmatmul.mubr.bf16.gmra.mrb[200].mxu1 %v21800_v56  ;;  %8850 = vmatprep.mubr.bf16.mxu0 %v21801_v10  ;;  %v12817_v30 = vadd.f32 %v8031_v18, %v19510_v15  ;;  %v8257_v48 = vpop.f32.mrb[128].mxu1 }
 0x534   :  { %v15097_v1 = vpop.eup %15096  ;;  %15114 = vrcp.f32 %v10840_v39  ;;  %v10841_v33 = vadd.f32 1.0, %v15095_v63  ;;  %v8033_v53 = vpop.f32.mrb[129].mxu0  ;;  %8910 = vmatpush1.bf16.msra.mxu0 %v14672_v27  ;;  %9076 = vmatprep.mubr.bf16.mxu1 %v21801_v10  ;;  %v12849_v12 = vadd.f32 %v8257_v48, %v19517_v50  ;;  %v14689_v63 = vld [vmem:[%s21687_s7 + $0xd4c] ss:$76 sps:$4 sm:$0xff]  }
 0x535   :  { %v15099_v20 = vpop.eup %15098  ;;  %15116 = vrcp.f32 %v10839_v58  ;;  %v10857_v17 = vadd.f32 1.0, %v15097_v1  ;;  %v12818_v34 = vadd.f32 %v8033_v53, %v19521_v2  ;;  %v8259_v49 = vpop.f32.mrb[129].mxu1  ;;  %9136 = vmatpush1.bf16.msra.mxu1 %v14675_v55  ;;  %v9664_v16 = vsub.f32 0.0, %v12817_v30  ;;  %8911 = vmatprep.subr.bf16.mxu0 %v14680_v8  ;;  %v14687_v55 = vld [vmem:[%s21687_s7 + $0xd48] ss:$76 sps:$4 sm:$0xff]  }
 0x536   :  { %v15101_v6 = vpop.eup %15100  ;;  %15118 = vrcp.f32 %v10841_v33  ;;  %v10859_v25 = vadd.f32 1.0, %v15099_v20  ;;  %v8035_v51 = vpop.f32.mrb[130].mxu0  ;;  %v12850_v3 = vadd.f32 %v8259_v49, %v19528_v57  ;;  %v9666_v59 = vsub.f32 0.0, %v12849_v12  ;;  %9137 = vmatprep.subr.bf16.mxu1 %v14683_v61  ;;  %v14692_v53 = vld [vmem:[%s21687_s7 + $0xddc] ss:$76 sps:$4 sm:$0xff]  }
 0x537   :  { %v15103_v36 = vpop.eup %15102  ;;  %15120 = vrcp.f32 %v10857_v17  ;;  %v10858_v40 = vadd.f32 1.0, %v15101_v6  ;;  %v8261_v4 = vpop.f32.mrb[130].mxu1  ;;  %v9665_v62 = vsub.f32 0.0, %v12818_v34  ;;  %v12819_v60 = vadd.f32 %v8035_v51, %v19510_v15  ;;  %v21802_v12 = vld [vmem:[#allocation17_spill] sm:$0xff] }
 0x538   :  { %15122 = vrcp.f32 %v10859_v25  ;;  %v10860_v38 = vadd.f32 1.0, %v15103_v36  ;;  %v8037_v0 = vpop.f32.mrb[131].mxu0  ;;  %v8263_v39 = vpop.f32.mrb[131].mxu1  ;;  %v9972_v27 = vmul.f32 1.442695, %v9664_v16  ;;  %v9667_v1 = vsub.f32 0.0, %v12850_v3  ;;  %8912 = vmatpush1.bf16.msra.mxu0 %v14678_v9 }
 0x539   :  { %v15105_v45 = vpop.eup %15104  ;;  %15124 = vrcp.f32 %v10858_v40  ;;  %v12851_v33 = vadd.f32 %v8261_v4, %v19517_v50  ;;  %v9976_v20 = vmul.f32 1.442695, %v9666_v59  ;;  %v9974_v17 = vmul.f32 1.442695, %v9665_v62  ;;  %9138 = vmatpush1.bf16.msra.mxu1 %v14681_v23  ;;  %8913 = vmatprep.subr.bf16.mxu0 %v14686_v52  ;;  %v14690_v49 = vld [vmem:[%s21687_s7 + $0xdd8] ss:$76 sps:$4 sm:$0xff]  }
 0x53a   :  { %v15107_v58 = vpop.eup %15106  ;;  %11427 = vst [vmem:[%s21692_s9 + $0x7b8] sm:$0xff] %v15105_v45  ;;  %15126 = vrcp.f32 %v10860_v38  ;;  %v9683_v18 = vsub.f32 0.0, %v12819_v60  ;;  %v12820_v61 = vadd.f32 %v8037_v0, %v19521_v2  ;;  %v9978_v25 = vmul.f32 1.442695, %v9667_v1  ;;  %8851 = vmatmul.mubr.bf16.gmra.mrb[204].mxu0 %v21802_v12  ;;  %9139 = vmatprep.subr.bf16.mxu1 %v14689_v63  ;;  %v8041_v34 = vpop.f32.mrb[132].mxu0  ;;  %v21803_v3 = vld [vmem:[#allocation20_spill] sm:$0xff] }
 0x53b   :  { %v15109_v8 = vpop.eup %15108  ;;  %11429 = vst [vmem:[%s21692_s9 + $0x7c8] sm:$0xff] %v15107_v58  ;;  %15128 = vpow2.f32 %v9972_v27  ;;  %v9685_v30 = vsub.f32 0.0, %v12851_v33  ;;  %v12852_v48 = vadd.f32 %v8263_v39, %v19528_v57  ;;  %v14695_v23 = vld [vmem:[%s21687_s7 + $0xde4] ss:$76 sps:$4 sm:$0xff]   ;;  %9077 = vmatmul.mubr.bf16.gmra.mrb[204].mxu1 %v21802_v12  ;;  %8860 = vmatprep.mubr.bf16.mxu0 %v21803_v3  ;;  %v12821_v4 = vadd.f32 %v8041_v34, %v19510_v15  ;;  %v8267_v0 = vpop.f32.mrb[132].mxu1 }
 0x53c   :  { %v15111_v6 = vpop.eup %15110  ;;  %11428 = vst [vmem:[%s21692_s9 + $0x7c0] sm:$0xff] %v15109_v8  ;;  %15130 = vpow2.f32 %v9976_v20  ;;  %v10010_v9 = vmul.f32 1.442695, %v9683_v18  ;;  %v9684_v40 = vsub.f32 0.0, %v12820_v61  ;;  %v8043_v52 = vpop.f32.mrb[133].mxu0  ;;  %8914 = vmatpush1.bf16.msra.mxu0 %v14684_v13  ;;  %9086 = vmatprep.mubr.bf16.mxu1 %v21803_v3  ;;  %v12853_v60 = vadd.f32 %v8267_v0, %v19517_v50 }
 0x53d   :  { %v15113_v36 = vpop.eup %15112  ;;  %11430 = vst [vmem:[%s21692_s9 + $0x7d0] sm:$0xff] %v15111_v6  ;;  %15132 = vpow2.f32 %v9974_v17  ;;  %v10014_v38 = vmul.f32 1.442695, %v9685_v30  ;;  %v9686_v16 = vsub.f32 0.0, %v12852_v48  ;;  %v14693_v45 = vld [vmem:[%s21687_s7 + $0xde0] ss:$76 sps:$4 sm:$0xff]   ;;  %v12822_v39 = vadd.f32 %v8043_v52, %v19521_v2  ;;  %9140 = vmatpush1.bf16.msra.mxu1 %v14687_v55  ;;  %8915 = vmatprep.subr.bf16.mxu0 %v14692_v53 }
 0x53e   :  { %v15115_v51 = vpop.eup %15114  ;;  %11446 = vst [vmem:[%s21692_s9 + $0x850] sm:$0xff] %v15113_v36  ;;  %15134 = vpow2.f32 %v9978_v25  ;;  %v10012_v62 = vmul.f32 1.442695, %v9684_v40  ;;  %v8269_v63 = vpop.f32.mrb[133].mxu1  ;;  %v14698_v27 = vld [vmem:[%s21687_s7 + $0xe74] ss:$76 sps:$4 sm:$0xff]   ;;  %9141 = vmatprep.subr.bf16.mxu1 %v14695_v23 }
 0x53f   :  { %v15117_v59 = vpop.eup %15116  ;;  %11448 = vst [vmem:[%s21692_s9 + $0x860] sm:$0xff] %v15115_v51  ;;  %v8045_v58 = vpop.f32.mrb[134].mxu0  ;;  %15136 = vpow2.f32 %v10010_v9  ;;  %v10016_v33 = vmul.f32 1.442695, %v9686_v16  ;;  %v9702_v13 = vsub.f32 0.0, %v12821_v4  ;;  %v12854_v8 = vadd.f32 %v8269_v63, %v19528_v57  ;;  %v21804_v52 = vld [vmem:[#allocation19_spill] sm:$0xff] }
 0x540   :  { %v15119_v1 = vpop.eup %15118  ;;  %11447 = vst [vmem:[%s21692_s9 + $0x858] sm:$0xff] %v15117_v59  ;;  %v8271_v20 = vpop.f32.mrb[134].mxu1  ;;  %15138 = vpow2.f32 %v10014_v38  ;;  %v9704_v61 = vsub.f32 0.0, %v12853_v60  ;;  %v9703_v6 = vsub.f32 0.0, %v12822_v39  ;;  %v12823_v25 = vadd.f32 %v8045_v58, %v19510_v15  ;;  %v14701_v55 = vld [vmem:[%s21687_s7 + $0xe7c] ss:$76 sps:$4 sm:$0xff]   ;;  %8916 = vmatpush1.bf16.msra.mxu0 %v14690_v49 }
 0x541   :  { %v8047_v17 = vpop.f32.mrb[135].mxu0  ;;  %v15121_v18 = vpop.eup %15120  ;;  %11449 = vst [vmem:[%s21692_s9 + $0x868] sm:$0xff] %v15119_v1  ;;  %15140 = vpow2.f32 %v10012_v62  ;;  %v10048_v53 = vmul.f32 1.442695, %v9702_v13  ;;  %v9705_v36 = vsub.f32 0.0, %v12854_v8  ;;  %9142 = vmatpush1.bf16.msra.mxu1 %v14693_v45  ;;  %8917 = vmatprep.subr.bf16.mxu0 %v14698_v27  ;;  %v12855_v60 = vadd.f32 %v8271_v20, %v19517_v50  ;;  %v21805_v39 = vld [vmem:[#allocation22_spill] sm:$0xff] }
 0x542   :  { %v19614_v30 = vpop.f32.mrb[135].mxu1  ;;  %v15123_v48 = vpop.eup %15122  ;;  %11465 = vst [vmem:[%s21692_s9 + $0x8e8] sm:$0xff] %v15121_v18  ;;  %v14696_v9 = vld [vmem:[%s21687_s7 + $0xe70] ss:$76 sps:$4 sm:$0xff]   ;;  %15142 = vpow2.f32 %v10016_v33  ;;  %v10052_v34 = vmul.f32 1.442695, %v9704_v61  ;;  %8861 = vmatmul.mubr.bf16.gmra.mrb[208].mxu0 %v21804_v52  ;;  %9143 = vmatprep.subr.bf16.mxu1 %v14701_v55 }
 0x543   :  { %v15125_v40 = vpop.eup %15124  ;;  %11467 = vst [vmem:[%s21692_s9 + $0x8f8] sm:$0xff] %v15123_v48  ;;  %v10050_v23 = vmul.f32 1.442695, %v9703_v6  ;;  %v9721_v51 = vsub.f32 0.0, %v12823_v25  ;;  %15144 = vpow2.f32 %v10048_v53  ;;  %v10054_v16 = vmul.f32 1.442695, %v9705_v36  ;;  %9087 = vmatmul.mubr.bf16.gmra.mrb[208].mxu1 %v21804_v52  ;;  %8870 = vmatprep.mubr.bf16.mxu0 %v21805_v39 }
 0x544   :  { %v15127_v38 = vpop.eup %15126  ;;  %11466 = vst [vmem:[%s21692_s9 + $0x8f0] sm:$0xff] %v15125_v40  ;;  %v14699_v4 = vld [vmem:[%s21687_s7 + $0xe78] ss:$76 sps:$4 sm:$0xff]   ;;  %15146 = vpow2.f32 %v10052_v34  ;;  %v8051_v59 = vpop.f32.mrb[136].mxu0  ;;  %v14707_v45 = vld [vmem:[%s21687_s7 + $0xf14] ss:$76 sps:$4 sm:$0xff]   ;;  %8918 = vmatpush1.bf16.msra.mxu0 %v14696_v9  ;;  %9096 = vmatprep.mubr.bf16.mxu1 %v21805_v39  ;;  %v12824_v6 = vadd.f32 %v8047_v17, %v19521_v2 }
 0x545   :  { %v14704_v0 = vld [vmem:[%s21687_s7 + $0xf0c] ss:$76 sps:$4 sm:$0xff]   ;;  %11468 = vst [vmem:[%s21692_s9 + $0x900] sm:$0xff] %v15127_v38  ;;  %v10086_v49 = vmul.f32 1.442695, %v9721_v51  ;;  %v15129_v62 = vpop.eup %15128  ;;  %15148 = vpow2.f32 %v10050_v23  ;;  %v8277_v63 = vpop.f32.mrb[136].mxu1  ;;  %9144 = vmatpush1.bf16.msra.mxu1 %v14699_v4 }
 0x546   :  { %v19647_v58 = vpop.f32.mrb[137].mxu0  ;;  %v14702_v27 = vld [vmem:[%s21687_s7 + $0xf08] ss:$76 sps:$4 sm:$0xff]   ;;  %v15131_v1 = vpop.eup %15130  ;;  %v10576_v33 = vadd.f32 1.0, %v15129_v62  ;;  %15150 = vpow2.f32 %v10054_v16  ;;  %v14705_v8 = vld [vmem:[%s21687_s7 + $0xf10] ss:$76 sps:$4 sm:$0xff]   ;;  %8919 = vmatprep.subr.bf16.mxu0 %v14704_v0  ;;  %9145 = vmatprep.subr.bf16.mxu1 %v14707_v45  ;;  %v19675_v16 = vadd.f32 %v19614_v30, %v19528_v57 }
 0x547   :  { %v19653_v13 = vpop.f32.mrb[137].mxu1  ;;  %v19658_v20 = vpop.f32.mrb[138].mxu0  ;;  %v10578_v61 = vadd.f32 1.0, %v15131_v1  ;;  %15152 = vpow2.f32 %v10086_v49  ;;  %v14710_v48 = vld [vmem:[%s21687_s7 + $0xfa4] ss:$76 sps:$4 sm:$0xff]   ;;  %v9723_v23 = vsub.f32 0.0, %v12855_v60  ;;  %v19687_v1 = vadd.f32 %v8051_v59, %v19510_v15 }
 0x548   :  { %v15133_v18 = vpop.eup %15132  ;;  %v19661_v25 = vpop.f32.mrb[138].mxu1  ;;  %15154 = vrcp.f32 %v10576_v33  ;;  %v14713_v17 = vld [vmem:[%s21687_s7 + $0xfac] ss:$76 sps:$4 sm:$0xff]   ;;  %8920 = vmatpush1.bf16.msra.mxu0 %v14702_v27  ;;  %v9722_v45 = vsub.f32 0.0, %v12824_v6  ;;  %v14711_v62 = vld [vmem:[%s21687_s7 + $0xfa8] ss:$76 sps:$4 sm:$0xff]   ;;  %v19701_v59 = vadd.f32 %v8277_v63, %v19517_v50  ;;  %v19715_v63 = vadd.f32 %v19647_v58, %v19521_v2 }
 0x549   :  { %v19663_v55 = vpop.f32.mrb[139].mxu0  ;;  %v15135_v53 = vpop.eup %15134  ;;  %v10577_v36 = vadd.f32 1.0, %v15133_v18  ;;  %15156 = vrcp.f32 %v10578_v61  ;;  %v14708_v4 = vld [vmem:[%s21687_s7 + $0xfa0] ss:$76 sps:$4 sm:$0xff]   ;;  %9146 = vmatpush1.bf16.msra.mxu1 %v14705_v8  ;;  %8921 = vmatprep.subr.bf16.mxu0 %v14710_v48  ;;  %v14716_v30 = vld [vmem:[%s21687_s7 + $0x103c] ss:$76 sps:$4 sm:$0xff]  }
 0x54a   :  { %v19668_v9 = vpop.f32.mrb[139].mxu1  ;;  %v15137_v40 = vpop.eup %15136  ;;  %v10579_v34 = vadd.f32 1.0, %v15135_v53  ;;  %v21806_v33 = vld [vmem:[#allocation21_spill] sm:$0xff]  ;;  %9147 = vmatprep.subr.bf16.mxu1 %v14713_v17  ;;  %v14719_v61 = vld [vmem:[%s21687_s7 + $0x1044] ss:$76 sps:$4 sm:$0xff]   ;;  %v9740_v7 = vsub.f32 0.0, %v19687_v1  ;;  %v19754_v14 = vadd.f32 %v19663_v55, %v19521_v2 }
 0x54b   :  { %v15139_v51 = vpop.eup %15138  ;;  %15158 = vrcp.f32 %v10577_v36  ;;  %v10595_v38 = vadd.f32 1.0, %v15137_v40  ;;  %8871 = vmatmul.mubr.bf16.gmra.mrb[212].mxu0 %v21806_v33  ;;  %v19690_v18 = vpop.f32.mrb[140].mxu0  ;;  %v14714_v8 = vld [vmem:[%s21687_s7 + $0x1038] ss:$76 sps:$4 sm:$0xff]   ;;  %v19698_v53 = vmul.f32 1.442695, %v9723_v23  ;;  %9097 = vmatmul.mubr.bf16.gmra.mrb[212].mxu1 %v21806_v33  ;;  %v19768_v55 = vadd.f32 %v19668_v9, %v19528_v57 }
 0x54c   :  { %v15141_v0 = vpop.eup %15140  ;;  %15160 = vrcp.f32 %v10579_v34  ;;  %v10597_v49 = vadd.f32 1.0, %v15139_v51  ;;  %v21807_v36 = vld [vmem:[#allocation24_spill] sm:$0xff]  ;;  %v19705_v17 = vpop.f32.mrb[140].mxu1  ;;  %v14717_v34 = vld [vmem:[%s21687_s7 + $0x1040] ss:$76 sps:$4 sm:$0xff]   ;;  %v9724_v23 = vsub.f32 0.0, %v19675_v16  ;;  %8922 = vmatpush1.bf16.msra.mxu0 %v14708_v4  ;;  %v19727_v16 = vadd.f32 %v19653_v13, %v19528_v57 }
 0x54d   :  { %v15143_v60 = vpop.eup %15142  ;;  %15162 = vrcp.f32 %v10595_v38  ;;  %v10596_v27 = vadd.f32 1.0, %v15141_v0  ;;  %8880 = vmatprep.mubr.bf16.mxu0 %v21807_v36  ;;  %v19707_v40 = vpop.f32.mrb[141].mxu0  ;;  %9106 = vmatprep.mubr.bf16.mxu1 %v21807_v36  ;;  %v14725_v13 = vld [vmem:[%s21687_s7 + $0x10dc] ss:$76 sps:$4 sm:$0xff]   ;;  %v14754_v12 = vld [vmem:[%s21687_s7 + $0x174] ss:$76 sps:$4 sm:$0xff]  }
 0x54e   :  { %v15145_v6 = vpop.eup %15144  ;;  %15164 = vrcp.f32 %v10597_v49  ;;  %v10598_v48 = vadd.f32 1.0, %v15143_v60  ;;  %v19718_v0 = vpop.f32.mrb[141].mxu1  ;;  %v14722_v60 = vld [vmem:[%s21687_s7 + $0x10d4] ss:$76 sps:$4 sm:$0xff]   ;;  %9148 = vmatpush1.bf16.msra.mxu1 %v14711_v62  ;;  %8923 = vmatprep.subr.bf16.mxu0 %v14716_v30  ;;  %v21808_v9 = vld [vmem:[#allocation23_spill] sm:$0xff] }
 0x54f   :  { %v15147_v51 = vpop.eup %15146  ;;  %15166 = vrcp.f32 %v10596_v27  ;;  %v10614_v38 = vadd.f32 1.0, %v15145_v6  ;;  %v19720_v49 = vpop.f32.mrb[142].mxu0  ;;  %v10088_v6 = vmul.f32 1.442695, %v9722_v45  ;;  %9149 = vmatprep.subr.bf16.mxu1 %v14719_v61 }
 0x550   :  { %v15149_v37 = vpop.eup %15148  ;;  %15168 = vrcp.f32 %v10598_v48  ;;  %v10616_v27 = vadd.f32 1.0, %v15147_v51  ;;  %v19729_v58 = vpop.f32.mrb[142].mxu1  ;;  %v19736_v48 = vadd.f32 %v19658_v20, %v19510_v15  ;;  %v9742_v51 = vsub.f32 0.0, %v19701_v59  ;;  %v14720_v20 = vld [vmem:[%s21687_s7 + $0x10d0] ss:$76 sps:$4 sm:$0xff]   ;;  %8924 = vmatpush1.bf16.msra.mxu0 %v14714_v8 }
 0x551   :  { %v19731_v4 = vpop.f32.mrb[143].mxu0  ;;  %v15151_v5 = vpop.eup %15150  ;;  %15170 = vrcp.f32 %v10614_v38  ;;  %v10615_v41 = vadd.f32 1.0, %v15149_v37  ;;  %v19746_v37 = vadd.f32 %v19661_v25, %v19517_v50  ;;  %v9741_v38 = vsub.f32 0.0, %v19715_v63  ;;  %v14728_v25 = vld [vmem:[%s21687_s7 + $0x116c] ss:$76 sps:$4 sm:$0xff]   ;;  %8925 = vmatprep.subr.bf16.mxu0 %v14722_v60 }
 0x552   :  { %v19738_v45 = vpop.f32.mrb[143].mxu1  ;;  %v15153_v62 = vpop.eup %15152  ;;  %15172 = vrcp.f32 %v10616_v27  ;;  %v10617_v30 = vadd.f32 1.0, %v15151_v5  ;;  %v14723_v5 = vld [vmem:[%s21687_s7 + $0x10d8] ss:$76 sps:$4 sm:$0xff]   ;;  %v9743_v63 = vsub.f32 0.0, %v19727_v16  ;;  %9150 = vmatpush1.bf16.msra.mxu1 %v14717_v34  ;;  %v19779_v16 = vadd.f32 %v19690_v18, %v19510_v15 }
 0x553   :  { %v15155_v1 = vpop.eup %15154  ;;  %15174 = vrcp.f32 %v10615_v41  ;;  %v10633_v61 = vadd.f32 1.0, %v15153_v62  ;;  %v10092_v41 = vmul.f32 1.442695, %v9724_v23  ;;  %v14731_v8 = vld [vmem:[%s21687_s7 + $0x1174] ss:$76 sps:$4 sm:$0xff]   ;;  %v9759_v23 = vsub.f32 0.0, %v19736_v48  ;;  %8881 = vmatmul.mubr.bf16.gmra.mrb[216].mxu0 %v21808_v9  ;;  %9151 = vmatprep.subr.bf16.mxu1 %v14725_v13 }
 0x554   :  { %v15157_v59 = vpop.eup %15156  ;;  %11184 = vst [vmem:[%s21692_s9 + $0x20] sm:$0xff] %v15155_v1  ;;  %15176 = vrcp.f32 %v10617_v30  ;;  %v10124_v62 = vmul.f32 1.442695, %v9740_v7  ;;  %v19782_v34 = vpop.f32.mrb[144].mxu0  ;;  %v14726_v60 = vld [vmem:[%s21687_s7 + $0x1168] ss:$76 sps:$4 sm:$0xff]   ;;  %v19794_v48 = vadd.f32 %v19705_v17, %v19517_v50  ;;  %9107 = vmatmul.mubr.bf16.gmra.mrb[216].mxu1 %v21808_v9  ;;  %8926 = vmatpush1.bf16.msra.mxu0 %v14720_v20 }
 0x555   :  { %v15159_v27 = vpop.eup %15158  ;;  %11186 = vst [vmem:[%s21692_s9 + $0x30] sm:$0xff] %v15157_v59  ;;  %15178 = vrcp.f32 %v10633_v61  ;;  %v10128_v7 = vmul.f32 1.442695, %v9742_v51  ;;  %v9761_v18 = vsub.f32 0.0, %v19746_v37  ;;  %v21809_v13 = vld [vmem:[#allocation26_spill] sm:$0xff]  ;;  %v19798_v1 = vpop.f32.mrb[144].mxu1  ;;  %8927 = vmatprep.subr.bf16.mxu0 %v14728_v25 }
 0x556   :  { %v15161_v30 = vpop.eup %15160  ;;  %11185 = vst [vmem:[%s21692_s9 + $0x28] sm:$0xff] %v15159_v27  ;;  %15180 = vpow2.f32 %v19698_v53  ;;  %8890 = vmatprep.mubr.bf16.mxu0 %v21809_v13  ;;  %v19800_v61 = vpop.f32.mrb[145].mxu0  ;;  %v14729_v59 = vld [vmem:[%s21687_s7 + $0x1170] ss:$76 sps:$4 sm:$0xff]   ;;  %v10126_v17 = vmul.f32 1.442695, %v9741_v38  ;;  %9116 = vmatprep.mubr.bf16.mxu1 %v21809_v13 }
 0x557   :  { %v14734_v53 = vld [vmem:[%s21687_s7 + $0x1204] ss:$76 sps:$4 sm:$0xff]   ;;  %v15163_v51 = vpop.eup %15162  ;;  %11187 = vst [vmem:[%s21692_s9 + $0x38] sm:$0xff] %v15161_v30  ;;  %15182 = vpow2.f32 %v10088_v6  ;;  %v9760_v37 = vsub.f32 0.0, %v19754_v14  ;;  %v19813_v27 = vpop.f32.mrb[145].mxu1  ;;  %v9762_v30 = vsub.f32 0.0, %v19768_v55  ;;  %9152 = vmatpush1.bf16.msra.mxu1 %v14723_v5 }
 0x558   :  { %v19815_v9 = vpop.f32.mrb[146].mxu0  ;;  %v15165_v36 = vpop.eup %15164  ;;  %11203 = vst [vmem:[%s21692_s9 + $0xb8] sm:$0xff] %v15163_v51  ;;  %15184 = vpow2.f32 %v10092_v41  ;;  %v10130_v33 = vmul.f32 1.442695, %v9743_v63  ;;  %v10162_v38 = vmul.f32 1.442695, %v9759_v23  ;;  %9153 = vmatprep.subr.bf16.mxu1 %v14731_v8  ;;  %8928 = vmatpush1.bf16.msra.mxu0 %v14726_v60 }
 0x559   :  { %v19821_v6 = vpop.f32.mrb[146].mxu1  ;;  %v19823_v14 = vpop.f32.mrb[147].mxu0  ;;  %11205 = vst [vmem:[%s21692_s9 + $0xc8] sm:$0xff] %v15165_v36  ;;  %15186 = vpow2.f32 %v10124_v62  ;;  %v9778_v13 = vsub.f32 0.0, %v19779_v16  ;;  %v14737_v5 = vld [vmem:[%s21687_s7 + $0x120c] ss:$76 sps:$4 sm:$0xff]   ;;  %8929 = vmatprep.subr.bf16.mxu0 %v14734_v53 }
 0x55a   :  { %v15167_v20 = vpop.eup %15166  ;;  %v19829_v41 = vpop.f32.mrb[147].mxu1  ;;  %15188 = vpow2.f32 %v10128_v7  ;;  %v10166_v63 = vmul.f32 1.442695, %v9761_v18  ;;  %v9780_v36 = vsub.f32 0.0, %v19794_v48  ;;  %v10164_v8 = vmul.f32 1.442695, %v9760_v37 }
 0x55b   :  { %v15169_v25 = vpop.eup %15168  ;;  %11204 = vst [vmem:[%s21692_s9 + $0xc0] sm:$0xff] %v15167_v20  ;;  %15190 = vpow2.f32 %v10126_v17  ;;  %v14732_v62 = vld [vmem:[%s21687_s7 + $0x1200] ss:$76 sps:$4 sm:$0xff]   ;;  %v10168_v16 = vmul.f32 1.442695, %v9762_v30  ;;  %9154 = vmatpush1.bf16.msra.mxu1 %v14729_v59  ;;  %v21810_v51 = vld [vmem:[#allocation25_spill] sm:$0xff] }
 0x55c   :  { %v15171_v55 = vpop.eup %15170  ;;  %11206 = vst [vmem:[%s21692_s9 + $0xd0] sm:$0xff] %v15169_v25  ;;  %15192 = vpow2.f32 %v10130_v33  ;;  %v14735_v7 = vld [vmem:[%s21687_s7 + $0x1208] ss:$76 sps:$4 sm:$0xff]   ;;  %v10200_v48 = vmul.f32 1.442695, %v9778_v13  ;;  %8891 = vmatmul.mubr.bf16.gmra.mrb[220].mxu0 %v21810_v51  ;;  %9155 = vmatprep.subr.bf16.mxu1 %v14737_v5  ;;  %v19857_v33 = vpop.f32.mrb[148].mxu0 }
 0x55d   :  { %v15173_v23 = vpop.eup %15172  ;;  %11222 = vst [vmem:[%s21692_s9 + $0x150] sm:$0xff] %v15171_v55  ;;  %v14740_v60 = vld [vmem:[%s21687_s7 + $0x129c] ss:$76 sps:$4 sm:$0xff]   ;;  %15194 = vpow2.f32 %v10162_v38  ;;  %v14743_v59 = vld [vmem:[%s21687_s7 + $0x12a4] ss:$76 sps:$4 sm:$0xff]   ;;  %9117 = vmatmul.mubr.bf16.gmra.mrb[220].mxu1 %v21810_v51  ;;  %v19867_v13 = vpop.f32.mrb[148].mxu1  ;;  %8930 = vmatpush1.bf16.msra.mxu0 %v14732_v62 }
 0x55e   :  { %v15175_v18 = vpop.eup %15174  ;;  %11224 = vst [vmem:[%s21692_s9 + $0x160] sm:$0xff] %v15173_v23  ;;  %15196 = vpow2.f32 %v10166_v63  ;;  %v10204_v17 = vmul.f32 1.442695, %v9780_v36  ;;  %v21811_v37 = vld [vmem:[#allocation10_spill] sm:$0xff]  ;;  %v19869_v30 = vpop.f32.mrb[149].mxu0  ;;  %v12830_v36 = vadd.f32 %v19707_v40, %v19521_v2  ;;  %8931 = vmatprep.subr.bf16.mxu0 %v14740_v60 }
 0x55f   :  { %v15177_v53 = vpop.eup %15176  ;;  %11223 = vst [vmem:[%s21692_s9 + $0x158] sm:$0xff] %v15175_v18  ;;  %8933 = vmatprep.mubr.bf16.mxu0 %v21811_v37  ;;  %15198 = vpow2.f32 %v10164_v8  ;;  %9159 = vmatprep.mubr.bf16.mxu1 %v21811_v37  ;;  %v19875_v38 = vpop.f32.mrb[149].mxu1  ;;  %v14738_v5 = vld [vmem:[%s21687_s7 + $0x1298] ss:$76 sps:$4 sm:$0xff]   ;;  %v14741_v55 = vld [vmem:[%s21687_s7 + $0x12a0] ss:$76 sps:$4 sm:$0xff]  }
 0x560   :  { %v15179_v20 = vpop.eup %15178  ;;  %11225 = vst [vmem:[%s21692_s9 + $0x168] sm:$0xff] %v15177_v53  ;;  %v19880_v25 = vpop.f32.mrb[150].mxu0  ;;  %15200 = vpow2.f32 %v10168_v16  ;;  %9156 = vmatpush1.bf16.msra.mxu1 %v14735_v7  ;;  %v14746_v23 = vld [vmem:[%s21687_s7 + $0x44] ss:$76 sps:$4 sm:$0xff]   ;;  %v14747_v40 = vld [vmem:[%s21687_s7 + $0x508] ss:$76 sps:$4 sm:$0xff]  }
 0x561   :  { %v15181_v63 = vpop.eup %15180  ;;  %11241 = vst [vmem:[%s21692_s9 + $0x1e8] sm:$0xff] %v15179_v20  ;;  %v19890_v8 = vpop.f32.mrb[150].mxu1  ;;  %15202 = vpow2.f32 %v10200_v48  ;;  %9157 = vmatprep.subr.bf16.mxu1 %v14743_v59  ;;  %v12862_v20 = vadd.f32 %v19718_v0, %v19528_v57  ;;  %8932 = vmatpush1.bf16.msra.mxu0 %v14738_v5  ;;  %v9779_v59 = vsub.f32 0.0, %v12830_v36  ;;  %v19909_v0 = vadd.f32 %v19720_v49, %v19510_v15  ;;  %v14748_v5 = vld [vmem:[%s21687_s7 + $0x48] ss:$76 sps:$4 sm:$0xff]  }
 0x562   :  { %v19892_v62 = vpop.f32.mrb[151].mxu0  ;;  %v15183_v18 = vpop.eup %15182  ;;  %v10635_v53 = vadd.f32 1.0, %v15181_v63  ;;  %15204 = vpow2.f32 %v10204_v17  ;;  %v14744_v63 = vld [vmem:[%s21687_s7 + $0x40] ss:$76 sps:$4 sm:$0xff]   ;;  %9240 = vmatprep.subr.bf16.mxu0 %v14746_v23  ;;  %v14751_v36 = vld [vmem:[%s21687_s7 + $0xdc] ss:$76 sps:$4 sm:$0xff]  }
 0x563   :  { %v19897_v16 = vpop.f32.mrb[151].mxu1  ;;  %v15185_v7 = vpop.eup %15184  ;;  %v10634_v60 = vadd.f32 1.0, %v15183_v18  ;;  %v9797_v42 = vsub.f32 0.0, %v19909_v0 }
 0x564   :  { %v15187_v37 = vpop.eup %15186  ;;  %15206 = vrcp.f32 %v10635_v53  ;;  %v10636_v51 = vadd.f32 1.0, %v15185_v7  ;;  %9158 = vmatpush1.bf16.msra.mxu1 %v14741_v55  ;;  %v19920_v18 = vpop.f32.mrb[152].mxu1  ;;  %v14749_v53 = vld [vmem:[%s21687_s7 + $0xd8] ss:$76 sps:$4 sm:$0xff]  }
 0x565   :  { %v15189_v39 = vpop.eup %15188  ;;  %15208 = vrcp.f32 %v10634_v60  ;;  %v10652_v48 = vadd.f32 1.0, %v15187_v37  ;;  %12561 = vmatprep.subr.bf16.mxu1 %v14747_v40  ;;  %v19914_v37 = vpop.f32.mrb[152].mxu0  ;;  %v14755_v40 = vld [vmem:[%s21687_s7 + $0x5a0] ss:$76 sps:$4 sm:$0xff]  }
 0x566   :  { %v15191_v52 = vpop.eup %15190  ;;  %15210 = vrcp.f32 %v10636_v51  ;;  %v10654_v17 = vadd.f32 1.0, %v15189_v39  ;;  %v9781_v51 = vsub.f32 0.0, %v12862_v20  ;;  %v21812_v39 = vld [vmem:[#allocation8_spill] sm:$0xff]  ;;  %v19922_v49 = vpop.f32.mrb[153].mxu0  ;;  %v21813_v20 = vld [vmem:[#allocation14_spill] sm:$0xff] }
 0x567   :  { %v15193_v55 = vpop.eup %15192  ;;  %15212 = vrcp.f32 %v10652_v48  ;;  %v10653_v23 = vadd.f32 1.0, %v15191_v52  ;;  %8934 = vmatmul.mubr.bf16.vlgmr.msra.gmra.mrb[192].mxu0 %v21812_v39  ;;  %v19932_v52 = vadd.f32 %v19729_v58, %v19517_v50  ;;  %9160 = vmatmul.mubr.bf16.vlgmr.msra.gmra.mrb[192].mxu1 %v21812_v39  ;;  %v19936_v48 = vpop.f32.mrb[153].mxu1  ;;  %v19947_v58 = vadd.f32 %v19731_v4, %v19521_v2 }
 0x568   :  { %v15195_v7 = vpop.eup %15194  ;;  %15214 = vrcp.f32 %v10654_v17  ;;  %v10655_v60 = vadd.f32 1.0, %v15193_v55  ;;  %8943 = vmatprep.mubr.bf16.mxu0 %v21813_v20  ;;  %v19938_v3 = vpop.f32.mrb[154].mxu0  ;;  %v19943_v55 = vmul.f32 1.442695, %v9779_v59  ;;  %9169 = vmatprep.mubr.bf16.mxu1 %v21813_v20  ;;  %v19957_v59 = vadd.f32 %v19738_v45, %v19528_v57  ;;  %v14763_v45 = vld [vmem:[%s21687_s7 + $0x638] ss:$76 sps:$4 sm:$0xff]  }
 0x569   :  { %v15197_v10 = vpop.eup %15196  ;;  %15216 = vrcp.f32 %v10653_v23  ;;  %v10671_v17 = vadd.f32 1.0, %v15195_v7  ;;  %9241 = vmatpush1.bf16.msra.mxu0 %v14744_v63  ;;  %v19950_v39 = vpop.f32.mrb[154].mxu1  ;;  %12562 = vmatpush3.bf16.msra.mxu1 %v14748_v5  ;;  %v14756_v63 = vld [vmem:[%s21687_s7 + $0xe0] ss:$76 sps:$4 sm:$0xff]   ;;  %v10206_v20 = vmul.f32 1.442695, %v9781_v51 }
 0x56a   :  { %v19952_v56 = vpop.f32.mrb[155].mxu0  ;;  %v15199_v32 = vpop.eup %15198  ;;  %15218 = vrcp.f32 %v10655_v60  ;;  %v10673_v24 = vadd.f32 1.0, %v15197_v10  ;;  %9242 = vmatprep.subr.bf16.mxu0 %v14751_v36  ;;  %v19966_v10 = vadd.f32 %v19782_v34, %v19510_v15  ;;  %12563 = vmatprep.subr.bf16.mxu1 %v14755_v40  ;;  %v9799_v36 = vsub.f32 0.0, %v19932_v52 }
 0x56b   :  { %v19959_v4 = vpop.f32.mrb[155].mxu1  ;;  %v15201_v23 = vpop.eup %15200  ;;  %15220 = vrcp.f32 %v10671_v17  ;;  %v10672_v7 = vadd.f32 1.0, %v15199_v32  ;;  %v19974_v60 = vadd.f32 %v19798_v1, %v19517_v50  ;;  %v14752_v32 = vld [vmem:[%s21687_s7 + $0x170] ss:$76 sps:$4 sm:$0xff]   ;;  %v9798_v40 = vsub.f32 0.0, %v19947_v58 }
 0x56c   :  { %v15203_v0 = vpop.eup %15202  ;;  %15222 = vrcp.f32 %v10673_v24  ;;  %v10674_v5 = vadd.f32 1.0, %v15201_v23  ;;  %v19982_v17 = vadd.f32 %v19800_v61, %v19521_v2  ;;  %v14759_v24 = vld [vmem:[%s21687_s7 + $0x20c] ss:$76 sps:$4 sm:$0xff]   ;;  %v19993_v58 = vadd.f32 %v19813_v27, %v19528_v57  ;;  %v19995_v61 = vpop.f32.mrb[156].mxu0 }
 0x56d   :  { %v15205_v34 = vpop.eup %15204  ;;  %15224 = vrcp.f32 %v10672_v7  ;;  %v10690_v51 = vadd.f32 1.0, %v15203_v0  ;;  %9243 = vmatpush1.bf16.msra.mxu0 %v14749_v53  ;;  %v14764_v1 = vld [vmem:[%s21687_s7 + $0x178] ss:$76 sps:$4 sm:$0xff]   ;;  %v9800_v7 = vsub.f32 0.0, %v19957_v59  ;;  %12564 = vmatpush3.bf16.msra.mxu1 %v14756_v63  ;;  %v14771_v53 = vld [vmem:[%s21687_s7 + $0x6d0] ss:$76 sps:$4 sm:$0xff]   ;;  %v20006_v27 = vadd.f32 %v19815_v9, %v19510_v15 }
 0x56e   :  { %v15207_v52 = vpop.eup %15206  ;;  %15226 = vrcp.f32 %v10674_v5  ;;  %v10692_v23 = vadd.f32 1.0, %v15205_v34  ;;  %9244 = vmatprep.subr.bf16.mxu0 %v14754_v12  ;;  %v10238_v5 = vmul.f32 1.442695, %v9797_v42  ;;  %v9816_v59 = vsub.f32 0.0, %v19966_v10  ;;  %v21814_v12 = vld [vmem:[#allocation12_spill] sm:$0xff]  ;;  %v20009_v63 = vpop.f32.mrb[156].mxu1  ;;  %12565 = vmatprep.subr.bf16.mxu1 %v14763_v45 }
 0x56f   :  { %v15209_v0 = vpop.eup %15208  ;;  %11243 = vst [vmem:[%s21692_s9 + $0x1f8] sm:$0xff] %v15207_v52  ;;  %15228 = vrcp.f32 %v10690_v51  ;;  %8944 = vmatmul.mubr.bf16.gmra.mrb[196].mxu0 %v21814_v12  ;;  %v20011_v34 = vpop.f32.mrb[157].mxu0  ;;  %v10242_v42 = vmul.f32 1.442695, %v9799_v36  ;;  %v9818_v9 = vsub.f32 0.0, %v19974_v60  ;;  %v12867_v10 = vadd.f32 %v19821_v6, %v19517_v50  ;;  %9170 = vmatmul.mubr.bf16.gmra.mrb[196].mxu1 %v21814_v12 }
 0x570   :  { %v15211_v52 = vpop.eup %15210  ;;  %11242 = vst [vmem:[%s21692_s9 + $0x1f0] sm:$0xff] %v15209_v0  ;;  %15230 = vrcp.f32 %v10692_v23  ;;  %8953 = vmatprep.mubr.bf16.mxu0 %v17619_v46  ;;  %v20024_v51 = vpop.f32.mrb[157].mxu1  ;;  %v14762_v45 = vld [vmem:[%s21687_s7 + $0x2a4] ss:$76 sps:$4 sm:$0xff]   ;;  %v10240_v6 = vmul.f32 1.442695, %v9798_v40  ;;  %v12836_v60 = vadd.f32 %v19823_v14, %v19521_v2  ;;  %9179 = vmatprep.mubr.bf16.mxu1 %v17619_v46 }
 0x571   :  { %v20026_v35 = vpop.f32.mrb[158].mxu0  ;;  %v15213_v0 = vpop.eup %15212  ;;  %11244 = vst [vmem:[%s21692_s9 + $0x200] sm:$0xff] %v15211_v52  ;;  %15232 = vpow2.f32 %v19943_v55  ;;  %v9817_v36 = vsub.f32 0.0, %v19982_v17  ;;  %9245 = vmatpush1.bf16.msra.mxu0 %v14752_v32  ;;  %v10244_v55 = vmul.f32 1.442695, %v9800_v7  ;;  %v9819_v40 = vsub.f32 0.0, %v19993_v58  ;;  %12566 = vmatpush3.bf16.msra.mxu1 %v14764_v1 }
 0x572   :  { %21815 = vst [vmem:[#allocation27_spill] sm:$0xff] %v20026_v35  ;;  %v20039_v23 = vpop.f32.mrb[158].mxu1  ;;  %v20041_v12 = vpop.f32.mrb[159].mxu0  ;;  %11260 = vst [vmem:[%s21692_s9 + $0x280] sm:$0xff] %v15213_v0  ;;  %15234 = vpow2.f32 %v10206_v20  ;;  %9246 = vmatprep.subr.bf16.mxu0 %v14759_v24  ;;  %v14772_v14 = vld [vmem:[%s21687_s7 + $0x210] ss:$76 sps:$4 sm:$0xff]   ;;  %12567 = vmatprep.subr.bf16.mxu1 %v14771_v53 }
 0x573   :  { %v15215_v35 = vpop.eup %15214  ;;  %v20047_v17 = vpop.f32.mrb[159].mxu1  ;;  %15236 = vpow2.f32 %v10238_v5  ;;  %v10276_v52 = vmul.f32 1.442695, %v9816_v59  ;;  %v9835_v20 = vsub.f32 0.0, %v20006_v27  ;;  %v14779_v24 = vld [vmem:[%s21687_s7 + $0x768] ss:$76 sps:$4 sm:$0xff]  }
 0x574   :  { %v15217_v32 = vpop.eup %15216  ;;  %11262 = vst [vmem:[%s21692_s9 + $0x290] sm:$0xff] %v15215_v35  ;;  %15238 = vpow2.f32 %v10242_v42  ;;  %v10280_v1 = vmul.f32 1.442695, %v9818_v9  ;;  %v9837_v58 = vsub.f32 0.0, %v12867_v10  ;;  %v10278_v35 = vmul.f32 1.442695, %v9817_v36 }
 0x575   :  { %v15219_v7 = vpop.eup %15218  ;;  %11261 = vst [vmem:[%s21692_s9 + $0x288] sm:$0xff] %v15217_v32  ;;  %15240 = vpow2.f32 %v10240_v6  ;;  %v9836_v53 = vsub.f32 0.0, %v12836_v60  ;;  %9247 = vmatpush1.bf16.msra.mxu0 %v14757_v54  ;;  %v14760_v5 = vld [vmem:[%s21687_s7 + $0x2a0] ss:$76 sps:$4 sm:$0xff]   ;;  %v10282_v27 = vmul.f32 1.442695, %v9819_v40  ;;  %12568 = vmatpush3.bf16.msra.mxu1 %v14772_v14 }
 0x576   :  { %v15221_v0 = vpop.eup %15220  ;;  %11263 = vst [vmem:[%s21692_s9 + $0x298] sm:$0xff] %v15219_v7  ;;  %15242 = vpow2.f32 %v10244_v55  ;;  %9248 = vmatprep.subr.bf16.mxu0 %v14762_v45  ;;  %v14767_v42 = vld [vmem:[%s21687_s7 + $0x33c] ss:$76 sps:$4 sm:$0xff]   ;;  %v10314_v10 = vmul.f32 1.442695, %v9835_v20  ;;  %12569 = vmatprep.subr.bf16.mxu1 %v14779_v24  ;;  %v12868_v24 = vadd.f32 %v19829_v41, %v19528_v57 }
 0x577   :  { %v15223_v59 = vpop.eup %15222  ;;  %11279 = vst [vmem:[%s21692_s9 + $0x318] sm:$0xff] %v15221_v0  ;;  %v14780_v54 = vld [vmem:[%s21687_s7 + $0x2a8] ss:$76 sps:$4 sm:$0xff]   ;;  %15244 = vpow2.f32 %v10276_v52  ;;  %8954 = vmatmul.mubr.bf16.gmra.mrb[200].mxu0 %v17615_v44  ;;  %v14787_v45 = vld [vmem:[%s21687_s7 + $0x800] ss:$76 sps:$4 sm:$0xff]   ;;  %9180 = vmatmul.mubr.bf16.gmra.mrb[200].mxu1 %v17615_v44 }
 0x578   :  { %v15225_v9 = vpop.eup %15224  ;;  %11281 = vst [vmem:[%s21692_s9 + $0x328] sm:$0xff] %v15223_v59  ;;  %15246 = vpow2.f32 %v10280_v1  ;;  %v10318_v36 = vmul.f32 1.442695, %v9837_v58  ;;  %8963 = vmatprep.mubr.bf16.mxu0 %v17663_v28  ;;  %v10316_v55 = vmul.f32 1.442695, %v9836_v53  ;;  %9189 = vmatprep.mubr.bf16.mxu1 %v17663_v28  ;;  %v12837_v53 = vadd.f32 %v19857_v33, %v19510_v15 }
 0x579   :  { %v15227_v6 = vpop.eup %15226  ;;  %11280 = vst [vmem:[%s21692_s9 + $0x320] sm:$0xff] %v15225_v9  ;;  %15248 = vpow2.f32 %v10278_v35  ;;  %9249 = vmatpush1.bf16.msra.mxu0 %v14760_v5  ;;  %v14765_v40 = vld [vmem:[%s21687_s7 + $0x338] ss:$76 sps:$4 sm:$0xff]   ;;  %v14770_v32 = vld [vmem:[%s21687_s7 + $0x3d4] ss:$76 sps:$4 sm:$0xff]   ;;  %12570 = vmatpush3.bf16.msra.mxu1 %v14780_v54  ;;  %v9838_v9 = vsub.f32 0.0, %v12868_v24 }
 0x57a   :  { %v15229_v60 = vpop.eup %15228  ;;  %11282 = vst [vmem:[%s21692_s9 + $0x330] sm:$0xff] %v15227_v6  ;;  %15250 = vpow2.f32 %v10282_v27  ;;  %9250 = vmatprep.subr.bf16.mxu0 %v14767_v42  ;;  %v14788_v52 = vld [vmem:[%s21687_s7 + $0x340] ss:$76 sps:$4 sm:$0xff]   ;;  %12571 = vmatprep.subr.bf16.mxu1 %v14787_v45  ;;  %v14795_v7 = vld [vmem:[%s21687_s7 + $0x898] ss:$76 sps:$4 sm:$0xff]  }
 0x57b   :  { %v15231_v14 = vpop.eup %15230  ;;  %11298 = vst [vmem:[%s21692_s9 + $0x3b0] sm:$0xff] %v15229_v60  ;;  %15252 = vpow2.f32 %v10314_v10  ;;  %v14768_v5 = vld [vmem:[%s21687_s7 + $0x3d0] ss:$76 sps:$4 sm:$0xff]   ;;  %v14775_v27 = vld [vmem:[%s21687_s7 + $0x46c] ss:$76 sps:$4 sm:$0xff]  }
 0x57c   :  { %v15233_v20 = vpop.eup %15232  ;;  %11300 = vst [vmem:[%s21692_s9 + $0x3c0] sm:$0xff] %v15231_v14  ;;  %15254 = vpow2.f32 %v10318_v36  ;;  %v14796_v42 = vld [vmem:[%s21687_s7 + $0x3d8] ss:$76 sps:$4 sm:$0xff]   ;;  %v14803_v10 = vld [vmem:[%s21687_s7 + $0x930] ss:$76 sps:$4 sm:$0xff]   ;;  %v12869_v36 = vadd.f32 %v19867_v13, %v19517_v50  ;;  %v12838_v13 = vadd.f32 %v19869_v30, %v19521_v2 }
 0x57d   :  { %v15235_v1 = vpop.eup %15234  ;;  %v10691_v58 = vadd.f32 1.0, %v15233_v20  ;;  %15256 = vpow2.f32 %v10316_v55  ;;  %9251 = vmatpush1.bf16.msra.mxu0 %v14765_v40  ;;  %12572 = vmatpush3.bf16.msra.mxu1 %v14788_v52  ;;  %v9854_v40 = vsub.f32 0.0, %v12837_v53  ;;  %v14773_v14 = vld [vmem:[%s21687_s7 + $0x468] ss:$76 sps:$4 sm:$0xff]   ;;  %v14778_v20 = vld [vmem:[%s21687_s7 + $0x504] ss:$76 sps:$4 sm:$0xff]  }
 0x57e   :  { %v15237_v0 = vpop.eup %15236  ;;  %v10693_v35 = vadd.f32 1.0, %v15235_v1  ;;  %9252 = vmatprep.subr.bf16.mxu0 %v14770_v32  ;;  %12573 = vmatprep.subr.bf16.mxu1 %v14795_v7  ;;  %v14804_v24 = vld [vmem:[%s21687_s7 + $0x470] ss:$76 sps:$4 sm:$0xff]   ;;  %v14811_v30 = vld [vmem:[%s21687_s7 + $0xe88] ss:$76 sps:$4 sm:$0xff]  }
 0x57f   :  { %v15239_v41 = vpop.eup %15238  ;;  %15258 = vrcp.f32 %v10691_v58  ;;  %v10709_v59 = vadd.f32 1.0, %v15237_v0  ;;  %8964 = vmatmul.mubr.bf16.gmra.mrb[204].mxu0 %v17659_v26  ;;  %9190 = vmatmul.mubr.bf16.gmra.mrb[204].mxu1 %v17659_v26  ;;  %v10320_v58 = vmul.f32 1.442695, %v9838_v9  ;;  %v12870_v0 = vadd.f32 %v19875_v38, %v19528_v57  ;;  %v14776_v38 = vld [vmem:[%s21687_s7 + $0x500] ss:$76 sps:$4 sm:$0xff]  }
 0x580   :  { %v15241_v54 = vpop.eup %15240  ;;  %15260 = vrcp.f32 %v10693_v35  ;;  %v10711_v33 = vadd.f32 1.0, %v15239_v41  ;;  %8973 = vmatprep.mubr.bf16.mxu0 %v17707_v21  ;;  %9199 = vmatprep.mubr.bf16.mxu1 %v17707_v21  ;;  %v12839_v41 = vadd.f32 %v19880_v25, %v19510_v15  ;;  %v14783_v25 = vld [vmem:[%s21687_s7 + $0x59c] ss:$76 sps:$4 sm:$0xff]  }
 0x581   :  { %v15243_v45 = vpop.eup %15242  ;;  %15262 = vrcp.f32 %v10709_v59  ;;  %v10710_v6 = vadd.f32 1.0, %v15241_v54  ;;  %9253 = vmatpush1.bf16.msra.mxu0 %v14768_v5  ;;  %12574 = vmatpush3.bf16.msra.mxu1 %v14796_v42  ;;  %v9856_v5 = vsub.f32 0.0, %v12869_v36  ;;  %v10352_v42 = vmul.f32 1.442695, %v9854_v40 }
 0x582   :  { %v15245_v60 = vpop.eup %15244  ;;  %15264 = vrcp.f32 %v10711_v33  ;;  %v10712_v55 = vadd.f32 1.0, %v15243_v45  ;;  %9254 = vmatprep.subr.bf16.mxu0 %v14775_v27  ;;  %12575 = vmatprep.subr.bf16.mxu1 %v14803_v10  ;;  %v12871_v54 = vadd.f32 %v19890_v8, %v19517_v50  ;;  %v9855_v10 = vsub.f32 0.0, %v12838_v13 }
 0x583   :  { %v15247_v32 = vpop.eup %15246  ;;  %15266 = vrcp.f32 %v10710_v6  ;;  %v10728_v52 = vadd.f32 1.0, %v15245_v60  ;;  %v12840_v45 = vadd.f32 %v19892_v62, %v19521_v2  ;;  %v9857_v36 = vsub.f32 0.0, %v12870_v0 }
 0x584   :  { %v15249_v7 = vpop.eup %15248  ;;  %15268 = vrcp.f32 %v10712_v55  ;;  %v10730_v1 = vadd.f32 1.0, %v15247_v32  ;;  %v12872_v60 = vadd.f32 %v19897_v16, %v19528_v57  ;;  %v9873_v62 = vsub.f32 0.0, %v12839_v41 }
 0x585   :  { %v15251_v35 = vpop.eup %15250  ;;  %15270 = vrcp.f32 %v10728_v52  ;;  %v10729_v53 = vadd.f32 1.0, %v15249_v7  ;;  %9255 = vmatpush1.bf16.msra.mxu0 %v14773_v14  ;;  %12576 = vmatpush3.bf16.msra.mxu1 %v14804_v24  ;;  %v12841_v14 = vadd.f32 %v19914_v37, %v19510_v15  ;;  %v10356_v16 = vmul.f32 1.442695, %v9856_v5  ;;  %v14781_v37 = vld [vmem:[%s21687_s7 + $0x598] ss:$76 sps:$4 sm:$0xff]  }
 0x586   :  { %v15253_v59 = vpop.eup %15252  ;;  %15272 = vrcp.f32 %v10730_v1  ;;  %v10731_v27 = vadd.f32 1.0, %v15251_v35  ;;  %9256 = vmatprep.subr.bf16.mxu0 %v14778_v20  ;;  %12625 = vmatprep.subr.bf16.mxu1 %v14811_v30  ;;  %v9875_v52 = vsub.f32 0.0, %v12871_v54  ;;  %v12873_v13 = vadd.f32 %v19920_v18, %v19517_v50  ;;  %v14786_v18 = vld [vmem:[%s21687_s7 + $0x634] ss:$76 sps:$4 sm:$0xff]  }
 0x587   :  { %v15255_v33 = vpop.eup %15254  ;;  %15274 = vrcp.f32 %v10729_v53  ;;  %v10747_v9 = vadd.f32 1.0, %v15253_v59  ;;  %8974 = vmatmul.mubr.bf16.gmra.mrb[208].mxu0 %v17703_v19  ;;  %9200 = vmatmul.mubr.bf16.gmra.mrb[208].mxu1 %v17703_v19  ;;  %v10354_v24 = vmul.f32 1.442695, %v9855_v10  ;;  %v9874_v7 = vsub.f32 0.0, %v12840_v45 }
 0x588   :  { %v15257_v6 = vpop.eup %15256  ;;  %15276 = vrcp.f32 %v10731_v27  ;;  %v10749_v8 = vadd.f32 1.0, %v15255_v33  ;;  %8983 = vmatprep.mubr.bf16.mxu0 %v17751_v22  ;;  %9209 = vmatprep.mubr.bf16.mxu1 %v17751_v22  ;;  %v12842_v1 = vadd.f32 %v19922_v49, %v19521_v2  ;;  %v10358_v30 = vmul.f32 1.442695, %v9857_v36  ;;  %v14791_v33 = vld [vmem:[%s21687_s7 + $0x6cc] ss:$76 sps:$4 sm:$0xff]  }
 0x589   :  { %v15259_v55 = vpop.eup %15258  ;;  %15278 = vrcp.f32 %v10747_v9  ;;  %v10748_v40 = vadd.f32 1.0, %v15257_v6  ;;  %9257 = vmatpush1.bf16.msra.mxu0 %v14776_v38  ;;  %v9876_v35 = vsub.f32 0.0, %v12872_v60  ;;  %v12874_v53 = vadd.f32 %v19936_v48, %v19528_v57  ;;  %v14784_v48 = vld [vmem:[%s21687_s7 + $0x630] ss:$76 sps:$4 sm:$0xff]   ;;  %v14789_v60 = vld [vmem:[%s21687_s7 + $0x6c8] ss:$76 sps:$4 sm:$0xff]  }
 0x58a   :  { %v15261_v32 = vpop.eup %15260  ;;  %11299 = vst [vmem:[%s21692_s9 + $0x3b8] sm:$0xff] %v15259_v55  ;;  %15280 = vrcp.f32 %v10749_v8  ;;  %9258 = vmatprep.subr.bf16.mxu0 %v14783_v25  ;;  %v10390_v49 = vmul.f32 1.442695, %v9873_v62  ;;  %v9892_v41 = vsub.f32 0.0, %v12841_v14  ;;  %v9894_v27 = vsub.f32 0.0, %v12873_v13 }
 0x58b   :  { %v15263_v20 = vpop.eup %15262  ;;  %11301 = vst [vmem:[%s21692_s9 + $0x3c8] sm:$0xff] %v15261_v32  ;;  %15282 = vrcp.f32 %v10748_v40  ;;  %v9893_v38 = vsub.f32 0.0, %v12842_v1  ;;  %v10396_v10 = vmul.f32 1.442695, %v9876_v35  ;;  %v9895_v45 = vsub.f32 0.0, %v12874_v53 }
 0x58c   :  { %v15265_v0 = vpop.eup %15264  ;;  %11317 = vst [vmem:[%s21692_s9 + $0x448] sm:$0xff] %v15263_v20  ;;  %15284 = vpow2.f32 %v10320_v58  ;;  %v10394_v58 = vmul.f32 1.442695, %v9875_v52  ;;  %v10428_v6 = vmul.f32 1.442695, %v9892_v41  ;;  %v12843_v13 = vadd.f32 %v19938_v3, %v19510_v15 }
 0x58d   :  { %v15267_v5 = vpop.eup %15266  ;;  %11319 = vst [vmem:[%s21692_s9 + $0x458] sm:$0xff] %v15265_v0  ;;  %15286 = vpow2.f32 %v10352_v42  ;;  %9259 = vmatpush1.bf16.msra.mxu0 %v14781_v37  ;;  %v10392_v42 = vmul.f32 1.442695, %v9874_v7  ;;  %v10432_v36 = vmul.f32 1.442695, %v9894_v27 }
 0x58e   :  { %v15269_v59 = vpop.eup %15268  ;;  %11318 = vst [vmem:[%s21692_s9 + $0x450] sm:$0xff] %v15267_v5  ;;  %15288 = vpow2.f32 %v10356_v16  ;;  %9260 = vmatprep.subr.bf16.mxu0 %v14786_v18  ;;  %v10430_v40 = vmul.f32 1.442695, %v9893_v38  ;;  %v14794_v62 = vld [vmem:[%s21687_s7 + $0x764] ss:$76 sps:$4 sm:$0xff]   ;;  %v9911_v5 = vsub.f32 0.0, %v12843_v13 }
 0x58f   :  { %v15271_v54 = vpop.eup %15270  ;;  %11320 = vst [vmem:[%s21692_s9 + $0x460] sm:$0xff] %v15269_v59  ;;  %15290 = vpow2.f32 %v10354_v24  ;;  %8984 = vmatmul.mubr.bf16.gmra.mrb[212].mxu0 %v17747_v11  ;;  %9210 = vmatmul.mubr.bf16.gmra.mrb[212].mxu1 %v17747_v11  ;;  %v10434_v32 = vmul.f32 1.442695, %v9895_v45  ;;  %v14792_v37 = vld [vmem:[%s21687_s7 + $0x760] ss:$76 sps:$4 sm:$0xff]  }
 0x590   :  { %v15273_v9 = vpop.eup %15272  ;;  %11336 = vst [vmem:[%s21692_s9 + $0x4e0] sm:$0xff] %v15271_v54  ;;  %15292 = vpow2.f32 %v10358_v30  ;;  %8993 = vmatprep.mubr.bf16.mxu0 %v17795_v31  ;;  %9219 = vmatprep.mubr.bf16.mxu1 %v17795_v31  ;;  %v14799_v7 = vld [vmem:[%s21687_s7 + $0x7fc] ss:$76 sps:$4 sm:$0xff]   ;;  %v12875_v30 = vadd.f32 %v19950_v39, %v19517_v50  ;;  %v12844_v39 = vadd.f32 %v19952_v56, %v19521_v2  ;;  %v10466_v45 = vmul.f32 1.442695, %v9911_v5 }
 0x591   :  { %v15275_v25 = vpop.eup %15274  ;;  %11338 = vst [vmem:[%s21692_s9 + $0x4f0] sm:$0xff] %v15273_v9  ;;  %15294 = vpow2.f32 %v10390_v49  ;;  %9261 = vmatpush1.bf16.msra.mxu0 %v14784_v48  ;;  %v14797_v49 = vld [vmem:[%s21687_s7 + $0x7f8] ss:$76 sps:$4 sm:$0xff]   ;;  %v12876_v54 = vadd.f32 %v19959_v4, %v19528_v57  ;;  %v12845_v56 = vadd.f32 %v19995_v61, %v19510_v15 }
 0x592   :  { %v15277_v8 = vpop.eup %15276  ;;  %11337 = vst [vmem:[%s21692_s9 + $0x4e8] sm:$0xff] %v15275_v25  ;;  %15296 = vpow2.f32 %v10394_v58  ;;  %9262 = vmatprep.subr.bf16.mxu0 %v14791_v33  ;;  %v14802_v58 = vld [vmem:[%s21687_s7 + $0x894] ss:$76 sps:$4 sm:$0xff]   ;;  %v9913_v33 = vsub.f32 0.0, %v12875_v30  ;;  %v14800_v25 = vld [vmem:[%s21687_s7 + $0x890] ss:$76 sps:$4 sm:$0xff]  }
 0x593   :  { %v15279_v55 = vpop.eup %15278  ;;  %11339 = vst [vmem:[%s21692_s9 + $0x4f8] sm:$0xff] %v15277_v8  ;;  %15298 = vpow2.f32 %v10392_v42  ;;  %v9912_v4 = vsub.f32 0.0, %v12844_v39  ;;  %v14812_v39 = vld [vmem:[%s21687_s7 + $0x9c8] ss:$76 sps:$4 sm:$0xff]  }
 0x594   :  { %v15281_v14 = vpop.eup %15280  ;;  %11355 = vst [vmem:[%s21692_s9 + $0x578] sm:$0xff] %v15279_v55  ;;  %15300 = vpow2.f32 %v10396_v10 }
 0x595   :  { %v15283_v16 = vpop.eup %15282  ;;  %11357 = vst [vmem:[%s21692_s9 + $0x588] sm:$0xff] %v15281_v14  ;;  %15302 = vpow2.f32 %v10428_v6  ;;  %9263 = vmatpush1.bf16.msra.mxu0 %v14789_v60  ;;  %v14807_v60 = vld [vmem:[%s21687_s7 + $0x92c] ss:$76 sps:$4 sm:$0xff]   ;;  %v10468_v30 = vmul.f32 1.442695, %v9912_v4 }
 0x596   :  { %v15285_v52 = vpop.eup %15284  ;;  %11356 = vst [vmem:[%s21692_s9 + $0x580] sm:$0xff] %v15283_v16  ;;  %15304 = vpow2.f32 %v10432_v36  ;;  %9264 = vmatprep.subr.bf16.mxu0 %v14794_v62  ;;  %v12877_v36 = vadd.f32 %v20009_v63, %v19517_v50  ;;  %v12846_v62 = vadd.f32 %v20011_v34, %v19521_v2  ;;  %v10470_v16 = vmul.f32 1.442695, %v9913_v33 }
 0x597   :  { %v15287_v20 = vpop.eup %15286  ;;  %v10750_v24 = vadd.f32 1.0, %v15285_v52  ;;  %15306 = vpow2.f32 %v10430_v40  ;;  %8994 = vmatmul.mubr.bf16.gmra.mrb[216].mxu0 %v17791_v29  ;;  %9220 = vmatmul.mubr.bf16.gmra.mrb[216].mxu1 %v17791_v29  ;;  %v9914_v40 = vsub.f32 0.0, %v12876_v54  ;;  %v12878_v63 = vadd.f32 %v20024_v51, %v19528_v57  ;;  %v21816_v52 = vld [vmem:[#allocation9_spill] sm:$0xff] }
 0x598   :  { %v15289_v1 = vpop.eup %15288  ;;  %v10766_v18 = vadd.f32 1.0, %v15287_v20  ;;  %15308 = vpow2.f32 %v10434_v32  ;;  %9003 = vmatprep.mubr.bf16.mxu0 %v17839_v47  ;;  %9229 = vmatprep.mubr.bf16.mxu1 %v17839_v47  ;;  %v9930_v20 = vsub.f32 0.0, %v12845_v56 }
 0x599   :  { %v15291_v0 = vpop.eup %15290  ;;  %15310 = vrcp.f32 %v10750_v24  ;;  %v10768_v3 = vadd.f32 1.0, %v15289_v1  ;;  %9265 = vmatpush1.bf16.msra.mxu0 %v14792_v37  ;;  %v21817_v24 = vld [vmem:[#allocation27_spill] sm:$0xff] }
 0x59a   :  { %v15293_v35 = vpop.eup %15292  ;;  %15312 = vrcp.f32 %v10766_v18  ;;  %v10767_v53 = vadd.f32 1.0, %v15291_v0  ;;  %9266 = vmatprep.subr.bf16.mxu0 %v14799_v7  ;;  %v12847_v34 = vadd.f32 %v21817_v24, %v19510_v15  ;;  %v14805_v7 = vld [vmem:[%s21687_s7 + $0x928] ss:$76 sps:$4 sm:$0xff]   ;;  %v9932_v18 = vsub.f32 0.0, %v12877_v36 }
 0x59b   :  { %v15295_v41 = vpop.eup %15294  ;;  %15314 = vrcp.f32 %v10768_v3  ;;  %v10769_v59 = vadd.f32 1.0, %v15293_v35  ;;  %v12879_v0 = vadd.f32 %v20039_v23, %v19517_v50  ;;  %v14810_v3 = vld [vmem:[%s21687_s7 + $0x9c4] ss:$76 sps:$4 sm:$0xff]   ;;  %v9931_v35 = vsub.f32 0.0, %v12846_v62 }
 0x59c   :  { %v15297_v27 = vpop.eup %15296  ;;  %15316 = vrcp.f32 %v10767_v53  ;;  %v10785_v48 = vadd.f32 1.0, %v15295_v41  ;;  %v12848_v53 = vadd.f32 %v20041_v12, %v19521_v2  ;;  %v10472_v50 = vmul.f32 1.442695, %v9914_v40  ;;  %v14808_v41 = vld [vmem:[%s21687_s7 + $0x9c0] ss:$76 sps:$4 sm:$0xff]  }
 0x59d   :  { %v15299_v42 = vpop.eup %15298  ;;  %15318 = vrcp.f32 %v10769_v59  ;;  %v10787_v38 = vadd.f32 1.0, %v15297_v27  ;;  %9267 = vmatpush1.bf16.msra.mxu0 %v14797_v49  ;;  %v9933_v23 = vsub.f32 0.0, %v12878_v63  ;;  %v12880_v49 = vadd.f32 %v20047_v17, %v19528_v57  ;;  %v14815_v27 = vld [vmem:[%s21687_s7 + $0xa5c] ss:$76 sps:$4 sm:$0xff]   ;;  %v14827_v62 = vld [vmem:[%s21687_s7 + $0xfb8] ss:$76 sps:$4 sm:$0xff]  }
 0x59e   :  { %v15301_v9 = vpop.eup %15300  ;;  %15320 = vrcp.f32 %v10785_v48  ;;  %v10786_v10 = vadd.f32 1.0, %v15299_v42  ;;  %9268 = vmatprep.subr.bf16.mxu0 %v14802_v58  ;;  %v10504_v2 = vmul.f32 1.442695, %v9930_v20  ;;  %v9949_v12 = vsub.f32 0.0, %v12847_v34  ;;  %v14816_v63 = vld [vmem:[%s21687_s7 + $0xaf0] ss:$76 sps:$4 sm:$0xff]  }
 0x59f   :  { %v15303_v6 = vpop.eup %15302  ;;  %15322 = vrcp.f32 %v10787_v38  ;;  %v10788_v8 = vadd.f32 1.0, %v15301_v9  ;;  %9004 = vmatmul.mubr.bf16.gmra.mrb[220].mxu0 %v17835_v43  ;;  %9230 = vmatmul.mubr.bf16.gmra.mrb[220].mxu1 %v17835_v43  ;;  %v10508_v57 = vmul.f32 1.442695, %v9932_v18  ;;  %v9951_v17 = vsub.f32 0.0, %v12879_v0  ;;  %v14819_v38 = vld [vmem:[%s21687_s7 + $0xf20] ss:$76 sps:$4 sm:$0xff]  }
 0x5a0   :  { %v15305_v55 = vpop.eup %15304  ;;  %15324 = vrcp.f32 %v10786_v10  ;;  %v10804_v61 = vadd.f32 1.0, %v15303_v6  ;;  %9272 = vmatprep.mubr.bf16.mxu0 %v21816_v52  ;;  %9498 = vmatprep.mubr.bf16.mxu1 %v21816_v52  ;;  %v10506_v54 = vmul.f32 1.442695, %v9931_v35  ;;  %v9950_v42 = vsub.f32 0.0, %v12848_v53  ;;  %v21819_v6 = vld [vmem:[#allocation13_spill] sm:$0xff]  ;;  %v21821_v0 = vld [vmem:[#allocation16_spill] sm:$0xff] }
 0x5a1   :  { %v15307_v14 = vpop.eup %15306  ;;  %15326 = vrcp.f32 %v10788_v8  ;;  %v10806_v32 = vadd.f32 1.0, %v15305_v55  ;;  %9269 = vmatpush1.bf16.msra.mxu0 %v14800_v25  ;;  %v10510_v9 = vmul.f32 1.442695, %v9933_v23  ;;  %v9952_v10 = vsub.f32 0.0, %v12880_v49  ;;  %v14813_v8 = vld [vmem:[%s21687_s7 + $0xa58] ss:$76 sps:$4 sm:$0xff]  }
 0x5a2   :  { %v15309_v13 = vpop.eup %15308  ;;  %15328 = vrcp.f32 %v10804_v61  ;;  %v10805_v37 = vadd.f32 1.0, %v15307_v14  ;;  %9270 = vmatprep.subr.bf16.mxu0 %v14807_v60  ;;  %v10542_v25 = vmul.f32 1.442695, %v9949_v12  ;;  %v10546_v36 = vmul.f32 1.442695, %v9951_v17  ;;  %v4260_v53 = vld [vmem:[%s21691_s8 + $0x8] sm:$0xff] }
 0x5a3   :  { %v15311_v1 = vpop.eup %15310  ;;  %15330 = vrcp.f32 %v10806_v32  ;;  %v10807_v51 = vadd.f32 1.0, %v15309_v13  ;;  %v14818_v60 = vld [vmem:[%s21687_s7 + $0xaf4] ss:$76 sps:$4 sm:$0xff]   ;;  %v10544_v40 = vmul.f32 1.442695, %v9950_v42 }
 0x5a4   :  { %v15313_v15 = vpop.eup %15312  ;;  %11358 = vst [vmem:[%s21692_s9 + $0x590] sm:$0xff] %v15311_v1  ;;  %15332 = vrcp.f32 %v10805_v37  ;;  %v14820_v55 = vld [vmem:[%s21687_s7 + $0xa60] ss:$76 sps:$4 sm:$0xff]   ;;  %v10548_v32 = vmul.f32 1.442695, %v9952_v10 }
 0x5a5   :  { %v15315_v5 = vpop.eup %15314  ;;  %11374 = vst [vmem:[%s21692_s9 + $0x610] sm:$0xff] %v15313_v15  ;;  %15334 = vrcp.f32 %v10807_v51  ;;  %9271 = vmatpush1.bf16.msra.mxu0 %v14805_v7  ;;  %v14823_v13 = vld [vmem:[%s21687_s7 + $0xb8c] ss:$76 sps:$4 sm:$0xff]   ;;  %v14835_v1 = vld [vmem:[%s21687_s7 + $0x1050] ss:$76 sps:$4 sm:$0xff]   ;;  %v21825_v10 = vld [vmem:[#allocation6_spill] sm:$0xff] }
 0x5a6   :  { %v15317_v59 = vpop.eup %15316  ;;  %11376 = vst [vmem:[%s21692_s9 + $0x620] sm:$0xff] %v15315_v5  ;;  %15336 = vpow2.f32 %v10466_v45  ;;  %9353 = vmatprep.subr.bf16.mxu0 %v14810_v3  ;;  %v21818_v45 = vld [vmem:[#allocation7_spill] sm:$0xff]  ;;  %v14828_v20 = vld [vmem:[%s21687_s7 + $0xaf8] ss:$76 sps:$4 sm:$0xff]   ;;  %v14836_v23 = vld [vmem:[%s21687_s7 + $0xb90] ss:$76 sps:$4 sm:$0xff]  }
 0x5a7   :  { %v15319_v58 = vpop.eup %15318  ;;  %11375 = vst [vmem:[%s21692_s9 + $0x618] sm:$0xff] %v15317_v59  ;;  %15338 = vpow2.f32 %v10470_v16  ;;  %9499 = vmatmul.mubr.bf16.vlgmr.msra.gmra.mrb[224].mxu1 %v21818_v45  ;;  %v21820_v7 = vld [vmem:[#allocation11_spill] sm:$0xff]  ;;  %v14826_v35 = vld [vmem:[%s21687_s7 + $0xc24] ss:$76 sps:$4 sm:$0xff]  }
 0x5a8   :  { %v15321_v48 = vpop.eup %15320  ;;  %11377 = vst [vmem:[%s21692_s9 + $0x628] sm:$0xff] %v15319_v58  ;;  %15340 = vpow2.f32 %v10468_v30  ;;  %9273 = vmatmul.mubr.bf16.vlgmr.msra.gmra.mrb[224].mxu0 %v21818_v45  ;;  %9506 = vmatprep.mubr.bf16.mxu1 %v21819_v6  ;;  %v14821_v3 = vld [vmem:[%s21687_s7 + $0xb88] ss:$76 sps:$4 sm:$0xff]   ;;  %v14824_v12 = vld [vmem:[%s21687_s7 + $0xc20] ss:$76 sps:$4 sm:$0xff]   ;;  %v20403_v45 = vrot.slane %v4260_v53, %v21825_v10 }
 0x5a9   :  { %v15323_v33 = vpop.eup %15322  ;;  %11393 = vst [vmem:[%s21692_s9 + $0x6a8] sm:$0xff] %v15321_v48  ;;  %15342 = vpow2.f32 %v10472_v50  ;;  %9282 = vmatprep.mubr.bf16.mxu0 %v21819_v6  ;;  %9354 = vmatpush1.bf16.msra.mxu0 %v14808_v41 }
 0x5aa   :  { %v15325_v56 = vpop.eup %15324  ;;  %11395 = vst [vmem:[%s21692_s9 + $0x6b8] sm:$0xff] %v15323_v33  ;;  %15344 = vpow2.f32 %v10504_v2  ;;  %12626 = vmatpush3.bf16.msra.mxu1 %v14812_v39  ;;  %9355 = vmatprep.subr.bf16.mxu0 %v14815_v27  ;;  %v21822_v39 = vld [vmem:[#allocation3_spill] sm:$0xff]  ;;  %v21823_v27 = vld [vmem:[#allocation4_spill] sm:$0xff] }
 0x5ab   :  { %v15327_v4 = vpop.eup %15326  ;;  %11394 = vst [vmem:[%s21692_s9 + $0x6b0] sm:$0xff] %v15325_v56  ;;  %15346 = vpow2.f32 %v10508_v57  ;;  %12627 = vmatprep.subr.bf16.mxu1 %v14819_v38  ;;  %v20391_v58 = vrot.slane %v4260_v53, %v21822_v39  ;;  %v20394_v48 = vrot.slane %v4260_v53, %v21823_v27  ;;  %v14831_v38 = vld [vmem:[%s21687_s7 + $0xcbc] ss:$76 sps:$4 sm:$0xff]  }
 0x5ac   :  { %v15329_v61 = vpop.eup %15328  ;;  %11396 = vst [vmem:[%s21692_s9 + $0x6c0] sm:$0xff] %v15327_v4  ;;  %15348 = vpow2.f32 %v10506_v54  ;;  %v21824_v54 = vld [vmem:[#allocation5_spill] sm:$0xff]  ;;  %v14843_v56 = vld [vmem:[%s21687_s7 + $0x10e8] ss:$76 sps:$4 sm:$0xff]  }
 0x5ad   :  { %v15331_v14 = vpop.eup %15330  ;;  %11412 = vst [vmem:[%s21692_s9 + $0x740] sm:$0xff] %v15329_v61  ;;  %15350 = vpow2.f32 %v10510_v9  ;;  %9356 = vmatpush1.bf16.msra.mxu0 %v14813_v8  ;;  %v20397_v42 = vrot.slane %v4260_v53, %v21824_v54  ;;  %v21826_v8 = vld [vmem:[#allocation15_spill] sm:$0xff] }
 0x5ae   :  { %v15333_v16 = vpop.eup %15332  ;;  %11414 = vst [vmem:[%s21692_s9 + $0x750] sm:$0xff] %v15331_v14  ;;  %15352 = vpow2.f32 %v10542_v25  ;;  %9357 = vmatprep.subr.bf16.mxu0 %v14818_v60  ;;  %12628 = vmatpush3.bf16.msra.mxu1 %v14820_v55  ;;  %v14844_v60 = vld [vmem:[%s21687_s7 + $0xc28] ss:$76 sps:$4 sm:$0xff]  }
 0x5af   :  { %v15335_v52 = vpop.eup %15334  ;;  %11413 = vst [vmem:[%s21692_s9 + $0x748] sm:$0xff] %v15333_v16  ;;  %15354 = vpow2.f32 %v10546_v36  ;;  %12629 = vmatprep.subr.bf16.mxu1 %v14827_v62  ;;  %9507 = vmatmul.mubr.bf16.gmra.mrb[228].mxu1 %v21820_v7  ;;  %v14829_v36 = vld [vmem:[%s21687_s7 + $0xcb8] ss:$76 sps:$4 sm:$0xff]   ;;  %v14851_v16 = vld [vmem:[%s21687_s7 + $0x1180] ss:$76 sps:$4 sm:$0xff]  }
 0x5b0   :  { %v15337_v37 = vpop.eup %15336  ;;  %11415 = vst [vmem:[%s21692_s9 + $0x758] sm:$0xff] %v15335_v52  ;;  %15356 = vpow2.f32 %v10544_v40  ;;  %9283 = vmatmul.mubr.bf16.gmra.mrb[228].mxu0 %v21820_v7  ;;  %9514 = vmatprep.mubr.bf16.mxu1 %v21821_v0  ;;  %v21827_v40 = vld [vmem:[#allocation18_spill] sm:$0xff] }
 0x5b1   :  { %v15339_v24 = vpop.eup %15338  ;;  %v10823_v34 = vadd.f32 1.0, %v15337_v37  ;;  %15358 = vpow2.f32 %v10548_v32  ;;  %9292 = vmatprep.mubr.bf16.mxu0 %v21821_v0  ;;  %9358 = vmatpush1.bf16.msra.mxu0 %v14816_v63 }
 0x5b2   :  { %v15341_v51 = vpop.eup %15340  ;;  %v10825_v18 = vadd.f32 1.0, %v15339_v24  ;;  %9359 = vmatprep.subr.bf16.mxu0 %v14823_v13  ;;  %12630 = vmatpush3.bf16.msra.mxu1 %v14828_v20 }
 0x5b3   :  { %v15343_v15 = vpop.eup %15342  ;;  %15360 = vrcp.f32 %v10823_v34  ;;  %v10824_v30 = vadd.f32 1.0, %v15341_v51  ;;  %12631 = vmatprep.subr.bf16.mxu1 %v14835_v1  ;;  %v14834_v34 = vld [vmem:[%s21687_s7 + $0xd54] ss:$76 sps:$4 sm:$0xff]  }
 0x5b4   :  { %v15345_v5 = vpop.eup %15344  ;;  %15362 = vrcp.f32 %v10825_v18  ;;  %v10826_v50 = vadd.f32 1.0, %v15343_v15  ;;  %v8483_v4 = vpop.f32.mrb[160].mxu0 }
 0x5b5   :  { %v15347_v49 = vpop.eup %15346  ;;  %15364 = vrcp.f32 %v10824_v30  ;;  %v10842_v41 = vadd.f32 1.0, %v15345_v5  ;;  %9360 = vmatpush1.bf16.msra.mxu0 %v14821_v3  ;;  %v12881_v62 = vadd.f32 %v8483_v4, %v20391_v58  ;;  %v8709_v14 = vpop.f32.mrb[160].mxu1  ;;  %v14832_v5 = vld [vmem:[%s21687_s7 + $0xd50] ss:$76 sps:$4 sm:$0xff]  }
 0x5b6   :  { %v15349_v59 = vpop.eup %15348  ;;  %15366 = vrcp.f32 %v10826_v50  ;;  %v10844_v2 = vadd.f32 1.0, %v15347_v49  ;;  %9361 = vmatprep.subr.bf16.mxu0 %v14826_v35  ;;  %12632 = vmatpush3.bf16.msra.mxu1 %v14836_v23  ;;  %v8485_v32 = vpop.f32.mrb[161].mxu0  ;;  %v12913_v13 = vadd.f32 %v8709_v14, %v20394_v48 }
 0x5b7   :  { %v15351_v57 = vpop.eup %15350  ;;  %15368 = vrcp.f32 %v10842_v41  ;;  %v10843_v17 = vadd.f32 1.0, %v15349_v59  ;;  %9515 = vmatmul.mubr.bf16.gmra.mrb[232].mxu1 %v21826_v8  ;;  %v12882_v37 = vadd.f32 %v8485_v32, %v20397_v42  ;;  %v8711_v20 = vpop.f32.mrb[161].mxu1  ;;  %v9668_v1 = vsub.f32 0.0, %v12881_v62  ;;  %12633 = vmatprep.subr.bf16.mxu1 %v14843_v56  ;;  %v14839_v59 = vld [vmem:[%s21687_s7 + $0xdec] ss:$76 sps:$4 sm:$0xff]  }
 0x5b8   :  { %v15353_v33 = vpop.eup %15352  ;;  %15370 = vrcp.f32 %v10844_v2  ;;  %v10845_v9 = vadd.f32 1.0, %v15351_v57  ;;  %9293 = vmatmul.mubr.bf16.gmra.mrb[232].mxu0 %v21826_v8  ;;  %9522 = vmatprep.mubr.bf16.mxu1 %v21827_v40  ;;  %v8487_v24 = vpop.f32.mrb[162].mxu0  ;;  %v12914_v51 = vadd.f32 %v8711_v20, %v20403_v45  ;;  %v9670_v15 = vsub.f32 0.0, %v12913_v13 }
 0x5b9   :  { %v15355_v25 = vpop.eup %15354  ;;  %15372 = vrcp.f32 %v10843_v17  ;;  %v10861_v6 = vadd.f32 1.0, %v15353_v33  ;;  %9302 = vmatprep.mubr.bf16.mxu0 %v21827_v40  ;;  %9362 = vmatpush1.bf16.msra.mxu0 %v14824_v12  ;;  %v8713_v18 = vpop.f32.mrb[162].mxu1  ;;  %v9669_v30 = vsub.f32 0.0, %v12882_v37  ;;  %v12883_v35 = vadd.f32 %v8487_v24, %v20391_v58  ;;  %v14859_v40 = vld [vmem:[%s21687_s7 + $0x1218] ss:$76 sps:$4 sm:$0xff]  }
 0x5ba   :  { %v15357_v55 = vpop.eup %15356  ;;  %15374 = vrcp.f32 %v10845_v9  ;;  %v10863_v61 = vadd.f32 1.0, %v15355_v25  ;;  %9363 = vmatprep.subr.bf16.mxu0 %v14831_v38  ;;  %v8489_v0 = vpop.f32.mrb[163].mxu0  ;;  %12634 = vmatpush3.bf16.msra.mxu1 %v14844_v60  ;;  %v9980_v23 = vmul.f32 1.442695, %v9668_v1  ;;  %v9671_v49 = vsub.f32 0.0, %v12914_v51  ;;  %v21828_v60 = vld [vmem:[#allocation17_spill] sm:$0xff] }
 0x5bb   :  { %v15359_v63 = vpop.eup %15358  ;;  %15376 = vrcp.f32 %v10861_v6  ;;  %v10862_v52 = vadd.f32 1.0, %v15357_v55  ;;  %v8715_v53 = vpop.f32.mrb[163].mxu1  ;;  %v12915_v41 = vadd.f32 %v8713_v18, %v20394_v48  ;;  %12635 = vmatprep.subr.bf16.mxu1 %v14851_v16  ;;  %v9984_v12 = vmul.f32 1.442695, %v9670_v15  ;;  %v14837_v25 = vld [vmem:[%s21687_s7 + $0xde8] ss:$76 sps:$4 sm:$0xff]  }
 0x5bc   :  { %15378 = vrcp.f32 %v10863_v61  ;;  %v10864_v7 = vadd.f32 1.0, %v15359_v63  ;;  %v9982_v57 = vmul.f32 1.442695, %v9669_v30  ;;  %v9687_v17 = vsub.f32 0.0, %v12883_v35  ;;  %v14852_v6 = vld [vmem:[%s21687_s7 + $0xcc0] ss:$76 sps:$4 sm:$0xff]  }
 0x5bd   :  { %v15361_v3 = vpop.eup %15360  ;;  %15380 = vrcp.f32 %v10862_v52  ;;  %9364 = vmatpush1.bf16.msra.mxu0 %v14829_v36  ;;  %v12884_v38 = vadd.f32 %v8489_v0, %v20397_v42  ;;  %v9986_v9 = vmul.f32 1.442695, %v9671_v49  ;;  %v9689_v10 = vsub.f32 0.0, %v12915_v41  ;;  %v8493_v55 = vpop.f32.mrb[164].mxu0  ;;  %v14842_v61 = vld [vmem:[%s21687_s7 + $0xe84] ss:$76 sps:$4 sm:$0xff]  }
 0x5be   :  { %v15363_v50 = vpop.eup %15362  ;;  %11431 = vst [vmem:[%s21692_s9 + $0x7d8] sm:$0xff] %v15361_v3  ;;  %15382 = vrcp.f32 %v10864_v7  ;;  %9365 = vmatprep.subr.bf16.mxu0 %v14834_v34  ;;  %v12916_v56 = vadd.f32 %v8715_v53, %v20403_v45  ;;  %v10018_v4 = vmul.f32 1.442695, %v9687_v17  ;;  %v21829_v16 = vld [vmem:[#allocation20_spill] sm:$0xff]  ;;  %v12885_v63 = vadd.f32 %v8493_v55, %v20391_v58  ;;  %v8719_v52 = vpop.f32.mrb[164].mxu1  ;;  %12636 = vmatpush3.bf16.msra.mxu1 %v14852_v6 }
 0x5bf   :  { %v15365_v2 = vpop.eup %15364  ;;  %11433 = vst [vmem:[%s21692_s9 + $0x7e8] sm:$0xff] %v15363_v50  ;;  %15384 = vpow2.f32 %v9980_v23  ;;  %v9688_v36 = vsub.f32 0.0, %v12884_v38  ;;  %9523 = vmatmul.mubr.bf16.gmra.mrb[236].mxu1 %v21828_v60  ;;  %v10022_v14 = vmul.f32 1.442695, %v9689_v10  ;;  %v8495_v13 = vpop.f32.mrb[165].mxu0  ;;  %v12917_v24 = vadd.f32 %v8719_v52, %v20394_v48  ;;  %12637 = vmatprep.subr.bf16.mxu1 %v14859_v40 }
 0x5c0   :  { %v15367_v33 = vpop.eup %15366  ;;  %11432 = vst [vmem:[%s21692_s9 + $0x7e0] sm:$0xff] %v15365_v2  ;;  %15386 = vpow2.f32 %v9984_v12  ;;  %9303 = vmatmul.mubr.bf16.gmra.mrb[236].mxu0 %v21828_v60  ;;  %v9690_v32 = vsub.f32 0.0, %v12916_v56  ;;  %9530 = vmatprep.mubr.bf16.mxu1 %v21829_v16  ;;  %v12886_v34 = vadd.f32 %v8495_v13, %v20397_v42  ;;  %v8721_v7 = vpop.f32.mrb[165].mxu1  ;;  %v14860_v51 = vld [vmem:[%s21687_s7 + $0xd58] ss:$76 sps:$4 sm:$0xff]   ;;  %v9706_v3 = vsub.f32 0.0, %v12885_v63 }
 0x5c1   :  { %v15369_v8 = vpop.eup %15368  ;;  %11434 = vst [vmem:[%s21692_s9 + $0x7f0] sm:$0xff] %v15367_v33  ;;  %15388 = vpow2.f32 %v9982_v57  ;;  %9312 = vmatprep.mubr.bf16.mxu0 %v21829_v16  ;;  %9366 = vmatpush1.bf16.msra.mxu0 %v14832_v5  ;;  %v10020_v20 = vmul.f32 1.442695, %v9688_v36  ;;  %v8497_v1 = vpop.f32.mrb[166].mxu0  ;;  %v12918_v15 = vadd.f32 %v8721_v7, %v20403_v45  ;;  %v9708_v5 = vsub.f32 0.0, %v12917_v24 }
 0x5c2   :  { %v15371_v62 = vpop.eup %15370  ;;  %11450 = vst [vmem:[%s21692_s9 + $0x870] sm:$0xff] %v15369_v8  ;;  %15390 = vpow2.f32 %v9986_v9  ;;  %9367 = vmatprep.subr.bf16.mxu0 %v14839_v59  ;;  %v10024_v0 = vmul.f32 1.442695, %v9690_v32  ;;  %v8723_v30 = vpop.f32.mrb[166].mxu1  ;;  %v9707_v50 = vsub.f32 0.0, %v12886_v34  ;;  %v12887_v23 = vadd.f32 %v8497_v1, %v20391_v58  ;;  %12638 = vmatpush3.bf16.msra.mxu1 %v14860_v51  ;;  %v21830_v8 = vld [vmem:[#allocation19_spill] sm:$0xff] }
 0x5c3   :  { %v15373_v37 = vpop.eup %15372  ;;  %11452 = vst [vmem:[%s21692_s9 + $0x880] sm:$0xff] %v15371_v62  ;;  %15392 = vpow2.f32 %v10018_v4  ;;  %v8499_v35 = vpop.f32.mrb[167].mxu0  ;;  %v14840_v41 = vld [vmem:[%s21687_s7 + $0xe80] ss:$76 sps:$4 sm:$0xff]   ;;  %v10056_v2 = vmul.f32 1.442695, %v9706_v3  ;;  %v12919_v55 = vadd.f32 %v8723_v30, %v20394_v48 }
 0x5c4   :  { %v15375_v18 = vpop.eup %15374  ;;  %11451 = vst [vmem:[%s21692_s9 + $0x878] sm:$0xff] %v15373_v37  ;;  %15394 = vpow2.f32 %v10022_v14  ;;  %v20486_v49 = vpop.f32.mrb[167].mxu1  ;;  %v9709_v12 = vsub.f32 0.0, %v12918_v15  ;;  %v14847_v57 = vld [vmem:[%s21687_s7 + $0xf1c] ss:$76 sps:$4 sm:$0xff]   ;;  %v9725_v9 = vsub.f32 0.0, %v12887_v23  ;;  %v12888_v24 = vadd.f32 %v8499_v35, %v20397_v42 }
 0x5c5   :  { %v15377_v53 = vpop.eup %15376  ;;  %11453 = vst [vmem:[%s21692_s9 + $0x888] sm:$0xff] %v15375_v18  ;;  %15396 = vpow2.f32 %v10020_v20  ;;  %9368 = vmatpush1.bf16.msra.mxu0 %v14837_v25  ;;  %v10060_v38 = vmul.f32 1.442695, %v9708_v5  ;;  %v10058_v33 = vmul.f32 1.442695, %v9707_v50  ;;  %v8503_v4 = vpop.f32.mrb[168].mxu0  ;;  %v20539_v5 = vadd.f32 %v20486_v49, %v20403_v45 }
 0x5c6   :  { %v15379_v59 = vpop.eup %15378  ;;  %11469 = vst [vmem:[%s21692_s9 + $0x908] sm:$0xff] %v15377_v53  ;;  %15398 = vpow2.f32 %v10024_v0  ;;  %9369 = vmatprep.subr.bf16.mxu0 %v14842_v61  ;;  %v10062_v56 = vmul.f32 1.442695, %v9709_v12  ;;  %v14867_v25 = vld [vmem:[%s21687_s7 + $0x12b0] ss:$76 sps:$4 sm:$0xff]   ;;  %v21831_v61 = vld [vmem:[#allocation22_spill] sm:$0xff] }
 0x5c7   :  { %v15381_v17 = vpop.eup %15380  ;;  %11471 = vst [vmem:[%s21692_s9 + $0x918] sm:$0xff] %v15379_v59  ;;  %15400 = vpow2.f32 %v10056_v2  ;;  %v10094_v6 = vmul.f32 1.442695, %v9725_v9  ;;  %9531 = vmatmul.mubr.bf16.gmra.mrb[240].mxu1 %v21830_v8  ;;  %v14868_v36 = vld [vmem:[%s21687_s7 + $0xdf0] ss:$76 sps:$4 sm:$0xff]   ;;  %v8729_v40 = vpop.f32.mrb[168].mxu1  ;;  %12639 = vmatprep.subr.bf16.mxu1 %v14867_v25 }
 0x5c8   :  { %v15383_v10 = vpop.eup %15382  ;;  %11470 = vst [vmem:[%s21692_s9 + $0x910] sm:$0xff] %v15381_v17  ;;  %15402 = vpow2.f32 %v10060_v38  ;;  %9313 = vmatmul.mubr.bf16.gmra.mrb[240].mxu0 %v21830_v8  ;;  %v8505_v62 = vpop.f32.mrb[169].mxu0  ;;  %v14845_v14 = vld [vmem:[%s21687_s7 + $0xf18] ss:$76 sps:$4 sm:$0xff]   ;;  %9538 = vmatprep.mubr.bf16.mxu1 %v21831_v61  ;;  %v14850_v13 = vld [vmem:[%s21687_s7 + $0xfb4] ss:$76 sps:$4 sm:$0xff]  }
 0x5c9   :  { %11472 = vst [vmem:[%s21692_s9 + $0x920] sm:$0xff] %v15383_v10  ;;  %v15385_v60 = vpop.eup %15384  ;;  %15404 = vpow2.f32 %v10058_v33  ;;  %9322 = vmatprep.mubr.bf16.mxu0 %v21831_v61  ;;  %9370 = vmatpush1.bf16.msra.mxu0 %v14840_v41  ;;  %v20520_v63 = vpop.f32.mrb[169].mxu1  ;;  %v9727_v15 = vsub.f32 0.0, %v12919_v55  ;;  %v14848_v30 = vld [vmem:[%s21687_s7 + $0xfb0] ss:$76 sps:$4 sm:$0xff]   ;;  %v9726_v59 = vsub.f32 0.0, %v12888_v24  ;;  %v20556_v55 = vadd.f32 %v8505_v62, %v20397_v42 }
 0x5ca   :  { %v15387_v32 = vpop.eup %15386  ;;  %v10580_v16 = vadd.f32 1.0, %v15385_v60  ;;  %15406 = vpow2.f32 %v10062_v56  ;;  %9371 = vmatprep.subr.bf16.mxu0 %v14847_v57  ;;  %v20522_v52 = vpop.f32.mrb[170].mxu0  ;;  %12640 = vmatpush3.bf16.msra.mxu1 %v14868_v36  ;;  %v14855_v50 = vld [vmem:[%s21687_s7 + $0x104c] ss:$76 sps:$4 sm:$0xff]   ;;  %v12889_v57 = vadd.f32 %v8503_v4, %v20391_v58  ;;  %v14853_v38 = vld [vmem:[%s21687_s7 + $0x1048] ss:$76 sps:$4 sm:$0xff]   ;;  %v12921_v56 = vadd.f32 %v8729_v40, %v20394_v48 }
 0x5cb   :  { %v15389_v37 = vpop.eup %15388  ;;  %v10582_v20 = vadd.f32 1.0, %v15387_v32  ;;  %15408 = vpow2.f32 %v10094_v6  ;;  %v20528_v34 = vpop.f32.mrb[170].mxu1  ;;  %v21832_v17 = vld [vmem:[#allocation21_spill] sm:$0xff]  ;;  %v10098_v10 = vmul.f32 1.442695, %v9727_v15  ;;  %v21833_v25 = vld [vmem:[#allocation24_spill] sm:$0xff] }
 0x5cc   :  { %v20530_v7 = vpop.f32.mrb[171].mxu0  ;;  %v15391_v1 = vpop.eup %15390  ;;  %15410 = vrcp.f32 %v10580_v16  ;;  %v10581_v51 = vadd.f32 1.0, %v15389_v37  ;;  %v9728_v60 = vsub.f32 0.0, %v20539_v5  ;;  %v12922_v37 = vadd.f32 %v20520_v63, %v20403_v45 }
 0x5cd   :  { %v20532_v18 = vpop.f32.mrb[171].mxu1  ;;  %v15393_v0 = vpop.eup %15392  ;;  %15412 = vrcp.f32 %v10582_v20  ;;  %v10583_v3 = vadd.f32 1.0, %v15391_v1  ;;  %9372 = vmatpush1.bf16.msra.mxu0 %v14845_v14  ;;  %v14858_v14 = vld [vmem:[%s21687_s7 + $0x10e4] ss:$76 sps:$4 sm:$0xff]   ;;  %v12923_v63 = vadd.f32 %v20528_v34, %v20394_v48 }
 0x5ce   :  { %v15395_v35 = vpop.eup %15394  ;;  %15414 = vrcp.f32 %v10581_v51  ;;  %v10599_v53 = vadd.f32 1.0, %v15393_v0  ;;  %9373 = vmatprep.subr.bf16.mxu0 %v14850_v13  ;;  %v8513_v49 = vpop.f32.mrb[172].mxu0  ;;  %v10096_v13 = vmul.f32 1.442695, %v9726_v59  ;;  %v9744_v51 = vsub.f32 0.0, %v12889_v57 }
 0x5cf   :  { %v15397_v23 = vpop.eup %15396  ;;  %15416 = vrcp.f32 %v10583_v3  ;;  %v10601_v41 = vadd.f32 1.0, %v15395_v35  ;;  %9539 = vmatmul.mubr.bf16.gmra.mrb[244].mxu1 %v21832_v17  ;;  %v8739_v6 = vpop.f32.mrb[172].mxu1  ;;  %v12891_v0 = vadd.f32 %v20522_v52, %v20391_v58  ;;  %v9746_v35 = vsub.f32 0.0, %v12921_v56 }
 0x5d0   :  { %v15399_v2 = vpop.eup %15398  ;;  %15418 = vrcp.f32 %v10599_v53  ;;  %v10600_v12 = vadd.f32 1.0, %v15397_v23  ;;  %9323 = vmatmul.mubr.bf16.gmra.mrb[244].mxu0 %v21832_v17  ;;  %v20552_v8 = vpop.f32.mrb[173].mxu0  ;;  %9546 = vmatprep.mubr.bf16.mxu1 %v21833_v25  ;;  %v14856_v53 = vld [vmem:[%s21687_s7 + $0x10e0] ss:$76 sps:$4 sm:$0xff]   ;;  %v9745_v23 = vsub.f32 0.0, %v20556_v55  ;;  %v12892_v52 = vadd.f32 %v20530_v7, %v20397_v42 }
 0x5d1   :  { %v15401_v33 = vpop.eup %15400  ;;  %15420 = vrcp.f32 %v10601_v41  ;;  %v10602_v9 = vadd.f32 1.0, %v15399_v2  ;;  %9332 = vmatprep.mubr.bf16.mxu0 %v21833_v25  ;;  %9374 = vmatpush1.bf16.msra.mxu0 %v14848_v30  ;;  %v20559_v61 = vpop.f32.mrb[173].mxu1  ;;  %v14863_v41 = vld [vmem:[%s21687_s7 + $0x117c] ss:$76 sps:$4 sm:$0xff]   ;;  %v10100_v34 = vmul.f32 1.442695, %v9728_v60 }
 0x5d2   :  { %v15403_v4 = vpop.eup %15402  ;;  %15422 = vrcp.f32 %v10600_v12  ;;  %v10618_v36 = vadd.f32 1.0, %v15401_v33  ;;  %9375 = vmatprep.subr.bf16.mxu0 %v14855_v50  ;;  %v20561_v40 = vpop.f32.mrb[174].mxu0  ;;  %v9747_v2 = vsub.f32 0.0, %v12922_v37  ;;  %v12924_v12 = vadd.f32 %v20532_v18, %v20403_v45  ;;  %v14861_v7 = vld [vmem:[%s21687_s7 + $0x1178] ss:$76 sps:$4 sm:$0xff]  }
 0x5d3   :  { %v15405_v32 = vpop.eup %15404  ;;  %15424 = vrcp.f32 %v10602_v9  ;;  %v10620_v16 = vadd.f32 1.0, %v15403_v4  ;;  %v20568_v62 = vpop.f32.mrb[174].mxu1  ;;  %v10132_v17 = vmul.f32 1.442695, %v9744_v51  ;;  %v12893_v33 = vadd.f32 %v8513_v49, %v20391_v58  ;;  %v21834_v9 = vld [vmem:[#allocation23_spill] sm:$0xff]  ;;  %v21835_v60 = vld [vmem:[#allocation26_spill] sm:$0xff] }
 0x5d4   :  { %v20570_v20 = vpop.f32.mrb[175].mxu0  ;;  %v15407_v24 = vpop.eup %15406  ;;  %15426 = vrcp.f32 %v10618_v36  ;;  %v10619_v1 = vadd.f32 1.0, %v15405_v32  ;;  %v14866_v18 = vld [vmem:[%s21687_s7 + $0x1214] ss:$76 sps:$4 sm:$0xff]   ;;  %v10136_v4 = vmul.f32 1.442695, %v9746_v35  ;;  %v12925_v49 = vadd.f32 %v8739_v6, %v20394_v48 }
 0x5d5   :  { %v20574_v3 = vpop.f32.mrb[175].mxu1  ;;  %v15409_v15 = vpop.eup %15408  ;;  %15428 = vrcp.f32 %v10620_v16  ;;  %v10621_v30 = vadd.f32 1.0, %v15407_v24  ;;  %9376 = vmatpush1.bf16.msra.mxu0 %v14853_v38  ;;  %v9763_v38 = vsub.f32 0.0, %v12891_v0  ;;  %v9765_v36 = vsub.f32 0.0, %v12923_v63 }
 0x5d6   :  { %v15411_v5 = vpop.eup %15410  ;;  %15430 = vrcp.f32 %v10619_v1  ;;  %v10637_v50 = vadd.f32 1.0, %v15409_v15  ;;  %9377 = vmatprep.subr.bf16.mxu0 %v14858_v14  ;;  %v20601_v56 = vpop.f32.mrb[176].mxu0  ;;  %v10134_v16 = vmul.f32 1.442695, %v9745_v23  ;;  %v9764_v37 = vsub.f32 0.0, %v12892_v52 }
 0x5d7   :  { %v15413_v59 = vpop.eup %15412  ;;  %11188 = vst [vmem:[%s21692_s9 + $0x40] sm:$0xff] %v15411_v5  ;;  %15432 = vrcp.f32 %v10621_v30  ;;  %9547 = vmatmul.mubr.bf16.gmra.mrb[248].mxu1 %v21834_v9  ;;  %v20611_v55 = vpop.f32.mrb[176].mxu1  ;;  %v10138_v1 = vmul.f32 1.442695, %v9747_v2  ;;  %v9766_v51 = vsub.f32 0.0, %v12924_v12  ;;  %v9782_v35 = vsub.f32 0.0, %v12893_v33 }
 0x5d8   :  { %v15415_v57 = vpop.eup %15414  ;;  %11190 = vst [vmem:[%s21692_s9 + $0x50] sm:$0xff] %v15413_v59  ;;  %15434 = vrcp.f32 %v10637_v50  ;;  %9333 = vmatmul.mubr.bf16.gmra.mrb[248].mxu0 %v21834_v9  ;;  %v20613_v14 = vpop.f32.mrb[177].mxu0  ;;  %9554 = vmatprep.mubr.bf16.mxu1 %v21835_v60  ;;  %v10170_v30 = vmul.f32 1.442695, %v9763_v38  ;;  %v10174_v5 = vmul.f32 1.442695, %v9765_v36 }
 0x5d9   :  { %v15417_v25 = vpop.eup %15416  ;;  %11189 = vst [vmem:[%s21692_s9 + $0x48] sm:$0xff] %v15415_v57  ;;  %15436 = vpow2.f32 %v10098_v10  ;;  %9342 = vmatprep.mubr.bf16.mxu0 %v21835_v60  ;;  %9378 = vmatpush1.bf16.msra.mxu0 %v14856_v53  ;;  %v20619_v10 = vpop.f32.mrb[177].mxu1  ;;  %v9784_v50 = vsub.f32 0.0, %v12925_v49  ;;  %v14864_v23 = vld [vmem:[%s21687_s7 + $0x1210] ss:$76 sps:$4 sm:$0xff]   ;;  %v21837_v9 = vld [vmem:[#allocation10_spill] sm:$0xff] }
 0x5da   :  { %v15419_v32 = vpop.eup %15418  ;;  %11191 = vst [vmem:[%s21692_s9 + $0x58] sm:$0xff] %v15417_v25  ;;  %15438 = vpow2.f32 %v10096_v13  ;;  %9379 = vmatprep.subr.bf16.mxu0 %v14863_v41  ;;  %v20621_v6 = vpop.f32.mrb[178].mxu0  ;;  %v10172_v41 = vmul.f32 1.442695, %v9764_v37  ;;  %v14871_v59 = vld [vmem:[%s21687_s7 + $0x12ac] ss:$76 sps:$4 sm:$0xff]  }
 0x5db   :  { %v15421_v24 = vpop.eup %15420  ;;  %11207 = vst [vmem:[%s21692_s9 + $0xd8] sm:$0xff] %v15419_v32  ;;  %15440 = vpow2.f32 %v10100_v34  ;;  %v20626_v0 = vpop.f32.mrb[178].mxu1  ;;  %v10176_v2 = vmul.f32 1.442695, %v9766_v51  ;;  %v21836_v57 = vld [vmem:[#allocation25_spill] sm:$0xff] }
 0x5dc   :  { %v20628_v13 = vpop.f32.mrb[179].mxu0  ;;  %v15423_v15 = vpop.eup %15422  ;;  %11209 = vst [vmem:[%s21692_s9 + $0xe8] sm:$0xff] %v15421_v24  ;;  %15442 = vpow2.f32 %v10132_v17  ;;  %v10212_v33 = vmul.f32 1.442695, %v9784_v50 }
 0x5dd   :  { %v20633_v63 = vpop.f32.mrb[179].mxu1  ;;  %v15425_v53 = vpop.eup %15424  ;;  %11208 = vst [vmem:[%s21692_s9 + $0xe0] sm:$0xff] %v15423_v15  ;;  %15444 = vpow2.f32 %v10136_v4  ;;  %9380 = vmatpush1.bf16.msra.mxu0 %v14861_v7  ;;  %v10208_v7 = vmul.f32 1.442695, %v9782_v35  ;;  %v14869_v4 = vld [vmem:[%s21687_s7 + $0x12a8] ss:$76 sps:$4 sm:$0xff]  }
 0x5de   :  { %v15427_v52 = vpop.eup %15426  ;;  %11210 = vst [vmem:[%s21692_s9 + $0xf0] sm:$0xff] %v15425_v53  ;;  %15446 = vpow2.f32 %v10134_v16  ;;  %9381 = vmatprep.subr.bf16.mxu0 %v14866_v18  ;;  %v20655_v17 = vpop.f32.mrb[180].mxu0  ;;  %v12894_v16 = vadd.f32 %v20552_v8, %v20397_v42  ;;  %v12926_v53 = vadd.f32 %v20559_v61, %v20403_v45 }
 0x5df   :  { %v15429_v34 = vpop.eup %15428  ;;  %11226 = vst [vmem:[%s21692_s9 + $0x170] sm:$0xff] %v15427_v52  ;;  %15448 = vpow2.f32 %v10138_v1  ;;  %9555 = vmatmul.mubr.bf16.gmra.mrb[252].mxu1 %v21836_v57  ;;  %v20661_v18 = vpop.f32.mrb[180].mxu1 }
 0x5e0   :  { %v15431_v12 = vpop.eup %15430  ;;  %11228 = vst [vmem:[%s21692_s9 + $0x180] sm:$0xff] %v15429_v34  ;;  %15450 = vpow2.f32 %v10170_v30  ;;  %9343 = vmatmul.mubr.bf16.gmra.mrb[252].mxu0 %v21836_v57  ;;  %v20663_v25 = vpop.f32.mrb[181].mxu0  ;;  %9595 = vmatprep.mubr.bf16.mxu1 %v21837_v9  ;;  %v9783_v52 = vsub.f32 0.0, %v12894_v16  ;;  %v12895_v34 = vadd.f32 %v20561_v40, %v20391_v58  ;;  %v9785_v57 = vsub.f32 0.0, %v12926_v53 }
 0x5e1   :  { %v15433_v38 = vpop.eup %15432  ;;  %11227 = vst [vmem:[%s21692_s9 + $0x178] sm:$0xff] %v15431_v12  ;;  %15452 = vpow2.f32 %v10174_v5  ;;  %9382 = vmatpush1.bf16.msra.mxu0 %v14864_v23  ;;  %9385 = vmatprep.mubr.bf16.mxu0 %v21837_v9  ;;  %v20672_v49 = vpop.f32.mrb[181].mxu1 }
 0x5e2   :  { %v15435_v36 = vpop.eup %15434  ;;  %11229 = vst [vmem:[%s21692_s9 + $0x188] sm:$0xff] %v15433_v38  ;;  %15454 = vpow2.f32 %v10172_v41  ;;  %9383 = vmatprep.subr.bf16.mxu0 %v14871_v59  ;;  %v20674_v60 = vpop.f32.mrb[182].mxu0  ;;  %v21839_v38 = vld [vmem:[#allocation14_spill] sm:$0xff] }
 0x5e3   :  { %v15437_v32 = vpop.eup %15436  ;;  %11245 = vst [vmem:[%s21692_s9 + $0x208] sm:$0xff] %v15435_v36  ;;  %15456 = vpow2.f32 %v10176_v2  ;;  %v20681_v37 = vpop.f32.mrb[182].mxu1  ;;  %v21838_v2 = vld [vmem:[#allocation8_spill] sm:$0xff]  ;;  %v12927_v36 = vadd.f32 %v20568_v62, %v20394_v48  ;;  %v12928_v62 = vadd.f32 %v20574_v3, %v20403_v45 }
 0x5e4   :  { %v20683_v24 = vpop.f32.mrb[183].mxu0  ;;  %v15439_v1 = vpop.eup %15438  ;;  %v10639_v51 = vadd.f32 1.0, %v15437_v32  ;;  %15458 = vpow2.f32 %v10208_v7 }
 0x5e5   :  { %v20685_v15 = vpop.f32.mrb[183].mxu1  ;;  %v15441_v30 = vpop.eup %15440  ;;  %v10638_v35 = vadd.f32 1.0, %v15439_v1  ;;  %15460 = vpow2.f32 %v10212_v33  ;;  %9384 = vmatpush1.bf16.msra.mxu0 %v14869_v4 }
 0x5e6   :  { %v15443_v5 = vpop.eup %15442  ;;  %15462 = vrcp.f32 %v10639_v51  ;;  %v10640_v50 = vadd.f32 1.0, %v15441_v30  ;;  %v20693_v12 = vpop.f32.mrb[184].mxu0  ;;  %v10210_v30 = vmul.f32 1.442695, %v9783_v52  ;;  %v10214_v52 = vmul.f32 1.442695, %v9785_v57 }
 0x5e7   :  { %v15445_v8 = vpop.eup %15444  ;;  %15464 = vrcp.f32 %v10638_v35  ;;  %v10656_v23 = vadd.f32 1.0, %v15443_v5  ;;  %9596 = vmatmul.mubr.bf16.vlgmr.msra.gmra.mrb[0].mxu1 %v21838_v2  ;;  %v20697_v33 = vpop.f32.mrb[184].mxu1  ;;  %v12896_v35 = vadd.f32 %v20570_v20, %v20397_v42  ;;  %v12897_v20 = vadd.f32 %v20601_v56, %v20391_v58 }
 0x5e8   :  { %v15447_v41 = vpop.eup %15446  ;;  %15466 = vrcp.f32 %v10640_v50  ;;  %v10658_v59 = vadd.f32 1.0, %v15445_v8  ;;  %9386 = vmatmul.mubr.bf16.vlgmr.msra.gmra.mrb[224].mxu0 %v21838_v2  ;;  %9603 = vmatprep.mubr.bf16.mxu1 %v21839_v38  ;;  %v20699_v9 = vpop.f32.mrb[185].mxu0  ;;  %v12930_v56 = vadd.f32 %v20619_v10, %v20403_v45 }
 0x5e9   :  { %v15449_v61 = vpop.eup %15448  ;;  %15468 = vrcp.f32 %v10656_v23  ;;  %v10657_v7 = vadd.f32 1.0, %v15447_v41  ;;  %9395 = vmatprep.mubr.bf16.mxu0 %v21839_v38  ;;  %v20703_v32 = vpop.f32.mrb[185].mxu1  ;;  %v9801_v23 = vsub.f32 0.0, %v12895_v34  ;;  %v9803_v38 = vsub.f32 0.0, %v12927_v36 }
 0x5ea   :  { %v15451_v4 = vpop.eup %15450  ;;  %15470 = vrcp.f32 %v10658_v59  ;;  %v10659_v40 = vadd.f32 1.0, %v15449_v61  ;;  %v20705_v16 = vpop.f32.mrb[186].mxu0  ;;  %v9802_v3 = vsub.f32 0.0, %v12896_v35  ;;  %v9820_v35 = vsub.f32 0.0, %v12897_v20 }
 0x5eb   :  { %v15453_v1 = vpop.eup %15452  ;;  %15472 = vrcp.f32 %v10657_v7  ;;  %v10675_v51 = vadd.f32 1.0, %v15451_v4  ;;  %v20709_v53 = vpop.f32.mrb[186].mxu1  ;;  %v12929_v4 = vadd.f32 %v20611_v55, %v20394_v48  ;;  %v12931_v20 = vadd.f32 %v20626_v0, %v20394_v48 }
 0x5ec   :  { %v20711_v5 = vpop.f32.mrb[187].mxu0  ;;  %v15455_v50 = vpop.eup %15454  ;;  %15474 = vrcp.f32 %v10659_v40  ;;  %v10677_v8 = vadd.f32 1.0, %v15453_v1  ;;  %v12898_v1 = vadd.f32 %v20613_v14, %v20397_v42  ;;  %v10246_v14 = vmul.f32 1.442695, %v9801_v23 }
 0x5ed   :  { %v20715_v41 = vpop.f32.mrb[187].mxu1  ;;  %v15457_v59 = vpop.eup %15456  ;;  %15476 = vrcp.f32 %v10675_v51  ;;  %v10676_v2 = vadd.f32 1.0, %v15455_v50  ;;  %v9804_v50 = vsub.f32 0.0, %v12928_v62  ;;  %v12899_v62 = vadd.f32 %v20621_v6, %v20391_v58 }
 0x5ee   :  { %v15459_v61 = vpop.eup %15458  ;;  %15478 = vrcp.f32 %v10677_v8  ;;  %v10678_v7 = vadd.f32 1.0, %v15457_v59  ;;  %v21840_v8 = vld [vmem:[#allocation12_spill] sm:$0xff]  ;;  %v20727_v36 = vpop.f32.mrb[188].mxu0  ;;  %v9822_v23 = vsub.f32 0.0, %v12929_v4 }
 0x5ef   :  { %v15461_v34 = vpop.eup %15460  ;;  %15480 = vrcp.f32 %v10676_v2  ;;  %v10694_v40 = vadd.f32 1.0, %v15459_v61  ;;  %9604 = vmatmul.mubr.bf16.gmra.mrb[4].mxu1 %v21840_v8  ;;  %v20736_v10 = vpop.f32.mrb[188].mxu1  ;;  %v10250_v61 = vmul.f32 1.442695, %v9803_v38 }
 0x5f0   :  { %v15463_v51 = vpop.eup %15462  ;;  %15482 = vrcp.f32 %v10678_v7  ;;  %v10696_v57 = vadd.f32 1.0, %v15461_v34  ;;  %9396 = vmatmul.mubr.bf16.gmra.mrb[228].mxu0 %v21840_v8  ;;  %9611 = vmatprep.mubr.bf16.mxu1 %v17619_v46  ;;  %v20738_v59 = vpop.f32.mrb[189].mxu0  ;;  %v10248_v34 = vmul.f32 1.442695, %v9802_v3  ;;  %v9823_v8 = vsub.f32 0.0, %v12930_v56 }
 0x5f1   :  { %v15465_v55 = vpop.eup %15464  ;;  %11247 = vst [vmem:[%s21692_s9 + $0x218] sm:$0xff] %v15463_v51  ;;  %15484 = vrcp.f32 %v10694_v40  ;;  %9405 = vmatprep.mubr.bf16.mxu0 %v17619_v46  ;;  %v20745_v6 = vpop.f32.mrb[189].mxu1  ;;  %v9821_v40 = vsub.f32 0.0, %v12898_v1  ;;  %v12900_v51 = vadd.f32 %v20628_v13, %v20397_v42  ;;  %v10284_v13 = vmul.f32 1.442695, %v9820_v35 }
 0x5f2   :  { %v15467_v2 = vpop.eup %15466  ;;  %11246 = vst [vmem:[%s21692_s9 + $0x210] sm:$0xff] %v15465_v55  ;;  %15486 = vrcp.f32 %v10696_v57  ;;  %v20747_v7 = vpop.f32.mrb[190].mxu0  ;;  %v10252_v57 = vmul.f32 1.442695, %v9804_v50  ;;  %v9839_v3 = vsub.f32 0.0, %v12899_v62 }
 0x5f3   :  { %v15469_v46 = vpop.eup %15468  ;;  %11248 = vst [vmem:[%s21692_s9 + $0x220] sm:$0xff] %v15467_v2  ;;  %15488 = vpow2.f32 %v10210_v30  ;;  %v20754_v38 = vpop.f32.mrb[190].mxu1  ;;  %v10288_v2 = vmul.f32 1.442695, %v9822_v23  ;;  %v10286_v56 = vmul.f32 1.442695, %v9821_v40  ;;  %v12932_v40 = vadd.f32 %v20633_v63, %v20403_v45 }
 0x5f4   :  { %v20756_v4 = vpop.f32.mrb[191].mxu0  ;;  %v15471_v0 = vpop.eup %15470  ;;  %11264 = vst [vmem:[%s21692_s9 + $0x2a0] sm:$0xff] %v15469_v46  ;;  %15490 = vpow2.f32 %v10214_v52  ;;  %v9841_v52 = vsub.f32 0.0, %v12931_v20  ;;  %v9840_v46 = vsub.f32 0.0, %v12900_v51  ;;  %v10322_v62 = vmul.f32 1.442695, %v9839_v3 }
 0x5f5   :  { %v20761_v55 = vpop.f32.mrb[191].mxu1  ;;  %v15473_v30 = vpop.eup %15472  ;;  %11266 = vst [vmem:[%s21692_s9 + $0x2b0] sm:$0xff] %v15471_v0  ;;  %15492 = vpow2.f32 %v10246_v14  ;;  %v10290_v14 = vmul.f32 1.442695, %v9823_v8  ;;  %v9842_v63 = vsub.f32 0.0, %v12932_v40 }
 0x5f6   :  { %v15475_v1 = vpop.eup %15474  ;;  %11265 = vst [vmem:[%s21692_s9 + $0x2a8] sm:$0xff] %v15473_v30  ;;  %15494 = vpow2.f32 %v10250_v61  ;;  %v10326_v23 = vmul.f32 1.442695, %v9841_v52 }
 0x5f7   :  { %v15477_v50 = vpop.eup %15476  ;;  %11267 = vst [vmem:[%s21692_s9 + $0x2b8] sm:$0xff] %v15475_v1  ;;  %15496 = vpow2.f32 %v10248_v34  ;;  %9612 = vmatmul.mubr.bf16.gmra.mrb[8].mxu1 %v17615_v44 }
 0x5f8   :  { %v15479_v0 = vpop.eup %15478  ;;  %11283 = vst [vmem:[%s21692_s9 + $0x338] sm:$0xff] %v15477_v50  ;;  %15498 = vpow2.f32 %v10252_v57  ;;  %9406 = vmatmul.mubr.bf16.gmra.mrb[232].mxu0 %v17615_v44  ;;  %9619 = vmatprep.mubr.bf16.mxu1 %v17663_v28  ;;  %v10324_v44 = vmul.f32 1.442695, %v9840_v46 }
 0x5f9   :  { %v15481_v35 = vpop.eup %15480  ;;  %11285 = vst [vmem:[%s21692_s9 + $0x348] sm:$0xff] %v15479_v0  ;;  %15500 = vpow2.f32 %v10284_v13  ;;  %9415 = vmatprep.mubr.bf16.mxu0 %v17663_v28  ;;  %v12901_v13 = vadd.f32 %v20655_v17, %v20391_v58  ;;  %v12933_v17 = vadd.f32 %v20661_v18, %v20394_v48 }
 0x5fa   :  { %v15483_v61 = vpop.eup %15482  ;;  %11284 = vst [vmem:[%s21692_s9 + $0x340] sm:$0xff] %v15481_v35  ;;  %15502 = vpow2.f32 %v10288_v2 }
 0x5fb   :  { %v15485_v20 = vpop.eup %15484  ;;  %11286 = vst [vmem:[%s21692_s9 + $0x350] sm:$0xff] %v15483_v61  ;;  %15504 = vpow2.f32 %v10286_v56 }
 0x5fc   :  { %v15487_v34 = vpop.eup %15486  ;;  %11302 = vst [vmem:[%s21692_s9 + $0x3d0] sm:$0xff] %v15485_v20  ;;  %15506 = vpow2.f32 %v10290_v14  ;;  %v9858_v14 = vsub.f32 0.0, %v12901_v13  ;;  %v12934_v20 = vadd.f32 %v20672_v49, %v20403_v45  ;;  %v12904_v49 = vadd.f32 %v20683_v24, %v20397_v42 }
 0x5fd   :  { %v15489_v28 = vpop.eup %15488  ;;  %11304 = vst [vmem:[%s21692_s9 + $0x3e0] sm:$0xff] %v15487_v34  ;;  %15508 = vpow2.f32 %v10322_v62  ;;  %v12902_v62 = vadd.f32 %v20663_v25, %v20397_v42  ;;  %v9860_v34 = vsub.f32 0.0, %v12933_v17  ;;  %v12935_v25 = vadd.f32 %v20681_v37, %v20394_v48 }
 0x5fe   :  { %v15491_v51 = vpop.eup %15490  ;;  %v10695_v57 = vadd.f32 1.0, %v15489_v28  ;;  %15510 = vpow2.f32 %v10326_v23  ;;  %v12903_v28 = vadd.f32 %v20674_v60, %v20391_v58  ;;  %v12905_v24 = vadd.f32 %v20693_v12, %v20391_v58 }
 0x5ff   :  { %v15493_v8 = vpop.eup %15492  ;;  %v10697_v30 = vadd.f32 1.0, %v15491_v51  ;;  %15512 = vpow2.f32 %v10324_v44  ;;  %9620 = vmatmul.mubr.bf16.gmra.mrb[12].mxu1 %v17659_v26  ;;  %v9859_v13 = vsub.f32 0.0, %v12902_v62  ;;  %v12906_v12 = vadd.f32 %v20699_v9, %v20397_v42 }
 0x600   :  { %v15495_v3 = vpop.eup %15494  ;;  %15514 = vrcp.f32 %v10695_v57  ;;  %v10713_v1 = vadd.f32 1.0, %v15493_v8  ;;  %9416 = vmatmul.mubr.bf16.gmra.mrb[236].mxu0 %v17659_v26  ;;  %9627 = vmatprep.mubr.bf16.mxu1 %v17707_v21  ;;  %v10360_v57 = vmul.f32 1.442695, %v9858_v14 }
 0x601   :  { %v15497_v2 = vpop.eup %15496  ;;  %15516 = vrcp.f32 %v10697_v30  ;;  %v10715_v52 = vadd.f32 1.0, %v15495_v3  ;;  %9425 = vmatprep.mubr.bf16.mxu0 %v17707_v21  ;;  %v10328_v21 = vmul.f32 1.442695, %v9842_v63  ;;  %v9877_v63 = vsub.f32 0.0, %v12903_v28 }
 0x602   :  { %v15499_v50 = vpop.eup %15498  ;;  %15518 = vrcp.f32 %v10713_v1  ;;  %v10714_v56 = vadd.f32 1.0, %v15497_v2  ;;  %v9861_v1 = vsub.f32 0.0, %v12934_v20  ;;  %v12936_v2 = vadd.f32 %v20685_v15, %v20403_v45 }
 0x603   :  { %v15501_v46 = vpop.eup %15500  ;;  %15520 = vrcp.f32 %v10715_v52  ;;  %v10716_v0 = vadd.f32 1.0, %v15499_v50  ;;  %v12937_v15 = vadd.f32 %v20697_v33, %v20394_v48  ;;  %v12938_v33 = vadd.f32 %v20703_v32, %v20403_v45 }
 0x604   :  { %v15503_v35 = vpop.eup %15502  ;;  %15522 = vrcp.f32 %v10714_v56  ;;  %v10732_v26 = vadd.f32 1.0, %v15501_v46  ;;  %v9879_v56 = vsub.f32 0.0, %v12935_v25  ;;  %v9878_v46 = vsub.f32 0.0, %v12904_v49 }
 0x605   :  { %v15505_v61 = vpop.eup %15504  ;;  %15524 = vrcp.f32 %v10716_v0  ;;  %v10734_v23 = vadd.f32 1.0, %v15503_v35  ;;  %v10366_v14 = vmul.f32 1.442695, %v9861_v1  ;;  %v9880_v35 = vsub.f32 0.0, %v12936_v2 }
 0x606   :  { %v15507_v44 = vpop.eup %15506  ;;  %15526 = vrcp.f32 %v10732_v26  ;;  %v10733_v18 = vadd.f32 1.0, %v15505_v61  ;;  %v10398_v62 = vmul.f32 1.442695, %v9877_v63  ;;  %v9896_v61 = vsub.f32 0.0, %v12905_v24 }
 0x607   :  { %v15509_v40 = vpop.eup %15508  ;;  %15528 = vrcp.f32 %v10734_v23  ;;  %v10735_v51 = vadd.f32 1.0, %v15507_v44  ;;  %9628 = vmatmul.mubr.bf16.gmra.mrb[16].mxu1 %v17703_v19  ;;  %v10402_v23 = vmul.f32 1.442695, %v9879_v56  ;;  %v10400_v32 = vmul.f32 1.442695, %v9878_v46 }
 0x608   :  { %v15511_v8 = vpop.eup %15510  ;;  %15530 = vrcp.f32 %v10733_v18  ;;  %v10751_v30 = vadd.f32 1.0, %v15509_v40  ;;  %9426 = vmatmul.mubr.bf16.gmra.mrb[240].mxu0 %v17703_v19  ;;  %9635 = vmatprep.mubr.bf16.mxu1 %v17751_v22  ;;  %v10364_v19 = vmul.f32 1.442695, %v9860_v34  ;;  %v9897_v44 = vsub.f32 0.0, %v12906_v12 }
 0x609   :  { %v15513_v3 = vpop.eup %15512  ;;  %15532 = vrcp.f32 %v10735_v51  ;;  %v10753_v60 = vadd.f32 1.0, %v15511_v8  ;;  %9435 = vmatprep.mubr.bf16.mxu0 %v17751_v22  ;;  %v10362_v22 = vmul.f32 1.442695, %v9859_v13  ;;  %v10404_v34 = vmul.f32 1.442695, %v9880_v35 }
 0x60a   :  { %v15515_v37 = vpop.eup %15514  ;;  %15534 = vrcp.f32 %v10751_v30  ;;  %v10752_v52 = vadd.f32 1.0, %v15513_v3  ;;  %v9899_v28 = vsub.f32 0.0, %v12938_v33  ;;  %v10436_v51 = vmul.f32 1.442695, %v9896_v61 }
 0x60b   :  { %v15517_v50 = vpop.eup %15516  ;;  %11303 = vst [vmem:[%s21692_s9 + $0x3d8] sm:$0xff] %v15515_v37  ;;  %15536 = vrcp.f32 %v10753_v60  ;;  %v12907_v3 = vadd.f32 %v20705_v16, %v20391_v58  ;;  %v12939_v16 = vadd.f32 %v20709_v53, %v20394_v48  ;;  %v12909_v33 = vadd.f32 %v20727_v36, %v20391_v58 }
 0x60c   :  { %v15519_v17 = vpop.eup %15518  ;;  %11305 = vst [vmem:[%s21692_s9 + $0x3e8] sm:$0xff] %v15517_v50  ;;  %15538 = vrcp.f32 %v10752_v52  ;;  %v10442_v30 = vmul.f32 1.442695, %v9899_v28  ;;  %v12941_v61 = vadd.f32 %v20736_v10, %v20394_v48 }
 0x60d   :  { %v15521_v0 = vpop.eup %15520  ;;  %11321 = vst [vmem:[%s21692_s9 + $0x468] sm:$0xff] %v15519_v17  ;;  %15540 = vpow2.f32 %v10328_v21  ;;  %v9898_v21 = vsub.f32 0.0, %v12937_v15  ;;  %v12908_v15 = vadd.f32 %v20711_v5, %v20397_v42  ;;  %v9917_v53 = vsub.f32 0.0, %v12939_v16 }
 0x60e   :  { %v15523_v26 = vpop.eup %15522  ;;  %11323 = vst [vmem:[%s21692_s9 + $0x478] sm:$0xff] %v15521_v0  ;;  %15542 = vpow2.f32 %v10360_v57 }
 0x60f   :  { %v15525_v9 = vpop.eup %15524  ;;  %11322 = vst [vmem:[%s21692_s9 + $0x470] sm:$0xff] %v15523_v26  ;;  %15544 = vpow2.f32 %v10364_v19  ;;  %9636 = vmatmul.mubr.bf16.gmra.mrb[20].mxu1 %v17747_v11  ;;  %v10440_v57 = vmul.f32 1.442695, %v9898_v21  ;;  %v9915_v19 = vsub.f32 0.0, %v12907_v3  ;;  %v12910_v21 = vadd.f32 %v20738_v59, %v20397_v42 }
 0x610   :  { %v15527_v20 = vpop.eup %15526  ;;  %11324 = vst [vmem:[%s21692_s9 + $0x480] sm:$0xff] %v15525_v9  ;;  %15546 = vpow2.f32 %v10362_v22  ;;  %9436 = vmatmul.mubr.bf16.gmra.mrb[244].mxu0 %v17747_v11  ;;  %9643 = vmatprep.mubr.bf16.mxu1 %v17795_v31  ;;  %v12943_v59 = vadd.f32 %v20754_v38, %v20394_v48  ;;  %v12944_v48 = vadd.f32 %v20761_v55, %v20403_v45 }
 0x611   :  { %v15529_v18 = vpop.eup %15528  ;;  %11340 = vst [vmem:[%s21692_s9 + $0x500] sm:$0xff] %v15527_v20  ;;  %15548 = vpow2.f32 %v10366_v14  ;;  %9445 = vmatprep.mubr.bf16.mxu0 %v17795_v31  ;;  %v10438_v31 = vmul.f32 1.442695, %v9897_v44  ;;  %v10474_v35 = vmul.f32 1.442695, %v9915_v19  ;;  %v12942_v44 = vadd.f32 %v20745_v6, %v20403_v45 }
 0x612   :  { %v15531_v40 = vpop.eup %15530  ;;  %11342 = vst [vmem:[%s21692_s9 + $0x510] sm:$0xff] %v15529_v18  ;;  %15550 = vpow2.f32 %v10398_v62  ;;  %v9916_v62 = vsub.f32 0.0, %v12908_v15 }
 0x613   :  { %v15533_v11 = vpop.eup %15532  ;;  %11341 = vst [vmem:[%s21692_s9 + $0x508] sm:$0xff] %v15531_v40  ;;  %15552 = vpow2.f32 %v10402_v23 }
 0x614   :  { %v15535_v25 = vpop.eup %15534  ;;  %11343 = vst [vmem:[%s21692_s9 + $0x518] sm:$0xff] %v15533_v11  ;;  %15554 = vpow2.f32 %v10400_v32  ;;  %v10478_v32 = vmul.f32 1.442695, %v9917_v53  ;;  %v10476_v6 = vmul.f32 1.442695, %v9916_v62  ;;  %v16089_v62 = vld [vmem:[%s21691_s8 + $0x8] sm:$0xff] }
 0x615   :  { %v15537_v8 = vpop.eup %15536  ;;  %11359 = vst [vmem:[%s21692_s9 + $0x598] sm:$0xff] %v15535_v25  ;;  %15556 = vpow2.f32 %v10404_v34  ;;  %v9934_v34 = vsub.f32 0.0, %v12909_v33  ;;  %v12912_v25 = vadd.f32 %v20756_v4, %v20397_v42 }
 0x616   :  { %v15539_v13 = vpop.eup %15538  ;;  %11361 = vst [vmem:[%s21692_s9 + $0x5a8] sm:$0xff] %v15537_v8  ;;  %15558 = vpow2.f32 %v10436_v51  ;;  %v9936_v51 = vsub.f32 0.0, %v12941_v61  ;;  %v21841_v61 = vld [vmem:[#allocation2_spill] sm:$0xff] }
 0x617   :  { %v15541_v49 = vpop.eup %15540  ;;  %11360 = vst [vmem:[%s21692_s9 + $0x5a0] sm:$0xff] %v15539_v13  ;;  %15560 = vpow2.f32 %v10440_v57  ;;  %9644 = vmatmul.mubr.bf16.gmra.mrb[24].mxu1 %v17791_v29  ;;  %v9935_v57 = vsub.f32 0.0, %v12910_v21  ;;  %v10512_v8 = vmul.f32 1.442695, %v9934_v34  ;;  %v9955_v13 = vsub.f32 0.0, %v12943_v59 }
 0x618   :  { %v15543_v60 = vpop.eup %15542  ;;  %v10754_v1 = vadd.f32 1.0, %v15541_v49  ;;  %15562 = vpow2.f32 %v10438_v31  ;;  %9446 = vmatmul.mubr.bf16.gmra.mrb[248].mxu0 %v17791_v29  ;;  %9651 = vmatprep.mubr.bf16.mxu1 %v17839_v47  ;;  %v10516_v4 = vmul.f32 1.442695, %v9936_v51  ;;  %v9954_v55 = vsub.f32 0.0, %v12912_v25 }
 0x619   :  { %v15545_v2 = vpop.eup %15544  ;;  %v10770_v37 = vadd.f32 1.0, %v15543_v60  ;;  %15564 = vpow2.f32 %v10442_v30  ;;  %9455 = vmatprep.mubr.bf16.mxu0 %v17839_v47  ;;  %v12940_v47 = vadd.f32 %v20715_v41, %v20403_v45  ;;  %v10514_v45 = vmul.f32 1.442695, %v9935_v57 }
 0x61a   :  { %v15547_v52 = vpop.eup %15546  ;;  %15566 = vrcp.f32 %v10754_v1  ;;  %v10772_v63 = vadd.f32 1.0, %v15545_v2  ;;  %v9956_v1 = vsub.f32 0.0, %v12944_v48  ;;  %v21845_v34 = vsub.s32 7, %v21841_v61 }
 0x61b   :  { %v15549_v24 = vpop.eup %15548  ;;  %15568 = vrcp.f32 %v10770_v37  ;;  %v10771_v50 = vadd.f32 1.0, %v15547_v52  ;;  %v9918_v23 = vsub.f32 0.0, %v12940_v47 }
 0x61c   :  { %v15551_v56 = vpop.eup %15550  ;;  %15570 = vrcp.f32 %v10772_v63  ;;  %v10773_v29 = vadd.f32 1.0, %v15549_v24  ;;  %v10554_v63 = vmul.f32 1.442695, %v9955_v13  ;;  %v10552_v24 = vmul.f32 1.442695, %v9954_v55 }
 0x61d   :  { %v15553_v17 = vpop.eup %15552  ;;  %15572 = vrcp.f32 %v10771_v50  ;;  %v10789_v22 = vadd.f32 1.0, %v15551_v56  ;;  %v10556_v19 = vmul.f32 1.442695, %v9956_v1 }
 0x61e   :  { %v15555_v46 = vpop.eup %15554  ;;  %15574 = vrcp.f32 %v10773_v29  ;;  %v10791_v12 = vadd.f32 1.0, %v15553_v17 }
 0x61f   :  { %v15557_v0 = vpop.eup %15556  ;;  %15576 = vrcp.f32 %v10789_v22  ;;  %v10790_v14 = vadd.f32 1.0, %v15555_v46  ;;  %9652 = vmatmul.mubr.bf16.gmra.mrb[28].mxu1 %v17835_v43 }
 0x620   :  { %v15559_v26 = vpop.eup %15558  ;;  %15578 = vrcp.f32 %v10791_v12  ;;  %v10792_v5 = vadd.f32 1.0, %v15557_v0  ;;  %9456 = vmatmul.mubr.bf16.gmra.mrb[252].mxu0 %v17835_v43  ;;  %v12911_v43 = vadd.f32 %v20747_v7, %v20391_v58  ;;  %v10480_v58 = vmul.f32 1.442695, %v9918_v23 }
 0x621   :  { %v15561_v41 = vpop.eup %15560  ;;  %15580 = vrcp.f32 %v10790_v14  ;;  %v10808_v9 = vadd.f32 1.0, %v15559_v26  ;;  %v9937_v7 = vsub.f32 0.0, %v12942_v44 }
 0x622   :  { %v15563_v20 = vpop.eup %15562  ;;  %15582 = vrcp.f32 %v10792_v5  ;;  %v10810_v36 = vadd.f32 1.0, %v15561_v41  ;;  %v9953_v30 = vsub.f32 0.0, %v12911_v43  ;;  %v21842_v41 = vsub.s32 4, %v21841_v61 }
 0x623   :  { %v15565_v18 = vpop.eup %15564  ;;  %15584 = vrcp.f32 %v10808_v9  ;;  %v10809_v10 = vadd.f32 1.0, %v15563_v20  ;;  %v10518_v60 = vmul.f32 1.442695, %v9937_v7  ;;  %v21843_v20 = vsub.s32 6, %v21841_v61 }
 0x624   :  { %v15567_v28 = vpop.eup %15566  ;;  %15586 = vrcp.f32 %v10810_v36  ;;  %v10811_v40 = vadd.f32 1.0, %v15565_v18  ;;  %v10550_v37 = vmul.f32 1.442695, %v9953_v30  ;;  %v20945_v9 = vrot.slane %v16089_v62, %v21842_v41 }
 0x625   :  { %v15569_v11 = vpop.eup %15568  ;;  %11362 = vst [vmem:[%s21692_s9 + $0x5b0] sm:$0xff] %v15567_v28  ;;  %15588 = vrcp.f32 %v10809_v10  ;;  %v20949_v36 = vrot.slane %v16089_v62, %v21843_v20  ;;  %v20957_v43 = vrot.slane %v16089_v62, %v21845_v34 }
 0x626   :  { %v15571_v31 = vpop.eup %15570  ;;  %11378 = vst [vmem:[%s21692_s9 + $0x630] sm:$0xff] %v15569_v11  ;;  %15590 = vrcp.f32 %v10811_v40 }
 0x627   :  { %v15573_v38 = vpop.eup %15572  ;;  %11380 = vst [vmem:[%s21692_s9 + $0x640] sm:$0xff] %v15571_v31  ;;  %15592 = vpow2.f32 %v10474_v35 }
 0x628   :  { %v15575_v42 = vpop.eup %15574  ;;  %11379 = vst [vmem:[%s21692_s9 + $0x638] sm:$0xff] %v15573_v38  ;;  %15594 = vpow2.f32 %v10478_v32  ;;  %v21844_v32 = vsub.s32 5, %v21841_v61 }
 0x629   :  { %v15577_v49 = vpop.eup %15576  ;;  %11381 = vst [vmem:[%s21692_s9 + $0x648] sm:$0xff] %v15575_v42  ;;  %15596 = vpow2.f32 %v10476_v6 }
 0x62a   :  { %v15579_v3 = vpop.eup %15578  ;;  %11397 = vst [vmem:[%s21692_s9 + $0x6c8] sm:$0xff] %v15577_v49  ;;  %15598 = vpow2.f32 %v10480_v58  ;;  %v20953_v44 = vrot.slane %v16089_v62, %v21844_v32 }
 0x62b   :  { %v15581_v2 = vpop.eup %15580  ;;  %11399 = vst [vmem:[%s21692_s9 + $0x6d8] sm:$0xff] %v15579_v3  ;;  %15600 = vpow2.f32 %v10512_v8 }
 0x62c   :  { %v15583_v52 = vpop.eup %15582  ;;  %11398 = vst [vmem:[%s21692_s9 + $0x6d0] sm:$0xff] %v15581_v2  ;;  %15602 = vpow2.f32 %v10516_v4 }
 0x62d   :  { %v15585_v16 = vpop.eup %15584  ;;  %11400 = vst [vmem:[%s21692_s9 + $0x6e0] sm:$0xff] %v15583_v52  ;;  %15604 = vpow2.f32 %v10514_v45 }
 0x62e   :  { %v15587_v50 = vpop.eup %15586  ;;  %11416 = vst [vmem:[%s21692_s9 + $0x760] sm:$0xff] %v15585_v16  ;;  %15606 = vpow2.f32 %v10518_v60 }
 0x62f   :  { %v15589_v56 = vpop.eup %15588  ;;  %11418 = vst [vmem:[%s21692_s9 + $0x770] sm:$0xff] %v15587_v50  ;;  %15608 = vpow2.f32 %v10550_v37 }
 0x630   :  { %v15591_v29 = vpop.eup %15590  ;;  %11417 = vst [vmem:[%s21692_s9 + $0x768] sm:$0xff] %v15589_v56  ;;  %15610 = vpow2.f32 %v10554_v63 }
 0x631   :  { %v15593_v15 = vpop.eup %15592  ;;  %11419 = vst [vmem:[%s21692_s9 + $0x778] sm:$0xff] %v15591_v29  ;;  %15612 = vpow2.f32 %v10552_v24 }
 0x632   :  { %v15595_v17 = vpop.eup %15594  ;;  %v10827_v22 = vadd.f32 1.0, %v15593_v15  ;;  %15614 = vpow2.f32 %v10556_v19 }
 0x633   :  { %v15597_v47 = vpop.eup %15596  ;;  %v10829_v46 = vadd.f32 1.0, %v15595_v17 }
 0x634   :  { %v15599_v12 = vpop.eup %15598  ;;  %15616 = vrcp.f32 %v10827_v22  ;;  %v10828_v53 = vadd.f32 1.0, %v15597_v47 }
 0x635   :  { %v15601_v0 = vpop.eup %15600  ;;  %15618 = vrcp.f32 %v10829_v46  ;;  %v10830_v14 = vadd.f32 1.0, %v15599_v12 }
 0x636   :  { %v15603_v35 = vpop.eup %15602  ;;  %15620 = vrcp.f32 %v10828_v53  ;;  %v10846_v33 = vadd.f32 1.0, %v15601_v0 }
 0x637   :  { %v15605_v26 = vpop.eup %15604  ;;  %15622 = vrcp.f32 %v10830_v14  ;;  %v10848_v5 = vadd.f32 1.0, %v15603_v35 }
 0x638   :  { %v15607_v23 = vpop.eup %15606  ;;  %15624 = vrcp.f32 %v10846_v33  ;;  %v10847_v21 = vadd.f32 1.0, %v15605_v26 }
 0x639   :  { %v15609_v18 = vpop.eup %15608  ;;  %15626 = vrcp.f32 %v10848_v5  ;;  %v10849_v10 = vadd.f32 1.0, %v15607_v23 }
 0x63a   :  { %v15611_v28 = vpop.eup %15610  ;;  %15628 = vrcp.f32 %v10847_v21  ;;  %v10865_v40 = vadd.f32 1.0, %v15609_v18  ;;  %v8935_v51 = vpop.f32.mrb[192].mxu0 }
 0x63b   :  { %v15613_v59 = vpop.eup %15612  ;;  %15630 = vrcp.f32 %v10849_v10  ;;  %v10867_v11 = vadd.f32 1.0, %v15611_v28  ;;  %v12945_v6 = vadd.f32 %v8935_v51, %v20945_v9  ;;  %v9161_v57 = vpop.f32.mrb[192].mxu1 }
 0x63c   :  { %v8937_v25 = vpop.f32.mrb[193].mxu0  ;;  %v15615_v31 = vpop.eup %15614  ;;  %15632 = vrcp.f32 %v10865_v40  ;;  %v10866_v58 = vadd.f32 1.0, %v15613_v59  ;;  %v12977_v7 = vadd.f32 %v9161_v57, %v20949_v36 }
 0x63d   :  { %v12946_v48 = vadd.f32 %v8937_v25, %v20953_v44  ;;  %v9163_v38 = vpop.f32.mrb[193].mxu1  ;;  %v8939_v8 = vpop.f32.mrb[194].mxu0  ;;  %15634 = vrcp.f32 %v10867_v11  ;;  %v10868_v30 = vadd.f32 1.0, %v15615_v31  ;;  %v9672_v42 = vsub.f32 0.0, %v12945_v6 }
 0x63e   :  { %v12978_v4 = vadd.f32 %v9163_v38, %v20957_v43  ;;  %v9165_v13 = vpop.f32.mrb[194].mxu1  ;;  %v8941_v49 = vpop.f32.mrb[195].mxu0  ;;  %15636 = vrcp.f32 %v10866_v58  ;;  %v9674_v55 = vsub.f32 0.0, %v12977_v7  ;;  %v12947_v60 = vadd.f32 %v8939_v8, %v20945_v9 }
 0x63f   :  { %v15617_v45 = vpop.eup %15616  ;;  %v9673_v3 = vsub.f32 0.0, %v12946_v48  ;;  %v9167_v1 = vpop.f32.mrb[195].mxu1  ;;  %15638 = vrcp.f32 %v10868_v30  ;;  %v9988_v37 = vmul.f32 1.442695, %v9672_v42  ;;  %v12979_v63 = vadd.f32 %v9165_v13, %v20949_v36 }
 0x640   :  { %v15619_v2 = vpop.eup %15618  ;;  %11435 = vst [vmem:[%s21692_s9 + $0x7f8] sm:$0xff] %v15617_v45  ;;  %v9675_v52 = vsub.f32 0.0, %v12978_v4  ;;  %v9992_v24 = vmul.f32 1.442695, %v9674_v55  ;;  %v9691_v19 = vsub.f32 0.0, %v12947_v60  ;;  %v12948_v56 = vadd.f32 %v8941_v49, %v20953_v44 }
 0x641   :  { %v15621_v16 = vpop.eup %15620  ;;  %11437 = vst [vmem:[%s21692_s9 + $0x808] sm:$0xff] %v15619_v2  ;;  %v9990_v50 = vmul.f32 1.442695, %v9673_v3  ;;  %15640 = vpow2.f32 %v9988_v37  ;;  %v9693_v17 = vsub.f32 0.0, %v12979_v63  ;;  %v12980_v22 = vadd.f32 %v9167_v1, %v20957_v43 }
 0x642   :  { %v15623_v29 = vpop.eup %15622  ;;  %11436 = vst [vmem:[%s21692_s9 + $0x800] sm:$0xff] %v15621_v16  ;;  %v9994_v15 = vmul.f32 1.442695, %v9675_v52  ;;  %15642 = vpow2.f32 %v9992_v24  ;;  %v10026_v46 = vmul.f32 1.442695, %v9691_v19  ;;  %v9692_v12 = vsub.f32 0.0, %v12948_v56 }
 0x643   :  { %v15625_v47 = vpop.eup %15624  ;;  %11438 = vst [vmem:[%s21692_s9 + $0x810] sm:$0xff] %v15623_v29  ;;  %v8945_v53 = vpop.f32.mrb[196].mxu0  ;;  %15644 = vpow2.f32 %v9990_v50  ;;  %v10030_v14 = vmul.f32 1.442695, %v9693_v17  ;;  %v9694_v35 = vsub.f32 0.0, %v12980_v22 }
 0x644   :  { %v15627_v0 = vpop.eup %15626  ;;  %11454 = vst [vmem:[%s21692_s9 + $0x890] sm:$0xff] %v15625_v47  ;;  %v12949_v33 = vadd.f32 %v8945_v53, %v20945_v9  ;;  %v9171_v26 = vpop.f32.mrb[196].mxu1  ;;  %15646 = vpow2.f32 %v9994_v15  ;;  %v10028_v61 = vmul.f32 1.442695, %v9692_v12 }
 0x645   :  { %v8947_v5 = vpop.f32.mrb[197].mxu0  ;;  %v15629_v62 = vpop.eup %15628  ;;  %11456 = vst [vmem:[%s21692_s9 + $0x8a0] sm:$0xff] %v15627_v0  ;;  %v12981_v41 = vadd.f32 %v9171_v26, %v20949_v36  ;;  %15648 = vpow2.f32 %v10026_v46  ;;  %v10032_v18 = vmul.f32 1.442695, %v9694_v35 }
 0x646   :  { %v12950_v23 = vadd.f32 %v8947_v5, %v20953_v44  ;;  %v9173_v21 = vpop.f32.mrb[197].mxu1  ;;  %v8949_v20 = vpop.f32.mrb[198].mxu0  ;;  %11455 = vst [vmem:[%s21692_s9 + $0x898] sm:$0xff] %v15629_v62  ;;  %v9710_v10 = vsub.f32 0.0, %v12949_v33  ;;  %15650 = vpow2.f32 %v10030_v14 }
 0x647   :  { %v15631_v32 = vpop.eup %15630  ;;  %v12982_v34 = vadd.f32 %v9173_v21, %v20957_v43  ;;  %v9175_v28 = vpop.f32.mrb[198].mxu1  ;;  %v9712_v59 = vsub.f32 0.0, %v12981_v41  ;;  %v12951_v6 = vadd.f32 %v8949_v20, %v20945_v9  ;;  %15652 = vpow2.f32 %v10028_v61 }
 0x648   :  { %v8951_v40 = vpop.f32.mrb[199].mxu0  ;;  %v15633_v51 = vpop.eup %15632  ;;  %11457 = vst [vmem:[%s21692_s9 + $0x8a8] sm:$0xff] %v15631_v32  ;;  %v9711_v11 = vsub.f32 0.0, %v12950_v23  ;;  %v10064_v31 = vmul.f32 1.442695, %v9710_v10  ;;  %15654 = vpow2.f32 %v10032_v18  ;;  %v12983_v45 = vadd.f32 %v9175_v28, %v20949_v36 }
 0x649   :  { %v9177_v57 = vpop.f32.mrb[199].mxu1  ;;  %v15635_v25 = vpop.eup %15634  ;;  %11473 = vst [vmem:[%s21692_s9 + $0x928] sm:$0xff] %v15633_v51  ;;  %v9713_v58 = vsub.f32 0.0, %v12982_v34  ;;  %v10068_v48 = vmul.f32 1.442695, %v9712_v59  ;;  %v9729_v8 = vsub.f32 0.0, %v12951_v6  ;;  %v12952_v16 = vadd.f32 %v8951_v40, %v20953_v44 }
 0x64a   :  { %v15637_v7 = vpop.eup %15636  ;;  %11475 = vst [vmem:[%s21692_s9 + $0x938] sm:$0xff] %v15635_v25  ;;  %v10066_v38 = vmul.f32 1.442695, %v9711_v11  ;;  %15656 = vpow2.f32 %v10064_v31  ;;  %v8955_v13 = vpop.f32.mrb[200].mxu0  ;;  %v9731_v22 = vsub.f32 0.0, %v12983_v45  ;;  %v12984_v12 = vadd.f32 %v9177_v57, %v20957_v43 }
 0x64b   :  { %v15639_v30 = vpop.eup %15638  ;;  %11474 = vst [vmem:[%s21692_s9 + $0x930] sm:$0xff] %v15637_v7  ;;  %v10070_v42 = vmul.f32 1.442695, %v9713_v58  ;;  %15658 = vpow2.f32 %v10068_v48  ;;  %v10102_v4 = vmul.f32 1.442695, %v9729_v8  ;;  %v9181_v55 = vpop.f32.mrb[200].mxu1  ;;  %v12953_v26 = vadd.f32 %v8955_v13, %v20945_v9 }
 0x64c   :  { %11476 = vst [vmem:[%s21692_s9 + $0x940] sm:$0xff] %v15639_v30  ;;  %v15641_v49 = vpop.eup %15640  ;;  %15660 = vpow2.f32 %v10066_v38  ;;  %v8957_v3 = vpop.f32.mrb[201].mxu0  ;;  %v9730_v14 = vsub.f32 0.0, %v12952_v16  ;;  %v10106_v41 = vmul.f32 1.442695, %v9731_v22  ;;  %v12985_v23 = vadd.f32 %v9181_v55, %v20949_v36 }
 0x64d   :  { %v15643_v60 = vpop.eup %15642  ;;  %v10584_v1 = vadd.f32 1.0, %v15641_v49  ;;  %15662 = vpow2.f32 %v10070_v42  ;;  %v9183_v2 = vpop.f32.mrb[201].mxu1  ;;  %v9732_v10 = vsub.f32 0.0, %v12984_v12  ;;  %v12954_v34 = vadd.f32 %v8957_v3, %v20953_v44 }
 0x64e   :  { %v8959_v37 = vpop.f32.mrb[202].mxu0  ;;  %v15645_v52 = vpop.eup %15644  ;;  %v10586_v63 = vadd.f32 1.0, %v15643_v60  ;;  %15664 = vpow2.f32 %v10102_v4  ;;  %v10104_v11 = vmul.f32 1.442695, %v9730_v14  ;;  %v12986_v6 = vadd.f32 %v9183_v2, %v20957_v43 }
 0x64f   :  { %v9185_v24 = vpop.f32.mrb[202].mxu1  ;;  %v8961_v50 = vpop.f32.mrb[203].mxu0  ;;  %15666 = vrcp.f32 %v10584_v1  ;;  %v10585_v56 = vadd.f32 1.0, %v15645_v52  ;;  %v9748_v7 = vsub.f32 0.0, %v12953_v26  ;;  %v12955_v48 = vadd.f32 %v8959_v37, %v20945_v9 }
 0x650   :  { %v15647_v19 = vpop.eup %15646  ;;  %v9187_v29 = vpop.f32.mrb[203].mxu1  ;;  %15668 = vrcp.f32 %v10586_v63  ;;  %v9750_v42 = vsub.f32 0.0, %v12985_v23  ;;  %v12987_v4 = vadd.f32 %v9185_v24, %v20949_v36  ;;  %v9749_v45 = vsub.f32 0.0, %v12954_v34 }
 0x651   :  { %v15649_v15 = vpop.eup %15648  ;;  %v10587_v17 = vadd.f32 1.0, %v15647_v19  ;;  %15670 = vrcp.f32 %v10585_v56  ;;  %v12956_v55 = vadd.f32 %v8961_v50, %v20953_v44  ;;  %v10108_v60 = vmul.f32 1.442695, %v9732_v10 }
 0x652   :  { %v15651_v47 = vpop.eup %15650  ;;  %v10603_v46 = vadd.f32 1.0, %v15649_v15  ;;  %v8965_v5 = vpop.f32.mrb[204].mxu0  ;;  %v9751_v1 = vsub.f32 0.0, %v12986_v6  ;;  %v12988_v2 = vadd.f32 %v9187_v29, %v20957_v43  ;;  %v10140_v52 = vmul.f32 1.442695, %v9748_v7 }
 0x653   :  { %v15653_v53 = vpop.eup %15652  ;;  %15672 = vrcp.f32 %v10587_v17  ;;  %v10605_v0 = vadd.f32 1.0, %v15651_v47  ;;  %v9191_v21 = vpop.f32.mrb[204].mxu1  ;;  %v9767_v63 = vsub.f32 0.0, %v12955_v48  ;;  %v12957_v16 = vadd.f32 %v8965_v5, %v20945_v9 }
 0x654   :  { %v15655_v35 = vpop.eup %15654  ;;  %15674 = vrcp.f32 %v10603_v46  ;;  %v10604_v33 = vadd.f32 1.0, %v15653_v53  ;;  %v21013_v20 = vpop.f32.mrb[205].mxu0  ;;  %v10144_v19 = vmul.f32 1.442695, %v9750_v42  ;;  %v9769_v56 = vsub.f32 0.0, %v12987_v4 }
 0x655   :  { %v15657_v62 = vpop.eup %15656  ;;  %15676 = vrcp.f32 %v10605_v0  ;;  %v10606_v61 = vadd.f32 1.0, %v15655_v35  ;;  %v21016_v28 = vpop.f32.mrb[205].mxu1  ;;  %v12989_v29 = vadd.f32 %v9191_v21, %v20949_v36  ;;  %v10142_v47 = vmul.f32 1.442695, %v9749_v45 }
 0x656   :  { %v15659_v32 = vpop.eup %15658  ;;  %15678 = vrcp.f32 %v10604_v33  ;;  %v10622_v18 = vadd.f32 1.0, %v15657_v62  ;;  %v21018_v40 = vpop.f32.mrb[206].mxu0  ;;  %v9768_v46 = vsub.f32 0.0, %v12956_v55  ;;  %v10146_v14 = vmul.f32 1.442695, %v9751_v1 }
 0x657   :  { %v15661_v51 = vpop.eup %15660  ;;  %15680 = vrcp.f32 %v10606_v61  ;;  %v10624_v59 = vadd.f32 1.0, %v15659_v32  ;;  %v21021_v57 = vpop.f32.mrb[206].mxu1  ;;  %v9770_v35 = vsub.f32 0.0, %v12988_v2  ;;  %v10178_v62 = vmul.f32 1.442695, %v9767_v63 }
 0x658   :  { %v21023_v25 = vpop.f32.mrb[207].mxu0  ;;  %v15663_v31 = vpop.eup %15662  ;;  %15682 = vrcp.f32 %v10622_v18  ;;  %v10623_v58 = vadd.f32 1.0, %v15661_v51  ;;  %v9786_v61 = vsub.f32 0.0, %v12957_v16  ;;  %v10182_v21 = vmul.f32 1.442695, %v9769_v56 }
 0x659   :  { %v21026_v38 = vpop.f32.mrb[207].mxu1  ;;  %v15665_v8 = vpop.eup %15664  ;;  %15684 = vrcp.f32 %v10624_v59  ;;  %v10625_v30 = vadd.f32 1.0, %v15663_v31  ;;  %v9788_v32 = vsub.f32 0.0, %v12989_v29  ;;  %v10180_v10 = vmul.f32 1.442695, %v9768_v46 }
 0x65a   :  { %v15667_v13 = vpop.eup %15666  ;;  %15686 = vrcp.f32 %v10623_v58  ;;  %v10641_v49 = vadd.f32 1.0, %v15665_v8  ;;  %v21038_v24 = vpop.f32.mrb[208].mxu0  ;;  %v10184_v51 = vmul.f32 1.442695, %v9770_v35  ;;  %v12959_v29 = vadd.f32 %v21018_v40, %v20945_v9 }
 0x65b   :  { %v15669_v3 = vpop.eup %15668  ;;  %11192 = vst [vmem:[%s21692_s9 + $0x60] sm:$0xff] %v15667_v13  ;;  %15688 = vrcp.f32 %v10625_v30  ;;  %v21044_v15 = vpop.f32.mrb[208].mxu1  ;;  %v10220_v58 = vmul.f32 1.442695, %v9788_v32  ;;  %v12958_v13 = vadd.f32 %v21013_v20, %v20953_v44 }
 0x65c   :  { %v15671_v37 = vpop.eup %15670  ;;  %11194 = vst [vmem:[%s21692_s9 + $0x70] sm:$0xff] %v15669_v3  ;;  %15690 = vrcp.f32 %v10641_v49  ;;  %v21046_v17 = vpop.f32.mrb[209].mxu0 }
 0x65d   :  { %v15673_v50 = vpop.eup %15672  ;;  %11193 = vst [vmem:[%s21692_s9 + $0x68] sm:$0xff] %v15671_v37  ;;  %15692 = vpow2.f32 %v10106_v41  ;;  %v21051_v12 = vpop.f32.mrb[209].mxu1  ;;  %v12990_v37 = vadd.f32 %v21016_v28, %v20957_v43 }
 0x65e   :  { %v15675_v22 = vpop.eup %15674  ;;  %11195 = vst [vmem:[%s21692_s9 + $0x78] sm:$0xff] %v15673_v50  ;;  %15694 = vpow2.f32 %v10104_v11  ;;  %v21053_v53 = vpop.f32.mrb[210].mxu0  ;;  %v10216_v11 = vmul.f32 1.442695, %v9786_v61  ;;  %v9787_v50 = vsub.f32 0.0, %v12958_v13 }
 0x65f   :  { %v15677_v0 = vpop.eup %15676  ;;  %11211 = vst [vmem:[%s21692_s9 + $0xf8] sm:$0xff] %v15675_v22  ;;  %15696 = vpow2.f32 %v10108_v60  ;;  %v21058_v33 = vpop.f32.mrb[210].mxu1 }
 0x660   :  { %v21060_v26 = vpop.f32.mrb[211].mxu0  ;;  %v15679_v5 = vpop.eup %15678  ;;  %11213 = vst [vmem:[%s21692_s9 + $0x108] sm:$0xff] %v15677_v0  ;;  %15698 = vpow2.f32 %v10140_v52  ;;  %v9789_v0 = vsub.f32 0.0, %v12990_v37  ;;  %v10218_v32 = vmul.f32 1.442695, %v9787_v50 }
 0x661   :  { %v21065_v41 = vpop.f32.mrb[211].mxu1  ;;  %v15681_v23 = vpop.eup %15680  ;;  %11212 = vst [vmem:[%s21692_s9 + $0x100] sm:$0xff] %v15679_v5  ;;  %15700 = vpow2.f32 %v10144_v19 }
 0x662   :  { %v15683_v18 = vpop.eup %15682  ;;  %11214 = vst [vmem:[%s21692_s9 + $0x110] sm:$0xff] %v15681_v23  ;;  %15702 = vpow2.f32 %v10142_v47  ;;  %v21079_v6 = vpop.f32.mrb[212].mxu0 }
 0x663   :  { %v15685_v34 = vpop.eup %15684  ;;  %11230 = vst [vmem:[%s21692_s9 + $0x190] sm:$0xff] %v15683_v18  ;;  %15704 = vpow2.f32 %v10146_v14  ;;  %v21084_v7 = vpop.f32.mrb[212].mxu1  ;;  %v12960_v18 = vadd.f32 %v21023_v25, %v20953_v44  ;;  %v12961_v25 = vadd.f32 %v21038_v24, %v20945_v9  ;;  %v12994_v24 = vadd.f32 %v21051_v12, %v20957_v43 }
 0x664   :  { %v15687_v59 = vpop.eup %15686  ;;  %11232 = vst [vmem:[%s21692_s9 + $0x1a0] sm:$0xff] %v15685_v34  ;;  %15706 = vpow2.f32 %v10178_v62  ;;  %v21086_v48 = vpop.f32.mrb[213].mxu0  ;;  %v12991_v62 = vadd.f32 %v21021_v57, %v20949_v36  ;;  %v12992_v57 = vadd.f32 %v21026_v38, %v20957_v43 }
 0x665   :  { %v15689_v31 = vpop.eup %15688  ;;  %11231 = vst [vmem:[%s21692_s9 + $0x198] sm:$0xff] %v15687_v59  ;;  %15708 = vpow2.f32 %v10182_v21  ;;  %v21091_v30 = vpop.f32.mrb[213].mxu1  ;;  %v9806_v38 = vsub.f32 0.0, %v12960_v18  ;;  %v12964_v18 = vadd.f32 %v21060_v26, %v20953_v44 }
 0x666   :  { %v15691_v8 = vpop.eup %15690  ;;  %11233 = vst [vmem:[%s21692_s9 + $0x1a8] sm:$0xff] %v15689_v31  ;;  %15710 = vpow2.f32 %v10180_v10  ;;  %v21093_v42 = vpop.f32.mrb[214].mxu0 }
 0x667   :  { %v15693_v4 = vpop.eup %15692  ;;  %11249 = vst [vmem:[%s21692_s9 + $0x228] sm:$0xff] %v15691_v8  ;;  %15712 = vpow2.f32 %v10184_v51  ;;  %v21100_v49 = vpop.f32.mrb[214].mxu1 }
 0x668   :  { %v21102_v45 = vpop.f32.mrb[215].mxu0  ;;  %v15695_v55 = vpop.eup %15694  ;;  %v10643_v3 = vadd.f32 1.0, %v15693_v4  ;;  %15714 = vpow2.f32 %v10216_v11  ;;  %v9805_v11 = vsub.f32 0.0, %v12959_v29  ;;  %v10222_v4 = vmul.f32 1.442695, %v9789_v0 }
 0x669   :  { %v21104_v60 = vpop.f32.mrb[215].mxu1  ;;  %v15697_v1 = vpop.eup %15696  ;;  %v10642_v2 = vadd.f32 1.0, %v15695_v55  ;;  %15716 = vpow2.f32 %v10220_v58 }
 0x66a   :  { %v15699_v52 = vpop.eup %15698  ;;  %15718 = vrcp.f32 %v10643_v3  ;;  %v10644_v63 = vadd.f32 1.0, %v15697_v1  ;;  %v21110_v22 = vpop.f32.mrb[216].mxu0  ;;  %v9807_v3 = vsub.f32 0.0, %v12991_v62  ;;  %v12993_v1 = vadd.f32 %v21044_v15, %v20949_v36 }
 0x66b   :  { %v15701_v16 = vpop.eup %15700  ;;  %15720 = vrcp.f32 %v10642_v2  ;;  %v10660_v20 = vadd.f32 1.0, %v15699_v52  ;;  %v21112_v28 = vpop.f32.mrb[216].mxu1  ;;  %v12962_v52 = vadd.f32 %v21046_v17, %v20953_v44  ;;  %v10254_v15 = vmul.f32 1.442695, %v9805_v11 }
 0x66c   :  { %v15703_v19 = vpop.eup %15702  ;;  %15722 = vrcp.f32 %v10644_v63  ;;  %v10662_v56 = vadd.f32 1.0, %v15701_v16  ;;  %v21114_v14 = vpop.f32.mrb[217].mxu0  ;;  %v12963_v17 = vadd.f32 %v21053_v53, %v20945_v9  ;;  %v10258_v12 = vmul.f32 1.442695, %v9807_v3 }
 0x66d   :  { %v15705_v47 = vpop.eup %15704  ;;  %15724 = vrcp.f32 %v10660_v20  ;;  %v10661_v46 = vadd.f32 1.0, %v15703_v19  ;;  %v21118_v61 = vpop.f32.mrb[217].mxu1  ;;  %v9808_v20 = vsub.f32 0.0, %v12992_v57  ;;  %v9826_v0 = vsub.f32 0.0, %v12993_v1 }
 0x66e   :  { %v15707_v35 = vpop.eup %15706  ;;  %15726 = vrcp.f32 %v10662_v56  ;;  %v10663_v5 = vadd.f32 1.0, %v15705_v47  ;;  %v21120_v23 = vpop.f32.mrb[218].mxu0  ;;  %v9824_v56 = vsub.f32 0.0, %v12961_v25  ;;  %v9827_v57 = vsub.f32 0.0, %v12994_v24 }
 0x66f   :  { %v15709_v40 = vpop.eup %15708  ;;  %15728 = vrcp.f32 %v10661_v46  ;;  %v10679_v21 = vadd.f32 1.0, %v15707_v35  ;;  %v21124_v10 = vpop.f32.mrb[218].mxu1  ;;  %v12995_v35 = vadd.f32 %v21058_v33, %v20949_v36  ;;  %v10260_v11 = vmul.f32 1.442695, %v9808_v20 }
 0x670   :  { %v21126_v34 = vpop.f32.mrb[219].mxu0  ;;  %v15711_v51 = vpop.eup %15710  ;;  %15730 = vrcp.f32 %v10663_v5  ;;  %v10681_v59 = vadd.f32 1.0, %v15709_v40  ;;  %v10256_v40 = vmul.f32 1.442695, %v9806_v38  ;;  %v10292_v26 = vmul.f32 1.442695, %v9824_v56 }
 0x671   :  { %v21130_v31 = vpop.f32.mrb[219].mxu1  ;;  %v15713_v58 = vpop.eup %15712  ;;  %15732 = vrcp.f32 %v10679_v21  ;;  %v10680_v8 = vadd.f32 1.0, %v15711_v51  ;;  %v9825_v21 = vsub.f32 0.0, %v12962_v52  ;;  %v9844_v1 = vsub.f32 0.0, %v12964_v18 }
 0x672   :  { %v15715_v13 = vpop.eup %15714  ;;  %15734 = vrcp.f32 %v10681_v59  ;;  %v10682_v55 = vadd.f32 1.0, %v15713_v58  ;;  %v21140_v50 = vpop.f32.mrb[220].mxu0  ;;  %v12996_v56 = vadd.f32 %v21065_v41, %v20957_v43  ;;  %v12997_v41 = vadd.f32 %v21084_v7, %v20949_v36 }
 0x673   :  { %v15717_v2 = vpop.eup %15716  ;;  %15736 = vrcp.f32 %v10680_v8  ;;  %v10698_v37 = vadd.f32 1.0, %v15715_v13  ;;  %v21147_v29 = vpop.f32.mrb[220].mxu1  ;;  %v9843_v8 = vsub.f32 0.0, %v12963_v17  ;;  %v10296_v13 = vmul.f32 1.442695, %v9826_v0 }
 0x674   :  { %v15719_v63 = vpop.eup %15718  ;;  %15738 = vrcp.f32 %v10682_v55  ;;  %v10700_v16 = vadd.f32 1.0, %v15717_v2  ;;  %v21149_v47 = vpop.f32.mrb[221].mxu0  ;;  %v10294_v3 = vmul.f32 1.442695, %v9825_v21  ;;  %v12965_v17 = vadd.f32 %v21079_v6, %v20945_v9 }
 0x675   :  { %v15721_v19 = vpop.eup %15720  ;;  %11251 = vst [vmem:[%s21692_s9 + $0x238] sm:$0xff] %v15719_v63  ;;  %15740 = vrcp.f32 %v10698_v37  ;;  %v21156_v5 = vpop.f32.mrb[221].mxu1  ;;  %v10298_v37 = vmul.f32 1.442695, %v9827_v57  ;;  %v10330_v52 = vmul.f32 1.442695, %v9843_v8 }
 0x676   :  { %v15723_v46 = vpop.eup %15722  ;;  %11250 = vst [vmem:[%s21692_s9 + $0x230] sm:$0xff] %v15721_v19  ;;  %15742 = vrcp.f32 %v10700_v16  ;;  %v21158_v62 = vpop.f32.mrb[222].mxu0  ;;  %v9846_v18 = vsub.f32 0.0, %v12996_v56 }
 0x677   :  { %v15725_v53 = vpop.eup %15724  ;;  %11252 = vst [vmem:[%s21692_s9 + $0x240] sm:$0xff] %v15723_v46  ;;  %15744 = vpow2.f32 %v10218_v32  ;;  %v21165_v51 = vpop.f32.mrb[222].mxu1 }
 0x678   :  { %v21167_v59 = vpop.f32.mrb[223].mxu0  ;;  %v15727_v33 = vpop.eup %15726  ;;  %11268 = vst [vmem:[%s21692_s9 + $0x2c0] sm:$0xff] %v15725_v53  ;;  %15746 = vpow2.f32 %v10222_v4  ;;  %v9845_v4 = vsub.f32 0.0, %v12995_v35 }
 0x679   :  { %v21172_v58 = vpop.f32.mrb[223].mxu1  ;;  %v15729_v32 = vpop.eup %15728  ;;  %11270 = vst [vmem:[%s21692_s9 + $0x2d0] sm:$0xff] %v15727_v33  ;;  %15748 = vpow2.f32 %v10254_v15  ;;  %v10332_v15 = vmul.f32 1.442695, %v9844_v1  ;;  %v9862_v33 = vsub.f32 0.0, %v12965_v17 }
 0x67a   :  { %v15731_v25 = vpop.eup %15730  ;;  %11269 = vst [vmem:[%s21692_s9 + $0x2c8] sm:$0xff] %v15729_v32  ;;  %15750 = vpow2.f32 %v10258_v12  ;;  %v12577_v63 = vpop.f32.mrb[224].mxu1  ;;  %v10334_v20 = vmul.f32 1.442695, %v9845_v4  ;;  %v12966_v32 = vadd.f32 %v21086_v48, %v20953_v44 }
 0x67b   :  { %v15733_v55 = vpop.eup %15732  ;;  %11271 = vst [vmem:[%s21692_s9 + $0x2d8] sm:$0xff] %v15731_v25  ;;  %15752 = vpow2.f32 %v10256_v40  ;;  %v12578_v24 = vpop.f32.mrb[225].mxu1  ;;  %v9864_v25 = vsub.f32 0.0, %v12997_v41 }
 0x67c   :  { %v15735_v2 = vpop.eup %15734  ;;  %11287 = vst [vmem:[%s21692_s9 + $0x358] sm:$0xff] %v15733_v55  ;;  %15754 = vpow2.f32 %v10260_v11  ;;  %v12580_v46 = vpop.f32.mrb[226].mxu1  ;;  %v12998_v55 = vadd.f32 %v21091_v30, %v20957_v43  ;;  %v12967_v30 = vadd.f32 %v21093_v42, %v20945_v9  ;;  %v12968_v42 = vadd.f32 %v21102_v45, %v20953_v44 }
 0x67d   :  { %v15737_v38 = vpop.eup %15736  ;;  %11289 = vst [vmem:[%s21692_s9 + $0x368] sm:$0xff] %v15735_v2  ;;  %15756 = vpow2.f32 %v10292_v26  ;;  %v12581_v0 = vpop.f32.mrb[227].mxu1 }
 0x67e   :  { %v15739_v16 = vpop.eup %15738  ;;  %11288 = vst [vmem:[%s21692_s9 + $0x360] sm:$0xff] %v15737_v38  ;;  %15758 = vpow2.f32 %v10296_v13  ;;  %v10368_v38 = vmul.f32 1.442695, %v9862_v33 }
 0x67f   :  { %v15741_v19 = vpop.eup %15740  ;;  %11290 = vst [vmem:[%s21692_s9 + $0x370] sm:$0xff] %v15739_v16  ;;  %15760 = vpow2.f32 %v10294_v3 }
 0x680   :  { %v15743_v12 = vpop.eup %15742  ;;  %11306 = vst [vmem:[%s21692_s9 + $0x3f0] sm:$0xff] %v15741_v19  ;;  %15762 = vpow2.f32 %v10298_v37  ;;  %v10336_v37 = vmul.f32 1.442695, %v9846_v18  ;;  %v21211_v19 = vadd.f32 %v12578_v24, %v12577_v63  ;;  %v12999_v63 = vadd.f32 %v21100_v49, %v20949_v36 }
 0x681   :  { %v15745_v35 = vpop.eup %15744  ;;  %11308 = vst [vmem:[%s21692_s9 + $0x400] sm:$0xff] %v15743_v12  ;;  %15764 = vpow2.f32 %v10330_v52  ;;  %v10372_v12 = vmul.f32 1.442695, %v9864_v25  ;;  %v9881_v25 = vsub.f32 0.0, %v12967_v30 }
 0x682   :  { %v15747_v53 = vpop.eup %15746  ;;  %v10699_v40 = vadd.f32 1.0, %v15745_v35  ;;  %15766 = vpow2.f32 %v10334_v20  ;;  %v12583_v13 = vpop.f32.mrb[228].mxu1  ;;  %v9863_v20 = vsub.f32 0.0, %v12966_v32  ;;  %v13000_v32 = vadd.f32 %v21104_v60, %v20957_v43 }
 0x683   :  { %v15749_v6 = vpop.eup %15748  ;;  %v10701_v21 = vadd.f32 1.0, %v15747_v53  ;;  %15768 = vpow2.f32 %v10332_v15  ;;  %v12584_v3 = vpop.f32.mrb[229].mxu1  ;;  %v9865_v53 = vsub.f32 0.0, %v12998_v55  ;;  %v9883_v45 = vsub.f32 0.0, %v12999_v63 }
 0x684   :  { %v15751_v11 = vpop.eup %15750  ;;  %15770 = vrcp.f32 %v10699_v40  ;;  %v10717_v57 = vadd.f32 1.0, %v15749_v6  ;;  %v12586_v52 = vpop.f32.mrb[230].mxu1  ;;  %v21215_v40 = vadd.f32 %v12581_v0, %v12580_v46  ;;  %v21219_v24 = vadd.f32 %v12584_v3, %v12583_v13 }
 0x685   :  { %v15753_v26 = vpop.eup %15752  ;;  %15772 = vrcp.f32 %v10701_v21  ;;  %v10719_v8 = vadd.f32 1.0, %v15751_v11  ;;  %v12587_v15 = vpop.f32.mrb[231].mxu1  ;;  %v10370_v0 = vmul.f32 1.442695, %v9863_v20  ;;  %v12969_v13 = vadd.f32 %v21110_v22, %v20945_v9 }
 0x686   :  { %v15755_v7 = vpop.eup %15754  ;;  %15774 = vrcp.f32 %v10717_v57  ;;  %v10718_v4 = vadd.f32 1.0, %v15753_v26  ;;  %v21223_v11 = vadd.f32 %v12587_v15, %v12586_v52  ;;  %v13001_v55 = vadd.f32 %v21112_v28, %v20949_v36 }
 0x687   :  { %v15757_v1 = vpop.eup %15756  ;;  %15776 = vrcp.f32 %v10719_v8  ;;  %v10720_v2 = vadd.f32 1.0, %v15755_v7  ;;  %v10374_v22 = vmul.f32 1.442695, %v9865_v53  ;;  %v12970_v52 = vadd.f32 %v21114_v14, %v20953_v44 }
 0x688   :  { %v15759_v16 = vpop.eup %15758  ;;  %15778 = vrcp.f32 %v10718_v4  ;;  %v10736_v48 = vadd.f32 1.0, %v15757_v1  ;;  %v9884_v28 = vsub.f32 0.0, %v13000_v32  ;;  %v13002_v20 = vadd.f32 %v21118_v61, %v20957_v43 }
 0x689   :  { %v15761_v56 = vpop.eup %15760  ;;  %15780 = vrcp.f32 %v10720_v2  ;;  %v10738_v17 = vadd.f32 1.0, %v15759_v16  ;;  %v9882_v2 = vsub.f32 0.0, %v12968_v42  ;;  %v10406_v14 = vmul.f32 1.442695, %v9881_v25 }
 0x68a   :  { %v15763_v35 = vpop.eup %15762  ;;  %15782 = vrcp.f32 %v10736_v48  ;;  %v10737_v41 = vadd.f32 1.0, %v15761_v56  ;;  %v12589_v26 = vpop.f32.mrb[232].mxu1  ;;  %v9901_v53 = vsub.f32 0.0, %v12970_v52 }
 0x68b   :  { %v15765_v6 = vpop.eup %15764  ;;  %15784 = vrcp.f32 %v10738_v17  ;;  %v10739_v21 = vadd.f32 1.0, %v15763_v35  ;;  %v12590_v7 = vpop.f32.mrb[233].mxu1  ;;  %v9900_v17 = vsub.f32 0.0, %v12969_v13  ;;  %v9902_v35 = vsub.f32 0.0, %v13001_v55 }
 0x68c   :  { %v15767_v18 = vpop.eup %15766  ;;  %15786 = vrcp.f32 %v10737_v41  ;;  %v10755_v33 = vadd.f32 1.0, %v15765_v6  ;;  %v21234_v60 = vadd.f32 %v12590_v7, %v12589_v26  ;;  %v12592_v3 = vpop.f32.mrb[234].mxu1  ;;  %v10408_v61 = vmul.f32 1.442695, %v9882_v2 }
 0x68d   :  { %v15769_v57 = vpop.eup %15768  ;;  %15788 = vrcp.f32 %v10739_v21  ;;  %v10757_v46 = vadd.f32 1.0, %v15767_v18  ;;  %v12593_v16 = vpop.f32.mrb[235].mxu1  ;;  %v9903_v21 = vsub.f32 0.0, %v13002_v20  ;;  %v10444_v18 = vmul.f32 1.442695, %v9900_v17 }
 0x68e   :  { %v15771_v8 = vpop.eup %15770  ;;  %15790 = vrcp.f32 %v10755_v33  ;;  %v10756_v49 = vadd.f32 1.0, %v15769_v57  ;;  %v21246_v15 = vadd.f32 %v12593_v16, %v12592_v3  ;;  %v10448_v57 = vmul.f32 1.442695, %v9902_v35 }
 0x68f   :  { %v15773_v4 = vpop.eup %15772  ;;  %11307 = vst [vmem:[%s21692_s9 + $0x3f8] sm:$0xff] %v15771_v8  ;;  %15792 = vrcp.f32 %v10757_v46  ;;  %v10446_v26 = vmul.f32 1.442695, %v9901_v53  ;;  %v10450_v25 = vmul.f32 1.442695, %v9903_v21  ;;  %v13004_v17 = vadd.f32 %v21130_v31, %v20957_v43 }
 0x690   :  { %v15775_v1 = vpop.eup %15774  ;;  %11309 = vst [vmem:[%s21692_s9 + $0x408] sm:$0xff] %v15773_v4  ;;  %15794 = vrcp.f32 %v10756_v49  ;;  %v12971_v4 = vadd.f32 %v21120_v23, %v20945_v9 }
 0x691   :  { %v15777_v48 = vpop.eup %15776  ;;  %11325 = vst [vmem:[%s21692_s9 + $0x488] sm:$0xff] %v15775_v1  ;;  %15796 = vpow2.f32 %v10336_v37  ;;  %v10410_v37 = vmul.f32 1.442695, %v9883_v45  ;;  %v13003_v1 = vadd.f32 %v21124_v10, %v20949_v36 }
 0x692   :  { %v15779_v56 = vpop.eup %15778  ;;  %11327 = vst [vmem:[%s21692_s9 + $0x498] sm:$0xff] %v15777_v48  ;;  %15798 = vpow2.f32 %v10368_v38  ;;  %v10412_v38 = vmul.f32 1.442695, %v9884_v28  ;;  %v12595_v63 = vpop.f32.mrb[236].mxu1  ;;  %v9919_v23 = vsub.f32 0.0, %v12971_v4  ;;  %v12972_v28 = vadd.f32 %v21126_v34, %v20953_v44 }
 0x693   :  { %v15781_v30 = vpop.eup %15780  ;;  %11326 = vst [vmem:[%s21692_s9 + $0x490] sm:$0xff] %v15779_v56  ;;  %15800 = vpow2.f32 %v10372_v12  ;;  %v12596_v33 = vpop.f32.mrb[237].mxu1  ;;  %v12973_v34 = vadd.f32 %v21140_v50, %v20945_v9 }
 0x694   :  { %v15783_v41 = vpop.eup %15782  ;;  %11328 = vst [vmem:[%s21692_s9 + $0x4a0] sm:$0xff] %v15781_v30  ;;  %15802 = vpow2.f32 %v10370_v0  ;;  %v21266_v46 = vadd.f32 %v12596_v33, %v12595_v63  ;;  %v12598_v0 = vpop.f32.mrb[238].mxu1  ;;  %v9920_v31 = vsub.f32 0.0, %v12972_v28  ;;  %v10482_v33 = vmul.f32 1.442695, %v9919_v23 }
 0x695   :  { %v15785_v6 = vpop.eup %15784  ;;  %11344 = vst [vmem:[%s21692_s9 + $0x520] sm:$0xff] %v15783_v41  ;;  %15804 = vpow2.f32 %v10374_v22  ;;  %v12599_v8 = vpop.f32.mrb[239].mxu1  ;;  %v9921_v41 = vsub.f32 0.0, %v13003_v1  ;;  %v13007_v28 = vadd.f32 %v21165_v51, %v20949_v36 }
 0x696   :  { %v15787_v12 = vpop.eup %15786  ;;  %11346 = vst [vmem:[%s21692_s9 + $0x530] sm:$0xff] %v15785_v6  ;;  %15806 = vpow2.f32 %v10406_v14  ;;  %v21274_v13 = vadd.f32 %v12599_v8, %v12598_v0 }
 0x697   :  { %v15789_v42 = vpop.eup %15788  ;;  %11345 = vst [vmem:[%s21692_s9 + $0x528] sm:$0xff] %v15787_v12  ;;  %15808 = vpow2.f32 %v10410_v37 }
 0x698   :  { %v15791_v32 = vpop.eup %15790  ;;  %11347 = vst [vmem:[%s21692_s9 + $0x538] sm:$0xff] %v15789_v42  ;;  %15810 = vpow2.f32 %v10408_v61  ;;  %v9922_v42 = vsub.f32 0.0, %v13004_v17  ;;  %v13008_v17 = vadd.f32 %v21172_v58, %v20957_v43 }
 0x699   :  { %v15793_v49 = vpop.eup %15792  ;;  %11363 = vst [vmem:[%s21692_s9 + $0x5b8] sm:$0xff] %v15791_v32  ;;  %15812 = vpow2.f32 %v10412_v38  ;;  %v10486_v32 = vmul.f32 1.442695, %v9921_v41  ;;  %v9959_v41 = vsub.f32 0.0, %v13007_v28 }
 0x69a   :  { %v15795_v7 = vpop.eup %15794  ;;  %11365 = vst [vmem:[%s21692_s9 + $0x5c8] sm:$0xff] %v15793_v49  ;;  %15814 = vpow2.f32 %v10444_v18  ;;  %v12601_v52 = vpop.f32.mrb[240].mxu1  ;;  %v9938_v49 = vsub.f32 0.0, %v12973_v34 }
 0x69b   :  { %v15797_v45 = vpop.eup %15796  ;;  %11364 = vst [vmem:[%s21692_s9 + $0x5c0] sm:$0xff] %v15795_v7  ;;  %15816 = vpow2.f32 %v10448_v57  ;;  %v12602_v20 = vpop.f32.mrb[241].mxu1 }
 0x69c   :  { %v15799_v55 = vpop.eup %15798  ;;  %v10758_v3 = vadd.f32 1.0, %v15797_v45  ;;  %15818 = vpow2.f32 %v10446_v26  ;;  %v21290_v30 = vadd.f32 %v12602_v20, %v12601_v52  ;;  %v12604_v10 = vpop.f32.mrb[242].mxu1  ;;  %v13005_v26 = vadd.f32 %v21147_v29, %v20949_v36 }
 0x69d   :  { %v15801_v22 = vpop.eup %15800  ;;  %v10774_v2 = vadd.f32 1.0, %v15799_v55  ;;  %15820 = vpow2.f32 %v10450_v25  ;;  %v12605_v61 = vpop.f32.mrb[243].mxu1  ;;  %v12974_v25 = vadd.f32 %v21149_v47, %v20953_v44  ;;  %v10484_v55 = vmul.f32 1.442695, %v9920_v31 }
 0x69e   :  { %v15803_v16 = vpop.eup %15802  ;;  %15822 = vrcp.f32 %v10758_v3  ;;  %v10776_v48 = vadd.f32 1.0, %v15801_v22  ;;  %v21294_v38 = vadd.f32 %v12605_v61, %v12604_v10  ;;  %v13006_v3 = vadd.f32 %v21156_v5, %v20957_v43  ;;  %v21329_v43 = vld [vmem:[%s21691_s8 + $0x10] sm:$0x7] }
 0x69f   :  { %v15805_v56 = vpop.eup %15804  ;;  %15824 = vrcp.f32 %v10774_v2  ;;  %v10775_v14 = vadd.f32 1.0, %v15803_v16  ;;  %v12975_v29 = vadd.f32 %v21158_v62, %v20945_v9  ;;  %v9940_v23 = vsub.f32 0.0, %v13005_v26 }
 0x6a0   :  { %v15807_v37 = vpop.eup %15806  ;;  %15826 = vrcp.f32 %v10776_v48  ;;  %v10777_v35 = vadd.f32 1.0, %v15805_v56  ;;  %v9939_v5 = vsub.f32 0.0, %v12974_v25  ;;  %v12976_v9 = vadd.f32 %v21167_v59, %v20953_v44 }
 0x6a1   :  { %v15809_v53 = vpop.eup %15808  ;;  %15828 = vrcp.f32 %v10775_v14  ;;  %v10793_v6 = vadd.f32 1.0, %v15807_v37  ;;  %v10488_v36 = vmul.f32 1.442695, %v9922_v42  ;;  %v9941_v51 = vsub.f32 0.0, %v13006_v3 }
 0x6a2   :  { %v15811_v21 = vpop.eup %15810  ;;  %15830 = vrcp.f32 %v10777_v35  ;;  %v10795_v63 = vadd.f32 1.0, %v15809_v53  ;;  %v12607_v7 = vpop.f32.mrb[244].mxu1  ;;  %v10520_v44 = vmul.f32 1.442695, %v9938_v49  ;;  %v9957_v59 = vsub.f32 0.0, %v12975_v29 }
 0x6a3   :  { %v15813_v12 = vpop.eup %15812  ;;  %15832 = vrcp.f32 %v10793_v6  ;;  %v10794_v18 = vadd.f32 1.0, %v15811_v21  ;;  %v12608_v1 = vpop.f32.mrb[245].mxu1  ;;  %v10524_v35 = vmul.f32 1.442695, %v9940_v23  ;;  %v10522_v61 = vmul.f32 1.442695, %v9939_v5 }
 0x6a4   :  { %v15815_v57 = vpop.eup %15814  ;;  %15834 = vrcp.f32 %v10795_v63  ;;  %v10796_v0 = vadd.f32 1.0, %v15813_v12  ;;  %v21304_v52 = vadd.f32 %v12608_v1, %v12607_v7  ;;  %v12610_v16 = vpop.f32.mrb[246].mxu1  ;;  %v9958_v53 = vsub.f32 0.0, %v12976_v9 }
 0x6a5   :  { %v15817_v8 = vpop.eup %15816  ;;  %15836 = vrcp.f32 %v10794_v18  ;;  %v10812_v50 = vadd.f32 1.0, %v15815_v57  ;;  %v12611_v20 = vpop.f32.mrb[247].mxu1  ;;  %v10526_v21 = vmul.f32 1.442695, %v9941_v51  ;;  %v9960_v63 = vsub.f32 0.0, %v13008_v17 }
 0x6a6   :  { %v15819_v4 = vpop.eup %15818  ;;  %15838 = vrcp.f32 %v10796_v0  ;;  %v10814_v45 = vadd.f32 1.0, %v15817_v8  ;;  %v21313_v62 = vadd.f32 %v12611_v20, %v12610_v16  ;;  %v10558_v18 = vmul.f32 1.442695, %v9957_v59 }
 0x6a7   :  { %v15821_v22 = vpop.eup %15820  ;;  %15840 = vrcp.f32 %v10812_v50  ;;  %v10813_v2 = vadd.f32 1.0, %v15819_v4  ;;  %v10560_v50 = vmul.f32 1.442695, %v9958_v53  ;;  %v10564_v7 = vmul.f32 1.442695, %v9960_v63 }
 0x6a8   :  { %v15823_v48 = vpop.eup %15822  ;;  %15842 = vrcp.f32 %v10814_v45  ;;  %v10815_v47 = vadd.f32 1.0, %v15821_v22 }
 0x6a9   :  { %v15825_v56 = vpop.eup %15824  ;;  %11366 = vst [vmem:[%s21692_s9 + $0x5d0] sm:$0xff] %v15823_v48  ;;  %15844 = vrcp.f32 %v10813_v2 }
 0x6aa   :  { %v15827_v14 = vpop.eup %15826  ;;  %11382 = vst [vmem:[%s21692_s9 + $0x650] sm:$0xff] %v15825_v56  ;;  %15846 = vrcp.f32 %v10815_v47  ;;  %v12613_v6 = vpop.f32.mrb[248].mxu1 }
 0x6ab   :  { %v15829_v10 = vpop.eup %15828  ;;  %11384 = vst [vmem:[%s21692_s9 + $0x660] sm:$0xff] %v15827_v14  ;;  %15848 = vpow2.f32 %v10482_v33  ;;  %v12614_v31 = vpop.f32.mrb[249].mxu1  ;;  %v21342_v33 = vrot.slane %v21329_v43, %v21823_v27 }
 0x6ac   :  { %v15831_v37 = vpop.eup %15830  ;;  %11383 = vst [vmem:[%s21692_s9 + $0x658] sm:$0xff] %v15829_v10  ;;  %15850 = vpow2.f32 %v10486_v32  ;;  %v12615_v42 = vadd.f32 %v12614_v31, %v12613_v6  ;;  %v12616_v57 = vpop.f32.mrb[250].mxu1  ;;  %v10562_v32 = vmul.f32 1.442695, %v9959_v41  ;;  %v21373_v10 = vrot.slane %v21329_v43, %v21822_v39 }
 0x6ad   :  { %v15833_v58 = vpop.eup %15832  ;;  %11385 = vst [vmem:[%s21692_s9 + $0x668] sm:$0xff] %v15831_v37  ;;  %15852 = vpow2.f32 %v10484_v55  ;;  %v12617_v26 = vpop.f32.mrb[251].mxu1  ;;  %v9501_v39 = vadd.f32 %v21211_v19, %v21342_v33  ;;  %v9504_v31 = vadd.f32 %v21215_v40, %v21342_v33 }
 0x6ae   :  { %v15835_v34 = vpop.eup %15834  ;;  %11401 = vst [vmem:[%s21692_s9 + $0x6e8] sm:$0xff] %v15833_v58  ;;  %15854 = vpow2.f32 %v10488_v36  ;;  %v21351_v27 = vadd.f32 %v12615_v42, %v21342_v33  ;;  %v12618_v49 = vadd.f32 %v12617_v26, %v12616_v57 }
 0x6af   :  { %v15837_v12 = vpop.eup %15836  ;;  %11403 = vst [vmem:[%s21692_s9 + $0x6f8] sm:$0xff] %v15835_v34  ;;  %15856 = vpow2.f32 %v10520_v44 }
 0x6b0   :  { %v15839_v0 = vpop.eup %15838  ;;  %11402 = vst [vmem:[%s21692_s9 + $0x6f0] sm:$0xff] %v15837_v12  ;;  %15858 = vpow2.f32 %v10524_v35  ;;  %v21360_v45 = vadd.f32 %v12618_v49, %v21342_v33  ;;  %v21380_v35 = vrot.slane %v21329_v43, %v21824_v54 }
 0x6b1   :  { %v15841_v8 = vpop.eup %15840  ;;  %11404 = vst [vmem:[%s21692_s9 + $0x700] sm:$0xff] %v15839_v0  ;;  %15860 = vpow2.f32 %v10522_v61 }
 0x6b2   :  { %v15843_v25 = vpop.eup %15842  ;;  %11420 = vst [vmem:[%s21692_s9 + $0x780] sm:$0xff] %v15841_v8  ;;  %15862 = vpow2.f32 %v10526_v21  ;;  %v12619_v1 = vpop.f32.mrb[252].mxu1 }
 0x6b3   :  { %v15845_v4 = vpop.eup %15844  ;;  %11422 = vst [vmem:[%s21692_s9 + $0x790] sm:$0xff] %v15843_v25  ;;  %15864 = vpow2.f32 %v10558_v18  ;;  %v12620_v29 = vpop.f32.mrb[253].mxu1 }
 0x6b4   :  { %v15847_v55 = vpop.eup %15846  ;;  %11421 = vst [vmem:[%s21692_s9 + $0x788] sm:$0xff] %v15845_v4  ;;  %15866 = vpow2.f32 %v10562_v32  ;;  %v12621_v47 = vadd.f32 %v12620_v29, %v12619_v1  ;;  %v12622_v23 = vpop.f32.mrb[254].mxu1 }
 0x6b5   :  { %v15849_v3 = vpop.eup %15848  ;;  %11423 = vst [vmem:[%s21692_s9 + $0x798] sm:$0xff] %v15847_v55  ;;  %15868 = vpow2.f32 %v10560_v50  ;;  %v12623_v56 = vpop.f32.mrb[255].mxu1 }
 0x6b6   :  { %v15851_v22 = vpop.eup %15850  ;;  %v10831_v2 = vadd.f32 1.0, %v15849_v3  ;;  %15870 = vpow2.f32 %v10564_v7  ;;  %v21369_v14 = vadd.f32 %v12621_v47, %v21342_v33  ;;  %v12624_v36 = vadd.f32 %v12623_v56, %v12622_v23 }
 0x6b7   :  { %v15853_v16 = vpop.eup %15852  ;;  %v10833_v48 = vadd.f32 1.0, %v15851_v22 }
 0x6b8   :  { %v15855_v28 = vpop.eup %15854  ;;  %15872 = vrcp.f32 %v10831_v2  ;;  %v10832_v20 = vadd.f32 1.0, %v15853_v16  ;;  %v21376_v37 = vadd.f32 %v12624_v36, %v21342_v33 }
 0x6b9   :  { %v15857_v5 = vpop.eup %15856  ;;  %15874 = vrcp.f32 %v10833_v48  ;;  %v10834_v9 = vadd.f32 1.0, %v15855_v28 }
 0x6ba   :  { %v15859_v51 = vpop.eup %15858  ;;  %15876 = vrcp.f32 %v10832_v20  ;;  %v10850_v17 = vadd.f32 1.0, %v15857_v5  ;;  %v12641_v34 = vpop.f32.mrb[0].mxu1 }
 0x6bb   :  { %v15861_v44 = vpop.eup %15860  ;;  %15878 = vrcp.f32 %v10834_v9  ;;  %v10852_v59 = vadd.f32 1.0, %v15859_v51  ;;  %v9387_v6 = vpop.f32.mrb[224].mxu0 }
 0x6bc   :  { %v15863_v41 = vpop.eup %15862  ;;  %15880 = vrcp.f32 %v10850_v17  ;;  %v10851_v58 = vadd.f32 1.0, %v15861_v44  ;;  %v13009_v54 = vadd.f32 %v9387_v6, %v21373_v10  ;;  %v9389_v43 = vpop.f32.mrb[225].mxu0  ;;  %v9509_v44 = vadd.f32 %v21219_v24, %v21342_v33 }
 0x6bd   :  { %v15865_v61 = vpop.eup %15864  ;;  %15882 = vrcp.f32 %v10852_v59  ;;  %v10853_v53 = vadd.f32 1.0, %v15863_v41  ;;  %v12642_v12 = vpop.f32.mrb[1].mxu1  ;;  %v13010_v57 = vadd.f32 %v9389_v43, %v21380_v35 }
 0x6be   :  { %v15867_v21 = vpop.eup %15866  ;;  %15884 = vrcp.f32 %v10851_v58  ;;  %v10869_v63 = vadd.f32 1.0, %v15865_v61  ;;  %v12643_v0 = vadd.f32 %v12642_v12, %v12641_v34  ;;  %v9391_v32 = vpop.f32.mrb[226].mxu0  ;;  %v9676_v50 = vsub.f32 0.0, %v13009_v54 }
 0x6bf   :  { %v15869_v18 = vpop.eup %15868  ;;  %15886 = vrcp.f32 %v10853_v53  ;;  %v10871_v42 = vadd.f32 1.0, %v15867_v21  ;;  %v12644_v19 = vpop.f32.mrb[2].mxu1  ;;  %v13011_v49 = vadd.f32 %v9391_v32, %v21373_v10  ;;  %v9677_v4 = vsub.f32 0.0, %v13010_v57 }
 0x6c0   :  { %v15871_v26 = vpop.eup %15870  ;;  %15888 = vrcp.f32 %v10869_v63  ;;  %v10870_v8 = vadd.f32 1.0, %v15869_v18  ;;  %v9393_v25 = vpop.f32.mrb[227].mxu0  ;;  %v9598_v55 = vadd.f32 %v12643_v0, %v9501_v39  ;;  %v9996_v1 = vmul.f32 1.442695, %v9676_v50 }
 0x6c1   :  { %v12645_v40 = vpop.f32.mrb[3].mxu1  ;;  %15890 = vrcp.f32 %v10871_v42  ;;  %v10872_v7 = vadd.f32 1.0, %v15871_v26  ;;  %v9695_v22 = vsub.f32 0.0, %v13011_v49  ;;  %v13012_v2 = vadd.f32 %v9393_v25, %v21380_v35 }
 0x6c2   :  { %v15873_v3 = vpop.eup %15872  ;;  %15892 = vrcp.f32 %v10870_v8  ;;  %v9998_v16 = vmul.f32 1.442695, %v9677_v4  ;;  %v9678_v48 = vsub.f32 0.0, %v9598_v55  ;;  %v12646_v47 = vadd.f32 %v12645_v40, %v12644_v19  ;;  %v12647_v51 = vpop.f32.mrb[4].mxu1 }
 0x6c3   :  { %v15875_v29 = vpop.eup %15874  ;;  %11439 = vst [vmem:[%s21692_s9 + $0x818] sm:$0xff] %v15873_v3  ;;  %15894 = vrcp.f32 %v10872_v7  ;;  %v10034_v28 = vmul.f32 1.442695, %v9695_v22  ;;  %v9696_v20 = vsub.f32 0.0, %v13012_v2  ;;  %v9397_v36 = vpop.f32.mrb[228].mxu0  ;;  %v9512_v26 = vadd.f32 %v21223_v11, %v21342_v33 }
 0x6c4   :  { %v15877_v23 = vpop.eup %15876  ;;  %11441 = vst [vmem:[%s21692_s9 + $0x828] sm:$0xff] %v15875_v29  ;;  %15896 = vpow2.f32 %v9996_v1  ;;  %v10000_v5 = vmul.f32 1.442695, %v9678_v48  ;;  %v9601_v9 = vadd.f32 %v12646_v47, %v9504_v31  ;;  %v13013_v41 = vadd.f32 %v9397_v36, %v21373_v10  ;;  %v9399_v58 = vpop.f32.mrb[229].mxu0 }
 0x6c5   :  { %v15879_v56 = vpop.eup %15878  ;;  %11440 = vst [vmem:[%s21692_s9 + $0x820] sm:$0xff] %v15877_v23  ;;  %15898 = vpow2.f32 %v9998_v16  ;;  %v10036_v59 = vmul.f32 1.442695, %v9696_v20  ;;  %v12648_v61 = vpop.f32.mrb[5].mxu1  ;;  %v13014_v6 = vadd.f32 %v9399_v58, %v21380_v35 }
 0x6c6   :  { %v15881_v17 = vpop.eup %15880  ;;  %11442 = vst [vmem:[%s21692_s9 + $0x830] sm:$0xff] %v15879_v56  ;;  %15900 = vpow2.f32 %v10034_v28  ;;  %v9697_v39 = vsub.f32 0.0, %v9601_v9  ;;  %v12649_v34 = vadd.f32 %v12648_v61, %v12647_v51  ;;  %v9401_v21 = vpop.f32.mrb[230].mxu0  ;;  %v9714_v24 = vsub.f32 0.0, %v13013_v41 }
 0x6c7   :  { %v15883_v53 = vpop.eup %15882  ;;  %11458 = vst [vmem:[%s21692_s9 + $0x8b0] sm:$0xff] %v15881_v17  ;;  %15902 = vpow2.f32 %v10000_v5  ;;  %v12650_v63 = vpop.f32.mrb[6].mxu1  ;;  %v13015_v54 = vadd.f32 %v9401_v21, %v21373_v10  ;;  %v9715_v57 = vsub.f32 0.0, %v13014_v6  ;;  %v9517_v5 = vadd.f32 %v21234_v60, %v21342_v33 }
 0x6c8   :  { %v15885_v31 = vpop.eup %15884  ;;  %11460 = vst [vmem:[%s21692_s9 + $0x8c0] sm:$0xff] %v15883_v53  ;;  %15904 = vpow2.f32 %v10036_v59  ;;  %v9403_v43 = vpop.f32.mrb[231].mxu0  ;;  %v10038_v42 = vmul.f32 1.442695, %v9697_v39  ;;  %v9606_v0 = vadd.f32 %v12649_v34, %v9509_v44  ;;  %v10072_v8 = vmul.f32 1.442695, %v9714_v24 }
 0x6c9   :  { %v12651_v12 = vpop.f32.mrb[7].mxu1  ;;  %v15887_v18 = vpop.eup %15886  ;;  %11459 = vst [vmem:[%s21692_s9 + $0x8b8] sm:$0xff] %v15885_v31  ;;  %v13016_v32 = vadd.f32 %v9403_v43, %v21380_v35  ;;  %v9733_v50 = vsub.f32 0.0, %v13015_v54  ;;  %v10074_v40 = vmul.f32 1.442695, %v9715_v57  ;;  %v9520_v43 = vadd.f32 %v21246_v15, %v21342_v33 }
 0x6ca   :  { %v15889_v19 = vpop.eup %15888  ;;  %11461 = vst [vmem:[%s21692_s9 + $0x8c8] sm:$0xff] %v15887_v18  ;;  %v12652_v49 = vadd.f32 %v12651_v12, %v12650_v63  ;;  %15906 = vpow2.f32 %v10038_v42  ;;  %v9716_v7 = vsub.f32 0.0, %v9606_v0  ;;  %v12653_v16 = vpop.f32.mrb[8].mxu1  ;;  %v9525_v57 = vadd.f32 %v21266_v46, %v21342_v33 }
 0x6cb   :  { %v15891_v25 = vpop.eup %15890  ;;  %11477 = vst [vmem:[%s21692_s9 + $0x948] sm:$0xff] %v15889_v19  ;;  %v9734_v4 = vsub.f32 0.0, %v13016_v32  ;;  %15908 = vpow2.f32 %v10072_v8  ;;  %v10110_v3 = vmul.f32 1.442695, %v9733_v50  ;;  %v9407_v29 = vpop.f32.mrb[232].mxu0  ;;  %v9528_v50 = vadd.f32 %v21274_v13, %v21342_v33 }
 0x6cc   :  { %v15893_v55 = vpop.eup %15892  ;;  %11479 = vst [vmem:[%s21692_s9 + $0x958] sm:$0xff] %v15891_v25  ;;  %v9609_v11 = vadd.f32 %v12652_v49, %v9512_v26  ;;  %15910 = vpow2.f32 %v10074_v40  ;;  %v10076_v22 = vmul.f32 1.442695, %v9716_v7  ;;  %v13017_v23 = vadd.f32 %v9407_v29, %v21373_v10  ;;  %v9409_v28 = vpop.f32.mrb[233].mxu0 }
 0x6cd   :  { %v15895_v1 = vpop.eup %15894  ;;  %11478 = vst [vmem:[%s21692_s9 + $0x950] sm:$0xff] %v15893_v55  ;;  %v10112_v2 = vmul.f32 1.442695, %v9734_v4  ;;  %15912 = vpow2.f32 %v10110_v3  ;;  %v12654_v20 = vpop.f32.mrb[9].mxu1  ;;  %v13018_v58 = vadd.f32 %v9409_v28, %v21380_v35 }
 0x6ce   :  { %v15897_v48 = vpop.eup %15896  ;;  %11480 = vst [vmem:[%s21692_s9 + $0x960] sm:$0xff] %v15895_v1  ;;  %v9735_v47 = vsub.f32 0.0, %v9609_v11  ;;  %15914 = vpow2.f32 %v10076_v22  ;;  %v12655_v36 = vadd.f32 %v12654_v20, %v12653_v16  ;;  %v9411_v51 = vpop.f32.mrb[234].mxu0  ;;  %v9752_v41 = vsub.f32 0.0, %v13017_v23 }
 0x6cf   :  { %v15899_v56 = vpop.eup %15898  ;;  %v10588_v9 = vadd.f32 1.0, %v15897_v48  ;;  %v12656_v17 = vpop.f32.mrb[10].mxu1  ;;  %15916 = vpow2.f32 %v10112_v2  ;;  %v13019_v31 = vadd.f32 %v9411_v51, %v21373_v10  ;;  %v9753_v12 = vsub.f32 0.0, %v13018_v58 }
 0x6d0   :  { %v15901_v44 = vpop.eup %15900  ;;  %v10589_v59 = vadd.f32 1.0, %v15899_v56  ;;  %v9413_v61 = vpop.f32.mrb[235].mxu0  ;;  %v9614_v34 = vadd.f32 %v12655_v36, %v9517_v5  ;;  %v10114_v63 = vmul.f32 1.442695, %v9735_v47  ;;  %v10148_v54 = vmul.f32 1.442695, %v9752_v41 }
 0x6d1   :  { %v12657_v53 = vpop.f32.mrb[11].mxu1  ;;  %v15903_v39 = vpop.eup %15902  ;;  %15918 = vrcp.f32 %v10588_v9  ;;  %v10607_v6 = vadd.f32 1.0, %v15901_v44  ;;  %v13020_v32 = vadd.f32 %v9413_v61, %v21380_v35  ;;  %v9771_v15 = vsub.f32 0.0, %v13019_v31 }
 0x6d2   :  { %v15905_v21 = vpop.eup %15904  ;;  %15920 = vrcp.f32 %v10589_v59  ;;  %v10590_v60 = vadd.f32 1.0, %v15903_v39  ;;  %v12658_v18 = vadd.f32 %v12657_v53, %v12656_v17  ;;  %v9754_v0 = vsub.f32 0.0, %v9614_v34  ;;  %v12659_v26 = vpop.f32.mrb[12].mxu1 }
 0x6d3   :  { %15922 = vrcp.f32 %v10607_v6  ;;  %v10608_v24 = vadd.f32 1.0, %v15905_v21  ;;  %v9417_v19 = vpop.f32.mrb[236].mxu0  ;;  %v12660_v40 = vpop.f32.mrb[13].mxu1  ;;  %v10150_v2 = vmul.f32 1.442695, %v9753_v12  ;;  %v9772_v28 = vsub.f32 0.0, %v13020_v32 }
 0x6d4   :  { %15924 = vrcp.f32 %v10590_v60  ;;  %v15907_v42 = vpop.eup %15906  ;;  %v9419_v25 = vpop.f32.mrb[237].mxu0  ;;  %v9617_v55 = vadd.f32 %v12658_v18, %v9520_v43  ;;  %v13021_v46 = vadd.f32 %v9417_v19, %v21373_v10  ;;  %v10152_v23 = vmul.f32 1.442695, %v9754_v0 }
 0x6d5   :  { %15926 = vrcp.f32 %v10608_v24  ;;  %v15909_v8 = vpop.eup %15908  ;;  %v10609_v49 = vadd.f32 1.0, %v15907_v42  ;;  %v9421_v3 = vpop.f32.mrb[238].mxu0  ;;  %v13022_v29 = vadd.f32 %v9419_v25, %v21380_v35  ;;  %v12661_v9 = vadd.f32 %v12660_v40, %v12659_v26 }
 0x6d6   :  { %15928 = vpow2.f32 %v10114_v63  ;;  %v15911_v7 = vpop.eup %15910  ;;  %v10626_v4 = vadd.f32 1.0, %v15909_v8  ;;  %v12662_v11 = vpop.f32.mrb[14].mxu1  ;;  %v9773_v5 = vsub.f32 0.0, %v9617_v55  ;;  %v10186_v17 = vmul.f32 1.442695, %v9771_v15 }
 0x6d7   :  { %15930 = vpow2.f32 %v10148_v54  ;;  %v15913_v1 = vpop.eup %15912  ;;  %v10627_v22 = vadd.f32 1.0, %v15911_v7  ;;  %v9423_v13 = vpop.f32.mrb[239].mxu0  ;;  %v9790_v44 = vsub.f32 0.0, %v13021_v46  ;;  %v9791_v41 = vsub.f32 0.0, %v13022_v29 }
 0x6d8   :  { %15932 = vrcp.f32 %v10609_v49  ;;  %v12663_v16 = vpop.f32.mrb[15].mxu1  ;;  %v15915_v48 = vpop.eup %15914  ;;  %v10645_v47 = vadd.f32 1.0, %v15913_v1  ;;  %v9622_v58 = vadd.f32 %v12661_v9, %v9525_v57  ;;  %v13023_v61 = vadd.f32 %v9421_v3, %v21373_v10 }
 0x6d9   :  { %15934 = vrcp.f32 %v10626_v4  ;;  %v15917_v20 = vpop.eup %15916  ;;  %v10628_v56 = vadd.f32 1.0, %v15915_v48  ;;  %v10188_v39 = vmul.f32 1.442695, %v9772_v28  ;;  %v13024_v6 = vadd.f32 %v9423_v13, %v21380_v35 }
 0x6da   :  { %15936 = vrcp.f32 %v10627_v22  ;;  %v10646_v51 = vadd.f32 1.0, %v15917_v20  ;;  %v12664_v34 = vadd.f32 %v12663_v16, %v12662_v11  ;;  %v12665_v60 = vpop.f32.mrb[16].mxu1  ;;  %v10190_v31 = vmul.f32 1.442695, %v9773_v5 }
 0x6db   :  { %v15919_v36 = vpop.eup %15918  ;;  %15938 = vrcp.f32 %v10645_v47  ;;  %v9427_v21 = vpop.f32.mrb[240].mxu0  ;;  %v9792_v12 = vsub.f32 0.0, %v9622_v58  ;;  %v10224_v32 = vmul.f32 1.442695, %v9790_v44  ;;  %v10226_v19 = vmul.f32 1.442695, %v9791_v41 }
 0x6dc   :  { %v15921_v59 = vpop.eup %15920  ;;  %11196 = vst [vmem:[%s21692_s9 + $0x80] sm:$0xff] %v15919_v36  ;;  %15940 = vrcp.f32 %v10628_v56  ;;  %v9429_v24 = vpop.f32.mrb[241].mxu0  ;;  %v9625_v18 = vadd.f32 %v12664_v34, %v9528_v50  ;;  %v9809_v26 = vsub.f32 0.0, %v13023_v61  ;;  %v9810_v25 = vsub.f32 0.0, %v13024_v6 }
 0x6dd   :  { %v15923_v53 = vpop.eup %15922  ;;  %11197 = vst [vmem:[%s21692_s9 + $0x88] sm:$0xff] %v15921_v59  ;;  %15942 = vrcp.f32 %v10646_v51  ;;  %v12666_v54 = vpop.f32.mrb[17].mxu1  ;;  %v13025_v40 = vadd.f32 %v9427_v21, %v21373_v10  ;;  %v13026_v46 = vadd.f32 %v9429_v24, %v21380_v35  ;;  %v9533_v11 = vadd.f32 %v21290_v30, %v21342_v33 }
 0x6de   :  { %v15925_v63 = vpop.eup %15924  ;;  %11215 = vst [vmem:[%s21692_s9 + $0x118] sm:$0xff] %v15923_v53  ;;  %15944 = vpow2.f32 %v10150_v2  ;;  %v9431_v42 = vpop.f32.mrb[242].mxu0  ;;  %v9811_v55 = vsub.f32 0.0, %v9625_v18  ;;  %v10228_v1 = vmul.f32 1.442695, %v9792_v12  ;;  %v12667_v22 = vadd.f32 %v12666_v54, %v12665_v60 }
 0x6df   :  { %v15927_v43 = vpop.eup %15926  ;;  %11198 = vst [vmem:[%s21692_s9 + $0x90] sm:$0xff] %v15925_v63  ;;  %15946 = vpow2.f32 %v10152_v23  ;;  %v12668_v57 = vpop.f32.mrb[18].mxu1  ;;  %v9536_v29 = vadd.f32 %v21294_v38, %v21342_v33  ;;  %v10262_v13 = vmul.f32 1.442695, %v9809_v26  ;;  %v10264_v30 = vmul.f32 1.442695, %v9810_v25 }
 0x6e0   :  { %v15929_v0 = vpop.eup %15928  ;;  %11216 = vst [vmem:[%s21692_s9 + $0x120] sm:$0xff] %v15927_v43  ;;  %15948 = vpow2.f32 %v10186_v17  ;;  %v9433_v8 = vpop.f32.mrb[243].mxu0  ;;  %v9828_v47 = vsub.f32 0.0, %v13025_v40  ;;  %v21480_v23 = vadd.f32 %v12667_v22, %v9533_v11  ;;  %v10266_v56 = vmul.f32 1.442695, %v9811_v55 }
 0x6e1   :  { %v15931_v49 = vpop.eup %15930  ;;  %v10647_v15 = vadd.f32 1.0, %v15929_v0  ;;  %15950 = vpow2.f32 %v10188_v39  ;;  %v12669_v7 = vpop.f32.mrb[19].mxu1  ;;  %v9829_v5 = vsub.f32 0.0, %v13026_v46  ;;  %v13027_v44 = vadd.f32 %v9431_v42, %v21373_v10 }
 0x6e2   :  { %v15933_v50 = vpop.eup %15932  ;;  %v10664_v4 = vadd.f32 1.0, %v15931_v49  ;;  %15952 = vpow2.f32 %v10190_v31  ;;  %v12670_v16 = vadd.f32 %v12669_v7, %v12668_v57  ;;  %v12671_v20 = vpop.f32.mrb[20].mxu1  ;;  %v13028_v61 = vadd.f32 %v9433_v8, %v21380_v35 }
 0x6e3   :  { %v15935_v3 = vpop.eup %15934  ;;  %11217 = vst [vmem:[%s21692_s9 + $0x128] sm:$0xff] %v15933_v50  ;;  %15954 = vrcp.f32 %v10647_v15  ;;  %v9437_v28 = vpop.f32.mrb[244].mxu0  ;;  %v9541_v34 = vadd.f32 %v21304_v52, %v21342_v33  ;;  %v9544_v21 = vadd.f32 %v21313_v62, %v21342_v33  ;;  %v10300_v24 = vmul.f32 1.442695, %v9828_v47 }
 0x6e4   :  { %v15937_v2 = vpop.eup %15936  ;;  %11234 = vst [vmem:[%s21692_s9 + $0x1b0] sm:$0xff] %v15935_v3  ;;  %15956 = vrcp.f32 %v10664_v4  ;;  %v21485_v9 = vadd.f32 %v12670_v16, %v9536_v29  ;;  %v9439_v36 = vpop.f32.mrb[245].mxu0  ;;  %v10302_v54 = vmul.f32 1.442695, %v9829_v5  ;;  %v9847_v18 = vsub.f32 0.0, %v13027_v44 }
 0x6e5   :  { %v15939_v48 = vpop.eup %15938  ;;  %11235 = vst [vmem:[%s21692_s9 + $0x1b8] sm:$0xff] %v15937_v2  ;;  %15958 = vpow2.f32 %v10224_v32  ;;  %v12672_v51 = vpop.f32.mrb[21].mxu1  ;;  %v9848_v32 = vsub.f32 0.0, %v13028_v61  ;;  %v21502_v52 = vadd.f32 %v9437_v28, %v21373_v10  ;;  %v9830_v25 = vsub.f32 0.0, %v21480_v23 }
 0x6e6   :  { %v15941_v38 = vpop.eup %15940  ;;  %11253 = vst [vmem:[%s21692_s9 + $0x248] sm:$0xff] %v15939_v48  ;;  %15960 = vpow2.f32 %v10226_v19  ;;  %v9441_v59 = vpop.f32.mrb[246].mxu0  ;;  %v12673_v42 = vadd.f32 %v12672_v51, %v12671_v20  ;;  %v21511_v40 = vadd.f32 %v9439_v36, %v21380_v35  ;;  %v10338_v46 = vmul.f32 1.442695, %v9847_v18 }
 0x6e7   :  { %v15943_v17 = vpop.eup %15942  ;;  %11236 = vst [vmem:[%s21692_s9 + $0x1c0] sm:$0xff] %v15941_v38  ;;  %15962 = vpow2.f32 %v10228_v1  ;;  %v12674_v41 = vpop.f32.mrb[22].mxu1  ;;  %v13031_v16 = vadd.f32 %v9441_v59, %v21373_v10  ;;  %v9849_v23 = vsub.f32 0.0, %v21485_v9  ;;  %v9866_v28 = vsub.f32 0.0, %v21502_v52 }
 0x6e8   :  { %v15945_v58 = vpop.eup %15944  ;;  %11254 = vst [vmem:[%s21692_s9 + $0x250] sm:$0xff] %v15943_v17  ;;  %15964 = vpow2.f32 %v10262_v13  ;;  %v21495_v53 = vpop.f32.mrb[247].mxu0  ;;  %v21504_v19 = vadd.f32 %v12673_v42, %v9541_v34  ;;  %v10340_v13 = vmul.f32 1.442695, %v9848_v32  ;;  %v10304_v5 = vmul.f32 1.442695, %v9830_v25 }
 0x6e9   :  { %v12675_v39 = vpop.f32.mrb[23].mxu1  ;;  %v15947_v6 = vpop.eup %15946  ;;  %v10665_v60 = vadd.f32 1.0, %v15945_v58  ;;  %15966 = vpow2.f32 %v10264_v30  ;;  %v9867_v36 = vsub.f32 0.0, %v21511_v40  ;;  %v21530_v44 = vadd.f32 %v21495_v53, %v21380_v35 }
 0x6ea   :  { %v15949_v63 = vpop.eup %15948  ;;  %v10666_v31 = vadd.f32 1.0, %v15947_v6  ;;  %15968 = vpow2.f32 %v10266_v56  ;;  %v12676_v26 = vadd.f32 %v12675_v39, %v12674_v41  ;;  %v12677_v49 = vpop.f32.mrb[24].mxu1  ;;  %v9868_v58 = vsub.f32 0.0, %v21504_v19 }
 0x6eb   :  { %v15951_v43 = vpop.eup %15950  ;;  %15970 = vrcp.f32 %v10665_v60  ;;  %v10683_v12 = vadd.f32 1.0, %v15949_v63  ;;  %v9447_v8 = vpop.f32.mrb[248].mxu0  ;;  %v9885_v61 = vsub.f32 0.0, %v13031_v16  ;;  %v10342_v18 = vmul.f32 1.442695, %v9849_v23 }
 0x6ec   :  { %v15953_v57 = vpop.eup %15952  ;;  %15972 = vrcp.f32 %v10666_v31  ;;  %v10684_v0 = vadd.f32 1.0, %v15951_v43  ;;  %v21514_v7 = vadd.f32 %v9447_v8, %v21373_v10  ;;  %v9449_v50 = vpop.f32.mrb[249].mxu0  ;;  %v21519_v3 = vadd.f32 %v12676_v26, %v9544_v21 }
 0x6ed   :  { %v15955_v62 = vpop.eup %15954  ;;  %15974 = vrcp.f32 %v10683_v12  ;;  %v10685_v33 = vadd.f32 1.0, %v15953_v57  ;;  %v12678_v4 = vpop.f32.mrb[25].mxu1  ;;  %v21522_v11 = vadd.f32 %v9449_v50, %v21380_v35  ;;  %v10376_v52 = vmul.f32 1.442695, %v9866_v28 }
 0x6ee   :  { %v15957_v15 = vpop.eup %15956  ;;  %11255 = vst [vmem:[%s21692_s9 + $0x258] sm:$0xff] %v15955_v62  ;;  %15976 = vrcp.f32 %v10684_v0  ;;  %v9451_v1 = vpop.f32.mrb[250].mxu0  ;;  %v12679_v59 = vadd.f32 %v12678_v4, %v12677_v49  ;;  %v10378_v8 = vmul.f32 1.442695, %v9867_v36  ;;  %v10414_v25 = vmul.f32 1.442695, %v9885_v61 }
 0x6ef   :  { %v15959_v55 = vpop.eup %15958  ;;  %11272 = vst [vmem:[%s21692_s9 + $0x2e0] sm:$0xff] %v15957_v15  ;;  %15978 = vrcp.f32 %v10685_v33  ;;  %v12680_v22 = vpop.f32.mrb[26].mxu1  ;;  %v21537_v21 = vadd.f32 %v9451_v1, %v21373_v10  ;;  %v10380_v15 = vmul.f32 1.442695, %v9868_v58  ;;  %v9887_v4 = vsub.f32 0.0, %v21519_v3 }
 0x6f0   :  { %v15961_v2 = vpop.eup %15960  ;;  %v10702_v29 = vadd.f32 1.0, %v15959_v55  ;;  %15980 = vpow2.f32 %v10300_v24  ;;  %v9453_v48 = vpop.f32.mrb[251].mxu0  ;;  %v21534_v34 = vadd.f32 %v12679_v59, %v21351_v27 }
 0x6f1   :  { %v15963_v30 = vpop.eup %15962  ;;  %v10703_v47 = vadd.f32 1.0, %v15961_v2  ;;  %15982 = vpow2.f32 %v10302_v54  ;;  %v12681_v20 = vpop.f32.mrb[27].mxu1  ;;  %v21543_v31 = vadd.f32 %v9453_v48, %v21380_v35 }
 0x6f2   :  { %v15965_v38 = vpop.eup %15964  ;;  %15984 = vrcp.f32 %v10702_v29  ;;  %v10704_v56 = vadd.f32 1.0, %v15963_v30  ;;  %v12683_v63 = vpop.f32.mrb[28].mxu1  ;;  %v12682_v24 = vadd.f32 %v12681_v20, %v12680_v22  ;;  %v10418_v30 = vmul.f32 1.442695, %v9887_v4 }
 0x6f3   :  { %v15967_v51 = vpop.eup %15966  ;;  %15986 = vrcp.f32 %v10703_v47  ;;  %v10721_v17 = vadd.f32 1.0, %v15965_v38  ;;  %v9457_v60 = vpop.f32.mrb[252].mxu0 }
 0x6f4   :  { %v15969_v41 = vpop.eup %15968  ;;  %15988 = vrcp.f32 %v10704_v56  ;;  %v10722_v9 = vadd.f32 1.0, %v15967_v51  ;;  %v21546_v54 = vadd.f32 %v9457_v60, %v21373_v10  ;;  %v9459_v27 = vpop.f32.mrb[253].mxu0  ;;  %v21558_v62 = vadd.f32 %v12682_v24, %v21360_v45 }
 0x6f5   :  { %v15971_v39 = vpop.eup %15970  ;;  %15990 = vrcp.f32 %v10721_v17  ;;  %v10723_v6 = vadd.f32 1.0, %v15969_v41  ;;  %v12684_v43 = vpop.f32.mrb[29].mxu1  ;;  %v21552_v42 = vadd.f32 %v9459_v27, %v21380_v35  ;;  %v9886_v45 = vsub.f32 0.0, %v21530_v44 }
 0x6f6   :  { %v15973_v53 = vpop.eup %15972  ;;  %11273 = vst [vmem:[%s21692_s9 + $0x2e8] sm:$0xff] %v15971_v39  ;;  %15992 = vrcp.f32 %v10722_v9  ;;  %v9461_v57 = vpop.f32.mrb[254].mxu0  ;;  %v12685_v55 = vadd.f32 %v12684_v43, %v12683_v63  ;;  %v9906_v56 = vsub.f32 0.0, %v21534_v34  ;;  %v9923_v60 = vsub.f32 0.0, %v21537_v21 }
 0x6f7   :  { %v15975_v12 = vpop.eup %15974  ;;  %11274 = vst [vmem:[%s21692_s9 + $0x2f0] sm:$0xff] %v15973_v53  ;;  %15994 = vrcp.f32 %v10723_v6  ;;  %v12686_v0 = vpop.f32.mrb[30].mxu1  ;;  %v21570_v2 = vadd.f32 %v9461_v57, %v21373_v10  ;;  %v10416_v10 = vmul.f32 1.442695, %v9886_v45  ;;  %v9924_v24 = vsub.f32 0.0, %v21543_v31 }
 0x6f8   :  { %v15977_v32 = vpop.eup %15976  ;;  %11291 = vst [vmem:[%s21692_s9 + $0x378] sm:$0xff] %v15975_v12  ;;  %15996 = vpow2.f32 %v10304_v5  ;;  %v9463_v33 = vpop.f32.mrb[255].mxu0  ;;  %v10456_v61 = vmul.f32 1.442695, %v9906_v56  ;;  %v9925_v12 = vsub.f32 0.0, %v21558_v62  ;;  %v9943_v21 = vsub.f32 0.0, %v21552_v42 }
 0x6f9   :  { %v12687_v19 = vpop.f32.mrb[31].mxu1  ;;  %v15979_v26 = vpop.eup %15978  ;;  %11292 = vst [vmem:[%s21692_s9 + $0x380] sm:$0xff] %v15977_v32  ;;  %15998 = vpow2.f32 %v10338_v46  ;;  %v9904_v46 = vsub.f32 0.0, %v21514_v7  ;;  %v21579_v3 = vadd.f32 %v9463_v33, %v21380_v35  ;;  %v10490_v33 = vmul.f32 1.442695, %v9923_v60 }
 0x6fa   :  { %v15981_v49 = vpop.eup %15980  ;;  %11293 = vst [vmem:[%s21692_s9 + $0x388] sm:$0xff] %v15979_v26  ;;  %16000 = vpow2.f32 %v10340_v13  ;;  %v21576_v13 = vadd.f32 %v12685_v55, %v21369_v14  ;;  %v12688_v16 = vadd.f32 %v12687_v19, %v12686_v0  ;;  %v9942_v0 = vsub.f32 0.0, %v21546_v54 }
 0x6fb   :  { %v15983_v40 = vpop.eup %15982  ;;  %v10740_v50 = vadd.f32 1.0, %v15981_v49  ;;  %16002 = vpow2.f32 %v10342_v18  ;;  %v10452_v47 = vmul.f32 1.442695, %v9904_v46  ;;  %v10492_v31 = vmul.f32 1.442695, %v9924_v24 }
 0x6fc   :  { %v15985_v1 = vpop.eup %15984  ;;  %v10741_v22 = vadd.f32 1.0, %v15983_v40  ;;  %16004 = vpow2.f32 %v10376_v52  ;;  %v21588_v14 = vadd.f32 %v12688_v16, %v21376_v37  ;;  %v9905_v37 = vsub.f32 0.0, %v21522_v11 }
 0x6fd   :  { %v15987_v29 = vpop.eup %15986  ;;  %11310 = vst [vmem:[%s21692_s9 + $0x410] sm:$0xff] %v15985_v1  ;;  %16006 = vrcp.f32 %v10740_v50  ;;  %v10494_v62 = vmul.f32 1.442695, %v9925_v12  ;;  %v10528_v54 = vmul.f32 1.442695, %v9942_v0  ;;  %v9944_v42 = vsub.f32 0.0, %v21576_v13 }
 0x6fe   :  { %v15989_v48 = vpop.eup %15988  ;;  %11311 = vst [vmem:[%s21692_s9 + $0x418] sm:$0xff] %v15987_v29  ;;  %16008 = vrcp.f32 %v10741_v22  ;;  %v10454_v41 = vmul.f32 1.442695, %v9905_v37  ;;  %v9961_v45 = vsub.f32 0.0, %v21570_v2  ;;  %v9962_v50 = vsub.f32 0.0, %v21579_v3 }
 0x6ff   :  { %v15991_v7 = vpop.eup %15990  ;;  %11312 = vst [vmem:[%s21692_s9 + $0x420] sm:$0xff] %v15989_v48  ;;  %16010 = vpow2.f32 %v10378_v8  ;;  %v9963_v55 = vsub.f32 0.0, %v21588_v14  ;;  %v10532_v46 = vmul.f32 1.442695, %v9944_v42 }
 0x700   :  { %v15993_v35 = vpop.eup %15992  ;;  %11329 = vst [vmem:[%s21692_s9 + $0x4a8] sm:$0xff] %v15991_v7  ;;  %16012 = vpow2.f32 %v10380_v15  ;;  %v10566_v13 = vmul.f32 1.442695, %v9961_v45  ;;  %v10568_v3 = vmul.f32 1.442695, %v9962_v50 }
 0x701   :  { %v15995_v23 = vpop.eup %15994  ;;  %11330 = vst [vmem:[%s21692_s9 + $0x4b0] sm:$0xff] %v15993_v35  ;;  %16014 = vpow2.f32 %v10414_v25  ;;  %v10530_v25 = vmul.f32 1.442695, %v9943_v21 }
 0x702   :  { %v15997_v28 = vpop.eup %15996  ;;  %11331 = vst [vmem:[%s21692_s9 + $0x4b8] sm:$0xff] %v15995_v23  ;;  %16016 = vpow2.f32 %v10416_v10  ;;  %v10570_v10 = vmul.f32 1.442695, %v9963_v55 }
 0x703   :  { %v15999_v20 = vpop.eup %15998  ;;  %v10742_v38 = vadd.f32 1.0, %v15997_v28  ;;  %16018 = vpow2.f32 %v10418_v30 }
 0x704   :  { %v16001_v5 = vpop.eup %16000  ;;  %v10759_v36 = vadd.f32 1.0, %v15999_v20  ;;  %16020 = vpow2.f32 %v10452_v47 }
 0x705   :  { %v16003_v51 = vpop.eup %16002  ;;  %16022 = vrcp.f32 %v10742_v38  ;;  %v10760_v17 = vadd.f32 1.0, %v16001_v5 }
 0x706   :  { %v16005_v44 = vpop.eup %16004  ;;  %16024 = vrcp.f32 %v10759_v36  ;;  %v10761_v59 = vadd.f32 1.0, %v16003_v51 }
 0x707   :  { %v16007_v9 = vpop.eup %16006  ;;  %16026 = vrcp.f32 %v10760_v17  ;;  %v10778_v58 = vadd.f32 1.0, %v16005_v44 }
 0x708   :  { %v16009_v11 = vpop.eup %16008  ;;  %11348 = vst [vmem:[%s21692_s9 + $0x540] sm:$0xff] %v16007_v9  ;;  %16028 = vrcp.f32 %v10761_v59 }
 0x709   :  { %v16011_v39 = vpop.eup %16010  ;;  %11349 = vst [vmem:[%s21692_s9 + $0x548] sm:$0xff] %v16009_v11  ;;  %16030 = vrcp.f32 %v10778_v58 }
 0x70a   :  { %v16013_v6 = vpop.eup %16012  ;;  %v10779_v34 = vadd.f32 1.0, %v16011_v39  ;;  %16032 = vpow2.f32 %v10454_v41 }
 0x70b   :  { %v16015_v63 = vpop.eup %16014  ;;  %v10780_v53 = vadd.f32 1.0, %v16013_v6  ;;  %16034 = vpow2.f32 %v10456_v61 }
 0x70c   :  { %v16017_v27 = vpop.eup %16016  ;;  %16036 = vrcp.f32 %v10779_v34  ;;  %v10797_v43 = vadd.f32 1.0, %v16015_v63 }
 0x70d   :  { %v16019_v18 = vpop.eup %16018  ;;  %16038 = vrcp.f32 %v10780_v53  ;;  %v10798_v57 = vadd.f32 1.0, %v16017_v27 }
 0x70e   :  { %v16021_v32 = vpop.eup %16020  ;;  %16040 = vrcp.f32 %v10797_v43  ;;  %v10799_v52 = vadd.f32 1.0, %v16019_v18 }
 0x70f   :  { %v16023_v19 = vpop.eup %16022  ;;  %16042 = vrcp.f32 %v10798_v57  ;;  %v10816_v26 = vadd.f32 1.0, %v16021_v32 }
 0x710   :  { %v16025_v8 = vpop.eup %16024  ;;  %11350 = vst [vmem:[%s21692_s9 + $0x550] sm:$0xff] %v16023_v19  ;;  %16044 = vrcp.f32 %v10799_v52 }
 0x711   :  { %v16027_v49 = vpop.eup %16026  ;;  %11367 = vst [vmem:[%s21692_s9 + $0x5d8] sm:$0xff] %v16025_v8  ;;  %16046 = vrcp.f32 %v10816_v26 }
 0x712   :  { %v16029_v15 = vpop.eup %16028  ;;  %11368 = vst [vmem:[%s21692_s9 + $0x5e0] sm:$0xff] %v16027_v49  ;;  %16048 = vpow2.f32 %v10490_v33 }
 0x713   :  { %v16031_v40 = vpop.eup %16030  ;;  %11369 = vst [vmem:[%s21692_s9 + $0x5e8] sm:$0xff] %v16029_v15  ;;  %16050 = vpow2.f32 %v10492_v31 }
 0x714   :  { %v16033_v4 = vpop.eup %16032  ;;  %11386 = vst [vmem:[%s21692_s9 + $0x670] sm:$0xff] %v16031_v40  ;;  %16052 = vpow2.f32 %v10494_v62 }
 0x715   :  { %v16035_v1 = vpop.eup %16034  ;;  %v10817_v22 = vadd.f32 1.0, %v16033_v4  ;;  %16054 = vpow2.f32 %v10528_v54 }
 0x716   :  { %v16037_v2 = vpop.eup %16036  ;;  %v10818_v29 = vadd.f32 1.0, %v16035_v1  ;;  %16056 = vpow2.f32 %v10530_v25 }
 0x717   :  { %v16039_v16 = vpop.eup %16038  ;;  %11387 = vst [vmem:[%s21692_s9 + $0x678] sm:$0xff] %v16037_v2  ;;  %16058 = vrcp.f32 %v10817_v22 }
 0x718   :  { %v16041_v48 = vpop.eup %16040  ;;  %11388 = vst [vmem:[%s21692_s9 + $0x680] sm:$0xff] %v16039_v16  ;;  %16060 = vrcp.f32 %v10818_v29 }
 0x719   :  { %v16043_v7 = vpop.eup %16042  ;;  %11405 = vst [vmem:[%s21692_s9 + $0x708] sm:$0xff] %v16041_v48  ;;  %16062 = vpow2.f32 %v10532_v46 }
 0x71a   :  { %v16045_v30 = vpop.eup %16044  ;;  %11406 = vst [vmem:[%s21692_s9 + $0x710] sm:$0xff] %v16043_v7  ;;  %16064 = vpow2.f32 %v10566_v13 }
 0x71b   :  { %v16047_v14 = vpop.eup %16046  ;;  %11407 = vst [vmem:[%s21692_s9 + $0x718] sm:$0xff] %v16045_v30  ;;  %16066 = vpow2.f32 %v10568_v3 }
 0x71c   :  { %v16049_v35 = vpop.eup %16048  ;;  %11424 = vst [vmem:[%s21692_s9 + $0x7a0] sm:$0xff] %v16047_v14  ;;  %16068 = vpow2.f32 %v10570_v10 }
 0x71d   :  { %v16051_v47 = vpop.eup %16050  ;;  %v10835_v23 = vadd.f32 1.0, %v16049_v35 }
 0x71e   :  { %v16053_v28 = vpop.eup %16052  ;;  %v10836_v37 = vadd.f32 1.0, %v16051_v47 }
 0x71f   :  { %v16055_v20 = vpop.eup %16054  ;;  %16070 = vrcp.f32 %v10835_v23  ;;  %v10837_v38 = vadd.f32 1.0, %v16053_v28 }
 0x720   :  { %v16057_v56 = vpop.eup %16056  ;;  %16072 = vrcp.f32 %v10836_v37  ;;  %v10854_v5 = vadd.f32 1.0, %v16055_v20 }
 0x721   :  { %v16059_v36 = vpop.eup %16058  ;;  %16074 = vrcp.f32 %v10837_v38  ;;  %v10855_v51 = vadd.f32 1.0, %v16057_v56 }
 0x722   :  { %v16061_v17 = vpop.eup %16060  ;;  %11425 = vst [vmem:[%s21692_s9 + $0x7a8] sm:$0xff] %v16059_v36  ;;  %16076 = vrcp.f32 %v10854_v5 }
 0x723   :  { %v16063_v44 = vpop.eup %16062  ;;  %11426 = vst [vmem:[%s21692_s9 + $0x7b0] sm:$0xff] %v16061_v17  ;;  %16078 = vrcp.f32 %v10855_v51 }
 0x724   :  { %v16065_v59 = vpop.eup %16064  ;;  %v10856_v41 = vadd.f32 1.0, %v16063_v44 }
 0x725   :  { %v16067_v9 = vpop.eup %16066  ;;  %v10873_v58 = vadd.f32 1.0, %v16065_v59 }
 0x726   :  { %v16069_v61 = vpop.eup %16068  ;;  %16080 = vrcp.f32 %v10856_v41  ;;  %v10874_v11 = vadd.f32 1.0, %v16067_v9 }
 0x727   :  { %16082 = vrcp.f32 %v10873_v58  ;;  %v10875_v39 = vadd.f32 1.0, %v16069_v61 }
 0x728   :  { %16084 = vrcp.f32 %v10874_v11 }
 0x729   :  { %v16071_v6 = vpop.eup %16070  ;;  %16086 = vrcp.f32 %v10875_v39 }
 0x72a   :  { %v16073_v34 = vpop.eup %16072  ;;  %11443 = vst [vmem:[%s21692_s9 + $0x838] sm:$0xff] %v16071_v6 }
 0x72b   :  { %v16075_v60 = vpop.eup %16074  ;;  %11444 = vst [vmem:[%s21692_s9 + $0x840] sm:$0xff] %v16073_v34 }
 0x72c   :  { %v16077_v63 = vpop.eup %16076  ;;  %11445 = vst [vmem:[%s21692_s9 + $0x848] sm:$0xff] %v16075_v60 }
 0x72d   :  { %v16079_v53 = vpop.eup %16078  ;;  %11462 = vst [vmem:[%s21692_s9 + $0x8d0] sm:$0xff] %v16077_v63 }
 0x72e   :  { %11463 = vst [vmem:[%s21692_s9 + $0x8d8] sm:$0xff] %v16079_v53 }
 0x730   :  { %v16081_v24 = vpop.eup %16080 }
 0x731   :  { %v16083_v27 = vpop.eup %16082  ;;  %11464 = vst [vmem:[%s21692_s9 + $0x8e0] sm:$0xff] %v16081_v24 }
 0x732   :  { %v16085_v43 = vpop.eup %16084  ;;  %11481 = vst [vmem:[%s21692_s9 + $0x968] sm:$0xff] %v16083_v27 }
 0x733   :  { %v16087_v12 = vpop.eup %16086  ;;  %11482 = vst [vmem:[%s21692_s9 + $0x970] sm:$0xff] %v16085_v43 }
 0x734   :  { %11483 = vst [vmem:[%s21692_s9 + $0x978] sm:$0xff] %v16087_v12 }

</bundles_post_ra>
